<compile_context>
chip_gen: v7x
topology: tpu7x:2x2x1
jax: 0.10.0
libtpu: 0.0.40
codegen_flags: <defaults>
</compile_context>

<pallas_src>
import functools

import jax
import jax.numpy as jnp
from jax.experimental import pallas as pl
from jax.experimental.pallas import tpu as pltpu

_HIGHEST = jax.lax.Precision.HIGHEST


# --------------------------------------------------------------------------- #
# Kernel 1: fused Q / K / V projections (three MXU matmuls + bias adds)        #
# --------------------------------------------------------------------------- #
def _qkv_proj_kernel(q_ref, k_ref, v_ref, wq_ref, wk_ref, wv_ref,
                     bq_ref, bk_ref, bv_ref, qo_ref, ko_ref, vo_ref):
    qo_ref[...] = (jnp.dot(q_ref[...], wq_ref[...],
                           preferred_element_type=jnp.float32,
                           precision=_HIGHEST) + bq_ref[...]).astype(qo_ref.dtype)
    ko_ref[...] = (jnp.dot(k_ref[...], wk_ref[...],
                           preferred_element_type=jnp.float32,
                           precision=_HIGHEST) + bk_ref[...]).astype(ko_ref.dtype)
    vo_ref[...] = (jnp.dot(v_ref[...], wv_ref[...],
                           preferred_element_type=jnp.float32,
                           precision=_HIGHEST) + bv_ref[...]).astype(vo_ref.dtype)


def _qkv_proj(q2, k2, v2, wq, wk, wv, bq, bk, bv, *, block_rows=256):
    R, Dq = q2.shape
    Dk = k2.shape[1]
    M = wq.shape[1]
    bm = R if R <= block_rows else block_rows
    assert R % bm == 0 and bm % 8 == 0, "rows must tile by a multiple of 8"

    row_q = pl.BlockSpec((bm, Dq), lambda i: (i, 0))
    row_k = pl.BlockSpec((bm, Dk), lambda i: (i, 0))
    full = lambda shape: pl.BlockSpec(shape, lambda i: (0, 0))
    out_spec = pl.BlockSpec((bm, M), lambda i: (i, 0))

    return pl.pallas_call(
        _qkv_proj_kernel,
        grid=(R // bm,),
        in_specs=[row_q, row_k, row_q,
                  full((Dq, M)), full((Dk, M)), full((Dq, M)),
                  full((1, M)), full((1, M)), full((1, M))],
        out_specs=[out_spec, out_spec, out_spec],
        out_shape=[jax.ShapeDtypeStruct((R, M), q2.dtype)] * 3,
        compiler_params=pltpu.CompilerParams(dimension_semantics=("parallel",)),
    )(q2, k2, v2, wq, wk, wv, bq, bk, bv)


# --------------------------------------------------------------------------- #
# Kernel 2: scaled dot-product attention per (batch * head) grid step          #
# --------------------------------------------------------------------------- #
def _attention_kernel(q_ref, k_ref, v_ref, attn_ref, ctx_ref, *, scale):
    q = q_ref[0]                      # (Lq, D)
    k = k_ref[0]                      # (Lk, D)
    v = v_ref[0]                      # (Lk, D)

    # s = q @ k^T * scale   (contraction on the lane axis -> MXU, no explicit transpose)
    s = jax.lax.dot_general(q, k,
                            dimension_numbers=(((1,), (1,)), ((), ())),
                            preferred_element_type=jnp.float32,
                            precision=_HIGHEST) * scale
    s_max = jnp.max(s, axis=-1, keepdims=True)
    e = jnp.exp(s - s_max)            # exp lands on the EUP slot
    p = e / jnp.sum(e, axis=-1, keepdims=True)

    attn_ref[0] = p.astype(attn_ref.dtype)
    ctx_ref[0] = jnp.dot(p, v, preferred_element_type=jnp.float32,
                         precision=_HIGHEST).astype(ctx_ref.dtype)
    # TODO(synk): attn_mask (masked_fill with -inf) path not implemented; module is run with
    # attn_mask=None (the PyTorch `if attn_mask:` only supports the None path anyway).


def _attention(qh, kh, vh, *, scale):
    G, Lq, D = qh.shape
    Lk = kh.shape[1]
    kernel = functools.partial(_attention_kernel, scale=scale)
    return pl.pallas_call(
        kernel,
        grid=(G,),
        in_specs=[pl.BlockSpec((1, Lq, D), lambda g: (g, 0, 0)),
                  pl.BlockSpec((1, Lk, D), lambda g: (g, 0, 0)),
                  pl.BlockSpec((1, Lk, D), lambda g: (g, 0, 0))],
        out_specs=[pl.BlockSpec((1, Lq, Lk), lambda g: (g, 0, 0)),
                   pl.BlockSpec((1, Lq, D), lambda g: (g, 0, 0))],
        out_shape=[jax.ShapeDtypeStruct((G, Lq, Lk), jnp.float32),
                   jax.ShapeDtypeStruct((G, Lq, D), qh.dtype)],
        compiler_params=pltpu.CompilerParams(dimension_semantics=("parallel",)),
    )(qh, kh, vh)


# --------------------------------------------------------------------------- #
# Kernel 3: final linear + residual + LayerNorm (dropout == identity, eval)    #
# --------------------------------------------------------------------------- #
def _output_kernel(ctx_ref, res_ref, wf_ref, bf_ref, g_ref, b_ref, o_ref, *, eps):
    y = jnp.dot(ctx_ref[...], wf_ref[...], preferred_element_type=jnp.float32,
                precision=_HIGHEST) + bf_ref[...]
    y = res_ref[...] + y                          # residual; dropout is identity in eval mode
    mu = jnp.mean(y, axis=-1, keepdims=True)
    d = y - mu
    var = jnp.mean(d * d, axis=-1, keepdims=True)
    inv = jax.lax.rsqrt(var + eps)                # rsqrt -> EUP slot
    o_ref[...] = (d * inv * g_ref[...] + b_ref[...]).astype(o_ref.dtype)


def _output_block(ctx2, res2, wf, bf, gamma, beta, *, eps=1e-5, block_rows=256):
    R, M = ctx2.shape
    Dq = wf.shape[1]
    bm = R if R <= block_rows else block_rows
    assert R % bm == 0 and bm % 8 == 0, "rows must tile by a multiple of 8"
    kernel = functools.partial(_output_kernel, eps=eps)
    full = lambda shape: pl.BlockSpec(shape, lambda i: (0, 0))
    return pl.pallas_call(
        kernel,
        grid=(R // bm,),
        in_specs=[pl.BlockSpec((bm, M), lambda i: (i, 0)),
                  pl.BlockSpec((bm, Dq), lambda i: (i, 0)),
                  full((M, Dq)), full((1, Dq)), full((1, Dq)), full((1, Dq))],
        out_specs=pl.BlockSpec((bm, Dq), lambda i: (i, 0)),
        out_shape=jax.ShapeDtypeStruct((R, Dq), ctx2.dtype),
        compiler_params=pltpu.CompilerParams(dimension_semantics=("parallel",)),
    )(ctx2, res2, wf, bf, gamma, beta)


# --------------------------------------------------------------------------- #
# Public wrapper                                                               #
# --------------------------------------------------------------------------- #
def multi_head_attention_pallas(key, value, query, params, *, num_heads):
    """key: (B, L, key_size)  value/query: (B, L, query_size). Returns (output, attention)."""
    wq, bq = params["wq"], params["bq"]
    wk, bk = params["wk"], params["bk"]
    wv, bv = params["wv"], params["bv"]
    wf, bf = params["wf"], params["bf"]
    gamma, beta = params["gamma"], params["beta"]

    B, Lq, Dq = query.shape
    _, Lk, Dk = key.shape
    M = wq.shape[1]                      # model_dim
    D = M // num_heads                   # dim_per_head
    scale = (D // num_heads) ** (-0.5)   # exactly matches the PyTorch forward

    # Row-major flattens (free; no transposes).
    q2 = query.reshape(B * Lq, Dq)
    k2 = key.reshape(B * Lk, Dk)
    v2 = value.reshape(B * Lk, Dq)

    Q, K, V = _qkv_proj(q2, k2, v2, wq, wk, wv,
                        bq.reshape(1, M), bk.reshape(1, M), bv.reshape(1, M))

    # Exact PyTorch `.view(batch*num_heads, -1, dim_per_head)` semantics (row-major reinterpret).
    qh = Q.reshape(B * num_heads, -1, D)
    kh = K.reshape(B * num_heads, -1, D)
    vh = V.reshape(B * num_heads, -1, D)

    attn, ctx = _attention(qh, kh, vh, scale=scale)

    # `.view(batch, -1, dim_per_head*num_heads)` then flatten rows — same flat buffer.
    ctx2 = ctx.reshape(B * Lq, M)

    out2 = _output_block(ctx2, q2, wf, bf.reshape(1, Dq),
                         gamma.reshape(1, Dq), beta.reshape(1, Dq))
    return out2.reshape(B, Lq, Dq), attn


# --------------------------------------------------------------------------- #
# Pure-JAX reference (mirrors the PyTorch forward, eval mode)                  #
# --------------------------------------------------------------------------- #
def multi_head_attention_ref(key, value, query, params, *, num_heads):
    wq, bq = params["wq"], params["bq"]
    wk, bk = params["wk"], params["bk"]
    wv, bv = params["wv"], params["bv"]
    wf, bf = params["wf"], params["bf"]
    gamma, beta = params["gamma"], params["beta"]

    B, Lq, Dq = query.shape
    M = wq.shape[1]
    D = M // num_heads
    scale = (D // num_heads) ** (-0.5)

    Q = jnp.einsum("bld,dm->blm", query, wq, precision=_HIGHEST) + bq
    K = jnp.einsum("bld,dm->blm", key, wk, precision=_HIGHEST) + bk
    V = jnp.einsum("bld,dm->blm", value, wv, precision=_HIGHEST) + bv

    qh = Q.reshape(B * num_heads, -1, D)
    kh = K.reshape(B * num_heads, -1, D)
    vh = V.reshape(B * num_heads, -1, D)

    att = jnp.einsum("bld,bmd->blm", qh, kh, precision=_HIGHEST) * scale
    att = jax.nn.softmax(att, axis=-1)
    ctx = jnp.einsum("blm,bmd->bld", att, vh, precision=_HIGHEST)
    ctx = ctx.reshape(B, -1, D * num_heads)

    out = jnp.einsum("blm,md->bld", ctx, wf, precision=_HIGHEST) + bf
    y = query + out
    mu = jnp.mean(y, axis=-1, keepdims=True)
    var = jnp.mean((y - mu) ** 2, axis=-1, keepdims=True)
    out = (y - mu) / jnp.sqrt(var + 1e-5) * gamma + beta
    return out, att


if __name__ == "__main__":
    B, L = 2, 8
    query_size, key_size, model_dim, num_heads = 128, 512, 512, 2   # module defaults

    ks = jax.random.split(jax.random.PRNGKey(0), 13)
    query = jax.random.normal(ks[0], (B, L, query_size), jnp.float32)
    key_in = jax.random.normal(ks[1], (B, L, key_size), jnp.float32)
    value = jax.random.normal(ks[2], (B, L, query_size), jnp.float32)

    s = 0.05
    params = dict(
        wq=jax.random.normal(ks[3], (query_size, model_dim), jnp.float32) * s,
        bq=jax.random.normal(ks[4], (model_dim,), jnp.float32) * s,
        wk=jax.random.normal(ks[5], (key_size, model_dim), jnp.float32) * s,
        bk=jax.random.normal(ks[6], (model_dim,), jnp.float32) * s,
        wv=jax.random.normal(ks[7], (query_size, model_dim), jnp.float32) * s,
        bv=jax.random.normal(ks[8], (model_dim,), jnp.float32) * s,
        wf=jax.random.normal(ks[9], (model_dim, query_size), jnp.float32) * s,
        bf=jax.random.normal(ks[10], (query_size,), jnp.float32) * s,
        gamma=1.0 + 0.1 * jax.random.normal(ks[11], (query_size,), jnp.float32),
        beta=0.1 * jax.random.normal(ks[12], (query_size,), jnp.float32),
    )

    out, attn = jax.block_until_ready(
        multi_head_attention_pallas(key_in, value, query, params, num_heads=num_heads))
    out_ref, attn_ref = jax.block_until_ready(
        multi_head_attention_ref(key_in, value, query, params, num_heads=num_heads))

    assert out.shape == (B, L, query_size)
    assert attn.shape == (B * num_heads, L, L)
    err_out = float(jnp.max(jnp.abs(out - out_ref)))
    err_att = float(jnp.max(jnp.abs(attn - attn_ref)))
    # Loose-ish tolerance guards against MXU f32 pass-count differences vs XLA's dot lowering.
    assert err_out < 1e-2 and err_att < 1e-2, (err_out, err_att)
    print("KERNEL_OK")
</pallas_src>

<mosaic_0001>
module attributes {stable_mosaic.version = 11 : i64} {
  func.func @_qkv_proj_kernel(%arg0: i32, %arg1: memref<16x128xf32, #tpu.memory_space<vmem>>, %arg2: memref<16x512xf32, #tpu.memory_space<vmem>>, %arg3: memref<16x128xf32, #tpu.memory_space<vmem>>, %arg4: memref<128x512xf32, #tpu.memory_space<vmem>>, %arg5: memref<512x512xf32, #tpu.memory_space<vmem>>, %arg6: memref<128x512xf32, #tpu.memory_space<vmem>>, %arg7: memref<1x512xf32, #tpu.memory_space<vmem>>, %arg8: memref<1x512xf32, #tpu.memory_space<vmem>>, %arg9: memref<1x512xf32, #tpu.memory_space<vmem>>, %arg10: memref<16x512xf32, #tpu.memory_space<vmem>>, %arg11: memref<16x512xf32, #tpu.memory_space<vmem>>, %arg12: memref<16x512xf32, #tpu.memory_space<vmem>>) attributes {dimension_semantics = [#tpu.dimension_semantics<parallel>], iteration_bounds = array<i64: 1>, scalar_prefetch = 0 : i64, scratch_operands = 0 : i64, tpu.core_type = #tpu.core_type<tc>, window_params = [{transform_indices = @transform_0, window_bounds = array<i64: 16, 128>}, {transform_indices = @transform_1, window_bounds = array<i64: 16, 512>}, {transform_indices = @transform_2, window_bounds = array<i64: 16, 128>}, {pipeline_mode = #tpu.pipeline_mode<synchronous>, transform_indices = @transform_3, window_bounds = array<i64: 128, 512>}, {pipeline_mode = #tpu.pipeline_mode<synchronous>, transform_indices = @transform_4, window_bounds = array<i64: 512, 512>}, {pipeline_mode = #tpu.pipeline_mode<synchronous>, transform_indices = @transform_5, window_bounds = array<i64: 128, 512>}, {pipeline_mode = #tpu.pipeline_mode<synchronous>, transform_indices = @transform_6, window_bounds = array<i64: 1, 512>}, {pipeline_mode = #tpu.pipeline_mode<synchronous>, transform_indices = @transform_7, window_bounds = array<i64: 1, 512>}, {pipeline_mode = #tpu.pipeline_mode<synchronous>, transform_indices = @transform_8, window_bounds = array<i64: 1, 512>}, {transform_indices = @transform_9, window_bounds = array<i64: 16, 512>}, {transform_indices = @transform_10, window_bounds = array<i64: 16, 512>}, {transform_indices = @transform_11, window_bounds = array<i64: 16, 512>}]} {
    %c0 = arith.constant 0 : index
    %c0_0 = arith.constant 0 : index
    %0 = vector.load %arg1[%c0, %c0_0] : memref<16x128xf32, #tpu.memory_space<vmem>>, vector<16x128xf32>
    %c0_1 = arith.constant 0 : index
    %c0_2 = arith.constant 0 : index
    %1 = vector.load %arg4[%c0_1, %c0_2] : memref<128x512xf32, #tpu.memory_space<vmem>>, vector<128x512xf32>
    %cst = arith.constant dense<0.000000e+00> : vector<16x512xf32>
    %2 = tpu.matmul %0, %1, %cst {dimension_numbers = #tpu.dot_dimension_numbers<[1], [0], [0], [1], [0, 0, 1, 1], [], []>, precision = #tpu.contract_precision<fp32>} : vector<16x128xf32>, vector<128x512xf32>, vector<16x512xf32> -> vector<16x512xf32>
    %c0_3 = arith.constant 0 : index
    %c0_4 = arith.constant 0 : index
    %3 = vector.load %arg7[%c0_3, %c0_4] : memref<1x512xf32, #tpu.memory_space<vmem>>, vector<1x512xf32>
    %4 = vector.broadcast %3 : vector<1x512xf32> to vector<16x512xf32>
    %5 = arith.addf %2, %4 : vector<16x512xf32>
    %c0_5 = arith.constant 0 : index
    %c0_6 = arith.constant 0 : index
    %6 = vector.load %arg10[%c0_5, %c0_6] : memref<16x512xf32, #tpu.memory_space<vmem>>, vector<16x512xf32>
    tpu.vector_store %arg10[%c0_5, %c0_6], %5 {strides = array<i32>} : memref<16x512xf32, #tpu.memory_space<vmem>>, vector<16x512xf32>,
    %c0_7 = arith.constant 0 : index
    %c0_8 = arith.constant 0 : index
    %7 = vector.load %arg2[%c0_7, %c0_8] : memref<16x512xf32, #tpu.memory_space<vmem>>, vector<16x512xf32>
    %c0_9 = arith.constant 0 : index
    %c0_10 = arith.constant 0 : index
    %8 = vector.load %arg5[%c0_9, %c0_10] : memref<512x512xf32, #tpu.memory_space<vmem>>, vector<512x512xf32>
    %cst_11 = arith.constant dense<0.000000e+00> : vector<16x512xf32>
    %9 = tpu.matmul %7, %8, %cst_11 {dimension_numbers = #tpu.dot_dimension_numbers<[1], [0], [0], [1], [0, 0, 1, 1], [], []>, precision = #tpu.contract_precision<fp32>} : vector<16x512xf32>, vector<512x512xf32>, vector<16x512xf32> -> vector<16x512xf32>
    %c0_12 = arith.constant 0 : index
    %c0_13 = arith.constant 0 : index
    %10 = vector.load %arg8[%c0_12, %c0_13] : memref<1x512xf32, #tpu.memory_space<vmem>>, vector<1x512xf32>
    %11 = vector.broadcast %10 : vector<1x512xf32> to vector<16x512xf32>
    %12 = arith.addf %9, %11 : vector<16x512xf32>
    %c0_14 = arith.constant 0 : index
    %c0_15 = arith.constant 0 : index
    %13 = vector.load %arg11[%c0_14, %c0_15] : memref<16x512xf32, #tpu.memory_space<vmem>>, vector<16x512xf32>
    tpu.vector_store %arg11[%c0_14, %c0_15], %12 {strides = array<i32>} : memref<16x512xf32, #tpu.memory_space<vmem>>, vector<16x512xf32>,
    %c0_16 = arith.constant 0 : index
    %c0_17 = arith.constant 0 : index
    %14 = vector.load %arg3[%c0_16, %c0_17] : memref<16x128xf32, #tpu.memory_space<vmem>>, vector<16x128xf32>
    %c0_18 = arith.constant 0 : index
    %c0_19 = arith.constant 0 : index
    %15 = vector.load %arg6[%c0_18, %c0_19] : memref<128x512xf32, #tpu.memory_space<vmem>>, vector<128x512xf32>
    %cst_20 = arith.constant dense<0.000000e+00> : vector<16x512xf32>
    %16 = tpu.matmul %14, %15, %cst_20 {dimension_numbers = #tpu.dot_dimension_numbers<[1], [0], [0], [1], [0, 0, 1, 1], [], []>, precision = #tpu.contract_precision<fp32>} : vector<16x128xf32>, vector<128x512xf32>, vector<16x512xf32> -> vector<16x512xf32>
    %c0_21 = arith.constant 0 : index
    %c0_22 = arith.constant 0 : index
    %17 = vector.load %arg9[%c0_21, %c0_22] : memref<1x512xf32, #tpu.memory_space<vmem>>, vector<1x512xf32>
    %18 = vector.broadcast %17 : vector<1x512xf32> to vector<16x512xf32>
    %19 = arith.addf %16, %18 : vector<16x512xf32>
    %c0_23 = arith.constant 0 : index
    %c0_24 = arith.constant 0 : index
    %20 = vector.load %arg12[%c0_23, %c0_24] : memref<16x512xf32, #tpu.memory_space<vmem>>, vector<16x512xf32>
    tpu.vector_store %arg12[%c0_23, %c0_24], %19 {strides = array<i32>} : memref<16x512xf32, #tpu.memory_space<vmem>>, vector<16x512xf32>,
    return
  }
  func.func @transform_0(%arg0: i32) -> (i32, i32) {
    %c0_i32 = arith.constant 0 : i32
    %c0_i32_0 = arith.constant 0 : i32
    return %arg0, %c0_i32 : i32, i32
  }
  func.func @transform_1(%arg0: i32) -> (i32, i32) {
    %c0_i32 = arith.constant 0 : i32
    %c0_i32_0 = arith.constant 0 : i32
    return %arg0, %c0_i32 : i32, i32
  }
  func.func @transform_2(%arg0: i32) -> (i32, i32) {
    %c0_i32 = arith.constant 0 : i32
    %c0_i32_0 = arith.constant 0 : i32
    return %arg0, %c0_i32 : i32, i32
  }
  func.func @transform_3(%arg0: i32) -> (i32, i32) {
    %c0_i32 = arith.constant 0 : i32
    %c0_i32_0 = arith.constant 0 : i32
    %c0_i32_1 = arith.constant 0 : i32
    return %c0_i32, %c0_i32_0 : i32, i32
  }
  func.func @transform_4(%arg0: i32) -> (i32, i32) {
    %c0_i32 = arith.constant 0 : i32
    %c0_i32_0 = arith.constant 0 : i32
    %c0_i32_1 = arith.constant 0 : i32
    return %c0_i32, %c0_i32_0 : i32, i32
  }
  func.func @transform_5(%arg0: i32) -> (i32, i32) {
    %c0_i32 = arith.constant 0 : i32
    %c0_i32_0 = arith.constant 0 : i32
    %c0_i32_1 = arith.constant 0 : i32
    return %c0_i32, %c0_i32_0 : i32, i32
  }
  func.func @transform_6(%arg0: i32) -> (i32, i32) {
    %c0_i32 = arith.constant 0 : i32
    %c0_i32_0 = arith.constant 0 : i32
    %c0_i32_1 = arith.constant 0 : i32
    return %c0_i32, %c0_i32_0 : i32, i32
  }
  func.func @transform_7(%arg0: i32) -> (i32, i32) {
    %c0_i32 = arith.constant 0 : i32
    %c0_i32_0 = arith.constant 0 : i32
    %c0_i32_1 = arith.constant 0 : i32
    return %c0_i32, %c0_i32_0 : i32, i32
  }
  func.func @transform_8(%arg0: i32) -> (i32, i32) {
    %c0_i32 = arith.constant 0 : i32
    %c0_i32_0 = arith.constant 0 : i32
    %c0_i32_1 = arith.constant 0 : i32
    return %c0_i32, %c0_i32_0 : i32, i32
  }
  func.func @transform_9(%arg0: i32) -> (i32, i32) {
    %c0_i32 = arith.constant 0 : i32
    %c0_i32_0 = arith.constant 0 : i32
    return %arg0, %c0_i32 : i32, i32
  }
  func.func @transform_10(%arg0: i32) -> (i32, i32) {
    %c0_i32 = arith.constant 0 : i32
    %c0_i32_0 = arith.constant 0 : i32
    return %arg0, %c0_i32 : i32, i32
  }
  func.func @transform_11(%arg0: i32) -> (i32, i32) {
    %c0_i32 = arith.constant 0 : i32
    %c0_i32_0 = arith.constant 0 : i32
    return %arg0, %c0_i32 : i32, i32
  }
}

</mosaic_0001>

<bundles_post_ra>
// kernel: tpu_custom_call.1
= control target key start
LH: loop header
LB: loop body
LE: loop exit
PB: predicated region body
PF: predicated region fallthrough
CT: control target
= control target key end

     0   :  { %17 = vsyncpa [#allocation3], 0  ;;  %s18207_s0 = inlined_call_operand.hbm [shape: f32[16,128], index: 0, kind: input, shape index: {}]   ;;  %s18208_s1 = inlined_call_operand.hbm [shape: f32[16,512], index: 1, kind: input, shape index: {}]   ;;  %s18209_s2 = inlined_call_operand.hbm [shape: f32[16,128], index: 2, kind: input, shape index: {}]   ;;  %s18210_s3 = inlined_call_operand.hbm [shape: f32[128,512], index: 3, kind: input, shape index: {}]   ;;  %s18211_s4 = inlined_call_operand.hbm [shape: f32[512,512], index: 4, kind: input, shape index: {}]   ;;  %s18212_s5 = inlined_call_operand.hbm [shape: f32[128,512], index: 5, kind: input, shape index: {}]   ;;  %s18213_s6 = inlined_call_operand.vmem [shape: f32[1,512], index: 6, kind: input, shape index: {}]   ;;  %s18214_s7 = inlined_call_operand.vmem [shape: f32[1,512], index: 7, kind: input, shape index: {}]   ;;  %s18215_s8 = inlined_call_operand.vmem [shape: f32[1,512], index: 8, kind: input, shape index: {}]   ;;  %s18216_s9 = inlined_call_operand.hbm [shape: f32[16,512], index: 9, kind: output, shape index: {0}]   ;;  %s18217_s10 = inlined_call_operand.hbm [shape: f32[16,512], index: 10, kind: output, shape index: {1}]   ;;  %s18218_s11 = inlined_call_operand.hbm [shape: f32[16,512], index: 11, kind: output, shape index: {2}]  }
   0x1   :  { %18 = vsyncpa [#allocation6], 0 }
   0x2   :  { %19 = vsyncpa [#allocation9], 0 }
   0x3   :  { %20 = vsyncpa [#allocation12], 0 }
   0x4   :  { %21 = vsyncpa [#allocation4], 0 }
   0x5   :  { %22 = vsyncpa [#allocation15], 0  ;;  %s12376_s17 = smov [#allocation5]   ;;  %s12166_s21 = scalar_lea.hbm %s18208_s1, 1024 }
   0x6   :  { %s40_s18 = sshll.u32 %s12376_s17, 4  ;;  %p12167_p0 = scmp.ne.s32.totalorder %s18208_s1, %s12166_s21  ;;  %s41_s18 = int_to_ptr.vmem [resolvable:$true] %s40_s18 }
   0x7   :  { %p12170_p1 = scmp.lt.u32.totalorder %s12166_s21, %s18208_s1 }
   0x9   :  { %p12172_p2 = pnand %p12170_p1, %p12167_p0 }
   0xb   :  { %12175 = shalt.err (!%p12172_p2)
}
   0xc   :  { %s12176_s26 = scalar_lea.vmem %s41_s18, 1024  ;;  %p12181_p4 = scmp.lt.s32.totalorder %s41_s18, %s41_s18 }
   0xd   :  { %p12177_p3 = scmp.ne.s32.totalorder %s41_s18, %s12176_s26  ;;  %p12182_p5 = scmp.lt.s32.totalorder %s12176_s26, %s12176_s26 }
   0xf   :  { %p12183_p6 = por %p12182_p5, %p12181_p4 }
  0x11   :  { %p12184_p7 = pnand %p12183_p6, %p12177_p3 }
  0x13   :  { %12187 = shalt.err (!%p12184_p7)
}
  0x14   :  { %s12377_s27 = smov 512   ;;  %s12378_s28 = smov 32  }
  0x15   :  { %46 = dma.hbm_to_vmem [thread:$0]  %s18208_s1, 1024, %s41_s18, [#allocation6], %s12377_s27, %s12377_s27, %s12378_s28  }
  0x16   :  { %s12379_s12 = smov [#allocation8]   ;;  %s12380_s14 = smov [#allocation2]  }
  0x17   :  { %s64_s13 = sshll.u32 %s12379_s12, 4  ;;  %s28_s15 = sshll.u32 %s12380_s14, 4  ;;  %s65_s13 = int_to_ptr.vmem [resolvable:$true] %s64_s13  ;;  %s29_s15 = int_to_ptr.vmem [resolvable:$true] %s28_s15 }
  0x18   :  { %s12188_s19 = scalar_lea.hbm %s18210_s3, 8192 }
  0x19   :  { %p12189_p8 = scmp.ne.s32.totalorder %s18210_s3, %s12188_s19  ;;  %p12192_p9 = scmp.lt.u32.totalorder %s12188_s19, %s18210_s3 }
  0x1b   :  { %p12194_p10 = pnand %p12192_p9, %p12189_p8 }
  0x1d   :  { %12197 = shalt.err (!%p12194_p10)
}
  0x1e   :  { %s12198_s1 = scalar_lea.vmem %s65_s13, 8192  ;;  %p12203_p12 = scmp.lt.s32.totalorder %s65_s13, %s65_s13 }
  0x1f   :  { %p12199_p11 = scmp.ne.s32.totalorder %s65_s13, %s12198_s1  ;;  %p12204_p13 = scmp.lt.s32.totalorder %s12198_s1, %s12198_s1 }
  0x21   :  { %p12205_p0 = por %p12204_p13, %p12203_p12 }
  0x23   :  { %p12206_p1 = pnand %p12205_p0, %p12199_p11 }
  0x25   :  { %12209 = shalt.err (!%p12206_p1)
}
  0x26   :  { %70 = dma.hbm_to_vmem [thread:$0]  %s18210_s3, 8192, %s65_s13, [#allocation9], %s12377_s27, %s12377_s27, %s12378_s28  }
  0x27   :  { %s12210_s29 = scalar_lea.hbm %s18207_s0, 256 }
  0x28   :  { %p12211_p2 = scmp.ne.s32.totalorder %s18207_s0, %s12210_s29  ;;  %p12214_p3 = scmp.lt.u32.totalorder %s12210_s29, %s18207_s0 }
  0x2a   :  { %p12216_p4 = pnand %p12214_p3, %p12211_p2 }
  0x2c   :  { %12219 = shalt.err (!%p12216_p4)
}
  0x2d   :  { %s12220_s17 = scalar_lea.vmem %s29_s15, 256  ;;  %p12225_p6 = scmp.lt.s32.totalorder %s29_s15, %s29_s15 }
  0x2e   :  { %p12221_p5 = scmp.ne.s32.totalorder %s29_s15, %s12220_s17  ;;  %p12226_p7 = scmp.lt.s32.totalorder %s12220_s17, %s12220_s17 }
  0x30   :  { %p12227_p8 = por %p12226_p7, %p12225_p6 }
  0x32   :  { %p12228_p9 = pnand %p12227_p8, %p12221_p5 }
  0x34   :  { %12231 = shalt.err (!%p12228_p9)
}
  0x35   :  { %s12381_s3 = smov 128   ;;  %s12382_s13 = smov 8  }
  0x36   :  { %34 = dma.hbm_to_vmem [thread:$0]  %s18207_s0, 256, %s29_s15, [#allocation3], %s12381_s3, %s12381_s3, %s12382_s13  }
  0x37   :  { %s12383_s21 = smov [#allocation7]   ;;  %s12384_s23 = smov [#allocation10]  }
  0x38   :  { %s52_s22 = sshll.u32 %s12383_s21, 4  ;;  %s76_s1 = sshll.u32 %s12384_s23, 4  ;;  %s53_s22 = int_to_ptr.vmem [resolvable:$true] %s52_s22  ;;  %s77_s1 = int_to_ptr.vmem [resolvable:$true] %s76_s1 }
  0x39   :  { %s12232_s25 = scalar_lea.hbm %s18209_s2, 256 }
  0x3a   :  { %p12233_p10 = scmp.ne.s32.totalorder %s18209_s2, %s12232_s25  ;;  %p12236_p11 = scmp.lt.u32.totalorder %s12232_s25, %s18209_s2 }
  0x3c   :  { %p12238_p12 = pnand %p12236_p11, %p12233_p10 }
  0x3e   :  { %12241 = shalt.err (!%p12238_p12)
}
  0x3f   :  { %s12242_s0 = scalar_lea.vmem %s53_s22, 256  ;;  %p12247_p0 = scmp.lt.s32.totalorder %s53_s22, %s53_s22 }
  0x40   :  { %p12243_p13 = scmp.ne.s32.totalorder %s53_s22, %s12242_s0  ;;  %p12248_p1 = scmp.lt.s32.totalorder %s12242_s0, %s12242_s0 }
  0x42   :  { %p12249_p2 = por %p12248_p1, %p12247_p0 }
  0x44   :  { %p12250_p3 = pnand %p12249_p2, %p12243_p13 }
  0x46   :  { %12253 = shalt.err (!%p12250_p3)
}
  0x47   :  { %58 = dma.hbm_to_vmem [thread:$0]  %s18209_s2, 256, %s53_s22, [#allocation6], %s12381_s3, %s12381_s3, %s12382_s13  }
  0x48   :  { %s12254_s19 = scalar_lea.hbm %s18211_s4, 32768 }
  0x49   :  { %p12255_p4 = scmp.ne.s32.totalorder %s18211_s4, %s12254_s19  ;;  %p12258_p5 = scmp.lt.u32.totalorder %s12254_s19, %s18211_s4 }
  0x4b   :  { %p12260_p6 = pnand %p12258_p5, %p12255_p4 }
  0x4d   :  { %12263 = shalt.err (!%p12260_p6)
}
  0x4e   :  { %s12264_s24 = scalar_lea.vmem %s77_s1, 32768  ;;  %p12269_p8 = scmp.lt.s32.totalorder %s77_s1, %s77_s1 }
  0x4f   :  { %p12265_p7 = scmp.ne.s32.totalorder %s77_s1, %s12264_s24  ;;  %p12270_p9 = scmp.lt.s32.totalorder %s12264_s24, %s12264_s24 }
  0x51   :  { %p12271_p10 = por %p12270_p9, %p12269_p8 }
  0x53   :  { %p12272_p11 = pnand %p12271_p10, %p12265_p7 }
  0x55   :  { %12275 = shalt.err (!%p12272_p11)
}
  0x56   :  { %82 = dma.hbm_to_vmem [thread:$0]  %s18211_s4, 32768, %s77_s1, [#allocation9], %s12377_s27, %s12377_s27, %s12378_s28  }
  0x57   :  { %s12385_s13 = smov [#allocation11]   ;;  %s12276_s29 = scalar_lea.hbm %s18212_s5, 8192 }
  0x58   :  { %s88_s22 = sshll.u32 %s12385_s13, 4  ;;  %p12277_p12 = scmp.ne.s32.totalorder %s18212_s5, %s12276_s29  ;;  %s89_s22 = int_to_ptr.vmem [resolvable:$true] %s88_s22 }
  0x59   :  { %p12280_p13 = scmp.lt.u32.totalorder %s12276_s29, %s18212_s5 }
  0x5b   :  { %p12282_p0 = pnand %p12280_p13, %p12277_p12 }
  0x5d   :  { %12285 = shalt.err (!%p12282_p0)
}
  0x5e   :  { %s12286_s14 = scalar_lea.vmem %s89_s22, 8192  ;;  %p12291_p2 = scmp.lt.s32.totalorder %s89_s22, %s89_s22 }
  0x5f   :  { %p12287_p1 = scmp.ne.s32.totalorder %s89_s22, %s12286_s14  ;;  %p12292_p3 = scmp.lt.s32.totalorder %s12286_s14, %s12286_s14 }
  0x61   :  { %p12293_p4 = por %p12292_p3, %p12291_p2 }
  0x63   :  { %p12294_p5 = pnand %p12293_p4, %p12287_p1 }
  0x65   :  { %12297 = shalt.err (!%p12294_p5)
}
  0x66   :  { %94 = dma.hbm_to_vmem [thread:$0]  %s18212_s5, 8192, %s89_s22, [#allocation12], %s12377_s27, %s12377_s27, %s12378_s28  }
  0x67   :  { %12364 = dma.done.wait [#allocation3], 256  }
  0x68   :  { %12365 = vsyncadd [#allocation3], 4294967040 }
  0x69   :  { %12366 = dma.done.wait [#allocation6], 1280  }
  0x6a   :  { %12367 = vsyncadd [#allocation6], 4294966016 }
  0x6b   :  { %12368 = dma.done.wait [#allocation9], 40960  }
  0x6c   :  { %12369 = vsyncadd [#allocation9], 4294926336 }
  0x6d   :  { %12370 = dma.done.wait [#allocation12], 8192  }
  0x6e   :  { %12371 = vsyncadd [#allocation12], 4294959104  ;;  %v18219_v0 = vmov 0.0   ;;  %v122_v1 = vld [vmem:[#allocation8 + $0x8] sm:$0xff]  ;;  %v124_v3 = vld [vmem:[#allocation8 + $0x18] sm:$0xff]  ;;  %s12388_s20 = smov [#allocation13]  }
  0x6f   :  { %303 = vmatprep.mubr.f32.mxu0 %v18219_v0  ;;  %1207 = vmatprep.mubr.f32.mxu1 %v18219_v0  ;;  %v126_v2 = vld [vmem:[#allocation8 + $0x28] sm:$0xff]  ;;  %v207_v4 = vand.u32 4294901760, %v122_v1  ;;  %v128_v6 = vld [vmem:[#allocation8 + $0x38] sm:$0xff]  ;;  %v1111_v7 = vand.u32 4294901760, %v124_v3  ;;  %v121_v8 = vld [vmem:[#allocation8] sm:$0xff]  ;;  %s9610_s21 = sshll.u32 %s12388_s20, 4  ;;  %s9611_s21 = int_to_ptr.vmem [resolvable:$true] %s9610_s21 }
  0x70   :  { %v211_v5 = vand.u32 4294901760, %v126_v2  ;;  %v125_v9 = vld [vmem:[#allocation8 + $0x20] sm:$0xff]  ;;  %v1115_v10 = vand.u32 4294901760, %v128_v6  ;;  %v209_v11 = vand.u32 4294901760, %v121_v8  ;;  %v123_v13 = vld [vmem:[#allocation8 + $0x10] sm:$0xff]  ;;  %v130_v15 = vld [vmem:[#allocation8 + $0x48] sm:$0xff] }
  0x71   :  { %v213_v12 = vand.u32 4294901760, %v125_v9  ;;  %v127_v14 = vld [vmem:[#allocation8 + $0x30] sm:$0xff]  ;;  %v12538_v17 = vsub.f32 %v122_v1, %v207_v4  ;;  %v12542_v19 = vsub.f32 %v124_v3, %v1111_v7  ;;  %v134_v20 = vld [vmem:[#allocation8 + $0x68] sm:$0xff]  ;;  %v132_v21 = vld [vmem:[#allocation8 + $0x58] sm:$0xff]  ;;  %v1113_v29 = vand.u32 4294901760, %v123_v13 }
  0x72   :  { %v12536_v16 = vpack.c.bf16 %v211_v5, %v207_v4  ;;  %v12540_v18 = vsub.f32 %v126_v2, %v211_v5  ;;  %v136_v22 = vld [vmem:[#allocation8 + $0x78] sm:$0xff]  ;;  %v12544_v23 = vpack.c.bf16 %v1115_v10, %v1111_v7  ;;  %v12546_v24 = vsub.f32 %v128_v6, %v1115_v10  ;;  %v129_v27 = vld [vmem:[#allocation8 + $0x40] sm:$0xff]  ;;  %v131_v37 = vld [vmem:[#allocation8 + $0x50] sm:$0xff] }
  0x73   :  { %19372 = vst [vmem:[#allocation24_spill] sm:$0xff] %v12538_v17  ;;  %19374 = vst [vmem:[#allocation26_spill] sm:$0xff] %v12542_v19  ;;  %v12548_v25 = vpack.c.bf16 %v213_v12, %v209_v11  ;;  %v12550_v26 = vsub.f32 %v121_v8, %v209_v11  ;;  %v12553_v28 = vsub.f32 %v125_v9, %v213_v12  ;;  %v1117_v30 = vand.u32 4294901760, %v127_v14  ;;  %v133_v32 = vld [vmem:[#allocation8 + $0x60] sm:$0xff]  ;;  %v135_v38 = vld [vmem:[#allocation8 + $0x70] sm:$0xff] }
  0x74   :  { %19371 = vst [vmem:[#allocation23_spill] sm:$0xff] %v12536_v16  ;;  %19373 = vst [vmem:[#allocation25_spill] sm:$0xff] %v12540_v18  ;;  %9657 = vmatprep.subr.bf16.mxu0 %v12536_v16  ;;  %v215_v31 = vand.u32 4294901760, %v130_v15  ;;  %9849 = vmatprep.subr.bf16.mxu1 %v12544_v23  ;;  %v219_v33 = vand.u32 4294901760, %v134_v20  ;;  %v1119_v34 = vand.u32 4294901760, %v132_v21  ;;  %v1123_v35 = vand.u32 4294901760, %v136_v22 }
  0x75   :  { %19375 = vst [vmem:[#allocation27_spill] sm:$0xff] %v12544_v23  ;;  %19376 = vst [vmem:[#allocation28_spill] sm:$0xff] %v12546_v24  ;;  %9659 = vmatpush1.bf16.msra.mxu0 %v12548_v25  ;;  %v217_v36 = vand.u32 4294901760, %v129_v27  ;;  %v12557_v39 = vpack.c.bf16 %v1117_v30, %v1113_v29  ;;  %v12559_v40 = vsub.f32 %v123_v13, %v1113_v29  ;;  %v138_v43 = vld [vmem:[#allocation8 + $0x88] sm:$0xff]  ;;  %v140_v45 = vld [vmem:[#allocation8 + $0x98] sm:$0xff]  ;;  %v221_v52 = vand.u32 4294901760, %v133_v32 }
  0x76   :  { %19377 = vst [vmem:[#allocation29_spill] sm:$0xff] %v12548_v25  ;;  %19378 = vst [vmem:[#allocation30_spill] sm:$0xff] %v12550_v26  ;;  %v12561_v41 = vsub.f32 %v127_v14, %v1117_v30  ;;  %v12563_v42 = vsub.f32 %v130_v15, %v215_v31  ;;  %v142_v44 = vld [vmem:[#allocation8 + $0xa8] sm:$0xff]  ;;  %v12565_v46 = vpack.c.bf16 %v219_v33, %v215_v31  ;;  %v144_v50 = vld [vmem:[#allocation8 + $0xb8] sm:$0xff]  ;;  %v1121_v54 = vand.u32 4294901760, %v131_v37 }
  0x77   :  { %19379 = vst [vmem:[#allocation31_spill] sm:$0xff] %v12553_v28  ;;  %19380 = vst [vmem:[#allocation32_spill] sm:$0xff] %v12557_v39  ;;  %v12567_v47 = vsub.f32 %v134_v20, %v219_v33  ;;  %v12569_v48 = vpack.c.bf16 %v1123_v35, %v1119_v34  ;;  %v12571_v49 = vsub.f32 %v132_v21, %v1119_v34  ;;  %9851 = vmatpush1.bf16.msra.mxu1 %v12557_v39  ;;  %v137_v59 = vld [vmem:[#allocation8 + $0x80] sm:$0xff]  ;;  %v139_v2 = vld [vmem:[#allocation8 + $0x90] sm:$0xff] }
  0x78   :  { %19381 = vst [vmem:[#allocation33_spill] sm:$0xff] %v12559_v40  ;;  %19382 = vst [vmem:[#allocation34_spill] sm:$0xff] %v12561_v41  ;;  %v12574_v51 = vsub.f32 %v136_v22, %v1123_v35  ;;  %v12576_v53 = vsub.f32 %v129_v27, %v217_v36  ;;  %9661 = vmatprep.subr.bf16.mxu0 %v12565_v46  ;;  %v1125_v55 = vand.u32 4294901760, %v135_v38  ;;  %v223_v56 = vand.u32 4294901760, %v138_v43  ;;  %v141_v60 = vld [vmem:[#allocation8 + $0xa0] sm:$0xff]  ;;  %v143_v3 = vld [vmem:[#allocation8 + $0xb0] sm:$0xff] }
  0x79   :  { %19383 = vst [vmem:[#allocation35_spill] sm:$0xff] %v12565_v46  ;;  %19384 = vst [vmem:[#allocation36_spill] sm:$0xff] %v12569_v48  ;;  %9853 = vmatprep.subr.bf16.mxu1 %v12569_v48  ;;  %v227_v57 = vand.u32 4294901760, %v142_v44  ;;  %v1127_v58 = vand.u32 4294901760, %v140_v45  ;;  %v12580_v61 = vpack.c.bf16 %v221_v52, %v217_v36  ;;  %v12582_v62 = vsub.f32 %v133_v32, %v221_v52  ;;  %v146_v4 = vld [vmem:[#allocation8 + $0xc8] sm:$0xff]  ;;  %v148_v10 = vld [vmem:[#allocation8 + $0xd8] sm:$0xff] }
  0x7a   :  { %v12584_v63 = vsub.f32 %v131_v37, %v1121_v54  ;;  %v1131_v1 = vand.u32 4294901760, %v144_v50  ;;  %v12586_v5 = vpack.c.bf16 %v1125_v55, %v1121_v54  ;;  %v12588_v6 = vsub.f32 %v135_v38, %v1125_v55  ;;  %v150_v9 = vld [vmem:[#allocation8 + $0xe8] sm:$0xff]  ;;  %v152_v11 = vld [vmem:[#allocation8 + $0xf8] sm:$0xff]  ;;  %v145_v33 = vld [vmem:[#allocation8 + $0xc0] sm:$0xff] }
  0x7b   :  { %19385 = vst [vmem:[#allocation37_spill] sm:$0xff] %v12580_v61  ;;  %v12590_v7 = vpack.c.bf16 %v227_v57, %v223_v56  ;;  %v12592_v8 = vsub.f32 %v138_v43, %v223_v56  ;;  %9663 = vmatpush1.bf16.msra.mxu0 %v12580_v61  ;;  %v12595_v12 = vsub.f32 %v142_v44, %v227_v57  ;;  %v225_v20 = vand.u32 4294901760, %v137_v59  ;;  %v149_v38 = vld [vmem:[#allocation8 + $0xe0] sm:$0xff]  ;;  %v147_v43 = vld [vmem:[#allocation8 + $0xd0] sm:$0xff]  ;;  %v154_v55 = vld [vmem:[#allocation8 + $0x108] sm:$0xff] }
  0x7c   :  { %19386 = vst [vmem:[#allocation38_spill] sm:$0xff] %v12586_v5  ;;  %v12597_v13 = vpack.c.bf16 %v1131_v1, %v1127_v58  ;;  %v12599_v14 = vsub.f32 %v140_v45, %v1127_v58  ;;  %v12601_v15 = vsub.f32 %v144_v50, %v1131_v1  ;;  %9855 = vmatpush1.bf16.msra.mxu1 %v12586_v5  ;;  %v229_v21 = vand.u32 4294901760, %v141_v60  ;;  %v151_v44 = vld [vmem:[#allocation8 + $0xf0] sm:$0xff]  ;;  %v158_v56 = vld [vmem:[#allocation8 + $0x128] sm:$0xff]  ;;  %v156_v57 = vld [vmem:[#allocation8 + $0x118] sm:$0xff] }
  0x7d   :  { %19387 = vst [vmem:[#allocation39_spill] sm:$0xff] %v12590_v7  ;;  %9665 = vmatprep.subr.bf16.mxu0 %v12590_v7  ;;  %v1129_v22 = vand.u32 4294901760, %v139_v2  ;;  %v1133_v27 = vand.u32 4294901760, %v143_v3  ;;  %v231_v29 = vand.u32 4294901760, %v146_v4  ;;  %v235_v30 = vand.u32 4294901760, %v150_v9  ;;  %v157_v0 = vld [vmem:[#allocation8 + $0x120] sm:$0xff] }
  0x7e   :  { %19388 = vst [vmem:[#allocation40_spill] sm:$0xff] %v12597_v13  ;;  %9857 = vmatprep.subr.bf16.mxu1 %v12597_v13  ;;  %v1135_v31 = vand.u32 4294901760, %v148_v10  ;;  %v1139_v32 = vand.u32 4294901760, %v152_v11  ;;  %v12606_v34 = vpack.c.bf16 %v229_v21, %v225_v20  ;;  %v12608_v35 = vsub.f32 %v137_v59, %v225_v20  ;;  %v166_v13 = vld [vmem:[#allocation8 + $0x168] sm:$0xff]  ;;  %v164_v48 = vld [vmem:[#allocation8 + $0x158] sm:$0xff]  ;;  %v163_v46 = vld [vmem:[#allocation8 + $0x150] sm:$0xff] }
  0x7f   :  { %v12610_v36 = vsub.f32 %v141_v60, %v229_v21  ;;  %v12612_v37 = vpack.c.bf16 %v1133_v27, %v1129_v22  ;;  %v12614_v45 = vsub.f32 %v139_v2, %v1129_v22  ;;  %v12616_v50 = vsub.f32 %v143_v3, %v1133_v27  ;;  %v160_v21 = vld [vmem:[#allocation8 + $0x138] sm:$0xff]  ;;  %v167_v16 = vld [vmem:[#allocation8 + $0x170] sm:$0xff] }
  0x80   :  { %19389 = vst [vmem:[#allocation41_spill] sm:$0xff] %v12606_v34  ;;  %v12618_v52 = vpack.c.bf16 %v235_v30, %v231_v29  ;;  %v12620_v54 = vsub.f32 %v146_v4, %v231_v29  ;;  %9667 = vmatpush1.bf16.msra.mxu0 %v12606_v34  ;;  %v12624_v58 = vsub.f32 %v150_v9, %v235_v30  ;;  %v233_v1 = vand.u32 4294901760, %v145_v33  ;;  %v153_v30 = vld [vmem:[#allocation8 + $0x100] sm:$0xff]  ;;  %v162_v34 = vld [vmem:[#allocation8 + $0x148] sm:$0xff] }
  0x81   :  { %19390 = vst [vmem:[#allocation42_spill] sm:$0xff] %v12612_v37  ;;  %9859 = vmatpush1.bf16.msra.mxu1 %v12612_v37  ;;  %v12626_v59 = vpack.c.bf16 %v1139_v32, %v1135_v31  ;;  %v12628_v60 = vsub.f32 %v148_v10, %v1135_v31  ;;  %v12631_v2 = vsub.f32 %v152_v11, %v1139_v32  ;;  %v237_v3 = vand.u32 4294901760, %v149_v38  ;;  %v155_v10 = vld [vmem:[#allocation8 + $0x110] sm:$0xff] }
  0x82   :  { %19391 = vst [vmem:[#allocation43_spill] sm:$0xff] %v12618_v52  ;;  %9669 = vmatprep.subr.bf16.mxu0 %v12618_v52  ;;  %v1137_v4 = vand.u32 4294901760, %v147_v43  ;;  %v1141_v20 = vand.u32 4294901760, %v151_v44  ;;  %v12634_v22 = vsub.f32 %v145_v33, %v233_v1  ;;  %v239_v27 = vand.u32 4294901760, %v154_v55  ;;  %v159_v52 = vld [vmem:[#allocation8 + $0x130] sm:$0xff] }
  0x83   :  { %19392 = vst [vmem:[#allocation44_spill] sm:$0xff] %v12626_v59  ;;  %9861 = vmatprep.subr.bf16.mxu1 %v12626_v59  ;;  %v243_v9 = vand.u32 4294901760, %v158_v56  ;;  %v1143_v29 = vand.u32 4294901760, %v156_v57  ;;  %v12636_v31 = vpack.c.bf16 %v237_v3, %v233_v1  ;;  %v12638_v37 = vsub.f32 %v149_v38, %v237_v3 }
  0x84   :  { %v12640_v11 = vpack.c.bf16 %v1141_v20, %v1137_v4  ;;  %v12642_v32 = vsub.f32 %v147_v43, %v1137_v4  ;;  %v12644_v59 = vsub.f32 %v151_v44, %v1141_v20  ;;  %v12648_v7 = vsub.f32 %v154_v55, %v239_v27  ;;  %v168_v55 = vld [vmem:[#allocation8 + $0x178] sm:$0xff] }
  0x85   :  { %19393 = vst [vmem:[#allocation45_spill] sm:$0xff] %v12636_v31  ;;  %19394 = vst [vmem:[#allocation46_spill] sm:$0xff] %v12638_v37  ;;  %v12646_v33 = vpack.c.bf16 %v243_v9, %v239_v27  ;;  %v12650_v5 = vsub.f32 %v158_v56, %v243_v9  ;;  %9671 = vmatpush1.bf16.msra.mxu0 %v12636_v31  ;;  %v1147_v38 = vand.u32 4294901760, %v160_v21  ;;  %v241_v43 = vand.u32 4294901760, %v153_v30  ;;  %v165_v31 = vld [vmem:[#allocation8 + $0x160] sm:$0xff] }
  0x86   :  { %19395 = vst [vmem:[#allocation47_spill] sm:$0xff] %v12640_v11  ;;  %19396 = vst [vmem:[#allocation48_spill] sm:$0xff] %v12642_v32  ;;  %9863 = vmatpush1.bf16.msra.mxu1 %v12640_v11  ;;  %v12654_v1 = vsub.f32 %v156_v57, %v1143_v29  ;;  %v245_v3 = vand.u32 4294901760, %v157_v0  ;;  %v1145_v4 = vand.u32 4294901760, %v155_v10  ;;  %v1149_v44 = vand.u32 4294901760, %v159_v52  ;;  %v161_v57 = vld [vmem:[#allocation8 + $0x140] sm:$0xff] }
  0x87   :  { %19397 = vst [vmem:[#allocation49_spill] sm:$0xff] %v12644_v59  ;;  %19398 = vst [vmem:[#allocation50_spill] sm:$0xff] %v12646_v33  ;;  %9673 = vmatprep.subr.bf16.mxu0 %v12646_v33  ;;  %v247_v20 = vand.u32 4294901760, %v162_v34  ;;  %v251_v61 = vand.u32 4294901760, %v166_v13  ;;  %v12657_v27 = vpack.c.bf16 %v1147_v38, %v1143_v29  ;;  %v12659_v56 = vsub.f32 %v160_v21, %v1147_v38  ;;  %v170_v29 = vld [vmem:[#allocation8 + $0x188] sm:$0xff] }
  0x88   :  { %19399 = vst [vmem:[#allocation51_spill] sm:$0xff] %v12648_v7  ;;  %19400 = vst [vmem:[#allocation52_spill] sm:$0xff] %v12650_v5  ;;  %v12661_v9 = vpack.c.bf16 %v245_v3, %v241_v43  ;;  %v12663_v11 = vsub.f32 %v153_v30, %v241_v43  ;;  %v12665_v39 = vsub.f32 %v157_v0, %v245_v3  ;;  %v1151_v0 = vand.u32 4294901760, %v164_v48 }
  0x89   :  { %19401 = vst [vmem:[#allocation53_spill] sm:$0xff] %v12654_v1  ;;  %19402 = vst [vmem:[#allocation54_spill] sm:$0xff] %v12657_v27  ;;  %v12667_v33 = vpack.c.bf16 %v1149_v44, %v1145_v4  ;;  %v12669_v25 = vsub.f32 %v155_v10, %v1145_v4  ;;  %v12671_v23 = vsub.f32 %v159_v52, %v1149_v44  ;;  %v174_v1 = vld [vmem:[#allocation8 + $0x1a8] sm:$0xff]  ;;  %9865 = vmatprep.subr.bf16.mxu1 %v12657_v27 }
  0x8a   :  { %19403 = vst [vmem:[#allocation55_spill] sm:$0xff] %v12659_v56  ;;  %19404 = vst [vmem:[#allocation56_spill] sm:$0xff] %v12661_v9  ;;  %9675 = vmatpush1.bf16.msra.mxu0 %v12661_v9  ;;  %v12675_v21 = vpack.c.bf16 %v251_v61, %v247_v20  ;;  %v12677_v30 = vsub.f32 %v162_v34, %v247_v20  ;;  %v12679_v38 = vsub.f32 %v166_v13, %v251_v61  ;;  %v182_v56 = vld [vmem:[#allocation8 + $0x1e8] sm:$0xff] }
  0x8b   :  { %19405 = vst [vmem:[#allocation57_spill] sm:$0xff] %v12663_v11  ;;  %19406 = vst [vmem:[#allocation58_spill] sm:$0xff] %v12665_v39  ;;  %9867 = vmatpush1.bf16.msra.mxu1 %v12667_v33  ;;  %v1155_v10 = vand.u32 4294901760, %v168_v55  ;;  %v249_v43 = vand.u32 4294901760, %v161_v57  ;;  %v253_v52 = vand.u32 4294901760, %v165_v31  ;;  %v1153_v3 = vand.u32 4294901760, %v163_v46 }
  0x8c   :  { %19407 = vst [vmem:[#allocation59_spill] sm:$0xff] %v12667_v33  ;;  %19408 = vst [vmem:[#allocation60_spill] sm:$0xff] %v12669_v25  ;;  %9677 = vmatprep.subr.bf16.mxu0 %v12675_v21  ;;  %v12683_v4 = vsub.f32 %v164_v48, %v1151_v0  ;;  %v1157_v44 = vand.u32 4294901760, %v167_v16  ;;  %v255_v27 = vand.u32 4294901760, %v170_v29  ;;  %v259_v9 = vand.u32 4294901760, %v174_v1  ;;  %v176_v25 = vld [vmem:[#allocation8 + $0x1b8] sm:$0xff] }
  0x8d   :  { %19409 = vst [vmem:[#allocation61_spill] sm:$0xff] %v12671_v23  ;;  %19410 = vst [vmem:[#allocation62_spill] sm:$0xff] %v12675_v21  ;;  %v172_v23 = vld [vmem:[#allocation8 + $0x198] sm:$0xff]  ;;  %v12685_v34 = vpack.c.bf16 %v1155_v10, %v1151_v0  ;;  %v12687_v61 = vsub.f32 %v168_v55, %v1155_v10  ;;  %v12689_v13 = vpack.c.bf16 %v253_v52, %v249_v43  ;;  %v169_v33 = vld [vmem:[#allocation8 + $0x180] sm:$0xff] }
  0x8e   :  { %19411 = vst [vmem:[#allocation63_spill] sm:$0xff] %v12677_v30  ;;  %19412 = vst [vmem:[#allocation64_spill] sm:$0xff] %v12679_v38  ;;  %v12691_v20 = vsub.f32 %v161_v57, %v249_v43  ;;  %v173_v38 = vld [vmem:[#allocation8 + $0x1a0] sm:$0xff]  ;;  %v171_v30 = vld [vmem:[#allocation8 + $0x190] sm:$0xff]  ;;  %v12693_v39 = vsub.f32 %v165_v31, %v253_v52  ;;  %v12695_v48 = vpack.c.bf16 %v1157_v44, %v1153_v3  ;;  %v1159_v31 = vand.u32 4294901760, %v172_v23 }
  0x8f   :  { %19413 = vst [vmem:[#allocation65_spill] sm:$0xff] %v12683_v4  ;;  %19414 = vst [vmem:[#allocation66_spill] sm:$0xff] %v12685_v34  ;;  %v12697_v21 = vsub.f32 %v163_v46, %v1153_v3  ;;  %v12699_v4 = vsub.f32 %v167_v16, %v1157_v44  ;;  %v175_v11 = vld [vmem:[#allocation8 + $0x1b0] sm:$0xff]  ;;  %v178_v0 = vld [vmem:[#allocation8 + $0x1c8] sm:$0xff]  ;;  %9869 = vmatprep.subr.bf16.mxu1 %v12685_v34  ;;  %9679 = vmatpush1.bf16.msra.mxu0 %v12689_v13  ;;  %v1163_v46 = vand.u32 4294901760, %v176_v25 }
  0x90   :  { %19415 = vst [vmem:[#allocation67_spill] sm:$0xff] %v12687_v61  ;;  %19416 = vst [vmem:[#allocation68_spill] sm:$0xff] %v12689_v13  ;;  %v12703_v55 = vpack.c.bf16 %v259_v9, %v255_v27  ;;  %v12705_v57 = vsub.f32 %v170_v29, %v255_v27  ;;  %v12707_v10 = vsub.f32 %v174_v1, %v259_v9  ;;  %9871 = vmatpush1.bf16.msra.mxu1 %v12695_v48 }
  0x91   :  { %19417 = vst [vmem:[#allocation69_spill] sm:$0xff] %v12691_v20  ;;  %19418 = vst [vmem:[#allocation70_spill] sm:$0xff] %v12693_v39  ;;  %v257_v43 = vand.u32 4294901760, %v169_v33  ;;  %v261_v16 = vand.u32 4294901760, %v173_v38  ;;  %v1161_v52 = vand.u32 4294901760, %v171_v30  ;;  %v12711_v3 = vsub.f32 %v172_v23, %v1159_v31  ;;  %v183_v20 = vld [vmem:[#allocation8 + $0x1f0] sm:$0xff] }
  0x92   :  { %19419 = vst [vmem:[#allocation71_spill] sm:$0xff] %v12695_v48  ;;  %19420 = vst [vmem:[#allocation72_spill] sm:$0xff] %v12697_v21  ;;  %9681 = vmatprep.subr.bf16.mxu0 %v12703_v55  ;;  %v1165_v44 = vand.u32 4294901760, %v175_v11  ;;  %v263_v34 = vand.u32 4294901760, %v178_v0  ;;  %v267_v13 = vand.u32 4294901760, %v182_v56  ;;  %v184_v21 = vld [vmem:[#allocation8 + $0x1f8] sm:$0xff]  ;;  %v12713_v27 = vpack.c.bf16 %v1163_v46, %v1159_v31 }
  0x93   :  { %19421 = vst [vmem:[#allocation73_spill] sm:$0xff] %v12699_v4  ;;  %19422 = vst [vmem:[#allocation74_spill] sm:$0xff] %v12703_v55  ;;  %v180_v4 = vld [vmem:[#allocation8 + $0x1d8] sm:$0xff]  ;;  %v12715_v1 = vsub.f32 %v176_v25, %v1163_v46  ;;  %v12717_v9 = vpack.c.bf16 %v261_v16, %v257_v43  ;;  %v12719_v29 = vsub.f32 %v169_v33, %v257_v43  ;;  %v177_v48 = vld [vmem:[#allocation8 + $0x1c0] sm:$0xff] }
  0x94   :  { %19423 = vst [vmem:[#allocation75_spill] sm:$0xff] %v12705_v57  ;;  %19424 = vst [vmem:[#allocation76_spill] sm:$0xff] %v12707_v10  ;;  %v181_v10 = vld [vmem:[#allocation8 + $0x1e0] sm:$0xff]  ;;  %v179_v57 = vld [vmem:[#allocation8 + $0x1d0] sm:$0xff]  ;;  %v12721_v39 = vsub.f32 %v173_v38, %v261_v16  ;;  %v12723_v23 = vpack.c.bf16 %v1165_v44, %v1161_v52  ;;  %v12725_v55 = vsub.f32 %v171_v30, %v1161_v52  ;;  %9873 = vmatprep.subr.bf16.mxu1 %v12713_v27 }
  0x95   :  { %19425 = vst [vmem:[#allocation77_spill] sm:$0xff] %v12711_v3  ;;  %19426 = vst [vmem:[#allocation78_spill] sm:$0xff] %v12713_v27  ;;  %v12727_v3 = vsub.f32 %v175_v11, %v1165_v44  ;;  %9683 = vmatpush1.bf16.msra.mxu0 %v12717_v9  ;;  %v12731_v25 = vpack.c.bf16 %v267_v13, %v263_v34  ;;  %v12733_v33 = vsub.f32 %v178_v0, %v263_v34 }
  0x96   :  { %19427 = vst [vmem:[#allocation79_spill] sm:$0xff] %v12717_v9  ;;  %19428 = vst [vmem:[#allocation80_spill] sm:$0xff] %v12723_v23  ;;  %v12735_v31 = vsub.f32 %v182_v56, %v267_v13  ;;  %v1167_v46 = vand.u32 4294901760, %v180_v4  ;;  %9875 = vmatpush1.bf16.msra.mxu1 %v12723_v23  ;;  %v1171_v38 = vand.u32 4294901760, %v184_v21  ;;  %v265_v43 = vand.u32 4294901760, %v177_v48  ;;  %v119_v23 = vld [vmem:[#allocation2] sm:$0xff] }
  0x97   :  { %19429 = vst [vmem:[#allocation81_spill] sm:$0xff] %v12731_v25  ;;  %19430 = vst [vmem:[#allocation82_spill] sm:$0xff] %v12733_v33  ;;  %v269_v30 = vand.u32 4294901760, %v181_v10  ;;  %v1169_v16 = vand.u32 4294901760, %v179_v57  ;;  %9685 = vmatprep.subr.bf16.mxu0 %v12731_v25  ;;  %v1173_v52 = vand.u32 4294901760, %v183_v20  ;;  %v18297_v44 = vand.u32 4294901760, %v12538_v17 }
  0x98   :  { %19431 = vst [vmem:[#allocation83_spill] sm:$0xff] %v12735_v31  ;;  %v12739_v11 = vsub.f32 %v180_v4, %v1167_v46  ;;  %v18296_v9 = vand.u32 4294901760, %v12540_v18  ;;  %v12743_v34 = vpack.c.bf16 %v1171_v38, %v1167_v46  ;;  %v12745_v56 = vsub.f32 %v184_v21, %v1171_v38 }
  0x99   :  { %v12747_v13 = vpack.c.bf16 %v269_v30, %v265_v43  ;;  %v12749_v0 = vsub.f32 %v177_v48, %v265_v43  ;;  %v12751_v27 = vsub.f32 %v181_v10, %v269_v30  ;;  %v12753_v31 = vpack.c.bf16 %v1173_v52, %v1169_v16 }
  0x9a   :  { %19432 = vst [vmem:[#allocation84_spill] sm:$0xff] %v12743_v34  ;;  %v12755_v4 = vsub.f32 %v179_v57, %v1169_v16  ;;  %v12757_v25 = vsub.f32 %v183_v20, %v1173_v52  ;;  %9877 = vmatprep.subr.bf16.mxu1 %v12743_v34  ;;  %v329_v21 = vsub.f32 %v12538_v17, %v18297_v44  ;;  %v18300_v10 = vand.u32 4294901760, %v12542_v19 }
  0x9b   :  { %19433 = vst [vmem:[#allocation85_spill] sm:$0xff] %v12747_v13  ;;  %19434 = vst [vmem:[#allocation86_spill] sm:$0xff] %v12751_v27  ;;  %9687 = vmatpush1.bf16.msra.mxu0 %v12747_v13  ;;  %v341_v48 = vsub.f32 %v12540_v18, %v18296_v9  ;;  %v18305_v46 = vand.u32 4294901760, %v12546_v24  ;;  %9879 = vmatpush1.bf16.msra.mxu1 %v12753_v31  ;;  %v12770_v20 = vand.u32 4294901760, %v119_v23  ;;  %v18312_v57 = vand.u32 4294901760, %v12550_v26 }
  0x9c   :  { %19435 = vst [vmem:[#allocation87_spill] sm:$0xff] %v12753_v31  ;;  %19436 = vst [vmem:[#allocation88_spill] sm:$0xff] %v12755_v4  ;;  %v18313_v38 = vand.u32 4294901760, %v12553_v28  ;;  %v18317_v43 = vand.u32 4294901760, %v12559_v40  ;;  %v330_v30 = vand.u32 4294901760, %v329_v21  ;;  %v1233_v52 = vsub.f32 %v12542_v19, %v18300_v10 }
  0x9d   :  { %19437 = vst [vmem:[#allocation89_spill] sm:$0xff] %v12757_v25  ;;  %19438 = vst [vmem:[#allocation90_spill] sm:$0xff] %v12770_v20  ;;  %v342_v16 = vand.u32 4294901760, %v341_v48  ;;  %v1245_v9 = vsub.f32 %v12546_v24, %v18305_v46  ;;  %v12782_v44 = vsub.f32 %v119_v23, %v12770_v20  ;;  %v335_v31 = vsub.f32 %v12550_v26, %v18312_v57 }
  0x9e   :  { %v347_v21 = vsub.f32 %v12553_v28, %v18313_v38  ;;  %v1239_v48 = vsub.f32 %v12559_v40, %v18317_v43  ;;  %v1234_v13 = vand.u32 4294901760, %v1233_v52  ;;  %v18316_v46 = vand.u32 4294901760, %v12561_v41 }
  0x9f   :  { %19439 = vst [vmem:[#allocation91_spill] sm:$0xff] %v12782_v44  ;;  %v9688_v10 = vpack.c.bf16 %v342_v16, %v330_v30  ;;  %v1246_v34 = vand.u32 4294901760, %v1245_v9  ;;  %v12795_v23 = vand.u32 4294901760, %v12782_v44  ;;  %v336_v20 = vand.u32 4294901760, %v335_v31 }
  0xa0   :  { %v348_v24 = vand.u32 4294901760, %v347_v21  ;;  %v1240_v19 = vand.u32 4294901760, %v1239_v48  ;;  %v1251_v38 = vsub.f32 %v12561_v41, %v18316_v46  ;;  %v18319_v28 = vand.u32 4294901760, %v12563_v42 }
  0xa1   :  { %19440 = vst [vmem:[#allocation92_spill] sm:$0xff] %v12795_v23  ;;  %9689 = vmatprep.subr.bf16.mxu0 %v9688_v10  ;;  %v9880_v57 = vpack.c.bf16 %v1246_v34, %v1234_v13  ;;  %v18318_v30 = vand.u32 4294901760, %v12567_v47  ;;  %v307_v9 = vsub.f32 %v12782_v44, %v12795_v23  ;;  %v18320_v52 = vand.u32 4294901760, %v12571_v49 }
  0xa2   :  { %v9690_v16 = vpack.c.bf16 %v348_v24, %v336_v20  ;;  %v18323_v31 = vand.u32 4294901760, %v12574_v51  ;;  %v1252_v21 = vand.u32 4294901760, %v1251_v38  ;;  %v353_v34 = vsub.f32 %v12563_v42, %v18319_v28 }
  0xa3   :  { %9881 = vmatprep.subr.bf16.mxu1 %v9880_v57  ;;  %v365_v13 = vsub.f32 %v12567_v47, %v18318_v30  ;;  %v18324_v10 = vand.u32 4294901760, %v12576_v53  ;;  %v308_v48 = vand.u32 4294901760, %v307_v9  ;;  %v1257_v24 = vsub.f32 %v12571_v49, %v18320_v52 }
  0xa4   :  { %v1269_v20 = vsub.f32 %v12574_v51, %v18323_v31  ;;  %v18329_v57 = vand.u32 4294901760, %v12582_v62  ;;  %v9882_v38 = vpack.c.bf16 %v1252_v21, %v1240_v19  ;;  %v354_v46 = vand.u32 4294901760, %v353_v34 }
  0xa5   :  { %v366_v43 = vand.u32 4294901760, %v365_v13  ;;  %v359_v30 = vsub.f32 %v12576_v53, %v18324_v10  ;;  %309 = vmatmul.mubr.f32.vlgmr.msra.gmra.mrb[0].mxu0 %v308_v48  ;;  %1213 = vmatmul.mubr.f32.vlgmr.msra.gmra.mrb[0].mxu1 %v308_v48  ;;  %v1258_v9 = vand.u32 4294901760, %v1257_v24  ;;  %v18325_v23 = vand.u32 4294901760, %v12584_v63 }
  0xa6   :  { %v1270_v28 = vand.u32 4294901760, %v1269_v20  ;;  %v371_v52 = vsub.f32 %v12582_v62, %v18329_v57  ;;  %9691 = vmatpush1.bf16.msra.mxu0 %v9690_v16  ;;  %9883 = vmatpush1.bf16.msra.mxu1 %v9882_v38  ;;  %v18326_v21 = vand.u32 4294901760, %v12588_v6  ;;  %v18327_v34 = vand.u32 4294901760, %v12592_v8 }
  0xa7   :  { %v9692_v31 = vpack.c.bf16 %v366_v43, %v354_v46  ;;  %v360_v19 = vand.u32 4294901760, %v359_v30  ;;  %v1263_v48 = vsub.f32 %v12584_v63, %v18325_v23  ;;  %v18328_v24 = vand.u32 4294901760, %v12595_v12 }
  0xa8   :  { %v9884_v13 = vpack.c.bf16 %v1270_v28, %v1258_v9  ;;  %v372_v10 = vand.u32 4294901760, %v371_v52  ;;  %v19441_v20 = vmov 0.0   ;;  %v1275_v46 = vsub.f32 %v12588_v6, %v18326_v21 }
  0xa9   :  { %314 = vmatprep.mubr.f32.mxu0 %v19441_v20  ;;  %1218 = vmatprep.mubr.f32.mxu1 %v19441_v20  ;;  %v377_v28 = vsub.f32 %v12592_v8, %v18327_v34  ;;  %v18330_v43 = vand.u32 4294901760, %v12599_v14  ;;  %v18341_v30 = vand.u32 4294901760, %v12601_v15  ;;  %v1264_v52 = vand.u32 4294901760, %v1263_v48 }
  0xaa   :  { %9693 = vmatprep.subr.bf16.mxu0 %v9692_v31  ;;  %9885 = vmatprep.subr.bf16.mxu1 %v9884_v13  ;;  %v9694_v16 = vpack.c.bf16 %v372_v10, %v360_v19  ;;  %v389_v38 = vsub.f32 %v12595_v12, %v18328_v24  ;;  %v18333_v31 = vand.u32 4294901760, %v12608_v35  ;;  %v1276_v9 = vand.u32 4294901760, %v1275_v46 }
  0xab   :  { %v378_v23 = vand.u32 4294901760, %v377_v28  ;;  %v1281_v21 = vsub.f32 %v12599_v14, %v18330_v43  ;;  %v1293_v34 = vsub.f32 %v12601_v15, %v18341_v30  ;;  %v18334_v19 = vand.u32 4294901760, %v12610_v36 }
  0xac   :  { %9695 = vmatpush1.bf16.msra.mxu0 %v9694_v16  ;;  %v390_v13 = vand.u32 4294901760, %v389_v38  ;;  %v383_v10 = vsub.f32 %v12608_v35, %v18333_v31  ;;  %v18338_v48 = vand.u32 4294901760, %v12614_v45  ;;  %v9886_v46 = vpack.c.bf16 %v1276_v9, %v1264_v52 }
  0xad   :  { %v1282_v28 = vand.u32 4294901760, %v1281_v21  ;;  %v1294_v24 = vand.u32 4294901760, %v1293_v34  ;;  %v18335_v57 = vand.u32 4294901760, %v12616_v50  ;;  %v395_v16 = vsub.f32 %v12610_v36, %v18334_v19 }
  0xae   :  { %v9696_v43 = vpack.c.bf16 %v390_v13, %v378_v23  ;;  %v384_v44 = vand.u32 4294901760, %v383_v10  ;;  %v1287_v38 = vsub.f32 %v12614_v45, %v18338_v48  ;;  %9887 = vmatpush1.bf16.msra.mxu1 %v9886_v46  ;;  %v18336_v21 = vand.u32 4294901760, %v12620_v54 }
  0xaf   :  { %v9888_v31 = vpack.c.bf16 %v1294_v24, %v1282_v28  ;;  %v1299_v52 = vsub.f32 %v12616_v50, %v18335_v57  ;;  %v18337_v34 = vand.u32 4294901760, %v12624_v58  ;;  %v396_v23 = vand.u32 4294901760, %v395_v16 }
  0xb0   :  { %9697 = vmatprep.subr.bf16.mxu0 %v9696_v43  ;;  %v1288_v9 = vand.u32 4294901760, %v1287_v38  ;;  %v18339_v13 = vand.u32 4294901760, %v12628_v60  ;;  %v18340_v10 = vand.u32 4294901760, %v12631_v2  ;;  %v401_v24 = vsub.f32 %v12620_v54, %v18336_v21 }
  0xb1   :  { %9889 = vmatprep.subr.bf16.mxu1 %v9888_v31  ;;  %v1300_v19 = vand.u32 4294901760, %v1299_v52  ;;  %v413_v46 = vsub.f32 %v12624_v58, %v18337_v34  ;;  %v18344_v28 = vand.u32 4294901760, %v12634_v22  ;;  %v9698_v57 = vpack.c.bf16 %v396_v23, %v384_v44 }
  0xb2   :  { %v1305_v43 = vsub.f32 %v12628_v60, %v18339_v13  ;;  %v1317_v31 = vsub.f32 %v12631_v2, %v18340_v10  ;;  %v18343_v16 = vand.u32 4294901760, %v12638_v37  ;;  %v402_v52 = vand.u32 4294901760, %v401_v24 }
  0xb3   :  { %v9890_v38 = vpack.c.bf16 %v1300_v19, %v1288_v9  ;;  %v414_v21 = vand.u32 4294901760, %v413_v46  ;;  %v407_v34 = vsub.f32 %v12634_v22, %v18344_v28  ;;  %9699 = vmatpush1.bf16.msra.mxu0 %v9698_v57  ;;  %v18342_v13 = vand.u32 4294901760, %v12642_v32 }
  0xb4   :  { %v1306_v48 = vand.u32 4294901760, %v1305_v43  ;;  %v1318_v44 = vand.u32 4294901760, %v1317_v31  ;;  %v419_v23 = vsub.f32 %v12638_v37, %v18343_v16  ;;  %v18347_v19 = vand.u32 4294901760, %v12644_v59 }
  0xb5   :  { %9891 = vmatpush1.bf16.msra.mxu1 %v9890_v38  ;;  %v9700_v10 = vpack.c.bf16 %v414_v21, %v402_v52  ;;  %v408_v30 = vand.u32 4294901760, %v407_v34  ;;  %v18348_v9 = vand.u32 4294901760, %v12648_v7  ;;  %v1311_v57 = vsub.f32 %v12642_v32, %v18342_v13  ;;  %v19442_v34 = vld [vmem:[#allocation53_spill] sm:$0xff]  ;;  %v19443_v52 = vld [vmem:[#allocation55_spill] sm:$0xff] }
  0xb6   :  { %v9892_v24 = vpack.c.bf16 %v1318_v44, %v1306_v48  ;;  %v420_v46 = vand.u32 4294901760, %v419_v23  ;;  %v18349_v43 = vand.u32 4294901760, %v12650_v5  ;;  %v1323_v31 = vsub.f32 %v12644_v59, %v18347_v19  ;;  %v19447_v59 = vld [vmem:[#allocation61_spill] sm:$0xff] }
  0xb7   :  { %9701 = vmatprep.subr.bf16.mxu0 %v9700_v10  ;;  %v425_v21 = vsub.f32 %v12648_v7, %v18348_v9  ;;  %v18358_v38 = vand.u32 4294901760, %v19442_v34  ;;  %v18361_v48 = vand.u32 4294901760, %v19443_v52  ;;  %v1312_v23 = vand.u32 4294901760, %v1311_v57  ;;  %v19444_v10 = vld [vmem:[#allocation57_spill] sm:$0xff] }
  0xb8   :  { %9893 = vmatprep.subr.bf16.mxu1 %v9892_v24  ;;  %v9702_v44 = vpack.c.bf16 %v420_v46, %v408_v30  ;;  %v437_v13 = vsub.f32 %v12650_v5, %v18349_v43  ;;  %v18360_v16 = vand.u32 4294901760, %v19444_v10  ;;  %v1324_v28 = vand.u32 4294901760, %v1323_v31  ;;  %v19445_v46 = vld [vmem:[#allocation58_spill] sm:$0xff]  ;;  %v19446_v43 = vld [vmem:[#allocation60_spill] sm:$0xff] }
  0xb9   :  { %v426_v32 = vand.u32 4294901760, %v425_v21  ;;  %v1329_v19 = vsub.f32 %v19442_v34, %v18358_v38  ;;  %v1341_v9 = vsub.f32 %v19443_v52, %v18361_v48  ;;  %v18363_v57 = vand.u32 4294901760, %v19445_v46 }
  0xba   :  { %9703 = vmatpush1.bf16.msra.mxu0 %v9702_v44  ;;  %v438_v24 = vand.u32 4294901760, %v437_v13  ;;  %v431_v30 = vsub.f32 %v19444_v10, %v18360_v16  ;;  %v18366_v5 = vand.u32 4294901760, %v19446_v43  ;;  %v9894_v31 = vpack.c.bf16 %v1324_v28, %v1312_v23  ;;  %v19449_v23 = vld [vmem:[#allocation64_spill] sm:$0xff] }
  0xbb   :  { %v1330_v21 = vand.u32 4294901760, %v1329_v19  ;;  %v1342_v7 = vand.u32 4294901760, %v1341_v9  ;;  %v18365_v37 = vand.u32 4294901760, %v19447_v59  ;;  %v443_v44 = vsub.f32 %v19445_v46, %v18363_v57  ;;  %v19448_v19 = vld [vmem:[#allocation63_spill] sm:$0xff] }
  0xbc   :  { %v9704_v38 = vpack.c.bf16 %v438_v24, %v426_v32  ;;  %v432_v34 = vand.u32 4294901760, %v431_v30  ;;  %v1335_v13 = vsub.f32 %v19446_v43, %v18366_v5  ;;  %9895 = vmatpush1.bf16.msra.mxu1 %v9894_v31  ;;  %v18368_v9 = vand.u32 4294901760, %v19448_v19  ;;  %v19450_v30 = vld [vmem:[#allocation65_spill] sm:$0xff] }
  0xbd   :  { %v9896_v16 = vpack.c.bf16 %v1342_v7, %v1330_v21  ;;  %v1347_v28 = vsub.f32 %v19447_v59, %v18365_v37  ;;  %v18369_v48 = vand.u32 4294901760, %v19449_v23  ;;  %v444_v32 = vand.u32 4294901760, %v443_v44  ;;  %v19451_v21 = vld [vmem:[#allocation69_spill] sm:$0xff]  ;;  %v19452_v44 = vld [vmem:[#allocation70_spill] sm:$0xff] }
  0xbe   :  { %9705 = vmatprep.subr.bf16.mxu0 %v9704_v38  ;;  %v1336_v24 = vand.u32 4294901760, %v1335_v13  ;;  %v18371_v10 = vand.u32 4294901760, %v19450_v30  ;;  %v18373_v57 = vand.u32 4294901760, %v12687_v61  ;;  %v449_v7 = vsub.f32 %v19448_v19, %v18368_v9  ;;  %v19454_v19 = vld [vmem:[#allocation73_spill] sm:$0xff] }
  0xbf   :  { %9897 = vmatprep.subr.bf16.mxu1 %v9896_v16  ;;  %v1348_v46 = vand.u32 4294901760, %v1347_v28  ;;  %v461_v31 = vsub.f32 %v19449_v23, %v18369_v48  ;;  %v18380_v37 = vand.u32 4294901760, %v19451_v21  ;;  %v9706_v5 = vpack.c.bf16 %v444_v32, %v432_v34 }
  0xc0   :  { %v1353_v38 = vsub.f32 %v19450_v30, %v18371_v10  ;;  %v1365_v16 = vsub.f32 %v12687_v61, %v18373_v57  ;;  %v18378_v13 = vand.u32 4294901760, %v19452_v44  ;;  %v450_v59 = vand.u32 4294901760, %v449_v7  ;;  %v19453_v10 = vld [vmem:[#allocation72_spill] sm:$0xff] }
  0xc1   :  { %v9898_v28 = vpack.c.bf16 %v1348_v46, %v1336_v24  ;;  %v462_v9 = vand.u32 4294901760, %v461_v31  ;;  %v455_v48 = vsub.f32 %v19451_v21, %v18380_v37  ;;  %9707 = vmatpush1.bf16.msra.mxu0 %v9706_v5  ;;  %v18379_v30 = vand.u32 4294901760, %v19453_v10  ;;  %v19455_v24 = vld [vmem:[#allocation75_spill] sm:$0xff] }
  0xc2   :  { %v1354_v23 = vand.u32 4294901760, %v1353_v38  ;;  %v1366_v34 = vand.u32 4294901760, %v1365_v16  ;;  %v467_v32 = vsub.f32 %v19452_v44, %v18378_v13  ;;  %v18381_v46 = vand.u32 4294901760, %v19454_v19  ;;  %v19456_v38 = vld [vmem:[#allocation76_spill] sm:$0xff] }
  0xc3   :  { %9899 = vmatpush1.bf16.msra.mxu1 %v9898_v28  ;;  %v9708_v57 = vpack.c.bf16 %v462_v9, %v450_v59  ;;  %v456_v61 = vand.u32 4294901760, %v455_v48  ;;  %v18382_v7 = vand.u32 4294901760, %v19455_v24  ;;  %v1359_v5 = vsub.f32 %v19453_v10, %v18379_v30  ;;  %v19457_v48 = vld [vmem:[#allocation77_spill] sm:$0xff] }
  0xc4   :  { %v9900_v31 = vpack.c.bf16 %v1366_v34, %v1354_v23  ;;  %v468_v43 = vand.u32 4294901760, %v467_v32  ;;  %v18383_v16 = vand.u32 4294901760, %v19456_v38  ;;  %v1371_v13 = vsub.f32 %v19454_v19, %v18381_v46 }
  0xc5   :  { %9709 = vmatprep.subr.bf16.mxu0 %v9708_v57  ;;  %v473_v59 = vsub.f32 %v19455_v24, %v18382_v7  ;;  %v18385_v9 = vand.u32 4294901760, %v19457_v48  ;;  %v18388_v23 = vand.u32 4294901760, %v12715_v1  ;;  %v1360_v34 = vand.u32 4294901760, %v1359_v5 }
  0xc6   :  { %9901 = vmatprep.subr.bf16.mxu1 %v9900_v31  ;;  %v9710_v28 = vpack.c.bf16 %v468_v43, %v456_v61  ;;  %v485_v32 = vsub.f32 %v19456_v38, %v18383_v16  ;;  %v18387_v57 = vand.u32 4294901760, %v12719_v29  ;;  %v1372_v30 = vand.u32 4294901760, %v1371_v13 }
  0xc7   :  { %v474_v37 = vand.u32 4294901760, %v473_v59  ;;  %v1377_v46 = vsub.f32 %v19457_v48, %v18385_v9  ;;  %v1389_v7 = vsub.f32 %v12715_v1, %v18388_v23  ;;  %v18389_v43 = vand.u32 4294901760, %v12721_v39 }
  0xc8   :  { %9711 = vmatpush1.bf16.msra.mxu0 %v9710_v28  ;;  %v486_v31 = vand.u32 4294901760, %v485_v32  ;;  %v479_v61 = vsub.f32 %v12719_v29, %v18387_v57  ;;  %v18390_v5 = vand.u32 4294901760, %v12725_v55  ;;  %v9902_v13 = vpack.c.bf16 %v1372_v30, %v1360_v34  ;;  %v120_v57 = vld [vmem:[#allocation2 + $0x8] sm:$0xff] }
  0xc9   :  { %v1378_v59 = vand.u32 4294901760, %v1377_v46  ;;  %v1390_v16 = vand.u32 4294901760, %v1389_v7  ;;  %v18391_v38 = vand.u32 4294901760, %v12727_v3  ;;  %v491_v28 = vsub.f32 %v12721_v39, %v18389_v43  ;;  %v19458_v7 = vld [vmem:[#allocation83_spill] sm:$0xff] }
  0xca   :  { %v9712_v9 = vpack.c.bf16 %v486_v31, %v474_v37  ;;  %v480_v48 = vand.u32 4294901760, %v479_v61  ;;  %v1383_v32 = vsub.f32 %v12725_v55, %v18390_v5  ;;  %9903 = vmatpush1.bf16.msra.mxu1 %v9902_v13  ;;  %v18392_v46 = vand.u32 4294901760, %v12733_v33 }
  0xcb   :  { %v9904_v23 = vpack.c.bf16 %v1390_v16, %v1378_v59  ;;  %v1395_v30 = vsub.f32 %v12727_v3, %v18391_v38  ;;  %v18395_v37 = vand.u32 4294901760, %v19458_v7  ;;  %v492_v34 = vand.u32 4294901760, %v491_v28 }
  0xcc   :  { %9713 = vmatprep.subr.bf16.mxu0 %v9712_v9  ;;  %v1384_v31 = vand.u32 4294901760, %v1383_v32  ;;  %v18397_v61 = vand.u32 4294901760, %v12739_v11  ;;  %v18398_v43 = vand.u32 4294901760, %v12745_v56  ;;  %v497_v16 = vsub.f32 %v12733_v33, %v18392_v46 }
  0xcd   :  { %9905 = vmatprep.subr.bf16.mxu1 %v9904_v23  ;;  %v1396_v5 = vand.u32 4294901760, %v1395_v30  ;;  %v509_v13 = vsub.f32 %v19458_v7, %v18395_v37  ;;  %v13006_v59 = vand.u32 4294901760, %v120_v57  ;;  %v9714_v38 = vpack.c.bf16 %v492_v34, %v480_v48 }
  0xce   :  { %v1401_v9 = vsub.f32 %v12739_v11, %v18397_v61  ;;  %v1413_v23 = vsub.f32 %v12745_v56, %v18398_v43  ;;  %v18400_v28 = vand.u32 4294901760, %v12749_v0  ;;  %v498_v30 = vand.u32 4294901760, %v497_v16 }
  0xcf   :  { %19459 = vst [vmem:[#allocation55_spill] sm:$0xff] %v13006_v59  ;;  %v9906_v32 = vpack.c.bf16 %v1396_v5, %v1384_v31  ;;  %v510_v46 = vand.u32 4294901760, %v509_v13  ;;  %v13016_v33 = vsub.f32 %v120_v57, %v13006_v59  ;;  %9715 = vmatpush1.bf16.msra.mxu0 %v9714_v38  ;;  %v18399_v34 = vand.u32 4294901760, %v12751_v27 }
  0xd0   :  { %v1402_v37 = vand.u32 4294901760, %v1401_v9  ;;  %v1414_v7 = vand.u32 4294901760, %v1413_v23  ;;  %v503_v48 = vsub.f32 %v12749_v0, %v18400_v28  ;;  %v18404_v5 = vand.u32 4294901760, %v12755_v4 }
  0xd1   :  { %19460 = vst [vmem:[#allocation69_spill] sm:$0xff] %v13016_v33  ;;  %9907 = vmatpush1.bf16.msra.mxu1 %v9906_v32  ;;  %v9716_v61 = vpack.c.bf16 %v510_v46, %v498_v30  ;;  %v13023_v43 = vand.u32 4294901760, %v13016_v33  ;;  %v18403_v31 = vand.u32 4294901760, %v12757_v25  ;;  %v515_v38 = vsub.f32 %v12751_v27, %v18399_v34  ;;  %v19463_v34 = vld [vmem:[#allocation28_spill] sm:$0xff] }
  0xd2   :  { %v9908_v57 = vpack.c.bf16 %v1414_v7, %v1402_v37  ;;  %v504_v16 = vand.u32 4294901760, %v503_v48  ;;  %v1407_v46 = vsub.f32 %v12755_v4, %v18404_v5  ;;  %v9720_v30 = vpack.c.bf16 %v12540_v18, %v12538_v17  ;;  %v19462_v48 = vld [vmem:[#allocation26_spill] sm:$0xff] }
  0xd3   :  { %19461 = vst [vmem:[#allocation70_spill] sm:$0xff] %v13023_v43  ;;  %9717 = vmatprep.subr.bf16.mxu0 %v9716_v61  ;;  %v318_v13 = vsub.f32 %v13016_v33, %v13023_v43  ;;  %v1419_v9 = vsub.f32 %v12757_v25, %v18403_v31  ;;  %v516_v23 = vand.u32 4294901760, %v515_v38  ;;  %v9912_v28 = vpack.c.bf16 %v19463_v34, %v19462_v48  ;;  %v19464_v31 = vld [vmem:[#allocation31_spill] sm:$0xff] }
  0xd4   :  { %9909 = vmatprep.subr.bf16.mxu1 %v9908_v57  ;;  %v1408_v37 = vand.u32 4294901760, %v1407_v46  ;;  %v9722_v57 = vpack.c.bf16 %v19464_v31, %v12550_v26  ;;  %v9914_v38 = vpack.c.bf16 %v12561_v41, %v12559_v40  ;;  %v19465_v46 = vld [vmem:[#allocation90_spill] sm:$0xff]  ;;  %v19470_v41 = vld [vmem:[#allocation52_spill] sm:$0xff]  ;;  %v19471_v31 = vld [vmem:[#allocation53_spill] sm:$0xff]  ;;  %v19472_v26 = vand.u32 4294901760, %v12563_v42 }
  0xd5   :  { %v319_v7 = vand.u32 4294901760, %v318_v13  ;;  %v1420_v32 = vand.u32 4294901760, %v1419_v9  ;;  %v9718_v61 = vpack.c.bf16 %v516_v23, %v504_v16  ;;  %v9724_v16 = vpack.c.bf16 %v12567_v47, %v12563_v42 }
  0xd6   :  { %v9916_v13 = vpack.c.bf16 %v12574_v51, %v12571_v49  ;;  %v9918_v9 = vpack.c.bf16 %v12588_v6, %v12584_v63  ;;  %v9728_v23 = vpack.c.bf16 %v12595_v12, %v12592_v8  ;;  %v19473_v34 = vand.u32 4294901760, %v12567_v47 }
  0xd7   :  { %320 = vmatmul.mubr.f32.gmra.mrb[2].mxu0 %v319_v7  ;;  %1224 = vmatmul.mubr.f32.gmra.mrb[2].mxu1 %v319_v7  ;;  %v9910_v43 = vpack.c.bf16 %v1420_v32, %v1408_v37  ;;  %v9730_v7 = vpack.c.bf16 %v12610_v36, %v12608_v35  ;;  %v9922_v37 = vpack.c.bf16 %v12616_v50, %v12614_v45  ;;  %v19474_v18 = vand.u32 4294901760, %v12571_v49 }
  0xd8   :  { %9719 = vmatpush1.bf16.msra.mxu0 %v9718_v61  ;;  %550 = vmatprep.mubr.f32.mxu0 %v19441_v20  ;;  %v9732_v32 = vpack.c.bf16 %v12624_v58, %v12620_v54  ;;  %v19466_v61 = vld [vmem:[#allocation46_spill] sm:$0xff]  ;;  %v13086_v48 = vpack.c.bf16 %v19473_v34, %v19472_v26  ;;  %v19475_v17 = vand.u32 4294901760, %v12574_v51  ;;  %v19476_v25 = vand.u32 4294901760, %v12576_v53 }
  0xd9   :  { %9911 = vmatpush1.bf16.msra.mxu1 %v9910_v43  ;;  %9721 = vmatprep.subr.bf16.mxu0 %v9720_v30  ;;  %v9726_v43 = vpack.c.bf16 %v12582_v62, %v12576_v53  ;;  %v9924_v30 = vpack.c.bf16 %v12631_v2, %v12628_v60  ;;  %v19477_v4 = vand.u32 4294901760, %v12582_v62  ;;  %v19478_v42 = vand.u32 4294901760, %v12584_v63 }
  0xda   :  { %1454 = vmatprep.mubr.f32.mxu1 %v19441_v20  ;;  %9913 = vmatprep.subr.bf16.mxu1 %v9912_v28  ;;  %v9920_v28 = vpack.c.bf16 %v12601_v15, %v12599_v14  ;;  %v13092_v33 = vpack.c.bf16 %v19475_v17, %v19474_v18  ;;  %v19479_v47 = vand.u32 4294901760, %v12588_v6  ;;  %v19480_v49 = vand.u32 4294901760, %v12592_v8 }
  0xdb   :  { %552 = vmatmul.mubr.f32.vlgmr.msra.gmra.mrb[0].mxu0 %v19465_v46  ;;  %v13098_v27 = vpack.c.bf16 %v19477_v4, %v19476_v25  ;;  %v19481_v51 = vand.u32 4294901760, %v12595_v12  ;;  %v19482_v18 = vand.u32 4294901760, %v12599_v14  ;;  %v19483_v53 = vand.u32 4294901760, %v12601_v15 }
  0xdc   :  { %9723 = vmatpush1.bf16.msra.mxu0 %v9722_v57  ;;  %1456 = vmatmul.mubr.f32.vlgmr.msra.gmra.mrb[0].mxu1 %v19465_v46  ;;  %v9734_v57 = vpack.c.bf16 %v19466_v61, %v12634_v22  ;;  %v19469_v46 = vld [vmem:[#allocation51_spill] sm:$0xff]  ;;  %v13104_v26 = vpack.c.bf16 %v19479_v47, %v19478_v42  ;;  %v19484_v63 = vand.u32 4294901760, %v12608_v35  ;;  %v19485_v6 = vand.u32 4294901760, %v12610_v36  ;;  %v19500_v47 = vld [vmem:[#allocation57_spill] sm:$0xff] }
  0xdd   :  { %9915 = vmatpush1.bf16.msra.mxu1 %v9914_v38  ;;  %9725 = vmatprep.subr.bf16.mxu0 %v9724_v16  ;;  %v19467_v38 = vld [vmem:[#allocation48_spill] sm:$0xff]  ;;  %v19468_v16 = vld [vmem:[#allocation49_spill] sm:$0xff]  ;;  %v9736_v40 = vpack.c.bf16 %v19470_v41, %v19469_v46  ;;  %v13110_v17 = vpack.c.bf16 %v19481_v51, %v19480_v49  ;;  %v13116_v62 = vpack.c.bf16 %v19483_v53, %v19482_v18  ;;  %v19486_v8 = vand.u32 4294901760, %v12614_v45 }
  0xde   :  { %9917 = vmatprep.subr.bf16.mxu1 %v9916_v13  ;;  %557 = vmatprep.mubr.f32.mxu0 %v19441_v20  ;;  %v9926_v5 = vpack.c.bf16 %v19468_v16, %v19467_v38  ;;  %v9928_v13 = vpack.c.bf16 %v19443_v52, %v19471_v31  ;;  %v13123_v25 = vpack.c.bf16 %v19485_v6, %v19484_v63  ;;  %v19487_v12 = vand.u32 4294901760, %v12616_v50  ;;  %v19504_v18 = vld [vmem:[#allocation60_spill] sm:$0xff]  ;;  %v19508_v6 = vld [vmem:[#allocation63_spill] sm:$0xff] }
  0xdf   :  { %1461 = vmatprep.mubr.f32.mxu1 %v19441_v20  ;;  %559 = vmatmul.mubr.f32.gmra.mrb[2].mxu0 %v13006_v59  ;;  %v19488_v14 = vand.u32 4294901760, %v12620_v54  ;;  %v19489_v15 = vand.u32 4294901760, %v12624_v58  ;;  %v19490_v35 = vand.u32 4294901760, %v12628_v60  ;;  %v19491_v36 = vand.u32 4294901760, %v12631_v2 }
  0xe0   :  { %9727 = vmatpush1.bf16.msra.mxu0 %v9726_v43  ;;  %1463 = vmatmul.mubr.f32.gmra.mrb[2].mxu1 %v13006_v59  ;;  %v13129_v4 = vpack.c.bf16 %v19487_v12, %v19486_v8  ;;  %v19492_v45 = vand.u32 4294901760, %v12634_v22  ;;  %v19493_v50 = vand.u32 4294901760, %v19466_v61  ;;  %v19494_v54 = vand.u32 4294901760, %v19467_v38  ;;  %v19502_v38 = vld [vmem:[#allocation58_spill] sm:$0xff]  ;;  %v19510_v8 = vld [vmem:[#allocation64_spill] sm:$0xff] }
  0xe1   :  { %9919 = vmatpush1.bf16.msra.mxu1 %v9918_v9  ;;  %9729 = vmatprep.subr.bf16.mxu0 %v9728_v23  ;;  %v13135_v34 = vpack.c.bf16 %v19489_v15, %v19488_v14  ;;  %v13142_v43 = vpack.c.bf16 %v19491_v36, %v19490_v35  ;;  %v19495_v58 = vand.u32 4294901760, %v19468_v16  ;;  %v19497_v60 = vand.u32 4294901760, %v19470_v41  ;;  %v19514_v15 = vld [vmem:[#allocation67_spill] sm:$0xff] }
  0xe2   :  { %9921 = vmatprep.subr.bf16.mxu1 %v9920_v28  ;;  %693 = vmatprep.mubr.f32.mxu0 %v19441_v20  ;;  %v13148_v9 = vpack.c.bf16 %v19493_v50, %v19492_v45  ;;  %v19496_v28 = vand.u32 4294901760, %v19469_v46  ;;  %v19498_v2 = vand.u32 4294901760, %v19471_v31  ;;  %v19499_v22 = vand.u32 4294901760, %v19443_v52  ;;  %v19506_v46 = vld [vmem:[#allocation61_spill] sm:$0xff] }
  0xe3   :  { %1597 = vmatprep.mubr.f32.mxu1 %v19441_v20  ;;  %v13154_v23 = vpack.c.bf16 %v19495_v58, %v19494_v54  ;;  %v19501_v49 = vand.u32 4294901760, %v19500_v47  ;;  %v19503_v51 = vand.u32 4294901760, %v19502_v38  ;;  %v19505_v53 = vand.u32 4294901760, %v19504_v18  ;;  %v19512_v52 = vld [vmem:[#allocation65_spill] sm:$0xff] }
  0xe4   :  { %v13160_v42 = vpack.c.bf16 %v19497_v60, %v19496_v28  ;;  %9731 = vmatpush1.bf16.msra.mxu0 %v9730_v7  ;;  %v13166_v61 = vpack.c.bf16 %v19499_v22, %v19498_v2  ;;  %v19507_v63 = vand.u32 4294901760, %v19506_v46  ;;  %v19509_v7 = vand.u32 4294901760, %v19508_v6 }
  0xe5   :  { %v13172_v16 = vpack.c.bf16 %v19503_v51, %v19501_v49  ;;  %v19511_v31 = vand.u32 4294901760, %v19510_v8  ;;  %9923 = vmatpush1.bf16.msra.mxu1 %v9922_v37  ;;  %9733 = vmatprep.subr.bf16.mxu0 %v9732_v32  ;;  %v19513_v14 = vand.u32 4294901760, %v19512_v52  ;;  %v19515_v35 = vand.u32 4294901760, %v19514_v15  ;;  %v19522_v32 = vld [vmem:[#allocation76_spill] sm:$0xff]  ;;  %v19525_v49 = vld [vmem:[#allocation77_spill] sm:$0xff] }
  0xe6   :  { %v13178_v41 = vpack.c.bf16 %v19507_v63, %v19505_v53  ;;  %v19516_v45 = vand.u32 4294901760, %v19451_v21  ;;  %v19517_v50 = vand.u32 4294901760, %v19452_v44  ;;  %v19518_v58 = vand.u32 4294901760, %v19453_v10  ;;  %9925 = vmatprep.subr.bf16.mxu1 %v9924_v30 }
  0xe7   :  { %v13184_v12 = vpack.c.bf16 %v19511_v31, %v19509_v7  ;;  %v13190_v36 = vpack.c.bf16 %v19515_v35, %v19513_v14  ;;  %v19519_v28 = vand.u32 4294901760, %v19454_v19  ;;  %v19521_v37 = vand.u32 4294901760, %v19455_v24 }
  0xe8   :  { %v13196_v54 = vpack.c.bf16 %v19517_v50, %v19516_v45  ;;  %v19523_v2 = vand.u32 4294901760, %v19522_v32  ;;  %v19526_v51 = vand.u32 4294901760, %v19525_v49  ;;  %v19527_v53 = vand.u32 4294901760, %v12715_v1  ;;  %v19535_v50 = vld [vmem:[#allocation82_spill] sm:$0xff]  ;;  %9735 = vmatpush1.bf16.msra.mxu0 %v9734_v57 }
  0xe9   :  { %v13202_v60 = vpack.c.bf16 %v19519_v28, %v19518_v58  ;;  %v19529_v7 = vand.u32 4294901760, %v12719_v29  ;;  %v19530_v31 = vand.u32 4294901760, %v12721_v39  ;;  %v19532_v30 = vand.u32 4294901760, %v12725_v55  ;;  %v19537_v28 = vld [vmem:[#allocation83_spill] sm:$0xff]  ;;  %9927 = vmatpush1.bf16.msra.mxu1 %v9926_v5  ;;  %9737 = vmatprep.subr.bf16.mxu0 %v9736_v40 }
  0xea   :  { %v13208_v22 = vpack.c.bf16 %v19523_v2, %v19521_v37  ;;  %v13214_v63 = vpack.c.bf16 %v19527_v53, %v19526_v51  ;;  %v19533_v35 = vand.u32 4294901760, %v12727_v3  ;;  %v19536_v58 = vand.u32 4294901760, %v19535_v50  ;;  %9929 = vmatprep.subr.bf16.mxu1 %v9928_v13 }
  0xeb   :  { %19520 = vst [vmem:[#allocation72_spill] sm:$0xff] %v13202_v60  ;;  %v13220_v14 = vpack.c.bf16 %v19530_v31, %v19529_v7  ;;  %v19538_v37 = vand.u32 4294901760, %v19537_v28  ;;  %v19539_v51 = vand.u32 4294901760, %v12739_v11  ;;  %v19540_v53 = vand.u32 4294901760, %v12745_v56  ;;  %v19542_v31 = vld [vmem:[#allocation86_spill] sm:$0xff] }
  0xec   :  { %19524 = vst [vmem:[#allocation73_spill] sm:$0xff] %v13208_v22  ;;  %19528 = vst [vmem:[#allocation75_spill] sm:$0xff] %v13214_v63  ;;  %v13226_v45 = vpack.c.bf16 %v19533_v35, %v19532_v30  ;;  %v19541_v7 = vand.u32 4294901760, %v12749_v0  ;;  %v19544_v30 = vld [vmem:[#allocation88_spill] sm:$0xff]  ;;  %v9934_v5 = vpack.c.bf16 %v19454_v19, %v19453_v10  ;;  %v9744_v40 = vpack.c.bf16 %v19522_v32, %v19455_v24  ;;  %v19551_v19 = vld [vmem:[#allocation29_spill] sm:$0xff] }
  0xed   :  { %19531 = vst [vmem:[#allocation46_spill] sm:$0xff] %v13220_v14  ;;  %v13232_v2 = vpack.c.bf16 %v19538_v37, %v19536_v58  ;;  %v13238_v59 = vpack.c.bf16 %v19540_v53, %v19539_v51  ;;  %v19543_v14 = vand.u32 4294901760, %v19542_v31  ;;  %v19545_v35 = vand.u32 4294901760, %v19544_v30  ;;  %v19555_v24 = vld [vmem:[#allocation69_spill] sm:$0xff]  ;;  %v2035_v32 = vld [vmem:[#allocation10 + $0x20] sm:$0xff] }
  0xee   :  { %19534 = vst [vmem:[#allocation48_spill] sm:$0xff] %v13226_v45  ;;  %v19546_v45 = vld [vmem:[#allocation89_spill] sm:$0xff]  ;;  %v9738_v58 = vpack.c.bf16 %v19502_v38, %v19500_v47  ;;  %v9930_v37 = vpack.c.bf16 %v19506_v46, %v19504_v18  ;;  %v9740_v51 = vpack.c.bf16 %v19510_v8, %v19508_v6  ;;  %v9936_v57 = vpack.c.bf16 %v12715_v1, %v19525_v49  ;;  %v2032_v47 = vld [vmem:[#allocation10 + $0x8] sm:$0xff]  ;;  %v2034_v46 = vld [vmem:[#allocation10 + $0x18] sm:$0xff] }
  0xef   :  { %v13244_v63 = vpack.c.bf16 %v19543_v14, %v19541_v7  ;;  %v19547_v22 = vand.u32 4294901760, %v19546_v45  ;;  %v9932_v14 = vpack.c.bf16 %v19514_v15, %v19512_v52  ;;  %v9746_v13 = vpack.c.bf16 %v12721_v39, %v12719_v29  ;;  %v19550_v29 = vld [vmem:[#allocation91_spill] sm:$0xff]  ;;  %v2036_v38 = vld [vmem:[#allocation10 + $0x28] sm:$0xff]  ;;  %v19556_v18 = vld [vmem:[#allocation37_spill] sm:$0xff] }
  0xf0   :  { %9739 = vmatpush1.bf16.msra.mxu0 %v9738_v58  ;;  %9931 = vmatpush1.bf16.msra.mxu1 %v9930_v37  ;;  %v9940_v10 = vpack.c.bf16 %v12745_v56, %v12739_v11  ;;  %v9750_v1 = vpack.c.bf16 %v19542_v31, %v12749_v0  ;;  %v9942_v39 = vpack.c.bf16 %v19546_v45, %v19544_v30  ;;  %v19552_v11 = vld [vmem:[#allocation32_spill] sm:$0xff]  ;;  %v19553_v56 = vld [vmem:[#allocation35_spill] sm:$0xff]  ;;  %v2038_v6 = vld [vmem:[#allocation10 + $0x38] sm:$0xff]  ;;  %v2309_v45 = vand.u32 4294901760, %v2032_v47 }
  0xf1   :  { %v13250_v60 = vpack.c.bf16 %v19547_v22, %v19545_v35  ;;  %v9742_v22 = vpack.c.bf16 %v19452_v44, %v19451_v21  ;;  %9741 = vmatprep.subr.bf16.mxu0 %v9740_v51  ;;  %9933 = vmatprep.subr.bf16.mxu1 %v9932_v14  ;;  %v9938_v21 = vpack.c.bf16 %v12727_v3, %v12725_v55  ;;  %v19548_v55 = vld [vmem:[#allocation23_spill] sm:$0xff]  ;;  %v19554_v0 = vld [vmem:[#allocation36_spill] sm:$0xff]  ;;  %v19557_v52 = vld [vmem:[#allocation38_spill] sm:$0xff]  ;;  %v5001_v31 = vand.u32 4294901760, %v2034_v46 }
  0xf2   :  { %v9748_v44 = vpack.c.bf16 %v19537_v28, %v19535_v50  ;;  %v19549_v3 = vld [vmem:[#allocation27_spill] sm:$0xff]  ;;  %v19559_v49 = vld [vmem:[#allocation40_spill] sm:$0xff]  ;;  %v2313_v50 = vand.u32 4294901760, %v2036_v38  ;;  %v2033_v28 = vld [vmem:[#allocation10 + $0x10] sm:$0xff]  ;;  %v5005_v30 = vand.u32 4294901760, %v2038_v6 }
  0xf3   :  { %v2031_v8 = vld [vmem:[#allocation10] sm:$0xff]  ;;  %v2037_v53 = vld [vmem:[#allocation10 + $0x30] sm:$0xff]  ;;  %v2040_v7 = vld [vmem:[#allocation10 + $0x48] sm:$0xff] }
  0xf4   :  { %9743 = vmatpush1.bf16.msra.mxu0 %v9742_v22  ;;  %9935 = vmatpush1.bf16.msra.mxu1 %v9934_v5  ;;  %v19558_v15 = vld [vmem:[#allocation39_spill] sm:$0xff]  ;;  %v2311_v35 = vand.u32 4294901760, %v2031_v8  ;;  %v2044_v58 = vld [vmem:[#allocation10 + $0x68] sm:$0xff]  ;;  %v2042_v37 = vld [vmem:[#allocation10 + $0x58] sm:$0xff] }
  0xf5   :  { %9745 = vmatprep.subr.bf16.mxu0 %v9744_v40  ;;  %9937 = vmatprep.subr.bf16.mxu1 %v9936_v57  ;;  %v19560_v51 = vld [vmem:[#allocation41_spill] sm:$0xff]  ;;  %v19561_v14 = vld [vmem:[#allocation24_spill] sm:$0xff] }
  0xf6   :  { %v19562_v22 = vand.u32 4294901760, %v19561_v14  ;;  %v19563_v5 = vld [vmem:[#allocation25_spill] sm:$0xff]  ;;  %v19574_v14 = vld [vmem:[#allocation43_spill] sm:$0xff] }
  0xf7   :  { %v19564_v40 = vand.u32 4294901760, %v19563_v5  ;;  %v19575_v5 = vld [vmem:[#allocation33_spill] sm:$0xff] }
  0xf8   :  { %9747 = vmatpush1.bf16.msra.mxu0 %v9746_v13  ;;  %9939 = vmatpush1.bf16.msra.mxu1 %v9938_v21  ;;  %v19565_v13 = vld [vmem:[#allocation26_spill] sm:$0xff] }
  0xf9   :  { %9749 = vmatprep.subr.bf16.mxu0 %v9748_v44  ;;  %9941 = vmatprep.subr.bf16.mxu1 %v9940_v10  ;;  %v13303_v57 = vpack.c.bf16 %v19564_v40, %v19562_v22  ;;  %v19566_v21 = vand.u32 4294901760, %v19565_v13  ;;  %v19567_v44 = vld [vmem:[#allocation28_spill] sm:$0xff]  ;;  %v19576_v22 = vand.u32 4294901760, %v19575_v5  ;;  %v19577_v40 = vld [vmem:[#allocation34_spill] sm:$0xff]  ;;  %v13332_v5 = vpack.c.bf16 %v5005_v30, %v5001_v31 }
  0xfa   :  { %v19568_v10 = vand.u32 4294901760, %v19567_v44  ;;  %v5003_v44 = vand.u32 4294901760, %v2033_v28 }
  0xfb   :  { %19583 = vst [vmem:[#allocation53_spill] sm:$0xff] %v13332_v5  ;;  %v19591_v5 = vld [vmem:[#allocation50_spill] sm:$0xff] }
  0xfc   :  { %9751 = vmatpush1.bf16.msra.mxu0 %v9750_v1  ;;  %9943 = vmatpush1.bf16.msra.mxu1 %v9942_v39  ;;  %v13309_v1 = vpack.c.bf16 %v19568_v10, %v19566_v21  ;;  %v19569_v39 = vld [vmem:[#allocation30_spill] sm:$0xff]  ;;  %v5007_v21 = vand.u32 4294901760, %v2037_v53  ;;  %v2317_v10 = vand.u32 4294901760, %v2040_v7 }
  0xfd   :  { %9753 = vmatprep.subr.bf16.mxu0 %v19548_v55  ;;  %9945 = vmatprep.subr.bf16.mxu1 %v19549_v3  ;;  %v19586_v3 = vld [vmem:[#allocation45_spill] sm:$0xff] }
  0xff   :  { %696 = vmatmul.mubr.f32.vlgmr.msra.gmra.mrb[0].mxu0 %v19550_v29  ;;  %1600 = vmatmul.mubr.f32.vlgmr.msra.gmra.mrb[0].mxu1 %v19550_v29  ;;  %v19570_v29 = vand.u32 4294901760, %v19569_v39  ;;  %v19579_v39 = vld [vmem:[#allocation44_spill] sm:$0xff] }
 0x100   :  { %9755 = vmatpush1.bf16.msra.mxu0 %v19551_v19  ;;  %9947 = vmatpush1.bf16.msra.mxu1 %v19552_v11  ;;  %v13330_v11 = vsub.f32 %v2036_v38, %v2313_v50  ;;  %v2045_v19 = vld [vmem:[#allocation10 + $0x70] sm:$0xff]  ;;  %v2052_v38 = vld [vmem:[#allocation10 + $0xa8] sm:$0xff] }
 0x101   :  { %9757 = vmatprep.subr.bf16.mxu0 %v19553_v56  ;;  %9949 = vmatprep.subr.bf16.mxu1 %v19554_v0  ;;  %v2046_v0 = vld [vmem:[#allocation10 + $0x78] sm:$0xff]  ;;  %v2039_v56 = vld [vmem:[#allocation10 + $0x40] sm:$0xff] }
 0x102   :  { %701 = vmatprep.mubr.f32.mxu0 %v19441_v20  ;;  %1605 = vmatprep.mubr.f32.mxu1 %v19441_v20  ;;  %19582 = vst [vmem:[#allocation52_spill] sm:$0xff] %v13330_v11 }
 0x103   :  { %704 = vmatmul.mubr.f32.gmra.mrb[2].mxu0 %v19555_v24  ;;  %1608 = vmatmul.mubr.f32.gmra.mrb[2].mxu1 %v19555_v24  ;;  %v19571_v24 = vld [vmem:[#allocation31_spill] sm:$0xff] }
 0x104   :  { %9759 = vmatpush1.bf16.msra.mxu0 %v19556_v18  ;;  %9951 = vmatpush1.bf16.msra.mxu1 %v19557_v52  ;;  %v2315_v52 = vand.u32 4294901760, %v2035_v32  ;;  %v19578_v18 = vand.u32 4294901760, %v19577_v40  ;;  %v2041_v40 = vld [vmem:[#allocation10 + $0x50] sm:$0xff] }
 0x105   :  { %9761 = vmatprep.subr.bf16.mxu0 %v19558_v15  ;;  %9953 = vmatprep.subr.bf16.mxu1 %v19559_v49  ;;  %v19572_v49 = vand.u32 4294901760, %v19571_v24  ;;  %v13326_v24 = vpack.c.bf16 %v2313_v50, %v2309_v45  ;;  %v19590_v50 = vld [vmem:[#allocation47_spill] sm:$0xff] }
 0x106   :  { %806 = vmatprep.mubr.f32.mxu0 %v19441_v20  ;;  %1710 = vmatprep.mubr.f32.mxu1 %v19441_v20  ;;  %v13323_v13 = vpack.c.bf16 %v19578_v18, %v19576_v22  ;;  %v13334_v18 = vsub.f32 %v2034_v46, %v5001_v31  ;;  %v13336_v22 = vsub.f32 %v2038_v6, %v5005_v30  ;;  %v2319_v31 = vand.u32 4294901760, %v2039_v56 }
 0x107   :  { %v13315_v15 = vpack.c.bf16 %v19572_v49, %v19570_v29  ;;  %19580 = vst [vmem:[#allocation49_spill] sm:$0xff] %v13326_v24  ;;  %v13328_v49 = vsub.f32 %v2032_v47, %v2309_v45  ;;  %v2321_v29 = vand.u32 4294901760, %v2044_v58  ;;  %v13341_v47 = vsub.f32 %v2031_v8, %v2311_v35 }
 0x108   :  { %9763 = vmatpush1.bf16.msra.mxu0 %v19560_v51  ;;  %v19573_v51 = vld [vmem:[#allocation42_spill] sm:$0xff]  ;;  %19584 = vst [vmem:[#allocation57_spill] sm:$0xff] %v13334_v18  ;;  %19585 = vst [vmem:[#allocation58_spill] sm:$0xff] %v13336_v22  ;;  %v13343_v45 = vsub.f32 %v2035_v32, %v2315_v52  ;;  %v5013_v24 = vand.u32 4294901760, %v2046_v0  ;;  %v13347_v46 = vpack.c.bf16 %v5007_v21, %v5003_v44  ;;  %v5015_v32 = vand.u32 4294901760, %v2045_v19 }
 0x109   :  { %9955 = vmatpush1.bf16.msra.mxu1 %v19573_v51  ;;  %9765 = vmatprep.subr.bf16.mxu0 %v19574_v14  ;;  %19581 = vst [vmem:[#allocation51_spill] sm:$0xff] %v13328_v49  ;;  %v5009_v51 = vand.u32 4294901760, %v2042_v37  ;;  %v2043_v14 = vld [vmem:[#allocation10 + $0x60] sm:$0xff]  ;;  %19588 = vst [vmem:[#allocation61_spill] sm:$0xff] %v13341_v47  ;;  %v2048_v49 = vld [vmem:[#allocation10 + $0x88] sm:$0xff]  ;;  %v13349_v6 = vsub.f32 %v2033_v28, %v5003_v44  ;;  %v13354_v8 = vpack.c.bf16 %v2321_v29, %v2317_v10 }
 0x10a   :  { %9957 = vmatprep.subr.bf16.mxu1 %v19579_v39  ;;  %v13339_v39 = vpack.c.bf16 %v2315_v52, %v2311_v35  ;;  %19589 = vst [vmem:[#allocation63_spill] sm:$0xff] %v13343_v45  ;;  %19592 = vst [vmem:[#allocation64_spill] sm:$0xff] %v13347_v46  ;;  %v2323_v30 = vand.u32 4294901760, %v2043_v14  ;;  %v19594_v22 = vld [vmem:[#allocation54_spill] sm:$0xff]  ;;  %v5011_v52 = vand.u32 4294901760, %v2041_v40  ;;  %v13356_v47 = vsub.f32 %v2040_v7, %v2317_v10  ;;  %v2047_v28 = vld [vmem:[#allocation10 + $0x80] sm:$0xff] }
 0x10b   :  { %19593 = vst [vmem:[#allocation65_spill] sm:$0xff] %v13349_v6  ;;  %19596 = vst [vmem:[#allocation76_spill] sm:$0xff] %v13354_v8  ;;  %v2050_v35 = vld [vmem:[#allocation10 + $0x98] sm:$0xff]  ;;  %v13358_v18 = vsub.f32 %v2044_v58, %v2321_v29  ;;  %v2325_v11 = vand.u32 4294901760, %v2048_v49  ;;  %v2329_v46 = vand.u32 4294901760, %v2052_v38  ;;  %v2051_v44 = vld [vmem:[#allocation10 + $0xa0] sm:$0xff]  ;;  %v13367_v8 = vsub.f32 %v2039_v56, %v2319_v31 }
 0x10c   :  { %9767 = vmatpush1.bf16.msra.mxu0 %v19586_v3  ;;  %19587 = vst [vmem:[#allocation60_spill] sm:$0xff] %v13339_v39  ;;  %v13352_v39 = vsub.f32 %v2037_v53, %v5007_v21  ;;  %v2054_v45 = vld [vmem:[#allocation10 + $0xb8] sm:$0xff]  ;;  %19597 = vst [vmem:[#allocation77_spill] sm:$0xff] %v13356_v47  ;;  %v19599_v6 = vld [vmem:[#allocation56_spill] sm:$0xff]  ;;  %v13363_v53 = vsub.f32 %v2042_v37, %v5009_v51  ;;  %v13365_v21 = vsub.f32 %v2046_v0, %v5013_v24 }
 0x10d   :  { %9959 = vmatpush1.bf16.msra.mxu1 %v19590_v50  ;;  %9769 = vmatprep.subr.bf16.mxu0 %v19591_v5  ;;  %19598 = vst [vmem:[#allocation82_spill] sm:$0xff] %v13358_v18  ;;  %v13361_v5 = vpack.c.bf16 %v5013_v24, %v5009_v51  ;;  %19603 = vst [vmem:[#allocation89_spill] sm:$0xff] %v13367_v8  ;;  %v19604_v7 = vld [vmem:[#allocation59_spill] sm:$0xff]  ;;  %v19605_v58 = vld [vmem:[#allocation62_spill] sm:$0xff]  ;;  %v13371_v10 = vpack.c.bf16 %v2323_v30, %v2319_v31  ;;  %v5017_v18 = vand.u32 4294901760, %v2050_v35 }
 0x10e   :  { %9961 = vmatprep.subr.bf16.mxu1 %v19594_v22  ;;  %19595 = vst [vmem:[#allocation67_spill] sm:$0xff] %v13352_v39  ;;  %19601 = vst [vmem:[#allocation86_spill] sm:$0xff] %v13363_v53  ;;  %v2049_v39 = vld [vmem:[#allocation10 + $0x90] sm:$0xff]  ;;  %v13373_v29 = vsub.f32 %v2043_v14, %v2323_v30  ;;  %v5021_v47 = vand.u32 4294901760, %v2054_v45  ;;  %v19608_v37 = vld [vmem:[#allocation66_spill] sm:$0xff]  ;;  %v13376_v0 = vpack.c.bf16 %v5015_v32, %v5011_v52  ;;  %v2327_v51 = vand.u32 4294901760, %v2047_v28 }
 0x10f   :  { %19600 = vst [vmem:[#allocation83_spill] sm:$0xff] %v13361_v5  ;;  %19602 = vst [vmem:[#allocation88_spill] sm:$0xff] %v13365_v21  ;;  %v2053_v22 = vld [vmem:[#allocation10 + $0xb0] sm:$0xff]  ;;  %v2060_v5 = vld [vmem:[#allocation10 + $0xe8] sm:$0xff]  ;;  %v13378_v56 = vsub.f32 %v2041_v40, %v5011_v52  ;;  %v2331_v24 = vand.u32 4294901760, %v2051_v44  ;;  %v13380_v53 = vsub.f32 %v2045_v19, %v5015_v32  ;;  %v13382_v31 = vpack.c.bf16 %v2329_v46, %v2325_v11 }
 0x110   :  { %9771 = vmatpush1.bf16.msra.mxu0 %v19599_v6  ;;  %19606 = vst [vmem:[#allocation23_spill] sm:$0xff] %v13371_v10  ;;  %19607 = vst [vmem:[#allocation91_spill] sm:$0xff] %v13373_v29  ;;  %v2056_v6 = vld [vmem:[#allocation10 + $0xc8] sm:$0xff]  ;;  %v2058_v8 = vld [vmem:[#allocation10 + $0xd8] sm:$0xff]  ;;  %v5019_v14 = vand.u32 4294901760, %v2049_v39  ;;  %v5023_v30 = vand.u32 4294901760, %v2053_v22  ;;  %v13385_v10 = vsub.f32 %v2048_v49, %v2325_v11  ;;  %v13391_v19 = vpack.c.bf16 %v5021_v47, %v5017_v18 }
 0x111   :  { %9963 = vmatpush1.bf16.msra.mxu1 %v19604_v7  ;;  %9773 = vmatprep.subr.bf16.mxu0 %v19605_v58  ;;  %19609 = vst [vmem:[#allocation69_spill] sm:$0xff] %v13376_v0  ;;  %19610 = vst [vmem:[#allocation24_spill] sm:$0xff] %v13378_v56  ;;  %v2062_v21 = vld [vmem:[#allocation10 + $0xf8] sm:$0xff]  ;;  %v19613_v29 = vld [vmem:[#allocation68_spill] sm:$0xff]  ;;  %v13387_v58 = vsub.f32 %v2052_v38, %v2329_v46  ;;  %v2337_v0 = vand.u32 4294901760, %v2060_v5  ;;  %v13393_v32 = vsub.f32 %v2050_v35, %v5017_v18 }
 0x112   :  { %9965 = vmatprep.subr.bf16.mxu1 %v19608_v37  ;;  %19611 = vst [vmem:[#allocation25_spill] sm:$0xff] %v13380_v53  ;;  %19612 = vst [vmem:[#allocation26_spill] sm:$0xff] %v13382_v31  ;;  %v2333_v37 = vand.u32 4294901760, %v2056_v6  ;;  %v2055_v40 = vld [vmem:[#allocation10 + $0xc0] sm:$0xff]  ;;  %v19617_v7 = vld [vmem:[#allocation74_spill] sm:$0xff]  ;;  %v5025_v53 = vand.u32 4294901760, %v2058_v8  ;;  %v13396_v49 = vsub.f32 %v2054_v45, %v5021_v47  ;;  %v13398_v38 = vpack.c.bf16 %v2331_v24, %v2327_v51 }
 0x113   :  { %19614 = vst [vmem:[#allocation28_spill] sm:$0xff] %v13385_v10  ;;  %19615 = vst [vmem:[#allocation30_spill] sm:$0xff] %v13387_v58  ;;  %v2059_v52 = vld [vmem:[#allocation10 + $0xe0] sm:$0xff]  ;;  %v5029_v31 = vand.u32 4294901760, %v2062_v21  ;;  %v2057_v50 = vld [vmem:[#allocation10 + $0xd0] sm:$0xff]  ;;  %v13400_v46 = vsub.f32 %v2047_v28, %v2327_v51  ;;  %v13402_v58 = vsub.f32 %v2051_v44, %v2331_v24  ;;  %v13404_v10 = vpack.c.bf16 %v5023_v30, %v5019_v14 }
 0x114   :  { %9775 = vmatpush1.bf16.msra.mxu0 %v19613_v29  ;;  %v19616_v56 = vld [vmem:[#allocation71_spill] sm:$0xff]  ;;  %19618 = vst [vmem:[#allocation31_spill] sm:$0xff] %v13391_v19  ;;  %19619 = vst [vmem:[#allocation33_spill] sm:$0xff] %v13393_v32  ;;  %v2061_v29 = vld [vmem:[#allocation10 + $0xf0] sm:$0xff]  ;;  %v2335_v18 = vand.u32 4294901760, %v2055_v40  ;;  %v2339_v35 = vand.u32 4294901760, %v2059_v52  ;;  %v13409_v3 = vsub.f32 %v2053_v22, %v5023_v30  ;;  %v13411_v47 = vpack.c.bf16 %v2337_v0, %v2333_v37 }
 0x115   :  { %9967 = vmatpush1.bf16.msra.mxu1 %v19616_v56  ;;  %9777 = vmatprep.subr.bf16.mxu0 %v19617_v7  ;;  %v19620_v11 = vld [vmem:[#allocation78_spill] sm:$0xff]  ;;  %19621 = vst [vmem:[#allocation34_spill] sm:$0xff] %v13396_v49  ;;  %19623 = vst [vmem:[#allocation93_spill] sm:$0xff] %v13400_v46  ;;  %v13406_v7 = vsub.f32 %v2049_v39, %v5019_v14  ;;  %v2064_v32 = vld [vmem:[#allocation10 + $0x108] sm:$0xff]  ;;  %v5027_v45 = vand.u32 4294901760, %v2057_v50  ;;  %v13415_v39 = vsub.f32 %v2056_v6, %v2333_v37 }
 0x116   :  { %9969 = vmatprep.subr.bf16.mxu1 %v19620_v11  ;;  %19622 = vst [vmem:[#allocation78_spill] sm:$0xff] %v13398_v38  ;;  %19624 = vst [vmem:[#allocation94_spill] sm:$0xff] %v13402_v58  ;;  %v2068_v19 = vld [vmem:[#allocation10 + $0x128] sm:$0xff]  ;;  %v19627_v56 = vld [vmem:[#allocation79_spill] sm:$0xff]  ;;  %v5031_v38 = vand.u32 4294901760, %v2061_v29  ;;  %v13417_v14 = vsub.f32 %v2060_v5, %v2337_v0  ;;  %v13422_v30 = vsub.f32 %v2058_v8, %v5025_v53 }
 0x117   :  { %19625 = vst [vmem:[#allocation95_spill] sm:$0xff] %v13404_v10  ;;  %19626 = vst [vmem:[#allocation96_spill] sm:$0xff] %v13406_v7  ;;  %v2066_v28 = vld [vmem:[#allocation10 + $0x118] sm:$0xff]  ;;  %v19630_v44 = vld [vmem:[#allocation80_spill] sm:$0xff]  ;;  %v13419_v10 = vpack.c.bf16 %v5029_v31, %v5025_v53  ;;  %v2345_v46 = vand.u32 4294901760, %v2068_v19  ;;  %v13428_v6 = vsub.f32 %v2055_v40, %v2335_v18 }
 0x118   :  { %9779 = vmatpush1.bf16.msra.mxu0 %v19627_v56  ;;  %19628 = vst [vmem:[#allocation97_spill] sm:$0xff] %v13409_v3  ;;  %19629 = vst [vmem:[#allocation98_spill] sm:$0xff] %v13411_v47  ;;  %v2070_v51 = vld [vmem:[#allocation10 + $0x138] sm:$0xff]  ;;  %v19631_v24 = vld [vmem:[#allocation81_spill] sm:$0xff]  ;;  %v13424_v47 = vsub.f32 %v2062_v21, %v5029_v31  ;;  %v2341_v3 = vand.u32 4294901760, %v2064_v32  ;;  %v13426_v56 = vpack.c.bf16 %v2339_v35, %v2335_v18  ;;  %v5033_v5 = vand.u32 4294901760, %v2066_v28 }
 0x119   :  { %9971 = vmatpush1.bf16.msra.mxu1 %v19630_v44  ;;  %9781 = vmatprep.subr.bf16.mxu0 %v19631_v24  ;;  %19632 = vst [vmem:[#allocation81_spill] sm:$0xff] %v13415_v39  ;;  %19633 = vst [vmem:[#allocation99_spill] sm:$0xff] %v13417_v14  ;;  %v2063_v7 = vld [vmem:[#allocation10 + $0x100] sm:$0xff]  ;;  %v19635_v22 = vld [vmem:[#allocation84_spill] sm:$0xff]  ;;  %v5037_v37 = vand.u32 4294901760, %v2070_v51  ;;  %v13433_v8 = vpack.c.bf16 %v5031_v38, %v5027_v45  ;;  %v13439_v40 = vsub.f32 %v2061_v29, %v5031_v38 }
 0x11a   :  { %19634 = vst [vmem:[#allocation100_spill] sm:$0xff] %v13419_v10  ;;  %v2067_v58 = vld [vmem:[#allocation10 + $0x120] sm:$0xff]  ;;  %9973 = vmatprep.subr.bf16.mxu1 %v19635_v22  ;;  %19636 = vst [vmem:[#allocation101_spill] sm:$0xff] %v13422_v30  ;;  %v2065_v49 = vld [vmem:[#allocation10 + $0x110] sm:$0xff]  ;;  %v13431_v10 = vsub.f32 %v2059_v52, %v2339_v35  ;;  %v2343_v53 = vand.u32 4294901760, %v2063_v7  ;;  %v13442_v52 = vpack.c.bf16 %v2345_v46, %v2341_v3 }
 0x11b   :  { %19637 = vst [vmem:[#allocation102_spill] sm:$0xff] %v13424_v47  ;;  %v2069_v44 = vld [vmem:[#allocation10 + $0x130] sm:$0xff]  ;;  %19638 = vst [vmem:[#allocation103_spill] sm:$0xff] %v13426_v56  ;;  %v2072_v0 = vld [vmem:[#allocation10 + $0x148] sm:$0xff]  ;;  %v2347_v21 = vand.u32 4294901760, %v2067_v58  ;;  %v13437_v47 = vsub.f32 %v2057_v50, %v5027_v45  ;;  %v5035_v18 = vand.u32 4294901760, %v2065_v49  ;;  %v13444_v35 = vsub.f32 %v2064_v32, %v2341_v3 }
 0x11c   :  { %19639 = vst [vmem:[#allocation104_spill] sm:$0xff] %v13428_v6  ;;  %v2076_v14 = vld [vmem:[#allocation10 + $0x168] sm:$0xff]  ;;  %v19640_v39 = vld [vmem:[#allocation85_spill] sm:$0xff]  ;;  %19641 = vst [vmem:[#allocation105_spill] sm:$0xff] %v13431_v10  ;;  %v5039_v6 = vand.u32 4294901760, %v2069_v44  ;;  %v2349_v10 = vand.u32 4294901760, %v2072_v0  ;;  %v13449_v50 = vpack.c.bf16 %v5037_v37, %v5033_v5  ;;  %v13451_v29 = vsub.f32 %v2066_v28, %v5033_v5 }
 0x11d   :  { %9783 = vmatpush1.bf16.msra.mxu0 %v19640_v39  ;;  %19642 = vst [vmem:[#allocation106_spill] sm:$0xff] %v13433_v8  ;;  %v19643_v31 = vld [vmem:[#allocation87_spill] sm:$0xff]  ;;  %19644 = vst [vmem:[#allocation107_spill] sm:$0xff] %v13437_v47  ;;  %v2074_v30 = vld [vmem:[#allocation10 + $0x158] sm:$0xff]  ;;  %v2353_v8 = vand.u32 4294901760, %v2076_v14  ;;  %v13453_v38 = vsub.f32 %v2070_v51, %v5037_v37  ;;  %v13457_v3 = vpack.c.bf16 %v2347_v21, %v2343_v53 }
 0x11e   :  { %9975 = vmatpush1.bf16.msra.mxu1 %v19643_v31  ;;  %9785 = vmatprep.subr.bf16.mxu0 %v13303_v57  ;;  %19645 = vst [vmem:[#allocation108_spill] sm:$0xff] %v13439_v40  ;;  %v2078_v56 = vld [vmem:[#allocation10 + $0x178] sm:$0xff]  ;;  %19646 = vst [vmem:[#allocation109_spill] sm:$0xff] %v13442_v52  ;;  %v2071_v39 = vld [vmem:[#allocation10 + $0x140] sm:$0xff]  ;;  %v13447_v57 = vsub.f32 %v2068_v19, %v2345_v46  ;;  %v5041_v32 = vand.u32 4294901760, %v2074_v30  ;;  %v13463_v19 = vsub.f32 %v2067_v58, %v2347_v21 }
 0x11f   :  { %9977 = vmatprep.subr.bf16.mxu1 %v13309_v1  ;;  %19647 = vst [vmem:[#allocation110_spill] sm:$0xff] %v13444_v35  ;;  %v2075_v31 = vld [vmem:[#allocation10 + $0x160] sm:$0xff]  ;;  %v19648_v22 = vld [vmem:[#allocation92_spill] sm:$0xff]  ;;  %19650 = vst [vmem:[#allocation111_spill] sm:$0xff] %v13449_v50  ;;  %v13459_v1 = vsub.f32 %v2063_v7, %v2343_v53  ;;  %v5045_v45 = vand.u32 4294901760, %v2078_v56  ;;  %v13465_v46 = vpack.c.bf16 %v5039_v6, %v5035_v18  ;;  %v2351_v28 = vand.u32 4294901760, %v2071_v39 }
 0x120   :  { %810 = vmatmul.mubr.f32.vlgmr.msra.gmra.mrb[0].mxu0 %v19648_v22  ;;  %19649 = vst [vmem:[#allocation92_spill] sm:$0xff] %v13447_v57  ;;  %19651 = vst [vmem:[#allocation112_spill] sm:$0xff] %v13451_v29  ;;  %v2073_v35 = vld [vmem:[#allocation10 + $0x150] sm:$0xff]  ;;  %v2080_v51 = vld [vmem:[#allocation10 + $0x188] sm:$0xff]  ;;  %v13469_v7 = vsub.f32 %v2065_v49, %v5035_v18  ;;  %v13471_v5 = vsub.f32 %v2069_v44, %v5039_v6  ;;  %v13473_v37 = vpack.c.bf16 %v2353_v8, %v2349_v10 }
 0x121   :  { %19652 = vst [vmem:[#allocation113_spill] sm:$0xff] %v13453_v38  ;;  %9787 = vmatpush1.bf16.msra.mxu0 %v13315_v15  ;;  %1714 = vmatmul.mubr.f32.vlgmr.msra.gmra.mrb[0].mxu1 %v19648_v22  ;;  %19653 = vst [vmem:[#allocation114_spill] sm:$0xff] %v13457_v3  ;;  %v2077_v40 = vld [vmem:[#allocation10 + $0x170] sm:$0xff]  ;;  %v2355_v15 = vand.u32 4294901760, %v2075_v31  ;;  %v2084_v22 = vld [vmem:[#allocation10 + $0x1a8] sm:$0xff]  ;;  %v13479_v58 = vsub.f32 %v2076_v14, %v2353_v8  ;;  %v5043_v53 = vand.u32 4294901760, %v2073_v35 }
 0x122   :  { %19654 = vst [vmem:[#allocation115_spill] sm:$0xff] %v13459_v1  ;;  %9979 = vmatpush1.bf16.msra.mxu1 %v13323_v13  ;;  %9789 = vmatprep.subr.bf16.mxu0 %v13086_v48  ;;  %19655 = vst [vmem:[#allocation116_spill] sm:$0xff] %v13463_v19  ;;  %v19660_v48 = vld [vmem:[#allocation70_spill] sm:$0xff]  ;;  %v13477_v13 = vsub.f32 %v2072_v0, %v2349_v10  ;;  %v5047_v21 = vand.u32 4294901760, %v2077_v40  ;;  %v13483_v49 = vpack.c.bf16 %v5045_v45, %v5041_v32  ;;  %v2085_v8 = vld [vmem:[#allocation10 + $0x1b0] sm:$0xff] }
 0x123   :  { %19656 = vst [vmem:[#allocation117_spill] sm:$0xff] %v13465_v46  ;;  %9981 = vmatprep.subr.bf16.mxu1 %v13092_v33  ;;  %815 = vmatprep.mubr.f32.mxu0 %v19441_v20  ;;  %19657 = vst [vmem:[#allocation118_spill] sm:$0xff] %v13469_v7  ;;  %v2082_v19 = vld [vmem:[#allocation10 + $0x198] sm:$0xff]  ;;  %v13485_v44 = vsub.f32 %v2074_v30, %v5041_v32  ;;  %v2357_v6 = vand.u32 4294901760, %v2080_v51  ;;  %v2361_v18 = vand.u32 4294901760, %v2084_v22  ;;  %v2083_v7 = vld [vmem:[#allocation10 + $0x1a0] sm:$0xff] }
 0x124   :  { %19658 = vst [vmem:[#allocation119_spill] sm:$0xff] %v13471_v5  ;;  %19659 = vst [vmem:[#allocation120_spill] sm:$0xff] %v13473_v37  ;;  %1719 = vmatprep.mubr.f32.mxu1 %v19441_v20  ;;  %819 = vmatmul.mubr.f32.gmra.mrb[2].mxu0 %v19660_v48  ;;  %v2086_v33 = vld [vmem:[#allocation10 + $0x1b8] sm:$0xff]  ;;  %v2079_v5 = vld [vmem:[#allocation10 + $0x180] sm:$0xff]  ;;  %v13489_v10 = vsub.f32 %v2078_v56, %v5045_v45  ;;  %v13491_v14 = vpack.c.bf16 %v2355_v15, %v2351_v28 }
 0x125   :  { %19661 = vst [vmem:[#allocation70_spill] sm:$0xff] %v13477_v13  ;;  %19662 = vst [vmem:[#allocation121_spill] sm:$0xff] %v13479_v58  ;;  %9791 = vmatpush1.bf16.msra.mxu0 %v13098_v27  ;;  %1723 = vmatmul.mubr.f32.gmra.mrb[2].mxu1 %v19660_v48  ;;  %v13493_v0 = vsub.f32 %v2071_v39, %v2351_v28  ;;  %v2081_v27 = vld [vmem:[#allocation10 + $0x190] sm:$0xff]  ;;  %v13497_v30 = vsub.f32 %v2075_v31, %v2355_v15  ;;  %v5049_v48 = vand.u32 4294901760, %v2082_v19 }
 0x126   :  { %19663 = vst [vmem:[#allocation122_spill] sm:$0xff] %v13483_v49  ;;  %19664 = vst [vmem:[#allocation123_spill] sm:$0xff] %v13485_v44  ;;  %9983 = vmatpush1.bf16.msra.mxu1 %v13104_v26  ;;  %9793 = vmatprep.subr.bf16.mxu0 %v13110_v17  ;;  %v13499_v32 = vsub.f32 %v2073_v35, %v5043_v53  ;;  %v5053_v26 = vand.u32 4294901760, %v2086_v33  ;;  %v2088_v44 = vld [vmem:[#allocation10 + $0x1c8] sm:$0xff]  ;;  %v13502_v56 = vpack.c.bf16 %v5047_v21, %v5043_v53  ;;  %v2089_v58 = vld [vmem:[#allocation10 + $0x1d0] sm:$0xff] }
 0x127   :  { %19665 = vst [vmem:[#allocation124_spill] sm:$0xff] %v13489_v10  ;;  %19666 = vst [vmem:[#allocation125_spill] sm:$0xff] %v13491_v14  ;;  %9985 = vmatprep.subr.bf16.mxu1 %v13116_v62  ;;  %985 = vmatprep.mubr.f32.mxu0 %v19441_v20  ;;  %v2092_v17 = vld [vmem:[#allocation10 + $0x1e8] sm:$0xff]  ;;  %v13504_v39 = vsub.f32 %v2077_v40, %v5047_v21  ;;  %v2359_v45 = vand.u32 4294901760, %v2079_v5  ;;  %v2363_v28 = vand.u32 4294901760, %v2083_v7  ;;  %v2094_v62 = vld [vmem:[#allocation10 + $0x1f8] sm:$0xff] }
 0x128   :  { %19667 = vst [vmem:[#allocation126_spill] sm:$0xff] %v13493_v0  ;;  %19668 = vst [vmem:[#allocation127_spill] sm:$0xff] %v13497_v30  ;;  %1889 = vmatprep.mubr.f32.mxu1 %v19441_v20  ;;  %v2090_v0 = vld [vmem:[#allocation10 + $0x1d8] sm:$0xff]  ;;  %v13507_v31 = vpack.c.bf16 %v2361_v18, %v2357_v6  ;;  %v13509_v35 = vsub.f32 %v2080_v51, %v2357_v6  ;;  %v5051_v15 = vand.u32 4294901760, %v2081_v27  ;;  %v2087_v30 = vld [vmem:[#allocation10 + $0x1c0] sm:$0xff]  ;;  %v2365_v21 = vand.u32 4294901760, %v2088_v44 }
 0x129   :  { %19669 = vst [vmem:[#allocation128_spill] sm:$0xff] %v13499_v32  ;;  %19670 = vst [vmem:[#allocation129_spill] sm:$0xff] %v13502_v56  ;;  %9795 = vmatpush1.bf16.msra.mxu0 %v13123_v25  ;;  %v5055_v32 = vand.u32 4294901760, %v2085_v8  ;;  %v2091_v10 = vld [vmem:[#allocation10 + $0x1e0] sm:$0xff]  ;;  %v13513_v40 = vsub.f32 %v2084_v22, %v2361_v18  ;;  %v13515_v53 = vsub.f32 %v2082_v19, %v5049_v48  ;;  %v5057_v6 = vand.u32 4294901760, %v2090_v0  ;;  %v2093_v13 = vld [vmem:[#allocation10 + $0x1f0] sm:$0xff] }
 0x12a   :  { %19671 = vst [vmem:[#allocation130_spill] sm:$0xff] %v13504_v39  ;;  %19672 = vst [vmem:[#allocation131_spill] sm:$0xff] %v13507_v31  ;;  %9987 = vmatpush1.bf16.msra.mxu1 %v13129_v4  ;;  %9797 = vmatprep.subr.bf16.mxu0 %v13135_v34  ;;  %v2369_v39 = vand.u32 4294901760, %v2092_v17  ;;  %v13518_v25 = vpack.c.bf16 %v5053_v26, %v5049_v48  ;;  %v13520_v51 = vsub.f32 %v2086_v33, %v5053_v26  ;;  %v2096_v19 = vld [vmem:[#allocation10 + $0x208] sm:$0xff] }
 0x12b   :  { %19673 = vst [vmem:[#allocation132_spill] sm:$0xff] %v13509_v35  ;;  %19674 = vst [vmem:[#allocation133_spill] sm:$0xff] %v13513_v40  ;;  %9989 = vmatprep.subr.bf16.mxu1 %v13142_v43  ;;  %v5061_v35 = vand.u32 4294901760, %v2094_v62  ;;  %v13522_v1 = vpack.c.bf16 %v2363_v28, %v2359_v45  ;;  %v13524_v4 = vsub.f32 %v2079_v5, %v2359_v45  ;;  %v2367_v34 = vand.u32 4294901760, %v2087_v30  ;;  %v2100_v18 = vld [vmem:[#allocation10 + $0x228] sm:$0xff]  ;;  %v2106_v40 = vld [vmem:[#allocation10 + $0x258] sm:$0xff] }
 0x12c   :  { %19675 = vst [vmem:[#allocation134_spill] sm:$0xff] %v13515_v53  ;;  %19676 = vst [vmem:[#allocation135_spill] sm:$0xff] %v13518_v25  ;;  %v2371_v22 = vand.u32 4294901760, %v2091_v10  ;;  %v13527_v53 = vsub.f32 %v2083_v7, %v2363_v28  ;;  %v13529_v43 = vpack.c.bf16 %v5055_v32, %v5051_v15  ;;  %v13531_v33 = vsub.f32 %v2081_v27, %v5051_v15  ;;  %v2095_v7 = vld [vmem:[#allocation10 + $0x200] sm:$0xff] }
 0x12d   :  { %19677 = vst [vmem:[#allocation136_spill] sm:$0xff] %v13520_v51  ;;  %19678 = vst [vmem:[#allocation137_spill] sm:$0xff] %v13522_v1  ;;  %9799 = vmatpush1.bf16.msra.mxu0 %v13148_v9  ;;  %v13533_v48 = vsub.f32 %v2085_v8, %v5055_v32  ;;  %v13537_v5 = vpack.c.bf16 %v2369_v39, %v2365_v21  ;;  %v13539_v26 = vsub.f32 %v2088_v44, %v2365_v21  ;;  %v2098_v51 = vld [vmem:[#allocation10 + $0x218] sm:$0xff] }
 0x12e   :  { %19679 = vst [vmem:[#allocation138_spill] sm:$0xff] %v13524_v4  ;;  %19680 = vst [vmem:[#allocation139_spill] sm:$0xff] %v13527_v53  ;;  %9991 = vmatpush1.bf16.msra.mxu1 %v13154_v23  ;;  %9801 = vmatprep.subr.bf16.mxu0 %v13160_v42  ;;  %v5059_v45 = vand.u32 4294901760, %v2089_v58  ;;  %v5063_v4 = vand.u32 4294901760, %v2093_v13  ;;  %v2102_v9 = vld [vmem:[#allocation10 + $0x238] sm:$0xff]  ;;  %v13542_v28 = vsub.f32 %v2092_v17, %v2369_v39  ;;  %v2373_v8 = vand.u32 4294901760, %v2096_v19 }
 0x12f   :  { %19681 = vst [vmem:[#allocation140_spill] sm:$0xff] %v13529_v43  ;;  %19682 = vst [vmem:[#allocation141_spill] sm:$0xff] %v13531_v33  ;;  %9993 = vmatprep.subr.bf16.mxu1 %v13166_v61  ;;  %v13544_v27 = vpack.c.bf16 %v5061_v35, %v5057_v6  ;;  %v2377_v32 = vand.u32 4294901760, %v2100_v18  ;;  %v2099_v23 = vld [vmem:[#allocation10 + $0x220] sm:$0xff]  ;;  %v13546_v15 = vsub.f32 %v2090_v0, %v5057_v6  ;;  %v2104_v33 = vld [vmem:[#allocation10 + $0x248] sm:$0xff]  ;;  %v5065_v17 = vand.u32 4294901760, %v2098_v51 }
 0x130   :  { %19683 = vst [vmem:[#allocation142_spill] sm:$0xff] %v13533_v48  ;;  %19684 = vst [vmem:[#allocation143_spill] sm:$0xff] %v13537_v5  ;;  %v13548_v42 = vsub.f32 %v2094_v62, %v5061_v35  ;;  %v13550_v44 = vpack.c.bf16 %v2371_v22, %v2367_v34  ;;  %v13552_v21 = vsub.f32 %v2087_v30, %v2367_v34  ;;  %v2101_v48 = vld [vmem:[#allocation10 + $0x230] sm:$0xff]  ;;  %v5069_v39 = vand.u32 4294901760, %v2102_v9  ;;  %v2108_v53 = vld [vmem:[#allocation10 + $0x268] sm:$0xff] }
 0x131   :  { %19685 = vst [vmem:[#allocation144_spill] sm:$0xff] %v13539_v26  ;;  %19686 = vst [vmem:[#allocation145_spill] sm:$0xff] %v13542_v28  ;;  %v2097_v26 = vld [vmem:[#allocation10 + $0x210] sm:$0xff]  ;;  %9803 = vmatpush1.bf16.msra.mxu0 %v13172_v16  ;;  %v13555_v61 = vsub.f32 %v2091_v10, %v2371_v22  ;;  %v2375_v28 = vand.u32 4294901760, %v2095_v7  ;;  %v2110_v0 = vld [vmem:[#allocation10 + $0x278] sm:$0xff]  ;;  %v13559_v62 = vpack.c.bf16 %v5063_v4, %v5059_v45  ;;  %v2379_v6 = vand.u32 4294901760, %v2099_v23 }
 0x132   :  { %19687 = vst [vmem:[#allocation146_spill] sm:$0xff] %v13544_v27  ;;  %19688 = vst [vmem:[#allocation147_spill] sm:$0xff] %v13546_v15  ;;  %9995 = vmatpush1.bf16.msra.mxu1 %v13178_v41  ;;  %9805 = vmatprep.subr.bf16.mxu0 %v13184_v12  ;;  %v13561_v30 = vsub.f32 %v2089_v58, %v5059_v45  ;;  %v13563_v35 = vsub.f32 %v2093_v13, %v5063_v4  ;;  %v5067_v34 = vand.u32 4294901760, %v2097_v26  ;;  %v2107_v15 = vld [vmem:[#allocation10 + $0x260] sm:$0xff]  ;;  %v19702_v45 = vld [vmem:[#allocation72_spill] sm:$0xff] }
 0x133   :  { %19689 = vst [vmem:[#allocation148_spill] sm:$0xff] %v13548_v42  ;;  %19690 = vst [vmem:[#allocation149_spill] sm:$0xff] %v13550_v44  ;;  %9997 = vmatprep.subr.bf16.mxu1 %v13190_v36  ;;  %v13566_v16 = vpack.c.bf16 %v2377_v32, %v2373_v8  ;;  %v13568_v10 = vsub.f32 %v2096_v19, %v2373_v8  ;;  %v5071_v22 = vand.u32 4294901760, %v2101_v48  ;;  %v2385_v41 = vand.u32 4294901760, %v2108_v53  ;;  %v2105_v19 = vld [vmem:[#allocation10 + $0x250] sm:$0xff] }
 0x134   :  { %19691 = vst [vmem:[#allocation150_spill] sm:$0xff] %v13552_v21  ;;  %19692 = vst [vmem:[#allocation151_spill] sm:$0xff] %v13555_v61  ;;  %v2103_v61 = vld [vmem:[#allocation10 + $0x240] sm:$0xff]  ;;  %v2381_v21 = vand.u32 4294901760, %v2104_v33  ;;  %v5073_v42 = vand.u32 4294901760, %v2106_v40  ;;  %v5077_v12 = vand.u32 4294901760, %v2110_v0  ;;  %v13571_v58 = vsub.f32 %v2100_v18, %v2377_v32 }
 0x135   :  { %19693 = vst [vmem:[#allocation152_spill] sm:$0xff] %v13559_v62  ;;  %19694 = vst [vmem:[#allocation153_spill] sm:$0xff] %v13561_v30  ;;  %9807 = vmatpush1.bf16.msra.mxu0 %v13196_v54  ;;  %v13573_v13 = vpack.c.bf16 %v5069_v39, %v5065_v17  ;;  %v13575_v4 = vsub.f32 %v2098_v51, %v5065_v17  ;;  %v13577_v36 = vsub.f32 %v2102_v9, %v5069_v39  ;;  %v19703_v8 = vld [vmem:[#allocation73_spill] sm:$0xff]  ;;  %v2112_v32 = vld [vmem:[#allocation10 + $0x288] sm:$0xff] }
 0x136   :  { %19695 = vst [vmem:[#allocation154_spill] sm:$0xff] %v13563_v35  ;;  %19696 = vst [vmem:[#allocation155_spill] sm:$0xff] %v13566_v16  ;;  %9999 = vmatpush1.bf16.msra.mxu1 %v19702_v45  ;;  %9809 = vmatprep.subr.bf16.mxu0 %v19703_v8  ;;  %v13583_v35 = vsub.f32 %v2095_v7, %v2375_v28  ;;  %v13585_v30 = vsub.f32 %v2099_v23, %v2379_v6  ;;  %v2383_v54 = vand.u32 4294901760, %v2103_v61  ;;  %v2109_v18 = vld [vmem:[#allocation10 + $0x270] sm:$0xff]  ;;  %v2114_v45 = vld [vmem:[#allocation10 + $0x298] sm:$0xff] }
 0x137   :  { %19697 = vst [vmem:[#allocation156_spill] sm:$0xff] %v13568_v10  ;;  %19698 = vst [vmem:[#allocation157_spill] sm:$0xff] %v13571_v58  ;;  %v13581_v10 = vpack.c.bf16 %v2379_v6, %v2375_v28  ;;  %v2116_v58 = vld [vmem:[#allocation10 + $0x2a8] sm:$0xff]  ;;  %v13588_v51 = vpack.c.bf16 %v5071_v22, %v5067_v34  ;;  %v13590_v9 = vsub.f32 %v2097_v26, %v5067_v34  ;;  %v2387_v39 = vand.u32 4294901760, %v2107_v15  ;;  %v2118_v8 = vld [vmem:[#allocation10 + $0x2b8] sm:$0xff] }
 0x138   :  { %19699 = vst [vmem:[#allocation158_spill] sm:$0xff] %v13573_v13  ;;  %19700 = vst [vmem:[#allocation159_spill] sm:$0xff] %v13575_v4  ;;  %v19707_v13 = vld [vmem:[#allocation75_spill] sm:$0xff]  ;;  %v13592_v17 = vsub.f32 %v2101_v48, %v5071_v22  ;;  %v13596_v7 = vsub.f32 %v2104_v33, %v2381_v21  ;;  %v13598_v28 = vsub.f32 %v2108_v53, %v2385_v41  ;;  %v5079_v26 = vand.u32 4294901760, %v2109_v18  ;;  %v2113_v22 = vld [vmem:[#allocation10 + $0x290] sm:$0xff] }
 0x139   :  { %19701 = vst [vmem:[#allocation160_spill] sm:$0xff] %v13577_v36  ;;  %19704 = vst [vmem:[#allocation72_spill] sm:$0xff] %v13581_v10  ;;  %10001 = vmatprep.subr.bf16.mxu1 %v19707_v13  ;;  %v13594_v36 = vpack.c.bf16 %v2385_v41, %v2381_v21  ;;  %v13600_v23 = vpack.c.bf16 %v5077_v12, %v5073_v42  ;;  %v2111_v6 = vld [vmem:[#allocation10 + $0x280] sm:$0xff]  ;;  %v19715_v13 = vld [vmem:[#allocation46_spill] sm:$0xff]  ;;  %v2389_v34 = vand.u32 4294901760, %v2112_v32  ;;  %v2393_v48 = vand.u32 4294901760, %v2116_v58 }
 0x13a   :  { %19705 = vst [vmem:[#allocation73_spill] sm:$0xff] %v13583_v35  ;;  %19706 = vst [vmem:[#allocation161_spill] sm:$0xff] %v13585_v30  ;;  %v2115_v30 = vld [vmem:[#allocation10 + $0x2a0] sm:$0xff]  ;;  %9811 = vmatpush1.bf16.msra.mxu0 %v19715_v13  ;;  %v5075_v35 = vand.u32 4294901760, %v2105_v19  ;;  %v13605_v33 = vsub.f32 %v2106_v40, %v5073_v42  ;;  %v13607_v53 = vsub.f32 %v2110_v0, %v5077_v12  ;;  %v5081_v21 = vand.u32 4294901760, %v2114_v45  ;;  %v2122_v12 = vld [vmem:[#allocation10 + $0x2d8] sm:$0xff] }
 0x13b   :  { %19708 = vst [vmem:[#allocation75_spill] sm:$0xff] %v13588_v51  ;;  %19709 = vst [vmem:[#allocation162_spill] sm:$0xff] %v13590_v9  ;;  %v19716_v9 = vld [vmem:[#allocation48_spill] sm:$0xff]  ;;  %9813 = vmatprep.subr.bf16.mxu0 %v13232_v2  ;;  %v5085_v41 = vand.u32 4294901760, %v2118_v8  ;;  %v13612_v13 = vsub.f32 %v2103_v61, %v2383_v54  ;;  %v2395_v4 = vand.u32 4294901760, %v2115_v30  ;;  %v13614_v51 = vsub.f32 %v2107_v15, %v2387_v39 }
 0x13c   :  { %19710 = vst [vmem:[#allocation163_spill] sm:$0xff] %v13592_v17  ;;  %19711 = vst [vmem:[#allocation164_spill] sm:$0xff] %v13594_v36  ;;  %v2117_v17 = vld [vmem:[#allocation10 + $0x2b0] sm:$0xff]  ;;  %10003 = vmatpush1.bf16.msra.mxu1 %v19716_v9  ;;  %v2124_v36 = vld [vmem:[#allocation10 + $0x2e8] sm:$0xff]  ;;  %v13616_v9 = vsub.f32 %v2105_v19, %v5075_v35  ;;  %v5083_v2 = vand.u32 4294901760, %v2113_v22  ;;  %v13619_v42 = vpack.c.bf16 %v5079_v26, %v5075_v35 }
 0x13d   :  { %19712 = vst [vmem:[#allocation165_spill] sm:$0xff] %v13596_v7  ;;  %19713 = vst [vmem:[#allocation166_spill] sm:$0xff] %v13598_v28  ;;  %10005 = vmatprep.subr.bf16.mxu1 %v13238_v59  ;;  %v13610_v28 = vpack.c.bf16 %v2387_v39, %v2383_v54  ;;  %v2391_v7 = vand.u32 4294901760, %v2111_v6  ;;  %v5087_v40 = vand.u32 4294901760, %v2117_v17  ;;  %v13621_v0 = vsub.f32 %v2109_v18, %v5079_v26  ;;  %v2126_v54 = vld [vmem:[#allocation10 + $0x2f8] sm:$0xff]  ;;  %v2119_v35 = vld [vmem:[#allocation10 + $0x2c0] sm:$0xff] }
 0x13e   :  { %19714 = vst [vmem:[#allocation167_spill] sm:$0xff] %v13600_v23  ;;  %19717 = vst [vmem:[#allocation46_spill] sm:$0xff] %v13605_v33  ;;  %v2120_v23 = vld [vmem:[#allocation10 + $0x2c8] sm:$0xff]  ;;  %9815 = vmatpush1.bf16.msra.mxu0 %v13244_v63  ;;  %v13623_v59 = vpack.c.bf16 %v2393_v48, %v2389_v34  ;;  %v13625_v61 = vsub.f32 %v2112_v32, %v2389_v34  ;;  %v13629_v15 = vsub.f32 %v2116_v58, %v2393_v48  ;;  %v19729_v18 = vld [vmem:[#allocation27_spill] sm:$0xff] }
 0x13f   :  { %19718 = vst [vmem:[#allocation48_spill] sm:$0xff] %v13607_v53  ;;  %19719 = vst [vmem:[#allocation168_spill] sm:$0xff] %v13610_v28  ;;  %9817 = vmatprep.subr.bf16.mxu0 %v19548_v55  ;;  %v13631_v19 = vpack.c.bf16 %v5085_v41, %v5081_v21  ;;  %v2397_v39 = vand.u32 4294901760, %v2120_v23  ;;  %v2401_v63 = vand.u32 4294901760, %v2124_v36  ;;  %v13634_v26 = vsub.f32 %v2114_v45, %v5081_v21  ;;  %v2125_v55 = vld [vmem:[#allocation10 + $0x2f0] sm:$0xff]  ;;  %v19734_v58 = vld [vmem:[#allocation90_spill] sm:$0xff] }
 0x140   :  { %19720 = vst [vmem:[#allocation169_spill] sm:$0xff] %v13612_v13  ;;  %19721 = vst [vmem:[#allocation170_spill] sm:$0xff] %v13614_v51  ;;  %10007 = vmatpush1.bf16.msra.mxu1 %v13250_v60  ;;  %v13636_v32 = vsub.f32 %v2118_v8, %v5085_v41  ;;  %v13638_v34 = vpack.c.bf16 %v2395_v4, %v2391_v7  ;;  %v2121_v60 = vld [vmem:[#allocation10 + $0x2d0] sm:$0xff]  ;;  %v13643_v48 = vsub.f32 %v2115_v30, %v2395_v4  ;;  %v2128_v13 = vld [vmem:[#allocation10 + $0x308] sm:$0xff] }
 0x141   :  { %19722 = vst [vmem:[#allocation171_spill] sm:$0xff] %v13616_v9  ;;  %19723 = vst [vmem:[#allocation172_spill] sm:$0xff] %v13619_v42  ;;  %v2123_v9 = vld [vmem:[#allocation10 + $0x2e0] sm:$0xff]  ;;  %10009 = vmatprep.subr.bf16.mxu1 %v19729_v18  ;;  %987 = vmatmul.mubr.f32.vlgmr.msra.gmra.mrb[0].mxu0 %v19734_v58  ;;  %v5093_v51 = vand.u32 4294901760, %v2126_v54  ;;  %v2132_v18 = vld [vmem:[#allocation10 + $0x328] sm:$0xff]  ;;  %v13649_v8 = vsub.f32 %v2113_v22, %v5083_v2 }
 0x142   :  { %19724 = vst [vmem:[#allocation173_spill] sm:$0xff] %v13621_v0  ;;  %19725 = vst [vmem:[#allocation174_spill] sm:$0xff] %v13623_v59  ;;  %v5089_v0 = vand.u32 4294901760, %v2122_v12  ;;  %v19737_v45 = vld [vmem:[#allocation29_spill] sm:$0xff]  ;;  %v2403_v21 = vand.u32 4294901760, %v2123_v9  ;;  %v2130_v41 = vld [vmem:[#allocation10 + $0x318] sm:$0xff]  ;;  %992 = vmatprep.mubr.f32.mxu0 %v19441_v20 }
 0x143   :  { %19726 = vst [vmem:[#allocation175_spill] sm:$0xff] %v13625_v61  ;;  %19727 = vst [vmem:[#allocation176_spill] sm:$0xff] %v13629_v15  ;;  %v13640_v61 = vsub.f32 %v2111_v6, %v2391_v7  ;;  %v13645_v15 = vpack.c.bf16 %v5087_v40, %v5083_v2  ;;  %9819 = vmatpush1.bf16.msra.mxu0 %v19737_v45  ;;  %1891 = vmatmul.mubr.f32.vlgmr.msra.gmra.mrb[0].mxu1 %v19734_v58  ;;  %v2399_v6 = vand.u32 4294901760, %v2119_v35  ;;  %v19740_v30 = vld [vmem:[#allocation32_spill] sm:$0xff]  ;;  %v19741_v4 = vld [vmem:[#allocation35_spill] sm:$0xff] }
 0x144   :  { %19728 = vst [vmem:[#allocation177_spill] sm:$0xff] %v13631_v19  ;;  %19730 = vst [vmem:[#allocation27_spill] sm:$0xff] %v13634_v26  ;;  %v13651_v7 = vsub.f32 %v2117_v17, %v5087_v40  ;;  %10011 = vmatpush1.bf16.msra.mxu1 %v19740_v30  ;;  %9821 = vmatprep.subr.bf16.mxu0 %v19741_v4  ;;  %v5091_v26 = vand.u32 4294901760, %v2121_v60  ;;  %v5095_v45 = vand.u32 4294901760, %v2125_v55  ;;  %v19744_v53 = vld [vmem:[#allocation36_spill] sm:$0xff]  ;;  %v2405_v2 = vand.u32 4294901760, %v2128_v13 }
 0x145   :  { %19731 = vst [vmem:[#allocation178_spill] sm:$0xff] %v13636_v32  ;;  %19732 = vst [vmem:[#allocation179_spill] sm:$0xff] %v13638_v34  ;;  %v13657_v32 = vsub.f32 %v2120_v23, %v2397_v39  ;;  %10013 = vmatprep.subr.bf16.mxu1 %v19744_v53  ;;  %v13661_v17 = vsub.f32 %v2124_v36, %v2401_v63  ;;  %v13663_v22 = vsub.f32 %v2122_v12, %v5089_v0  ;;  %v2131_v30 = vld [vmem:[#allocation10 + $0x320] sm:$0xff]  ;;  %v2133_v33 = vld [vmem:[#allocation10 + $0x330] sm:$0xff] }
 0x146   :  { %19733 = vst [vmem:[#allocation180_spill] sm:$0xff] %v13640_v61  ;;  %19735 = vst [vmem:[#allocation90_spill] sm:$0xff] %v13643_v48  ;;  %v2134_v61 = vld [vmem:[#allocation10 + $0x338] sm:$0xff]  ;;  %v13655_v48 = vpack.c.bf16 %v2401_v63, %v2397_v39  ;;  %v2409_v40 = vand.u32 4294901760, %v2132_v18  ;;  %1896 = vmatprep.mubr.f32.mxu1 %v19441_v20  ;;  %v19747_v4 = vld [vmem:[#allocation55_spill] sm:$0xff]  ;;  %v13667_v23 = vpack.c.bf16 %v5093_v51, %v5089_v0 }
 0x147   :  { %19736 = vst [vmem:[#allocation181_spill] sm:$0xff] %v13645_v15  ;;  %19738 = vst [vmem:[#allocation29_spill] sm:$0xff] %v13649_v8  ;;  %994 = vmatmul.mubr.f32.gmra.mrb[2].mxu0 %v19747_v4  ;;  %v13669_v39 = vsub.f32 %v2126_v54, %v5093_v51  ;;  %v5101_v53 = vand.u32 4294901760, %v2134_v61  ;;  %v2129_v8 = vld [vmem:[#allocation10 + $0x310] sm:$0xff]  ;;  %1898 = vmatmul.mubr.f32.gmra.mrb[2].mxu1 %v19747_v4  ;;  %v13673_v12 = vpack.c.bf16 %v2403_v21, %v2399_v6  ;;  %v19755_v0 = vld [vmem:[#allocation39_spill] sm:$0xff] }
 0x148   :  { %19739 = vst [vmem:[#allocation182_spill] sm:$0xff] %v13651_v7  ;;  %19742 = vst [vmem:[#allocation32_spill] sm:$0xff] %v13655_v48  ;;  %v2127_v7 = vld [vmem:[#allocation10 + $0x300] sm:$0xff]  ;;  %v19750_v36 = vld [vmem:[#allocation37_spill] sm:$0xff]  ;;  %v13675_v63 = vsub.f32 %v2119_v35, %v2399_v6  ;;  %v13681_v51 = vpack.c.bf16 %v5095_v45, %v5091_v26  ;;  %v13683_v54 = vsub.f32 %v2121_v60, %v5091_v26  ;;  %1096 = vmatprep.mubr.f32.mxu0 %v19441_v20 }
 0x149   :  { %19743 = vst [vmem:[#allocation35_spill] sm:$0xff] %v13657_v32  ;;  %19745 = vst [vmem:[#allocation36_spill] sm:$0xff] %v13661_v17  ;;  %v5097_v32 = vand.u32 4294901760, %v2130_v41  ;;  %9823 = vmatpush1.bf16.msra.mxu0 %v19750_v36  ;;  %v2136_v17 = vld [vmem:[#allocation10 + $0x348] sm:$0xff]  ;;  %v19754_v48 = vld [vmem:[#allocation38_spill] sm:$0xff]  ;;  %v13689_v35 = vpack.c.bf16 %v2409_v40, %v2405_v2  ;;  %v5103_v6 = vand.u32 4294901760, %v2133_v33  ;;  %2000 = vmatprep.mubr.f32.mxu1 %v19441_v20 }
 0x14a   :  { %19746 = vst [vmem:[#allocation183_spill] sm:$0xff] %v13663_v22  ;;  %19748 = vst [vmem:[#allocation55_spill] sm:$0xff] %v13667_v23  ;;  %v13677_v22 = vsub.f32 %v2123_v9, %v2403_v21  ;;  %10015 = vmatpush1.bf16.msra.mxu1 %v19754_v48  ;;  %9825 = vmatprep.subr.bf16.mxu0 %v19755_v0  ;;  %v2411_v23 = vand.u32 4294901760, %v2131_v30  ;;  %v2140_v36 = vld [vmem:[#allocation10 + $0x368] sm:$0xff]  ;;  %v2138_v15 = vld [vmem:[#allocation10 + $0x358] sm:$0xff]  ;;  %v13687_v9 = vsub.f32 %v2125_v55, %v5095_v45 }
 0x14b   :  { %19749 = vst [vmem:[#allocation184_spill] sm:$0xff] %v13669_v39  ;;  %19751 = vst [vmem:[#allocation37_spill] sm:$0xff] %v13673_v12  ;;  %v2407_v39 = vand.u32 4294901760, %v2127_v7  ;;  %v2142_v34 = vld [vmem:[#allocation10 + $0x378] sm:$0xff]  ;;  %v19758_v19 = vld [vmem:[#allocation40_spill] sm:$0xff]  ;;  %v5099_v48 = vand.u32 4294901760, %v2129_v8  ;;  %v13692_v21 = vsub.f32 %v2128_v13, %v2405_v2  ;;  %v13694_v26 = vsub.f32 %v2132_v18, %v2409_v40 }
 0x14c   :  { %19752 = vst [vmem:[#allocation185_spill] sm:$0xff] %v13675_v63  ;;  %19753 = vst [vmem:[#allocation186_spill] sm:$0xff] %v13677_v22  ;;  %10017 = vmatprep.subr.bf16.mxu1 %v19758_v19  ;;  %v13696_v60 = vpack.c.bf16 %v5101_v53, %v5097_v32  ;;  %v13698_v0 = vsub.f32 %v2130_v41, %v5097_v32  ;;  %v2139_v19 = vld [vmem:[#allocation10 + $0x360] sm:$0xff]  ;;  %v19765_v22 = vld [vmem:[#allocation41_spill] sm:$0xff]  ;;  %v2413_v55 = vand.u32 4294901760, %v2136_v17  ;;  %v2417_v45 = vand.u32 4294901760, %v2140_v36 }
 0x14d   :  { %19756 = vst [vmem:[#allocation38_spill] sm:$0xff] %v13681_v51  ;;  %19757 = vst [vmem:[#allocation39_spill] sm:$0xff] %v13683_v54  ;;  %v2135_v54 = vld [vmem:[#allocation10 + $0x340] sm:$0xff]  ;;  %9827 = vmatpush1.bf16.msra.mxu0 %v19765_v22  ;;  %v5109_v63 = vand.u32 4294901760, %v2142_v34  ;;  %v2141_v51 = vld [vmem:[#allocation10 + $0x370] sm:$0xff]  ;;  %v13703_v18 = vsub.f32 %v2134_v61, %v5101_v53  ;;  %v13705_v2 = vpack.c.bf16 %v2411_v23, %v2407_v39 }
 0x14e   :  { %19759 = vst [vmem:[#allocation40_spill] sm:$0xff] %v13687_v9  ;;  %19760 = vst [vmem:[#allocation187_spill] sm:$0xff] %v13689_v35  ;;  %v5105_v9 = vand.u32 4294901760, %v2138_v15  ;;  %v2137_v35 = vld [vmem:[#allocation10 + $0x350] sm:$0xff]  ;;  %v19766_v12 = vld [vmem:[#allocation42_spill] sm:$0xff]  ;;  %v13707_v32 = vsub.f32 %v2127_v7, %v2407_v39  ;;  %v13710_v40 = vsub.f32 %v2131_v30, %v2411_v23  ;;  %v13712_v22 = vpack.c.bf16 %v5103_v6, %v5099_v48 }
 0x14f   :  { %19761 = vst [vmem:[#allocation188_spill] sm:$0xff] %v13692_v21  ;;  %19762 = vst [vmem:[#allocation189_spill] sm:$0xff] %v13694_v26  ;;  %10019 = vmatpush1.bf16.msra.mxu1 %v19766_v12  ;;  %v19767_v13 = vld [vmem:[#allocation43_spill] sm:$0xff]  ;;  %v19771_v41 = vld [vmem:[#allocation44_spill] sm:$0xff]  ;;  %v2419_v26 = vand.u32 4294901760, %v2139_v19  ;;  %v13714_v59 = vsub.f32 %v2129_v8, %v5099_v48  ;;  %v13716_v12 = vsub.f32 %v2133_v33, %v5103_v6  ;;  %v5107_v61 = vand.u32 4294901760, %v2137_v35 }
 0x150   :  { %19763 = vst [vmem:[#allocation190_spill] sm:$0xff] %v13696_v60  ;;  %19764 = vst [vmem:[#allocation191_spill] sm:$0xff] %v13698_v0  ;;  %9829 = vmatprep.subr.bf16.mxu0 %v19767_v13  ;;  %10021 = vmatprep.subr.bf16.mxu1 %v19771_v41  ;;  %v2415_v0 = vand.u32 4294901760, %v2135_v54  ;;  %v2144_v21 = vld [vmem:[#allocation10 + $0x388] sm:$0xff]  ;;  %v5111_v53 = vand.u32 4294901760, %v2141_v51  ;;  %v2146_v13 = vld [vmem:[#allocation10 + $0x398] sm:$0xff]  ;;  %v13719_v39 = vpack.c.bf16 %v2417_v45, %v2413_v55 }
 0x151   :  { %19768 = vst [vmem:[#allocation41_spill] sm:$0xff] %v13703_v18  ;;  %19769 = vst [vmem:[#allocation42_spill] sm:$0xff] %v13705_v2  ;;  %v2148_v60 = vld [vmem:[#allocation10 + $0x3a8] sm:$0xff]  ;;  %v2150_v18 = vld [vmem:[#allocation10 + $0x3b8] sm:$0xff]  ;;  %v13721_v30 = vsub.f32 %v2136_v17, %v2413_v55  ;;  %v13723_v23 = vsub.f32 %v2140_v36, %v2417_v45  ;;  %v13725_v41 = vpack.c.bf16 %v5109_v63, %v5105_v9  ;;  %v5113_v45 = vand.u32 4294901760, %v2146_v13 }
 0x152   :  { %19770 = vst [vmem:[#allocation43_spill] sm:$0xff] %v13707_v32  ;;  %19772 = vst [vmem:[#allocation44_spill] sm:$0xff] %v13710_v40  ;;  %v19776_v7 = vld [vmem:[#allocation45_spill] sm:$0xff]  ;;  %v2143_v40 = vld [vmem:[#allocation10 + $0x380] sm:$0xff]  ;;  %v13729_v48 = vsub.f32 %v2138_v15, %v5105_v9  ;;  %v13731_v6 = vsub.f32 %v2142_v34, %v5109_v63  ;;  %v13734_v36 = vpack.c.bf16 %v2419_v26, %v2415_v0 }
 0x153   :  { %19773 = vst [vmem:[#allocation192_spill] sm:$0xff] %v13712_v22  ;;  %19774 = vst [vmem:[#allocation193_spill] sm:$0xff] %v13714_v59  ;;  %9831 = vmatpush1.bf16.msra.mxu0 %v19776_v7  ;;  %v2147_v32 = vld [vmem:[#allocation10 + $0x3a0] sm:$0xff]  ;;  %v19782_v33 = vld [vmem:[#allocation50_spill] sm:$0xff]  ;;  %v2425_v7 = vand.u32 4294901760, %v2148_v60  ;;  %v13736_v55 = vsub.f32 %v2135_v54, %v2415_v0  ;;  %v2423_v15 = vand.u32 4294901760, %v2143_v40 }
 0x154   :  { %19775 = vst [vmem:[#allocation194_spill] sm:$0xff] %v13716_v12  ;;  %19777 = vst [vmem:[#allocation45_spill] sm:$0xff] %v13719_v39  ;;  %v19781_v8 = vld [vmem:[#allocation47_spill] sm:$0xff]  ;;  %9833 = vmatprep.subr.bf16.mxu0 %v19782_v33  ;;  %v2421_v12 = vand.u32 4294901760, %v2144_v21  ;;  %v2145_v59 = vld [vmem:[#allocation10 + $0x390] sm:$0xff]  ;;  %v2427_v9 = vand.u32 4294901760, %v2147_v32 }
 0x155   :  { %19778 = vst [vmem:[#allocation195_spill] sm:$0xff] %v13721_v30  ;;  %19779 = vst [vmem:[#allocation196_spill] sm:$0xff] %v13723_v23  ;;  %10023 = vmatpush1.bf16.msra.mxu1 %v19781_v8  ;;  %v2149_v39 = vld [vmem:[#allocation10 + $0x3b0] sm:$0xff]  ;;  %v19785_v17 = vld [vmem:[#allocation54_spill] sm:$0xff]  ;;  %v5117_v23 = vand.u32 4294901760, %v2150_v18  ;;  %v13738_v30 = vsub.f32 %v2139_v19, %v2419_v26  ;;  %v13740_v8 = vpack.c.bf16 %v5111_v53, %v5107_v61 }
 0x156   :  { %19780 = vst [vmem:[#allocation197_spill] sm:$0xff] %v13725_v41  ;;  %19783 = vst [vmem:[#allocation47_spill] sm:$0xff] %v13729_v48  ;;  %10025 = vmatprep.subr.bf16.mxu1 %v19785_v17  ;;  %v2024_v34 = vld [vmem:[#allocation5 + $0x8] sm:$0xff]  ;;  %v2023_v63 = vld [vmem:[#allocation5] sm:$0xff]  ;;  %v13745_v48 = vsub.f32 %v2141_v51, %v5111_v53  ;;  %v5115_v17 = vand.u32 4294901760, %v2145_v59  ;;  %v13749_v26 = vpack.c.bf16 %v2425_v7, %v2421_v12 }
 0x157   :  { %19784 = vst [vmem:[#allocation50_spill] sm:$0xff] %v13731_v6  ;;  %19786 = vst [vmem:[#allocation54_spill] sm:$0xff] %v13734_v36  ;;  %v19790_v33 = vld [vmem:[#allocation56_spill] sm:$0xff]  ;;  %v13743_v6 = vsub.f32 %v2137_v35, %v5107_v61  ;;  %v5119_v36 = vand.u32 4294901760, %v2149_v39  ;;  %v19793_v54 = vld [vmem:[#allocation59_spill] sm:$0xff]  ;;  %v13751_v19 = vsub.f32 %v2144_v21, %v2421_v12  ;;  %v13756_v35 = vpack.c.bf16 %v5117_v23, %v5113_v45 }
 0x158   :  { %19787 = vst [vmem:[#allocation198_spill] sm:$0xff] %v13736_v55  ;;  %19788 = vst [vmem:[#allocation199_spill] sm:$0xff] %v13738_v30  ;;  %9835 = vmatpush1.bf16.msra.mxu0 %v19790_v33  ;;  %v19794_v0 = vld [vmem:[#allocation62_spill] sm:$0xff]  ;;  %v13753_v30 = vsub.f32 %v2148_v60, %v2425_v7  ;;  %v2152_v55 = vld [vmem:[#allocation10 + $0x3c8] sm:$0xff]  ;;  %v13758_v51 = vsub.f32 %v2146_v13, %v5113_v45  ;;  %v13760_v61 = vand.u32 4294901760, %v2024_v34  ;;  %v13762_v53 = vand.u32 4294901760, %v2023_v63 }
 0x159   :  { %19789 = vst [vmem:[#allocation200_spill] sm:$0xff] %v13740_v8  ;;  %19791 = vst [vmem:[#allocation56_spill] sm:$0xff] %v13743_v6  ;;  %10027 = vmatpush1.bf16.msra.mxu1 %v19793_v54  ;;  %9837 = vmatprep.subr.bf16.mxu0 %v19794_v0  ;;  %v2156_v8 = vld [vmem:[#allocation10 + $0x3e8] sm:$0xff]  ;;  %v19798_v41 = vld [vmem:[#allocation66_spill] sm:$0xff]  ;;  %v13764_v33 = vsub.f32 %v2150_v18, %v5117_v23  ;;  %v13766_v54 = vpack.c.bf16 %v2427_v9, %v2423_v15 }
 0x15a   :  { %19792 = vst [vmem:[#allocation201_spill] sm:$0xff] %v13745_v48  ;;  %19795 = vst [vmem:[#allocation59_spill] sm:$0xff] %v13749_v26  ;;  %10029 = vmatprep.subr.bf16.mxu1 %v19798_v41  ;;  %v13768_v21 = vsub.f32 %v2143_v40, %v2423_v15  ;;  %v13770_v60 = vsub.f32 %v2147_v32, %v2427_v9  ;;  %v19807_v12 = vld [vmem:[#allocation68_spill] sm:$0xff]  ;;  %v13773_v7 = vpack.c.bf16 %v5119_v36, %v5115_v17  ;;  %v2154_v13 = vld [vmem:[#allocation10 + $0x3d8] sm:$0xff] }
 0x15b   :  { %19796 = vst [vmem:[#allocation62_spill] sm:$0xff] %v13751_v19  ;;  %19797 = vst [vmem:[#allocation202_spill] sm:$0xff] %v13753_v30  ;;  %v2429_v41 = vand.u32 4294901760, %v2152_v55  ;;  %v2433_v0 = vand.u32 4294901760, %v2156_v8  ;;  %v2158_v45 = vld [vmem:[#allocation10 + $0x3f8] sm:$0xff]  ;;  %v19809_v30 = vld [vmem:[#allocation51_spill] sm:$0xff]  ;;  %v13780_v40 = vsub.f32 %v2145_v59, %v5115_v17  ;;  %v13787_v6 = vsub.f32 %v2024_v34, %v13760_v61 }
 0x15c   :  { %19799 = vst [vmem:[#allocation66_spill] sm:$0xff] %v13756_v35  ;;  %19800 = vst [vmem:[#allocation203_spill] sm:$0xff] %v13758_v51  ;;  %9839 = vmatpush1.bf16.msra.mxu0 %v19807_v12  ;;  %v13775_v51 = vld [vmem:[#allocation10 + $0x3c0] sm:$0xff]  ;;  %v19811_v23 = vld [vmem:[#allocation74_spill] sm:$0xff]  ;;  %v13790_v19 = vsub.f32 %v2023_v63, %v13762_v53  ;;  %v5121_v9 = vand.u32 4294901760, %v2154_v13  ;;  %v19824_v63 = vand.u32 4294901760, %v19809_v30 }
 0x15d   :  { %19801 = vst [vmem:[#allocation204_spill] sm:$0xff] %v13760_v61  ;;  %19802 = vst [vmem:[#allocation205_spill] sm:$0xff] %v13762_v53  ;;  %v19810_v18 = vld [vmem:[#allocation71_spill] sm:$0xff]  ;;  %9841 = vmatprep.subr.bf16.mxu0 %v19811_v23  ;;  %v19813_v15 = vld [vmem:[#allocation52_spill] sm:$0xff] }
 0x15e   :  { %19803 = vst [vmem:[#allocation206_spill] sm:$0xff] %v13764_v33  ;;  %19804 = vst [vmem:[#allocation207_spill] sm:$0xff] %v13766_v54  ;;  %10031 = vmatpush1.bf16.msra.mxu1 %v19810_v18  ;;  %v2155_v32 = vld [vmem:[#allocation10 + $0x3e0] sm:$0xff]  ;;  %v19814_v12 = vld [vmem:[#allocation57_spill] sm:$0xff]  ;;  %v13800_v54 = vsub.f32 %v2152_v55, %v2429_v41  ;;  %v2473_v53 = vsub.f32 %v19809_v30, %v19824_v63  ;;  %v19826_v17 = vand.u32 4294901760, %v19813_v15 }
 0x15f   :  { %19805 = vst [vmem:[#allocation208_spill] sm:$0xff] %v13768_v21  ;;  %19806 = vst [vmem:[#allocation209_spill] sm:$0xff] %v13770_v60  ;;  %v19815_v21 = vld [vmem:[#allocation58_spill] sm:$0xff]  ;;  %10033 = vmatprep.subr.bf16.mxu1 %v19620_v11  ;;  %v2153_v48 = vld [vmem:[#allocation10 + $0x3d0] sm:$0xff]  ;;  %v2431_v60 = vand.u32 4294901760, %v13775_v51  ;;  %v13798_v11 = vpack.c.bf16 %v2433_v0, %v2429_v41  ;;  %v2435_v34 = vand.u32 4294901760, %v2155_v32  ;;  %v13831_v30 = vsub.f32 %v2154_v13, %v5121_v9 }
 0x160   :  { %19808 = vst [vmem:[#allocation68_spill] sm:$0xff] %v13773_v7  ;;  %19812 = vst [vmem:[#allocation71_spill] sm:$0xff] %v13780_v40  ;;  %v19818_v18 = vld [vmem:[#allocation61_spill] sm:$0xff]  ;;  %v19819_v59 = vld [vmem:[#allocation63_spill] sm:$0xff]  ;;  %v13794_v40 = vsub.f32 %v2149_v39, %v5119_v36  ;;  %v5125_v7 = vand.u32 4294901760, %v2158_v45  ;;  %v5123_v36 = vand.u32 4294901760, %v2153_v48 }
 0x161   :  { %19816 = vst [vmem:[#allocation74_spill] sm:$0xff] %v13787_v6  ;;  %19817 = vst [vmem:[#allocation210_spill] sm:$0xff] %v13790_v19  ;;  %v19821_v33 = vld [vmem:[#allocation79_spill] sm:$0xff]  ;;  %v19825_v23 = vld [vmem:[#allocation80_spill] sm:$0xff]  ;;  %v19828_v41 = vand.u32 4294901760, %v19815_v21  ;;  %v19832_v63 = vand.u32 4294901760, %v19818_v18  ;;  %v13840_v2 = vpack.c.bf16 %v2435_v34, %v2431_v60 }
 0x162   :  { %19820 = vst [vmem:[#allocation211_spill] sm:$0xff] %v13794_v40  ;;  %9843 = vmatpush1.bf16.msra.mxu0 %v19821_v33  ;;  %19822 = vst [vmem:[#allocation79_spill] sm:$0xff] %v13798_v11  ;;  %10035 = vmatpush1.bf16.msra.mxu1 %v19825_v23  ;;  %v2157_v39 = vld [vmem:[#allocation10 + $0x3f0] sm:$0xff]  ;;  %v2485_v40 = vsub.f32 %v19813_v15, %v19826_v17  ;;  %v19827_v33 = vand.u32 4294901760, %v19814_v12  ;;  %v19829_v61 = vld [vmem:[#allocation84_spill] sm:$0xff]  ;;  %v13818_v23 = vand.u32 4294901760, %v13787_v6 }
 0x163   :  { %19823 = vst [vmem:[#allocation212_spill] sm:$0xff] %v13800_v54  ;;  %9845 = vmatprep.subr.bf16.mxu0 %v19631_v24  ;;  %v5177_v54 = vsub.f32 %v19815_v21, %v19828_v41  ;;  %10037 = vmatprep.subr.bf16.mxu1 %v19829_v61  ;;  %v13821_v24 = vand.u32 4294901760, %v13790_v19  ;;  %v2479_v17 = vsub.f32 %v19818_v18, %v19832_v63  ;;  %v19833_v15 = vand.u32 4294901760, %v19819_v59  ;;  %v19836_v41 = vld [vmem:[#allocation65_spill] sm:$0xff]  ;;  %v19837_v21 = vld [vmem:[#allocation67_spill] sm:$0xff] }
 0x164   :  { %v5165_v55 = vsub.f32 %v19814_v12, %v19827_v33  ;;  %19830 = vst [vmem:[#allocation80_spill] sm:$0xff] %v13818_v23  ;;  %v13829_v12 = vsub.f32 %v2156_v8, %v2433_v0  ;;  %19835 = vst [vmem:[#allocation214_spill] sm:$0xff] %v13831_v30  ;;  %v19838_v35 = vld [vmem:[#allocation85_spill] sm:$0xff]  ;;  %v13836_v26 = vpack.c.bf16 %v5125_v7, %v5121_v9  ;;  %v5127_v63 = vand.u32 4294901760, %v2157_v39  ;;  %v19842_v18 = vld [vmem:[#allocation87_spill] sm:$0xff] }
 0x165   :  { %19831 = vst [vmem:[#allocation84_spill] sm:$0xff] %v13821_v24  ;;  %v2491_v33 = vsub.f32 %v19819_v59, %v19833_v15  ;;  %v13838_v22 = vsub.f32 %v2158_v45, %v5125_v7  ;;  %19841 = vst [vmem:[#allocation216_spill] sm:$0xff] %v13840_v2  ;;  %v19843_v15 = vld [vmem:[#allocation49_spill] sm:$0xff]  ;;  %v2474_v8 = vand.u32 4294901760, %v2473_v53  ;;  %v2486_v0 = vand.u32 4294901760, %v2485_v40 }
 0x166   :  { %19834 = vst [vmem:[#allocation213_spill] sm:$0xff] %v13829_v12  ;;  %9847 = vmatpush1.bf16.msra.mxu0 %v19838_v35  ;;  %19839 = vst [vmem:[#allocation85_spill] sm:$0xff] %v13836_v26  ;;  %10039 = vmatpush1.bf16.msra.mxu1 %v19842_v18  ;;  %v5166_v13 = vand.u32 4294901760, %v5165_v55  ;;  %v5178_v59 = vand.u32 4294901760, %v5177_v54  ;;  %v19844_v61 = vld [vmem:[#allocation53_spill] sm:$0xff]  ;;  %v2440_v35 = vsub.f32 %v13787_v6, %v13818_v23  ;;  %v2480_v45 = vand.u32 4294901760, %v2479_v17 }
 0x167   :  { %19840 = vst [vmem:[#allocation215_spill] sm:$0xff] %v13838_v22  ;;  %10041 = vmatprep.subr.bf16.mxu0 %v19843_v15  ;;  %10809 = vmatprep.subr.bf16.mxu1 %v19844_v61  ;;  %v2446_v7 = vsub.f32 %v13790_v19, %v13821_v24  ;;  %v2492_v9 = vand.u32 4294901760, %v2491_v33  ;;  %v19845_v18 = vand.u32 4294901760, %v19836_v41  ;;  %v19846_v53 = vand.u32 4294901760, %v19837_v21  ;;  %v19847_v40 = vld [vmem:[#allocation77_spill] sm:$0xff]  ;;  %v19848_v23 = vld [vmem:[#allocation82_spill] sm:$0xff] }
 0x168   :  { %v19849_v17 = vld [vmem:[#allocation60_spill] sm:$0xff]  ;;  %v13865_v33 = vsub.f32 %v13775_v51, %v2431_v60  ;;  %v13867_v24 = vsub.f32 %v2155_v32, %v2435_v34  ;;  %v19853_v19 = vld [vmem:[#allocation86_spill] sm:$0xff]  ;;  %v13876_v61 = vsub.f32 %v2157_v39, %v5127_v63  ;;  %v13883_v60 = vpack.c.bf16 %v5178_v59, %v5166_v13  ;;  %v19875_v39 = vld [vmem:[#allocation33_spill] sm:$0xff] }
 0x169   :  { %1098 = vmatmul.mubr.f32.vlgmr.msra.gmra.mrb[0].mxu0 %v19734_v58  ;;  %v13853_v11 = vsub.f32 %v19836_v41, %v19845_v18  ;;  %v13858_v54 = vsub.f32 %v19837_v21, %v19846_v53  ;;  %2002 = vmatmul.mubr.f32.vlgmr.msra.gmra.mrb[0].mxu1 %v19734_v58  ;;  %v13869_v18 = vsub.f32 %v2153_v48, %v5123_v36  ;;  %v18598_v15 = vand.u32 4294901760, %v19853_v19  ;;  %v19854_v6 = vld [vmem:[#allocation64_spill] sm:$0xff]  ;;  %v19877_v21 = vld [vmem:[#allocation93_spill] sm:$0xff]  ;;  %v19878_v41 = vld [vmem:[#allocation94_spill] sm:$0xff] }
 0x16a   :  { %10043 = vmatpush1.bf16.msra.mxu0 %v19849_v17  ;;  %19850 = vst [vmem:[#allocation87_spill] sm:$0xff] %v13865_v33  ;;  %19851 = vst [vmem:[#allocation217_spill] sm:$0xff] %v13867_v24  ;;  %10811 = vmatpush1.bf16.msra.mxu1 %v19854_v6  ;;  %v13874_v53 = vpack.c.bf16 %v5127_v63, %v5123_v36  ;;  %v13878_v58 = vpack.c.bf16 %v2486_v0, %v2474_v8  ;;  %v19857_v55 = vld [vmem:[#allocation88_spill] sm:$0xff]  ;;  %v2441_v48 = vand.u32 4294901760, %v2440_v35  ;;  %v19861_v36 = vld [vmem:[#allocation83_spill] sm:$0xff] }
 0x16b   :  { %19852 = vst [vmem:[#allocation218_spill] sm:$0xff] %v13869_v18  ;;  %1103 = vmatprep.mubr.f32.mxu0 %v19441_v20  ;;  %19856 = vst [vmem:[#allocation220_spill] sm:$0xff] %v13876_v61  ;;  %2007 = vmatprep.mubr.f32.mxu1 %v19441_v20  ;;  %v19858_v51 = vld [vmem:[#allocation76_spill] sm:$0xff]  ;;  %v13885_v32 = vand.u32 4294901760, %v2446_v7  ;;  %v13887_v34 = vpack.c.bf16 %v2492_v9, %v2480_v45  ;;  %v19862_v8 = vand.u32 4294901760, %v19847_v40  ;;  %v19863_v59 = vand.u32 4294901760, %v19848_v23 }
 0x16c   :  { %19855 = vst [vmem:[#allocation219_spill] sm:$0xff] %v13874_v53  ;;  %10045 = vmatprep.subr.bf16.mxu0 %v19858_v51  ;;  %10813 = vmatprep.subr.bf16.mxu1 %v19861_v36  ;;  %v19864_v35 = vld [vmem:[#allocation23_spill] sm:$0xff]  ;;  %v13908_v7 = vsub.f32 %v19853_v19, %v18598_v15  ;;  %v19865_v45 = vld [vmem:[#allocation89_spill] sm:$0xff]  ;;  %v19869_v36 = vld [vmem:[#allocation26_spill] sm:$0xff] }
 0x16d   :  { %19859 = vst [vmem:[#allocation221_spill] sm:$0xff] %v13885_v32  ;;  %19860 = vst [vmem:[#allocation222_spill] sm:$0xff] %v13887_v34  ;;  %1105 = vmatmul.mubr.f32.gmra.mrb[2].mxu0 %v19747_v4  ;;  %v13896_v0 = vsub.f32 %v19847_v40, %v19862_v8  ;;  %v13901_v13 = vsub.f32 %v19848_v23, %v19863_v59  ;;  %2009 = vmatmul.mubr.f32.gmra.mrb[2].mxu1 %v19747_v4  ;;  %v19866_v63 = vld [vmem:[#allocation91_spill] sm:$0xff]  ;;  %v19867_v8 = vld [vmem:[#allocation24_spill] sm:$0xff]  ;;  %v19870_v59 = vand.u32 4294901760, %v19857_v55 }
 0x16e   :  { %10047 = vmatpush1.bf16.msra.mxu0 %v19864_v35  ;;  %v19868_v20 = vld [vmem:[#allocation69_spill] sm:$0xff]  ;;  %v19872_v6 = vld [vmem:[#allocation28_spill] sm:$0xff]  ;;  %v19873_v19 = vld [vmem:[#allocation30_spill] sm:$0xff]  ;;  %2442 = vmatprep.mubr.f32.mxu0 %v2441_v48  ;;  %v19882_v17 = vand.u32 4294901760, %v19865_v45 }
 0x16f   :  { %10815 = vmatpush1.bf16.msra.mxu1 %v19868_v20  ;;  %10049 = vmatprep.subr.bf16.mxu0 %v19869_v36  ;;  %v13918_v4 = vsub.f32 %v19857_v55, %v19870_v59  ;;  %v19871_v35 = vld [vmem:[#allocation25_spill] sm:$0xff]  ;;  %v19874_v9 = vld [vmem:[#allocation31_spill] sm:$0xff]  ;;  %v19876_v40 = vld [vmem:[#allocation34_spill] sm:$0xff]  ;;  %v2498_v59 = vand.u32 4294901760, %v13896_v0  ;;  %v2510_v51 = vand.u32 4294901760, %v13901_v13  ;;  %v19883_v36 = vand.u32 4294901760, %v19866_v63 }
 0x170   :  { %10817 = vmatprep.subr.bf16.mxu1 %v19874_v9  ;;  %5134 = vmatprep.mubr.f32.mxu1 %v2441_v48  ;;  %v19879_v55 = vld [vmem:[#allocation96_spill] sm:$0xff]  ;;  %v19880_v18 = vld [vmem:[#allocation97_spill] sm:$0xff]  ;;  %v19881_v24 = vld [vmem:[#allocation78_spill] sm:$0xff]  ;;  %v5190_v9 = vand.u32 4294901760, %v13908_v7  ;;  %v2503_v20 = vsub.f32 %v19865_v45, %v19882_v17  ;;  %v19884_v0 = vand.u32 4294901760, %v19867_v8  ;;  %v19887_v7 = vand.u32 4294901760, %v19871_v35 }
 0x171   :  { %v2515_v48 = vsub.f32 %v19866_v63, %v19883_v36  ;;  %v19885_v61 = vld [vmem:[#allocation95_spill] sm:$0xff]  ;;  %v19886_v15 = vld [vmem:[#allocation98_spill] sm:$0xff]  ;;  %v5202_v23 = vand.u32 4294901760, %v13918_v4  ;;  %v19888_v17 = vand.u32 4294901760, %v19872_v6  ;;  %v19889_v36 = vand.u32 4294901760, %v19873_v19  ;;  %v19890_v33 = vld [vmem:[#allocation100_spill] sm:$0xff] }
 0x172   :  { %10051 = vmatpush1.bf16.msra.mxu0 %v19881_v24  ;;  %v5195_v13 = vsub.f32 %v19867_v8, %v19884_v0  ;;  %v5207_v24 = vsub.f32 %v19871_v35, %v19887_v7  ;;  %v19891_v0 = vand.u32 4294901760, %v19875_v39  ;;  %v19892_v4 = vand.u32 4294901760, %v19876_v40  ;;  %v19898_v22 = vld [vmem:[#allocation99_spill] sm:$0xff]  ;;  %v19901_v34 = vld [vmem:[#allocation102_spill] sm:$0xff] }
 0x173   :  { %10819 = vmatpush1.bf16.msra.mxu1 %v19885_v61  ;;  %10053 = vmatprep.subr.bf16.mxu0 %v19886_v15  ;;  %v2521_v45 = vsub.f32 %v19872_v6, %v19888_v17  ;;  %v2533_v63 = vsub.f32 %v19873_v19, %v19889_v36  ;;  %v19893_v7 = vand.u32 4294901760, %v19877_v21  ;;  %v19894_v17 = vand.u32 4294901760, %v19878_v41 }
 0x174   :  { %10821 = vmatprep.subr.bf16.mxu1 %v19890_v33  ;;  %v5213_v15 = vsub.f32 %v19875_v39, %v19891_v0  ;;  %v5225_v61 = vsub.f32 %v19876_v40, %v19892_v4  ;;  %v19895_v36 = vand.u32 4294901760, %v19879_v55  ;;  %v19896_v19 = vand.u32 4294901760, %v19880_v18  ;;  %v19897_v39 = vld [vmem:[#allocation81_spill] sm:$0xff]  ;;  %v19899_v40 = vld [vmem:[#allocation103_spill] sm:$0xff] }
 0x175   :  { %v2527_v35 = vsub.f32 %v19877_v21, %v19893_v7  ;;  %v2539_v6 = vsub.f32 %v19878_v41, %v19894_v17  ;;  %v2504_v30 = vand.u32 4294901760, %v2503_v20  ;;  %v2516_v7 = vand.u32 4294901760, %v2515_v48  ;;  %v19900_v21 = vld [vmem:[#allocation101_spill] sm:$0xff]  ;;  %v19902_v41 = vld [vmem:[#allocation106_spill] sm:$0xff] }
 0x176   :  { %v5219_v33 = vsub.f32 %v19879_v55, %v19895_v36  ;;  %v5231_v0 = vsub.f32 %v19880_v18, %v19896_v19  ;;  %10055 = vmatpush1.bf16.msra.mxu0 %v19899_v40  ;;  %v5196_v36 = vand.u32 4294901760, %v5195_v13  ;;  %v5208_v55 = vand.u32 4294901760, %v5207_v24 }
 0x177   :  { %10823 = vmatpush1.bf16.msra.mxu1 %v19902_v41  ;;  %10057 = vmatprep.subr.bf16.mxu0 %v13442_v52  ;;  %v2522_v32 = vand.u32 4294901760, %v2521_v45  ;;  %v2534_v19 = vand.u32 4294901760, %v2533_v63  ;;  %v5214_v8 = vand.u32 4294901760, %v5213_v15  ;;  %v5226_v4 = vand.u32 4294901760, %v5225_v61  ;;  %v19910_v45 = vld [vmem:[#allocation105_spill] sm:$0xff] }
 0x178   :  { %10825 = vmatprep.subr.bf16.mxu1 %v13449_v50  ;;  %v2528_v18 = vand.u32 4294901760, %v2527_v35  ;;  %v2540_v40 = vand.u32 4294901760, %v2539_v6  ;;  %v5220_v20 = vand.u32 4294901760, %v5219_v33  ;;  %v5232_v48 = vand.u32 4294901760, %v5231_v0 }
 0x179   :  { %v19903_v12 = vand.u32 4294901760, %v19897_v39  ;;  %v19904_v41 = vand.u32 4294901760, %v19898_v22  ;;  %v19905_v24 = vand.u32 4294901760, %v13853_v11  ;;  %v19906_v61 = vand.u32 4294901760, %v13858_v54 }
 0x17a   :  { %10059 = vmatpush1.bf16.msra.mxu0 %v13457_v3  ;;  %v13999_v6 = vpack.c.bf16 %v2510_v51, %v2498_v59  ;;  %v19907_v33 = vand.u32 4294901760, %v19900_v21  ;;  %v19908_v63 = vand.u32 4294901760, %v19901_v34  ;;  %v14013_v11 = vpack.c.bf16 %v5202_v23, %v5190_v9  ;;  %v19909_v51 = vld [vmem:[#allocation104_spill] sm:$0xff] }
 0x17b   :  { %v13985_v17 = vsub.f32 %v19897_v39, %v19903_v12  ;;  %v13990_v13 = vsub.f32 %v19898_v22, %v19904_v41  ;;  %v13997_v15 = vpack.c.bf16 %v19906_v61, %v19905_v24  ;;  %10827 = vmatpush1.bf16.msra.mxu1 %v13465_v46  ;;  %10061 = vmatprep.subr.bf16.mxu0 %v13473_v37  ;;  %v18625_v35 = vand.u32 4294901760, %v19909_v51  ;;  %v19922_v37 = vld [vmem:[#allocation124_spill] sm:$0xff] }
 0x17c   :  { %v14004_v12 = vsub.f32 %v19900_v21, %v19907_v33  ;;  %v14009_v41 = vsub.f32 %v19901_v34, %v19908_v63  ;;  %v14015_v54 = vpack.c.bf16 %v2516_v7, %v2504_v30  ;;  %v18626_v59 = vand.u32 4294901760, %v19910_v45  ;;  %10829 = vmatprep.subr.bf16.mxu1 %v13483_v49  ;;  %v19914_v30 = vld [vmem:[#allocation116_spill] sm:$0xff] }
 0x17d   :  { %v14020_v0 = vpack.c.bf16 %v5208_v55, %v5196_v36  ;;  %v14022_v24 = vpack.c.bf16 %v2534_v19, %v2522_v32  ;;  %v14024_v61 = vpack.c.bf16 %v5226_v4, %v5214_v8  ;;  %v14026_v33 = vpack.c.bf16 %v2540_v40, %v2528_v18  ;;  %v19911_v32 = vld [vmem:[#allocation108_spill] sm:$0xff]  ;;  %v19912_v8 = vld [vmem:[#allocation110_spill] sm:$0xff]  ;;  %v19913_v55 = vld [vmem:[#allocation115_spill] sm:$0xff] }
 0x17e   :  { %v14028_v63 = vpack.c.bf16 %v5232_v48, %v5220_v20  ;;  %v18639_v9 = vand.u32 4294901760, %v13437_v47  ;;  %10063 = vmatpush1.bf16.msra.mxu0 %v13491_v14  ;;  %v14043_v40 = vsub.f32 %v19909_v51, %v18625_v35  ;;  %v14048_v18 = vsub.f32 %v19910_v45, %v18626_v59  ;;  %v19915_v4 = vld [vmem:[#allocation118_spill] sm:$0xff]  ;;  %v19916_v59 = vld [vmem:[#allocation119_spill] sm:$0xff]  ;;  %v19918_v14 = vld [vmem:[#allocation121_spill] sm:$0xff] }
 0x17f   :  { %10831 = vmatpush1.bf16.msra.mxu1 %v13502_v56  ;;  %10065 = vmatprep.subr.bf16.mxu0 %v13507_v31  ;;  %v19917_v56 = vld [vmem:[#allocation70_spill] sm:$0xff]  ;;  %v19919_v48 = vand.u32 4294901760, %v19911_v32  ;;  %v19920_v23 = vand.u32 4294901760, %v19912_v8  ;;  %v19923_v31 = vand.u32 4294901760, %v13447_v57  ;;  %v19931_v52 = vand.u32 4294901760, %v19918_v14  ;;  %v20037_v22 = vld [vmem:[#allocation176_spill] sm:$0xff] }
 0x180   :  { %10833 = vmatprep.subr.bf16.mxu1 %v13518_v25  ;;  %v5243_v36 = vsub.f32 %v13437_v47, %v18639_v9  ;;  %v19921_v25 = vld [vmem:[#allocation123_spill] sm:$0xff]  ;;  %v2552_v20 = vand.u32 4294901760, %v14043_v40  ;;  %v2564_v19 = vand.u32 4294901760, %v14048_v18  ;;  %v19925_v9 = vand.u32 4294901760, %v13453_v38  ;;  %v19991_v51 = vld [vmem:[#allocation42_spill] sm:$0xff] }
 0x181   :  { %v5255_v7 = vsub.f32 %v19911_v32, %v19919_v48  ;;  %v2569_v35 = vsub.f32 %v19912_v8, %v19920_v23  ;;  %v2581_v48 = vsub.f32 %v13447_v57, %v19923_v31  ;;  %v19927_v18 = vand.u32 4294901760, %v19914_v30  ;;  %v19984_v8 = vld [vmem:[#allocation154_spill] sm:$0xff]  ;;  %v19986_v32 = vld [vmem:[#allocation187_spill] sm:$0xff] }
 0x182   :  { %10067 = vmatpush1.bf16.msra.mxu0 %v13522_v1  ;;  %v19924_v1 = vand.u32 4294901760, %v13451_v29  ;;  %v5273_v49 = vsub.f32 %v13453_v38, %v19925_v9  ;;  %v19928_v31 = vand.u32 4294901760, %v19915_v4  ;;  %v5244_v3 = vand.u32 4294901760, %v5243_v36 }
 0x183   :  { %10835 = vmatpush1.bf16.msra.mxu1 %v13529_v43  ;;  %10069 = vmatprep.subr.bf16.mxu0 %v13537_v5  ;;  %v19926_v5 = vand.u32 4294901760, %v19913_v55  ;;  %v2587_v43 = vsub.f32 %v19914_v30, %v19927_v18  ;;  %v19930_v50 = vand.u32 4294901760, %v19917_v56  ;;  %v5256_v18 = vand.u32 4294901760, %v5255_v7  ;;  %v19936_v7 = vld [vmem:[#allocation158_spill] sm:$0xff] }
 0x184   :  { %v5261_v23 = vsub.f32 %v13451_v29, %v19924_v1  ;;  %10837 = vmatprep.subr.bf16.mxu1 %v13544_v27  ;;  %v5267_v46 = vsub.f32 %v19915_v4, %v19928_v31  ;;  %v19929_v1 = vand.u32 4294901760, %v19916_v59  ;;  %v2570_v30 = vand.u32 4294901760, %v2569_v35 }
 0x185   :  { %v2575_v40 = vsub.f32 %v19913_v55, %v19926_v5  ;;  %v2593_v9 = vsub.f32 %v19917_v56, %v19930_v50  ;;  %v2605_v5 = vsub.f32 %v19918_v14, %v19931_v52  ;;  %v19932_v55 = vand.u32 4294901760, %v19921_v25  ;;  %v19935_v14 = vld [vmem:[#allocation127_spill] sm:$0xff] }
 0x186   :  { %v5279_v27 = vsub.f32 %v19916_v59, %v19929_v1  ;;  %10071 = vmatpush1.bf16.msra.mxu0 %v13550_v44  ;;  %v19933_v31 = vand.u32 4294901760, %v19922_v37  ;;  %v2582_v50 = vand.u32 4294901760, %v2581_v48  ;;  %v5262_v56 = vand.u32 4294901760, %v5261_v23  ;;  %v19934_v59 = vld [vmem:[#allocation126_spill] sm:$0xff] }
 0x187   :  { %v5285_v36 = vsub.f32 %v19921_v25, %v19932_v55  ;;  %10839 = vmatpush1.bf16.msra.mxu1 %v13559_v62  ;;  %10073 = vmatprep.subr.bf16.mxu0 %v13566_v16  ;;  %v5274_v35 = vand.u32 4294901760, %v5273_v49  ;;  %v2576_v4 = vand.u32 4294901760, %v2575_v40  ;;  %v2588_v38 = vand.u32 4294901760, %v2587_v43  ;;  %v19941_v40 = vld [vmem:[#allocation75_spill] sm:$0xff] }
 0x188   :  { %v5297_v1 = vsub.f32 %v19922_v37, %v19933_v31  ;;  %10841 = vmatprep.subr.bf16.mxu1 %v19936_v7  ;;  %v5268_v55 = vand.u32 4294901760, %v5267_v46  ;;  %v5280_v25 = vand.u32 4294901760, %v5279_v27  ;;  %v2594_v29 = vand.u32 4294901760, %v2593_v9  ;;  %v19937_v31 = vld [vmem:[#allocation128_spill] sm:$0xff]  ;;  %v19940_v7 = vld [vmem:[#allocation130_spill] sm:$0xff] }
 0x189   :  { %v2606_v57 = vand.u32 4294901760, %v2605_v5  ;;  %v19938_v48 = vand.u32 4294901760, %v13985_v17  ;;  %v19939_v23 = vand.u32 4294901760, %v13990_v13  ;;  %v5286_v44 = vand.u32 4294901760, %v5285_v36  ;;  %v19942_v46 = vld [vmem:[#allocation164_spill] sm:$0xff] }
 0x18a   :  { %10075 = vmatpush1.bf16.msra.mxu0 %v13581_v10  ;;  %v5298_v16 = vand.u32 4294901760, %v5297_v1  ;;  %v19943_v43 = vand.u32 4294901760, %v14004_v12  ;;  %v19944_v27 = vand.u32 4294901760, %v14009_v41  ;;  %v19945_v17 = vand.u32 4294901760, %v19934_v59  ;;  %v19947_v1 = vld [vmem:[#allocation132_spill] sm:$0xff] }
 0x18b   :  { %v14122_v52 = vpack.c.bf16 %v19939_v23, %v19938_v48  ;;  %10843 = vmatpush1.bf16.msra.mxu1 %v19941_v40  ;;  %10077 = vmatprep.subr.bf16.mxu0 %v19942_v46  ;;  %v19946_v5 = vand.u32 4294901760, %v19935_v14  ;;  %v19948_v23 = vld [vmem:[#allocation167_spill] sm:$0xff]  ;;  %v14145_v49 = vpack.c.bf16 %v2564_v19, %v2552_v20  ;;  %v14147_v12 = vpack.c.bf16 %v5256_v18, %v5244_v3  ;;  %v19955_v18 = vld [vmem:[#allocation136_spill] sm:$0xff] }
 0x18c   :  { %v14131_v9 = vpack.c.bf16 %v19944_v27, %v19943_v43  ;;  %v14136_v13 = vsub.f32 %v19934_v59, %v19945_v17  ;;  %10845 = vmatprep.subr.bf16.mxu1 %v19948_v23  ;;  %v14149_v41 = vpack.c.bf16 %v2582_v50, %v2570_v30  ;;  %v14151_v43 = vpack.c.bf16 %v5274_v35, %v5262_v56  ;;  %v19956_v35 = vld [vmem:[#allocation177_spill] sm:$0xff]  ;;  %v19963_v40 = vld [vmem:[#allocation147_spill] sm:$0xff]  ;;  %v19969_v46 = vld [vmem:[#allocation32_spill] sm:$0xff] }
 0x18d   :  { %v14141_v36 = vsub.f32 %v19935_v14, %v19946_v5  ;;  %v14153_v27 = vpack.c.bf16 %v2588_v38, %v2576_v4  ;;  %v14155_v17 = vpack.c.bf16 %v5280_v25, %v5268_v55  ;;  %v14157_v37 = vpack.c.bf16 %v2606_v57, %v2594_v29  ;;  %v19951_v38 = vld [vmem:[#allocation133_spill] sm:$0xff]  ;;  %v19952_v25 = vld [vmem:[#allocation134_spill] sm:$0xff]  ;;  %v19973_v14 = vld [vmem:[#allocation55_spill] sm:$0xff] }
 0x18e   :  { %v19949_v5 = vand.u32 4294901760, %v19937_v31  ;;  %10079 = vmatpush1.bf16.msra.mxu0 %v13610_v28  ;;  %v14165_v19 = vpack.c.bf16 %v5298_v16, %v5286_v44  ;;  %v19950_v3 = vand.u32 4294901760, %v19940_v7  ;;  %v19953_v57 = vld [vmem:[#allocation174_spill] sm:$0xff]  ;;  %v2600_v29 = vand.u32 4294901760, %v14136_v13  ;;  %v19959_v30 = vld [vmem:[#allocation141_spill] sm:$0xff]  ;;  %v19961_v13 = vld [vmem:[#allocation144_spill] sm:$0xff] }
 0x18f   :  { %10847 = vmatpush1.bf16.msra.mxu1 %v13619_v42  ;;  %10081 = vmatprep.subr.bf16.mxu0 %v19953_v57  ;;  %v2612_v20 = vand.u32 4294901760, %v14141_v36  ;;  %v19954_v44 = vand.u32 4294901760, %v19947_v1  ;;  %v19957_v55 = vld [vmem:[#allocation138_spill] sm:$0xff]  ;;  %v19962_v36 = vld [vmem:[#allocation145_spill] sm:$0xff]  ;;  %v19966_v4 = vand.u32 4294901760, %v19951_v38  ;;  %v19967_v28 = vand.u32 4294901760, %v19952_v25 }
 0x190   :  { %v14162_v48 = vsub.f32 %v19937_v31, %v19949_v5  ;;  %v14170_v56 = vsub.f32 %v19940_v7, %v19950_v3  ;;  %10849 = vmatprep.subr.bf16.mxu1 %v19956_v35  ;;  %v19958_v3 = vld [vmem:[#allocation139_spill] sm:$0xff]  ;;  %v19960_v57 = vld [vmem:[#allocation142_spill] sm:$0xff]  ;;  %v19968_v35 = vld [vmem:[#allocation181_spill] sm:$0xff]  ;;  %v19970_v10 = vand.u32 4294901760, %v19955_v18  ;;  %v19978_v31 = vand.u32 4294901760, %v19961_v13 }
 0x191   :  { %v14181_v16 = vsub.f32 %v19947_v1, %v19954_v44  ;;  %v19964_v44 = vld [vmem:[#allocation148_spill] sm:$0xff]  ;;  %v19965_v1 = vld [vmem:[#allocation179_spill] sm:$0xff]  ;;  %v2629_v42 = vsub.f32 %v19951_v38, %v19966_v4  ;;  %v5309_v23 = vsub.f32 %v19952_v25, %v19967_v28  ;;  %v19974_v4 = vand.u32 4294901760, %v19957_v55 }
 0x192   :  { %10083 = vmatpush1.bf16.msra.mxu0 %v19965_v1  ;;  %v5292_v50 = vand.u32 4294901760, %v14162_v48  ;;  %v5304_v5 = vand.u32 4294901760, %v14170_v56  ;;  %v5321_v48 = vsub.f32 %v19955_v18, %v19970_v10  ;;  %v19971_v1 = vld [vmem:[#allocation150_spill] sm:$0xff]  ;;  %v19972_v7 = vld [vmem:[#allocation151_spill] sm:$0xff]  ;;  %v19977_v10 = vand.u32 4294901760, %v19960_v57 }
 0x193   :  { %10851 = vmatpush1.bf16.msra.mxu1 %v19968_v35  ;;  %10085 = vmatprep.subr.bf16.mxu0 %v19969_v46  ;;  %v2618_v62 = vand.u32 4294901760, %v14181_v16  ;;  %v2623_v28 = vsub.f32 %v19957_v55, %v19974_v4  ;;  %v19975_v35 = vand.u32 4294901760, %v19958_v3  ;;  %v19976_v16 = vand.u32 4294901760, %v19959_v30 }
 0x194   :  { %10853 = vmatprep.subr.bf16.mxu1 %v19973_v14  ;;  %v5327_v56 = vsub.f32 %v19960_v57, %v19977_v10  ;;  %v2641_v14 = vsub.f32 %v19961_v13, %v19978_v31  ;;  %v19979_v18 = vand.u32 4294901760, %v19962_v36  ;;  %v19980_v55 = vand.u32 4294901760, %v19963_v40  ;;  %v19983_v57 = vld [vmem:[#allocation153_spill] sm:$0xff]  ;;  %v19985_v13 = vld [vmem:[#allocation38_spill] sm:$0xff] }
 0x195   :  { %v2635_v46 = vsub.f32 %v19958_v3, %v19975_v35  ;;  %v5315_v25 = vsub.f32 %v19959_v30, %v19976_v16  ;;  %v19981_v3 = vand.u32 4294901760, %v19964_v44  ;;  %v19982_v30 = vld [vmem:[#allocation37_spill] sm:$0xff]  ;;  %v2630_v38 = vand.u32 4294901760, %v2629_v42 }
 0x196   :  { %v2653_v4 = vsub.f32 %v19962_v36, %v19979_v18  ;;  %v5333_v35 = vsub.f32 %v19963_v40, %v19980_v55  ;;  %10087 = vmatpush1.bf16.msra.mxu0 %v19982_v30  ;;  %v5310_v10 = vand.u32 4294901760, %v5309_v23  ;;  %v5322_v18 = vand.u32 4294901760, %v5321_v48  ;;  %v19989_v30 = vld [vmem:[#allocation156_spill] sm:$0xff]  ;;  %v19990_v23 = vld [vmem:[#allocation190_spill] sm:$0xff] }
 0x197   :  { %v5345_v16 = vsub.f32 %v19964_v44, %v19981_v3  ;;  %10855 = vmatpush1.bf16.msra.mxu1 %v19985_v13  ;;  %10089 = vmatprep.subr.bf16.mxu0 %v19986_v32  ;;  %v19987_v36 = vand.u32 4294901760, %v19971_v1  ;;  %v19988_v40 = vand.u32 4294901760, %v19972_v7  ;;  %v2624_v59 = vand.u32 4294901760, %v2623_v28  ;;  %v19994_v28 = vld [vmem:[#allocation157_spill] sm:$0xff] }
 0x198   :  { %10857 = vmatprep.subr.bf16.mxu1 %v19990_v23  ;;  %v2636_v44 = vand.u32 4294901760, %v2635_v46  ;;  %v5316_v31 = vand.u32 4294901760, %v5315_v25  ;;  %v5328_v47 = vand.u32 4294901760, %v5327_v56  ;;  %v2642_v13 = vand.u32 4294901760, %v2641_v14  ;;  %v19995_v25 = vld [vmem:[#allocation192_spill] sm:$0xff]  ;;  %v19996_v14 = vld [vmem:[#allocation45_spill] sm:$0xff] }
 0x199   :  { %v2647_v55 = vsub.f32 %v19971_v1, %v19987_v36  ;;  %v2659_v3 = vsub.f32 %v19972_v7, %v19988_v40  ;;  %v2654_v45 = vand.u32 4294901760, %v2653_v4  ;;  %v5334_v32 = vand.u32 4294901760, %v5333_v35  ;;  %v20023_v7 = vld [vmem:[#allocation68_spill] sm:$0xff] }
 0x19a   :  { %v5346_v48 = vand.u32 4294901760, %v5345_v16  ;;  %10091 = vmatpush1.bf16.msra.mxu0 %v19991_v51  ;;  %v14249_v34 = vpack.c.bf16 %v2612_v20, %v2600_v29  ;;  %v19992_v36 = vand.u32 4294901760, %v19983_v57  ;;  %v19993_v42 = vand.u32 4294901760, %v19984_v8  ;;  %v19998_v20 = vld [vmem:[#allocation159_spill] sm:$0xff] }
 0x19b   :  { %10859 = vmatpush1.bf16.msra.mxu1 %v19995_v25  ;;  %10093 = vmatprep.subr.bf16.mxu0 %v19996_v14  ;;  %v2648_v56 = vand.u32 4294901760, %v2647_v55  ;;  %v2660_v4 = vand.u32 4294901760, %v2659_v3  ;;  %v19997_v35 = vand.u32 4294901760, %v19989_v30  ;;  %v14267_v51 = vpack.c.bf16 %v5304_v5, %v5292_v50  ;;  %v20000_v25 = vld [vmem:[#allocation160_spill] sm:$0xff]  ;;  %v20015_v5 = vld [vmem:[#allocation166_spill] sm:$0xff] }
 0x19c   :  { %v5339_v40 = vsub.f32 %v19983_v57, %v19992_v36  ;;  %v5351_v23 = vsub.f32 %v19984_v8, %v19993_v42  ;;  %v19999_v36 = vld [vmem:[#allocation197_spill] sm:$0xff]  ;;  %v14269_v42 = vpack.c.bf16 %v2630_v38, %v2618_v62  ;;  %v14271_v46 = vpack.c.bf16 %v5322_v18, %v5310_v10  ;;  %v20006_v10 = vld [vmem:[#allocation200_spill] sm:$0xff]  ;;  %v20011_v18 = vld [vmem:[#allocation66_spill] sm:$0xff] }
 0x19d   :  { %v14263_v29 = vsub.f32 %v19989_v30, %v19997_v35  ;;  %10861 = vmatprep.subr.bf16.mxu1 %v19999_v36  ;;  %v18710_v8 = vand.u32 4294901760, %v20000_v25  ;;  %v14274_v14 = vpack.c.bf16 %v2636_v44, %v2624_v59  ;;  %v14276_v55 = vpack.c.bf16 %v5328_v47, %v5316_v31  ;;  %v20003_v30 = vld [vmem:[#allocation54_spill] sm:$0xff]  ;;  %v20005_v38 = vld [vmem:[#allocation73_spill] sm:$0xff]  ;;  %v20007_v59 = vld [vmem:[#allocation59_spill] sm:$0xff] }
 0x19e   :  { %v14278_v3 = vpack.c.bf16 %v2654_v45, %v2642_v13  ;;  %v14280_v35 = vpack.c.bf16 %v5346_v48, %v5334_v32  ;;  %10095 = vmatpush1.bf16.msra.mxu0 %v20003_v30  ;;  %v5340_v16 = vand.u32 4294901760, %v5339_v40  ;;  %v5352_v36 = vand.u32 4294901760, %v5351_v23  ;;  %v20010_v44 = vld [vmem:[#allocation161_spill] sm:$0xff]  ;;  %v20012_v48 = vld [vmem:[#allocation162_spill] sm:$0xff]  ;;  %v20017_v30 = vld [vmem:[#allocation48_spill] sm:$0xff] }
 0x19f   :  { %v20004_v50 = vand.u32 4294901760, %v19994_v28  ;;  %10863 = vmatpush1.bf16.msra.mxu1 %v20006_v10  ;;  %10097 = vmatprep.subr.bf16.mxu0 %v20007_v59  ;;  %v14291_v47 = vpack.c.bf16 %v2660_v4, %v2648_v56  ;;  %v2666_v45 = vand.u32 4294901760, %v14263_v29  ;;  %v20009_v32 = vand.u32 4294901760, %v19998_v20  ;;  %v20013_v56 = vld [vmem:[#allocation163_spill] sm:$0xff]  ;;  %v20016_v10 = vld [vmem:[#allocation46_spill] sm:$0xff]  ;;  %v20018_v31 = vld [vmem:[#allocation169_spill] sm:$0xff] }
 0x1a0   :  { %20001 = vst [vmem:[#allocation223_spill] sm:$0xff] %v14278_v3  ;;  %20002 = vst [vmem:[#allocation224_spill] sm:$0xff] %v14280_v35  ;;  %10865 = vmatprep.subr.bf16.mxu1 %v20011_v18  ;;  %v14304_v23 = vsub.f32 %v20000_v25, %v18710_v8  ;;  %v20019_v18 = vld [vmem:[#allocation207_spill] sm:$0xff]  ;;  %v14314_v57 = vpack.c.bf16 %v5352_v36, %v5340_v16  ;;  %v20021_v40 = vand.u32 4294901760, %v20005_v38  ;;  %v20022_v25 = vld [vmem:[#allocation170_spill] sm:$0xff]  ;;  %v20028_v29 = vand.u32 4294901760, %v20012_v48 }
 0x1a1   :  { %v14286_v62 = vsub.f32 %v19994_v28, %v20004_v50  ;;  %20008 = vst [vmem:[#allocation225_spill] sm:$0xff] %v14291_v47  ;;  %v14297_v13 = vsub.f32 %v19998_v20, %v20009_v32  ;;  %v20014_v50 = vld [vmem:[#allocation165_spill] sm:$0xff]  ;;  %v20024_v59 = vld [vmem:[#allocation79_spill] sm:$0xff]  ;;  %v20025_v28 = vand.u32 4294901760, %v20010_v44  ;;  %v20031_v36 = vand.u32 4294901760, %v20015_v5  ;;  %v20041_v35 = vld [vmem:[#allocation178_spill] sm:$0xff] }
 0x1a2   :  { %10099 = vmatpush1.bf16.msra.mxu0 %v20019_v18  ;;  %20020 = vst [vmem:[#allocation165_spill] sm:$0xff] %v14314_v57  ;;  %v2671_v4 = vsub.f32 %v20005_v38, %v20021_v40  ;;  %v20026_v16 = vld [vmem:[#allocation171_spill] sm:$0xff]  ;;  %v20027_v18 = vld [vmem:[#allocation173_spill] sm:$0xff]  ;;  %v5370_v40 = vand.u32 4294901760, %v14304_v23  ;;  %v20030_v38 = vand.u32 4294901760, %v20014_v50 }
 0x1a3   :  { %v2678_v8 = vand.u32 4294901760, %v14286_v62  ;;  %10867 = vmatpush1.bf16.msra.mxu1 %v20023_v7  ;;  %10101 = vmatprep.subr.bf16.mxu0 %v20024_v59  ;;  %v5358_v20 = vand.u32 4294901760, %v14297_v13  ;;  %v2683_v32 = vsub.f32 %v20010_v44, %v20025_v28  ;;  %v5363_v7 = vsub.f32 %v20012_v48, %v20028_v29  ;;  %v20040_v57 = vld [vmem:[#allocation27_spill] sm:$0xff] }
 0x1a4   :  { %10869 = vmatprep.subr.bf16.mxu1 %v13836_v26  ;;  %v20029_v59 = vand.u32 4294901760, %v20013_v56  ;;  %v2689_v28 = vsub.f32 %v20014_v50, %v20030_v38  ;;  %v2701_v62 = vsub.f32 %v20015_v5, %v20031_v36  ;;  %v20032_v26 = vand.u32 4294901760, %v20016_v10  ;;  %v20036_v36 = vld [vmem:[#allocation175_spill] sm:$0xff] }
 0x1a5   :  { %v20033_v44 = vand.u32 4294901760, %v20017_v30  ;;  %v20034_v48 = vand.u32 4294901760, %v20018_v31  ;;  %v20035_v38 = vand.u32 4294901760, %v20022_v25  ;;  %v20044_v47 = vand.u32 4294901760, %v20036_v36 }
 0x1a6   :  { %v5375_v13 = vsub.f32 %v20013_v56, %v20029_v59  ;;  %v5381_v23 = vsub.f32 %v20016_v10, %v20032_v26  ;;  %10103 = vmatpush1.bf16.msra.mxu0 %v13840_v2  ;;  %v2672_v56 = vand.u32 4294901760, %v2671_v4  ;;  %v2684_v26 = vand.u32 4294901760, %v2683_v32 }
 0x1a7   :  { %v5393_v29 = vsub.f32 %v20017_v30, %v20033_v44  ;;  %v2695_v59 = vsub.f32 %v20018_v31, %v20034_v48  ;;  %v2707_v1 = vsub.f32 %v20022_v25, %v20035_v38  ;;  %10871 = vmatpush1.bf16.msra.mxu1 %v13874_v53  ;;  %10105 = vmatprep.subr.bf16.mxu0 %v13878_v58  ;;  %v20038_v44 = vand.u32 4294901760, %v20026_v16  ;;  %v20042_v25 = vld [vmem:[#allocation221_spill] sm:$0xff] }
 0x1a8   :  { %v20039_v2 = vand.u32 4294901760, %v20027_v18  ;;  %10873 = vmatprep.subr.bf16.mxu1 %v13883_v60  ;;  %v5364_v38 = vand.u32 4294901760, %v5363_v7  ;;  %v5376_v21 = vand.u32 4294901760, %v5375_v13  ;;  %v2690_v39 = vand.u32 4294901760, %v2689_v28  ;;  %v20046_v28 = vld [vmem:[#allocation180_spill] sm:$0xff] }
 0x1a9   :  { %v5387_v48 = vsub.f32 %v20026_v16, %v20038_v44  ;;  %2448 = vmatmul.mubr.f32.vlgmr.msra.gmra.mrb[4].mxu0 %v20042_v25  ;;  %v2702_v58 = vand.u32 4294901760, %v2701_v62  ;;  %v5382_v32 = vand.u32 4294901760, %v5381_v23  ;;  %v5394_v31 = vand.u32 4294901760, %v5393_v29  ;;  %v20043_v44 = vld [vmem:[#allocation222_spill] sm:$0xff] }
 0x1aa   :  { %v5399_v4 = vsub.f32 %v20027_v18, %v20039_v2  ;;  %v2696_v3 = vand.u32 4294901760, %v2695_v59  ;;  %10107 = vmatpush1.bf16.msra.mxu0 %v20043_v44  ;;  %5140 = vmatmul.mubr.f32.vlgmr.msra.gmra.mrb[4].mxu1 %v20042_v25  ;;  %v2708_v2 = vand.u32 4294901760, %v2707_v1  ;;  %v2713_v60 = vsub.f32 %v20036_v36, %v20044_v47  ;;  %v2028_v18 = vld [vmem:[#allocation5 + $0x28] sm:$0xff] }
 0x1ab   :  { %v20045_v7 = vand.u32 4294901760, %v20037_v22  ;;  %v18731_v53 = vand.u32 4294901760, %v20046_v28  ;;  %10875 = vmatpush1.bf16.msra.mxu1 %v13997_v15  ;;  %10109 = vmatprep.subr.bf16.mxu0 %v13999_v6  ;;  %v14381_v62 = vpack.c.bf16 %v2678_v8, %v2666_v45  ;;  %v5388_v23 = vand.u32 4294901760, %v5387_v48 }
 0x1ac   :  { %v5400_v25 = vand.u32 4294901760, %v5399_v4  ;;  %v20047_v1 = vand.u32 4294901760, %v20040_v57  ;;  %10877 = vmatprep.subr.bf16.mxu1 %v14013_v11  ;;  %v14387_v47 = vpack.c.bf16 %v5370_v40, %v5358_v20  ;;  %v14389_v59 = vpack.c.bf16 %v2684_v26, %v2672_v56 }
 0x1ad   :  { %v2725_v13 = vsub.f32 %v20037_v22, %v20045_v7  ;;  %v20048_v44 = vand.u32 4294901760, %v20041_v35  ;;  %v20049_v7 = vld [vmem:[#allocation90_spill] sm:$0xff]  ;;  %v14395_v8 = vpack.c.bf16 %v5376_v21, %v5364_v38  ;;  %v14397_v45 = vpack.c.bf16 %v2702_v58, %v2690_v39 }
 0x1ae   :  { %v5405_v29 = vsub.f32 %v20040_v57, %v20047_v1  ;;  %v18730_v6 = vand.u32 4294901760, %v20049_v7  ;;  %v14399_v48 = vpack.c.bf16 %v5394_v31, %v5382_v32  ;;  %v14401_v4 = vand.u32 4294901760, %v2028_v18  ;;  %v2027_v1 = vld [vmem:[#allocation5 + $0x20] sm:$0xff]  ;;  %10111 = vmatpush1.bf16.msra.mxu0 %v14015_v54  ;;  %v20056_v58 = vld [vmem:[#allocation182_spill] sm:$0xff] }
 0x1af   :  { %v5417_v15 = vsub.f32 %v20041_v35, %v20048_v44  ;;  %v14404_v11 = vpack.c.bf16 %v2708_v2, %v2696_v3  ;;  %v2714_v20 = vand.u32 4294901760, %v2713_v60  ;;  %v2726_v56 = vand.u32 4294901760, %v2725_v13  ;;  %10879 = vmatpush1.bf16.msra.mxu1 %v14020_v0  ;;  %10113 = vmatprep.subr.bf16.mxu0 %v14022_v24  ;;  %v20054_v31 = vld [vmem:[#allocation29_spill] sm:$0xff]  ;;  %v20058_v24 = vld [vmem:[#allocation35_spill] sm:$0xff]  ;;  %v20059_v60 = vld [vmem:[#allocation36_spill] sm:$0xff] }
 0x1b0   :  { %20050 = vst [vmem:[#allocation166_spill] sm:$0xff] %v14399_v48  ;;  %20051 = vst [vmem:[#allocation46_spill] sm:$0xff] %v14401_v4  ;;  %v2719_v40 = vsub.f32 %v20046_v28, %v18731_v53  ;;  %v14411_v21 = vpack.c.bf16 %v5400_v25, %v5388_v23  ;;  %v5406_v39 = vand.u32 4294901760, %v5405_v29  ;;  %v18732_v26 = vand.u32 4294901760, %v20054_v31  ;;  %10881 = vmatprep.subr.bf16.mxu1 %v14024_v61  ;;  %v20060_v23 = vld [vmem:[#allocation183_spill] sm:$0xff]  ;;  %v20063_v29 = vld [vmem:[#allocation184_spill] sm:$0xff] }
 0x1b1   :  { %20052 = vst [vmem:[#allocation48_spill] sm:$0xff] %v14404_v11  ;;  %v14415_v38 = vsub.f32 %v2028_v18, %v14401_v4  ;;  %v5418_v54 = vand.u32 4294901760, %v5417_v15  ;;  %v2731_v3 = vsub.f32 %v20049_v7, %v18730_v6  ;;  %v18733_v32 = vand.u32 4294901760, %v20056_v58  ;;  %v20064_v15 = vld [vmem:[#allocation185_spill] sm:$0xff]  ;;  %v20066_v2 = vld [vmem:[#allocation186_spill] sm:$0xff] }
 0x1b2   :  { %20053 = vst [vmem:[#allocation171_spill] sm:$0xff] %v14411_v21  ;;  %v14422_v0 = vand.u32 4294901760, %v2027_v1  ;;  %10115 = vmatpush1.bf16.msra.mxu0 %v14026_v33  ;;  %v14431_v61 = vpack.c.bf16 %v2726_v56, %v2714_v20  ;;  %v18740_v44 = vand.u32 4294901760, %v20063_v29  ;;  %v2720_v13 = vand.u32 4294901760, %v2719_v40 }
 0x1b3   :  { %20055 = vst [vmem:[#allocation221_spill] sm:$0xff] %v14415_v38  ;;  %v14428_v18 = vand.u32 4294901760, %v14415_v38  ;;  %10883 = vmatpush1.bf16.msra.mxu1 %v14028_v63  ;;  %10117 = vmatprep.subr.bf16.mxu0 %v14122_v52  ;;  %v5411_v25 = vsub.f32 %v20054_v31, %v18732_v26  ;;  %v14447_v56 = vpack.c.bf16 %v5418_v54, %v5406_v39  ;;  %v20069_v40 = vand.u32 4294901760, %v20058_v24 }
 0x1b4   :  { %20057 = vst [vmem:[#allocation222_spill] sm:$0xff] %v14422_v0  ;;  %20062 = vst [vmem:[#allocation227_spill] sm:$0xff] %v14431_v61  ;;  %v14436_v53 = vsub.f32 %v2027_v1, %v14422_v0  ;;  %10885 = vmatprep.subr.bf16.mxu1 %v14131_v9  ;;  %v2732_v1 = vand.u32 4294901760, %v2731_v3  ;;  %v5423_v63 = vsub.f32 %v20056_v58, %v18733_v32  ;;  %v20070_v33 = vand.u32 4294901760, %v20059_v60 }
 0x1b5   :  { %20061 = vst [vmem:[#allocation226_spill] sm:$0xff] %v14428_v18  ;;  %v2456_v20 = vsub.f32 %v14415_v38, %v14428_v18  ;;  %20067 = vst [vmem:[#allocation229_spill] sm:$0xff] %v14447_v56  ;;  %v2737_v26 = vsub.f32 %v20058_v24, %v20069_v40  ;;  %v20071_v9 = vand.u32 4294901760, %v20060_v23  ;;  %v5441_v3 = vsub.f32 %v20063_v29, %v18740_v44  ;;  %v20073_v40 = vld [vmem:[#allocation39_spill] sm:$0xff]  ;;  %v20076_v44 = vld [vmem:[#allocation188_spill] sm:$0xff] }
 0x1b6   :  { %20065 = vst [vmem:[#allocation228_spill] sm:$0xff] %v14436_v53  ;;  %v14453_v52 = vand.u32 4294901760, %v14436_v53  ;;  %v2749_v6 = vsub.f32 %v20059_v60, %v20070_v33  ;;  %10119 = vmatpush1.bf16.msra.mxu0 %v14145_v49  ;;  %v20072_v32 = vand.u32 4294901760, %v20064_v15  ;;  %v20077_v56 = vld [vmem:[#allocation189_spill] sm:$0xff]  ;;  %v20078_v38 = vld [vmem:[#allocation191_spill] sm:$0xff]  ;;  %v5424_v11 = vand.u32 4294901760, %v5423_v63 }
 0x1b7   :  { %v5429_v39 = vsub.f32 %v20060_v23, %v20071_v9  ;;  %v2457_v54 = vand.u32 4294901760, %v2456_v20  ;;  %10887 = vmatpush1.bf16.msra.mxu1 %v14147_v12  ;;  %10121 = vmatprep.subr.bf16.mxu0 %v14149_v41  ;;  %v20074_v20 = vand.u32 4294901760, %v20066_v2  ;;  %v20075_v9 = vld [vmem:[#allocation40_spill] sm:$0xff]  ;;  %v18747_v21 = vand.u32 4294901760, %v20078_v38  ;;  %v20131_v24 = vld [vmem:[#allocation166_spill] sm:$0xff] }
 0x1b8   :  { %20068 = vst [vmem:[#allocation230_spill] sm:$0xff] %v14453_v52  ;;  %v2743_v18 = vsub.f32 %v20064_v15, %v20072_v32  ;;  %v2462_v33 = vsub.f32 %v14436_v53, %v14453_v52  ;;  %10889 = vmatprep.subr.bf16.mxu1 %v14151_v43  ;;  %v5412_v32 = vand.u32 4294901760, %v5411_v25  ;;  %v20079_v52 = vld [vmem:[#allocation41_spill] sm:$0xff]  ;;  %v14485_v41 = vpack.c.bf16 %v2732_v1, %v2720_v13 }
 0x1b9   :  { %v2755_v49 = vsub.f32 %v20066_v2, %v20074_v20  ;;  %v18748_v53 = vand.u32 4294901760, %v20079_v52  ;;  %2458 = vmatprep.mubr.f32.mxu0 %v2457_v54  ;;  %v2738_v48 = vand.u32 4294901760, %v2737_v26  ;;  %v2750_v20 = vand.u32 4294901760, %v2749_v6  ;;  %5150 = vmatprep.mubr.f32.mxu1 %v2457_v54  ;;  %v20125_v2 = vld [vmem:[#allocation218_spill] sm:$0xff] }
 0x1ba   :  { %v2463_v12 = vand.u32 4294901760, %v2462_v33  ;;  %10123 = vmatpush1.bf16.msra.mxu0 %v14153_v27  ;;  %v5430_v4 = vand.u32 4294901760, %v5429_v39  ;;  %v5442_v0 = vand.u32 4294901760, %v5441_v3  ;;  %v2744_v61 = vand.u32 4294901760, %v2743_v18  ;;  %v20084_v39 = vld [vmem:[#allocation43_spill] sm:$0xff]  ;;  %v20085_v3 = vld [vmem:[#allocation44_spill] sm:$0xff] }
 0x1bb   :  { %v20080_v43 = vand.u32 4294901760, %v20073_v40  ;;  %10891 = vmatpush1.bf16.msra.mxu1 %v14155_v17  ;;  %10125 = vmatprep.subr.bf16.mxu0 %v14157_v37  ;;  %v2756_v13 = vand.u32 4294901760, %v2755_v49  ;;  %v20081_v26 = vand.u32 4294901760, %v20075_v9  ;;  %v20082_v27 = vand.u32 4294901760, %v20076_v44  ;;  %v20092_v33 = vld [vmem:[#allocation195_spill] sm:$0xff] }
 0x1bc   :  { %5156 = vmatmul.mubr.f32.gmra.mrb[6].mxu1 %v2463_v12  ;;  %v20083_v1 = vand.u32 4294901760, %v20077_v56  ;;  %10893 = vmatprep.subr.bf16.mxu1 %v14165_v19  ;;  %v14514_v37 = vsub.f32 %v20078_v38, %v18747_v21  ;;  %v14519_v17 = vsub.f32 %v20079_v52, %v18748_v53  ;;  %v14523_v49 = vpack.c.bf16 %v5424_v11, %v5412_v32  ;;  %v20088_v19 = vld [vmem:[#allocation193_spill] sm:$0xff]  ;;  %v20090_v21 = vld [vmem:[#allocation204_spill] sm:$0xff]  ;;  %v20118_v38 = vld [vmem:[#allocation211_spill] sm:$0xff] }
 0x1bd   :  { %v14491_v25 = vsub.f32 %v20073_v40, %v20080_v43  ;;  %v14498_v6 = vsub.f32 %v20075_v9, %v20081_v26  ;;  %v14503_v18 = vsub.f32 %v20076_v44, %v20082_v27  ;;  %2464 = vmatmul.mubr.f32.gmra.mrb[6].mxu0 %v2463_v12  ;;  %v14525_v43 = vpack.c.bf16 %v2750_v20, %v2738_v48  ;;  %v20089_v27 = vld [vmem:[#allocation194_spill] sm:$0xff]  ;;  %v20093_v11 = vld [vmem:[#allocation196_spill] sm:$0xff]  ;;  %v20120_v44 = vld [vmem:[#allocation213_spill] sm:$0xff] }
 0x1be   :  { %v14508_v63 = vsub.f32 %v20077_v56, %v20083_v1  ;;  %20086 = vst [vmem:[#allocation231_spill] sm:$0xff] %v14523_v49  ;;  %v18749_v26 = vand.u32 4294901760, %v20088_v19  ;;  %2855 = vmatprep.mubr.f32.mxu0 %v20090_v21  ;;  %5547 = vmatprep.mubr.f32.mxu1 %v20090_v21  ;;  %v14532_v53 = vpack.c.bf16 %v5442_v0, %v5430_v4  ;;  %v18751_v12 = vand.u32 4294901760, %v20092_v33  ;;  %v20098_v0 = vld [vmem:[#allocation47_spill] sm:$0xff]  ;;  %v20099_v1 = vld [vmem:[#allocation50_spill] sm:$0xff]  ;;  %v20102_v21 = vld [vmem:[#allocation169_spill] sm:$0xff] }
 0x1bf   :  { %20087 = vst [vmem:[#allocation232_spill] sm:$0xff] %v14525_v43  ;;  %10127 = vmatpush1.bf16.msra.mxu0 %v14249_v34  ;;  %v18752_v32 = vand.u32 4294901760, %v20093_v11  ;;  %10895 = vmatpush1.bf16.msra.mxu1 %v14267_v51  ;;  %v14539_v48 = vpack.c.bf16 %v2756_v13, %v2744_v61  ;;  %v20095_v54 = vand.u32 4294901760, %v20084_v39  ;;  %v20105_v49 = vld [vmem:[#allocation224_spill] sm:$0xff]  ;;  %v20111_v43 = vld [vmem:[#allocation62_spill] sm:$0xff]  ;;  %v20122_v40 = vld [vmem:[#allocation215_spill] sm:$0xff] }
 0x1c0   :  { %20091 = vst [vmem:[#allocation233_spill] sm:$0xff] %v14532_v53  ;;  %10129 = vmatprep.subr.bf16.mxu0 %v14269_v42  ;;  %10897 = vmatprep.subr.bf16.mxu1 %v14271_v46  ;;  %v20096_v42 = vand.u32 4294901760, %v20085_v3  ;;  %v14560_v13 = vsub.f32 %v20088_v19, %v18749_v26  ;;  %v20097_v46 = vand.u32 4294901760, %v20089_v27  ;;  %v20104_v53 = vld [vmem:[#allocation173_spill] sm:$0xff]  ;;  %v20109_v34 = vld [vmem:[#allocation56_spill] sm:$0xff]  ;;  %v20112_v19 = vld [vmem:[#allocation202_spill] sm:$0xff] }
 0x1c1   :  { %20094 = vst [vmem:[#allocation234_spill] sm:$0xff] %v14539_v48  ;;  %v14550_v51 = vsub.f32 %v20084_v39, %v20095_v54  ;;  %v14578_v26 = vsub.f32 %v20093_v11, %v18752_v32  ;;  %v20100_v54 = vld [vmem:[#allocation223_spill] sm:$0xff]  ;;  %v20110_v48 = vld [vmem:[#allocation201_spill] sm:$0xff]  ;;  %v20119_v52 = vld [vmem:[#allocation212_spill] sm:$0xff]  ;;  %v20127_v20 = vand.u32 4294901760, %v20098_v0  ;;  %v20128_v29 = vand.u32 4294901760, %v20099_v1 }
 0x1c2   :  { %v14555_v61 = vsub.f32 %v20085_v3, %v20096_v42  ;;  %v14565_v4 = vsub.f32 %v20089_v27, %v20097_v46  ;;  %v14573_v42 = vsub.f32 %v20092_v33, %v18751_v12  ;;  %v20103_v12 = vld [vmem:[#allocation170_spill] sm:$0xff]  ;;  %v20106_v46 = vld [vmem:[#allocation225_spill] sm:$0xff]  ;;  %v20113_v33 = vld [vmem:[#allocation203_spill] sm:$0xff]  ;;  %v20132_v39 = vand.u32 4294901760, %v14491_v25 }
 0x1c3   :  { %10131 = vmatpush1.bf16.msra.mxu0 %v14274_v14  ;;  %10899 = vmatpush1.bf16.msra.mxu1 %v14276_v55  ;;  %v20101_v14 = vld [vmem:[#allocation198_spill] sm:$0xff]  ;;  %v20107_v55 = vld [vmem:[#allocation165_spill] sm:$0xff]  ;;  %v20117_v3 = vld [vmem:[#allocation71_spill] sm:$0xff]  ;;  %v2768_v11 = vand.u32 4294901760, %v14550_v51 }
 0x1c4   :  { %10133 = vmatprep.subr.bf16.mxu0 %v20100_v54  ;;  %10901 = vmatprep.subr.bf16.mxu1 %v20105_v49  ;;  %v20108_v49 = vld [vmem:[#allocation199_spill] sm:$0xff]  ;;  %v20116_v27 = vld [vmem:[#allocation209_spill] sm:$0xff]  ;;  %v20121_v56 = vld [vmem:[#allocation214_spill] sm:$0xff]  ;;  %v5489_v54 = vsub.f32 %v20099_v1, %v20128_v29  ;;  %v2780_v23 = vand.u32 4294901760, %v14555_v61  ;;  %v5460_v29 = vand.u32 4294901760, %v14560_v13  ;;  %v2798_v61 = vand.u32 4294901760, %v14578_v26 }
 0x1c5   :  { %v20123_v9 = vld [vmem:[#allocation87_spill] sm:$0xff]  ;;  %v20126_v32 = vld [vmem:[#allocation220_spill] sm:$0xff]  ;;  %v20130_v15 = vand.u32 4294901760, %v20108_v49  ;;  %v20134_v1 = vand.u32 4294901760, %v14503_v18  ;;  %v20138_v26 = vand.u32 4294901760, %v14519_v17  ;;  %v20143_v13 = vld [vmem:[#allocation229_spill] sm:$0xff] }
 0x1c6   :  { %v5490_v60 = vand.u32 4294901760, %v5489_v54  ;;  %v18781_v54 = vand.u32 4294901760, %v20113_v33 }
 0x1c7   :  { %10135 = vmatpush1.bf16.msra.mxu0 %v20106_v46  ;;  %10903 = vmatpush1.bf16.msra.mxu1 %v20107_v55  ;;  %v20114_v55 = vld [vmem:[#allocation206_spill] sm:$0xff]  ;;  %v5477_v46 = vsub.f32 %v20098_v0, %v20127_v20  ;;  %v2803_v20 = vsub.f32 %v20108_v49, %v20130_v15  ;;  %v20135_v15 = vand.u32 4294901760, %v14508_v63  ;;  %v20136_v49 = vld [vmem:[#allocation48_spill] sm:$0xff]  ;;  %v20141_v63 = vld [vmem:[#allocation227_spill] sm:$0xff] }
 0x1c8   :  { %10137 = vmatprep.subr.bf16.mxu0 %v14381_v62  ;;  %10905 = vmatprep.subr.bf16.mxu1 %v14387_v47  ;;  %v20115_v62 = vld [vmem:[#allocation208_spill] sm:$0xff]  ;;  %v20124_v47 = vld [vmem:[#allocation217_spill] sm:$0xff] }
 0x1c9   :  { %v10152_v0 = vpack.c.bf16 %v20135_v15, %v20134_v1  ;;  %v5478_v25 = vand.u32 4294901760, %v5477_v46  ;;  %v10154_v1 = vpack.c.bf16 %v2780_v23, %v2768_v11  ;;  %v2804_v15 = vand.u32 4294901760, %v2803_v20 }
 0x1ca   :  { %v20144_v23 = vand.u32 4294901760, %v20112_v19  ;;  %v18777_v20 = vand.u32 4294901760, %v20116_v27 }
 0x1cb   :  { %10139 = vmatpush1.bf16.msra.mxu0 %v14389_v59  ;;  %10907 = vmatpush1.bf16.msra.mxu1 %v14395_v8  ;;  %v20129_v59 = vand.u32 4294901760, %v20101_v14  ;;  %v5472_v8 = vand.u32 4294901760, %v14565_v4  ;;  %v20137_v4 = vand.u32 4294901760, %v14514_v37 }
 0x1cc   :  { %10141 = vmatprep.subr.bf16.mxu0 %v14397_v45  ;;  %10909 = vmatprep.subr.bf16.mxu1 %v20131_v24  ;;  %v2786_v45 = vand.u32 4294901760, %v14573_v42  ;;  %v18775_v24 = vand.u32 4294901760, %v20111_v43  ;;  %v2821_v11 = vsub.f32 %v20112_v19, %v20144_v23  ;;  %v18784_v23 = vand.u32 4294901760, %v20120_v44 }
 0x1cd   :  { %v2791_v51 = vsub.f32 %v20101_v14, %v20129_v59  ;;  %v20133_v59 = vand.u32 4294901760, %v14498_v6  ;;  %v10920_v42 = vpack.c.bf16 %v20138_v26, %v20137_v4  ;;  %v20139_v6 = vand.u32 4294901760, %v20109_v34 }
 0x1ce   :  { %v10922_v17 = vpack.c.bf16 %v5472_v8, %v5460_v29  ;;  %v10156_v46 = vpack.c.bf16 %v2798_v61, %v2786_v45  ;;  %v18776_v4 = vand.u32 4294901760, %v20114_v55  ;;  %v2809_v26 = vsub.f32 %v20111_v43, %v18775_v24  ;;  %v20147_v24 = vld [vmem:[#allocation233_spill] sm:$0xff] }
 0x1cf   :  { %v10918_v14 = vpack.c.bf16 %v20133_v59, %v20132_v39  ;;  %10143 = vmatpush1.bf16.msra.mxu0 %v20136_v49  ;;  %v5483_v18 = vsub.f32 %v20109_v34, %v20139_v6  ;;  %v20140_v39 = vld [vmem:[#allocation171_spill] sm:$0xff]  ;;  %v2792_v59 = vand.u32 4294901760, %v2791_v51  ;;  %v20142_v49 = vand.u32 4294901760, %v20110_v48  ;;  %v20146_v6 = vld [vmem:[#allocation232_spill] sm:$0xff] }
 0x1d0   :  { %10911 = vmatpush1.bf16.msra.mxu1 %v20140_v39  ;;  %10145 = vmatprep.subr.bf16.mxu0 %v20141_v63  ;;  %v18779_v51 = vand.u32 4294901760, %v20115_v62  ;;  %v10924_v29 = vpack.c.bf16 %v5490_v60, %v5478_v25  ;;  %v18778_v45 = vand.u32 4294901760, %v20117_v3  ;;  %v18780_v61 = vand.u32 4294901760, %v20118_v38 }
 0x1d1   :  { %v5495_v37 = vsub.f32 %v20110_v48, %v20142_v49  ;;  %10913 = vmatprep.subr.bf16.mxu1 %v20143_v13  ;;  %v5484_v8 = vand.u32 4294901760, %v5483_v18  ;;  %v20145_v13 = vld [vmem:[#allocation231_spill] sm:$0xff]  ;;  %v10158_v39 = vpack.c.bf16 %v2804_v15, %v2792_v59  ;;  %v18782_v49 = vand.u32 4294901760, %v20119_v52 }
 0x1d2   :  { %v5501_v60 = vsub.f32 %v20113_v33, %v18781_v54  ;;  %v18785_v25 = vand.u32 4294901760, %v20121_v56  ;;  %v18787_v18 = vand.u32 4294901760, %v20122_v40  ;;  %v2810_v59 = vand.u32 4294901760, %v2809_v26 }
 0x1d3   :  { %10147 = vmatpush1.bf16.msra.mxu0 %v14485_v41  ;;  %v5496_v63 = vand.u32 4294901760, %v5495_v37  ;;  %v5513_v41 = vsub.f32 %v20114_v55, %v18776_v4  ;;  %v2822_v15 = vand.u32 4294901760, %v2821_v11  ;;  %v2815_v37 = vsub.f32 %v20115_v62, %v18779_v51 }
 0x1d4   :  { %10915 = vmatpush1.bf16.msra.mxu1 %v20145_v13  ;;  %10149 = vmatprep.subr.bf16.mxu0 %v20146_v6  ;;  %v20148_v13 = vld [vmem:[#allocation234_spill] sm:$0xff]  ;;  %v5507_v6 = vsub.f32 %v20117_v3, %v18778_v45  ;;  %v5519_v4 = vsub.f32 %v20118_v38, %v18780_v61  ;;  %v5502_v61 = vand.u32 4294901760, %v5501_v60  ;;  %v20149_v51 = vand.u32 4294901760, %v20123_v9 }
 0x1d5   :  { %10917 = vmatprep.subr.bf16.mxu1 %v20147_v24  ;;  %v2827_v24 = vsub.f32 %v20116_v27, %v18777_v20  ;;  %v2833_v20 = vsub.f32 %v20119_v52, %v18782_v49  ;;  %v5514_v54 = vand.u32 4294901760, %v5513_v41  ;;  %v10926_v49 = vpack.c.bf16 %v5496_v63, %v5484_v8 }
 0x1d6   :  { %v10160_v11 = vpack.c.bf16 %v2822_v15, %v2810_v59  ;;  %v2816_v26 = vand.u32 4294901760, %v2815_v37  ;;  %v5520_v45 = vand.u32 4294901760, %v5519_v4  ;;  %v20150_v60 = vand.u32 4294901760, %v20124_v47 }
 0x1d7   :  { %10151 = vmatpush1.bf16.msra.mxu0 %v20148_v13  ;;  %v2845_v13 = vsub.f32 %v20120_v44, %v18784_v23  ;;  %v2828_v52 = vand.u32 4294901760, %v2827_v24  ;;  %v5508_v23 = vand.u32 4294901760, %v5507_v6  ;;  %v20151_v8 = vand.u32 4294901760, %v20125_v2 }
 0x1d8   :  { %10919 = vmatpush1.bf16.msra.mxu1 %v10918_v14  ;;  %10153 = vmatprep.subr.bf16.mxu0 %v10152_v0  ;;  %v5525_v14 = vsub.f32 %v20121_v56, %v18785_v25  ;;  %v5537_v0 = vsub.f32 %v20122_v40, %v18787_v18  ;;  %v2851_v41 = vsub.f32 %v20124_v47, %v20150_v60  ;;  %v2834_v25 = vand.u32 4294901760, %v2833_v20  ;;  %v20178_v18 = vld [vmem:[#allocation96_spill] sm:$0xff] }
 0x1d9   :  { %10921 = vmatprep.subr.bf16.mxu1 %v10920_v42  ;;  %v2839_v42 = vsub.f32 %v20123_v9, %v20149_v51  ;;  %v2846_v56 = vand.u32 4294901760, %v2845_v13  ;;  %v5531_v63 = vsub.f32 %v20125_v2, %v20151_v8  ;;  %v10928_v59 = vpack.c.bf16 %v5514_v54, %v5502_v61  ;;  %v20153_v54 = vld [vmem:[#allocation51_spill] sm:$0xff]  ;;  %v20154_v61 = vld [vmem:[#allocation52_spill] sm:$0xff] }
 0x1da   :  { %v5526_v15 = vand.u32 4294901760, %v5525_v14  ;;  %v5538_v51 = vand.u32 4294901760, %v5537_v0  ;;  %v10162_v37 = vpack.c.bf16 %v2828_v52, %v2816_v26  ;;  %v2852_v6 = vand.u32 4294901760, %v2851_v41  ;;  %v20155_v52 = vld [vmem:[#allocation57_spill] sm:$0xff] }
 0x1db   :  { %10155 = vmatpush1.bf16.msra.mxu0 %v10154_v1  ;;  %v20152_v1 = vand.u32 4294901760, %v20126_v32  ;;  %v2840_v24 = vand.u32 4294901760, %v2839_v42  ;;  %v5532_v20 = vand.u32 4294901760, %v5531_v63  ;;  %v10168_v14 = vpack.c.bf16 %v20154_v61, %v20153_v54  ;;  %v20161_v0 = vld [vmem:[#allocation77_spill] sm:$0xff]  ;;  %v20162_v42 = vld [vmem:[#allocation82_spill] sm:$0xff] }
 0x1dc   :  { %10923 = vmatpush1.bf16.msra.mxu1 %v10922_v17  ;;  %10157 = vmatprep.subr.bf16.mxu0 %v10156_v46  ;;  %v10930_v17 = vpack.c.bf16 %v5520_v45, %v5508_v23  ;;  %v10164_v46 = vpack.c.bf16 %v2846_v56, %v2834_v25  ;;  %v10932_v60 = vpack.c.bf16 %v5538_v51, %v5526_v15  ;;  %v20158_v45 = vld [vmem:[#allocation63_spill] sm:$0xff]  ;;  %v20159_v23 = vld [vmem:[#allocation65_spill] sm:$0xff]  ;;  %v20163_v63 = vld [vmem:[#allocation86_spill] sm:$0xff] }
 0x1dd   :  { %v5543_v4 = vsub.f32 %v20126_v32, %v20152_v1  ;;  %10925 = vmatprep.subr.bf16.mxu1 %v10924_v29  ;;  %v10166_v8 = vpack.c.bf16 %v2852_v6, %v2840_v24  ;;  %v20160_v25 = vld [vmem:[#allocation67_spill] sm:$0xff]  ;;  %v10172_v41 = vpack.c.bf16 %v20162_v42, %v20161_v0  ;;  %v20164_v1 = vld [vmem:[#allocation88_spill] sm:$0xff]  ;;  %v20166_v15 = vld [vmem:[#allocation89_spill] sm:$0xff] }
 0x1de   :  { %v20167_v51 = vld [vmem:[#allocation91_spill] sm:$0xff]  ;;  %v20168_v24 = vld [vmem:[#allocation24_spill] sm:$0xff]  ;;  %v20169_v6 = vld [vmem:[#allocation25_spill] sm:$0xff] }
 0x1df   :  { %10159 = vmatpush1.bf16.msra.mxu0 %v10158_v39  ;;  %v5544_v13 = vand.u32 4294901760, %v5543_v4  ;;  %v20156_v39 = vld [vmem:[#allocation58_spill] sm:$0xff]  ;;  %v10940_v4 = vpack.c.bf16 %v20164_v1, %v20163_v63 }
 0x1e0   :  { %10927 = vmatpush1.bf16.msra.mxu1 %v10926_v49  ;;  %10161 = vmatprep.subr.bf16.mxu0 %v10160_v11  ;;  %v10936_v26 = vpack.c.bf16 %v20156_v39, %v20155_v52  ;;  %v20157_v49 = vld [vmem:[#allocation61_spill] sm:$0xff]  ;;  %v10938_v11 = vpack.c.bf16 %v20160_v25, %v20159_v23 }
 0x1e1   :  { %10929 = vmatprep.subr.bf16.mxu1 %v10928_v59  ;;  %v10934_v29 = vpack.c.bf16 %v5544_v13, %v5532_v20  ;;  %v10170_v56 = vpack.c.bf16 %v20158_v45, %v20157_v49  ;;  %v20165_v59 = vld [vmem:[#allocation205_spill] sm:$0xff]  ;;  %v20171_v20 = vld [vmem:[#allocation30_spill] sm:$0xff] }
 0x1e3   :  { %10163 = vmatpush1.bf16.msra.mxu0 %v10162_v37  ;;  %v10174_v37 = vpack.c.bf16 %v20167_v51, %v20166_v15  ;;  %v20194_v51 = vld [vmem:[#allocation116_spill] sm:$0xff] }
 0x1e4   :  { %10931 = vmatpush1.bf16.msra.mxu1 %v10930_v17  ;;  %10165 = vmatprep.subr.bf16.mxu0 %v10164_v46  ;;  %v10942_v17 = vpack.c.bf16 %v20169_v6, %v20168_v24  ;;  %v20170_v46 = vld [vmem:[#allocation28_spill] sm:$0xff]  ;;  %v20183_v6 = vld [vmem:[#allocation102_spill] sm:$0xff] }
 0x1e5   :  { %10933 = vmatprep.subr.bf16.mxu1 %v10932_v60  ;;  %v10176_v13 = vpack.c.bf16 %v20171_v20, %v20170_v46  ;;  %v20172_v60 = vld [vmem:[#allocation33_spill] sm:$0xff]  ;;  %v20181_v46 = vld [vmem:[#allocation99_spill] sm:$0xff]  ;;  %v20184_v24 = vld [vmem:[#allocation74_spill] sm:$0xff] }
 0x1e6   :  { %v20180_v20 = vld [vmem:[#allocation81_spill] sm:$0xff] }
 0x1e7   :  { %10167 = vmatpush1.bf16.msra.mxu0 %v10166_v8  ;;  %v20173_v8 = vld [vmem:[#allocation34_spill] sm:$0xff] }
 0x1e8   :  { %10935 = vmatpush1.bf16.msra.mxu1 %v10934_v29  ;;  %10169 = vmatprep.subr.bf16.mxu0 %v10168_v14  ;;  %v10944_v29 = vpack.c.bf16 %v20173_v8, %v20172_v60  ;;  %v20174_v14 = vld [vmem:[#allocation46_spill] sm:$0xff]  ;;  %v10180_v8 = vpack.c.bf16 %v20181_v46, %v20180_v20  ;;  %v20182_v60 = vld [vmem:[#allocation101_spill] sm:$0xff] }
 0x1e9   :  { %10937 = vmatprep.subr.bf16.mxu1 %v10936_v26  ;;  %v20175_v26 = vld [vmem:[#allocation222_spill] sm:$0xff]  ;;  %v20192_v20 = vld [vmem:[#allocation113_spill] sm:$0xff] }
 0x1ea   :  { %2857 = vmatmul.mubr.f32.vlgmr.msra.gmra.mrb[4].mxu0 %v20165_v59 }
 0x1eb   :  { %10171 = vmatpush1.bf16.msra.mxu0 %v10170_v56  ;;  %5549 = vmatmul.mubr.f32.vlgmr.msra.gmra.mrb[4].mxu1 %v20165_v59  ;;  %v20176_v56 = vld [vmem:[#allocation93_spill] sm:$0xff] }
 0x1ec   :  { %10939 = vmatpush1.bf16.msra.mxu1 %v10938_v11  ;;  %10173 = vmatprep.subr.bf16.mxu0 %v10172_v41  ;;  %v20177_v11 = vld [vmem:[#allocation94_spill] sm:$0xff]  ;;  %v20179_v59 = vld [vmem:[#allocation97_spill] sm:$0xff] }
 0x1ed   :  { %10941 = vmatprep.subr.bf16.mxu1 %v10940_v4  ;;  %2863 = vmatprep.mubr.f32.mxu0 %v20174_v14  ;;  %v10178_v41 = vpack.c.bf16 %v20177_v11, %v20176_v56  ;;  %v10946_v4 = vpack.c.bf16 %v20179_v59, %v20178_v18  ;;  %v20186_v11 = vld [vmem:[#allocation105_spill] sm:$0xff]  ;;  %v20189_v18 = vld [vmem:[#allocation110_spill] sm:$0xff]  ;;  %v20190_v56 = vld [vmem:[#allocation92_spill] sm:$0xff] }
 0x1ee   :  { %5555 = vmatprep.mubr.f32.mxu1 %v20174_v14  ;;  %2865 = vmatmul.mubr.f32.gmra.mrb[6].mxu0 %v20175_v26  ;;  %v10948_v14 = vpack.c.bf16 %v20183_v6, %v20182_v60  ;;  %v10184_v46 = vpack.c.bf16 %v20190_v56, %v20189_v18  ;;  %v20193_v60 = vld [vmem:[#allocation115_spill] sm:$0xff] }
 0x1ef   :  { %10175 = vmatpush1.bf16.msra.mxu0 %v10174_v37  ;;  %5557 = vmatmul.mubr.f32.gmra.mrb[6].mxu1 %v20175_v26  ;;  %v20185_v37 = vld [vmem:[#allocation104_spill] sm:$0xff]  ;;  %v20202_v18 = vld [vmem:[#allocation127_spill] sm:$0xff] }
 0x1f0   :  { %10943 = vmatpush1.bf16.msra.mxu1 %v10942_v17  ;;  %10177 = vmatprep.subr.bf16.mxu0 %v10176_v13  ;;  %v10182_v26 = vpack.c.bf16 %v20186_v11, %v20185_v37  ;;  %v20187_v17 = vld [vmem:[#allocation107_spill] sm:$0xff]  ;;  %v20188_v13 = vld [vmem:[#allocation108_spill] sm:$0xff]  ;;  %v20198_v37 = vld [vmem:[#allocation121_spill] sm:$0xff] }
 0x1f1   :  { %10945 = vmatprep.subr.bf16.mxu1 %v10944_v29  ;;  %3065 = vmatprep.mubr.f32.mxu0 %v20184_v24  ;;  %v10950_v59 = vpack.c.bf16 %v20188_v13, %v20187_v17  ;;  %v20191_v29 = vld [vmem:[#allocation112_spill] sm:$0xff]  ;;  %v20196_v11 = vld [vmem:[#allocation119_spill] sm:$0xff] }
 0x1f2   :  { %5757 = vmatprep.mubr.f32.mxu1 %v20184_v24  ;;  %v10952_v6 = vpack.c.bf16 %v20192_v20, %v20191_v29  ;;  %v10186_v24 = vpack.c.bf16 %v20194_v51, %v20193_v60  ;;  %v20199_v13 = vld [vmem:[#allocation123_spill] sm:$0xff]  ;;  %v20200_v17 = vld [vmem:[#allocation124_spill] sm:$0xff]  ;;  %v20204_v51 = vld [vmem:[#allocation130_spill] sm:$0xff] }
 0x1f3   :  { %10179 = vmatpush1.bf16.msra.mxu0 %v10178_v41  ;;  %v20195_v41 = vld [vmem:[#allocation118_spill] sm:$0xff]  ;;  %v10956_v56 = vpack.c.bf16 %v20200_v17, %v20199_v13  ;;  %v20206_v60 = vld [vmem:[#allocation133_spill] sm:$0xff] }
 0x1f4   :  { %10947 = vmatpush1.bf16.msra.mxu1 %v10946_v4  ;;  %10181 = vmatprep.subr.bf16.mxu0 %v10180_v8  ;;  %v10954_v4 = vpack.c.bf16 %v20196_v11, %v20195_v41  ;;  %v20197_v8 = vld [vmem:[#allocation70_spill] sm:$0xff]  ;;  %v20208_v41 = vld [vmem:[#allocation136_spill] sm:$0xff] }
 0x1f5   :  { %10949 = vmatprep.subr.bf16.mxu1 %v10948_v14  ;;  %v10188_v15 = vpack.c.bf16 %v20198_v37, %v20197_v8  ;;  %v20201_v14 = vld [vmem:[#allocation126_spill] sm:$0xff]  ;;  %v20210_v8 = vld [vmem:[#allocation139_spill] sm:$0xff] }
 0x1f6   :  { %v10190_v20 = vpack.c.bf16 %v20202_v18, %v20201_v14  ;;  %v20207_v11 = vld [vmem:[#allocation134_spill] sm:$0xff]  ;;  %v20214_v14 = vld [vmem:[#allocation145_spill] sm:$0xff] }
 0x1f7   :  { %10183 = vmatpush1.bf16.msra.mxu0 %v10182_v26  ;;  %v20203_v26 = vld [vmem:[#allocation128_spill] sm:$0xff]  ;;  %v10960_v37 = vpack.c.bf16 %v20208_v41, %v20207_v11  ;;  %v20212_v18 = vld [vmem:[#allocation142_spill] sm:$0xff] }
 0x1f8   :  { %10951 = vmatpush1.bf16.msra.mxu1 %v10950_v59  ;;  %10185 = vmatprep.subr.bf16.mxu0 %v10184_v46  ;;  %v10958_v59 = vpack.c.bf16 %v20204_v51, %v20203_v26  ;;  %v20205_v46 = vld [vmem:[#allocation132_spill] sm:$0xff]  ;;  %v20215_v51 = vld [vmem:[#allocation147_spill] sm:$0xff] }
 0x1f9   :  { %10953 = vmatprep.subr.bf16.mxu1 %v10952_v6  ;;  %v10192_v29 = vpack.c.bf16 %v20206_v60, %v20205_v46  ;;  %v20209_v6 = vld [vmem:[#allocation138_spill] sm:$0xff]  ;;  %v20216_v26 = vld [vmem:[#allocation148_spill] sm:$0xff]  ;;  %v20218_v46 = vld [vmem:[#allocation151_spill] sm:$0xff] }
 0x1fa   :  { %v10194_v17 = vpack.c.bf16 %v20210_v8, %v20209_v6  ;;  %v10964_v60 = vpack.c.bf16 %v20216_v26, %v20215_v51  ;;  %v20220_v8 = vld [vmem:[#allocation154_spill] sm:$0xff]  ;;  %v20222_v6 = vld [vmem:[#allocation157_spill] sm:$0xff] }
 0x1fb   :  { %10187 = vmatpush1.bf16.msra.mxu0 %v10186_v24  ;;  %v20211_v24 = vld [vmem:[#allocation141_spill] sm:$0xff] }
 0x1fc   :  { %10955 = vmatpush1.bf16.msra.mxu1 %v10954_v4  ;;  %10189 = vmatprep.subr.bf16.mxu0 %v10188_v15  ;;  %v10962_v4 = vpack.c.bf16 %v20212_v18, %v20211_v24  ;;  %v20213_v15 = vld [vmem:[#allocation144_spill] sm:$0xff]  ;;  %v20223_v18 = vld [vmem:[#allocation159_spill] sm:$0xff] }
 0x1fd   :  { %10957 = vmatprep.subr.bf16.mxu1 %v10956_v56  ;;  %v10196_v13 = vpack.c.bf16 %v20214_v14, %v20213_v15  ;;  %v20217_v56 = vld [vmem:[#allocation150_spill] sm:$0xff]  ;;  %v20224_v24 = vld [vmem:[#allocation160_spill] sm:$0xff]  ;;  %v20226_v15 = vld [vmem:[#allocation161_spill] sm:$0xff] }
 0x1fe   :  { %v10198_v41 = vpack.c.bf16 %v20218_v46, %v20217_v56  ;;  %v10968_v14 = vpack.c.bf16 %v20224_v24, %v20223_v18  ;;  %v20228_v46 = vld [vmem:[#allocation163_spill] sm:$0xff] }
 0x1ff   :  { %10191 = vmatpush1.bf16.msra.mxu0 %v10190_v20  ;;  %v20219_v20 = vld [vmem:[#allocation153_spill] sm:$0xff] }
 0x200   :  { %10959 = vmatpush1.bf16.msra.mxu1 %v10958_v59  ;;  %10193 = vmatprep.subr.bf16.mxu0 %v10192_v29  ;;  %v10966_v59 = vpack.c.bf16 %v20220_v8, %v20219_v20  ;;  %v20221_v29 = vld [vmem:[#allocation156_spill] sm:$0xff] }
 0x201   :  { %10961 = vmatprep.subr.bf16.mxu1 %v10960_v37  ;;  %v10200_v11 = vpack.c.bf16 %v20222_v6, %v20221_v29  ;;  %v20225_v37 = vld [vmem:[#allocation73_spill] sm:$0xff] }
 0x202   :  { %v10202_v26 = vpack.c.bf16 %v20226_v15, %v20225_v37 }
 0x203   :  { %10195 = vmatpush1.bf16.msra.mxu0 %v10194_v17  ;;  %v20227_v17 = vld [vmem:[#allocation162_spill] sm:$0xff] }
 0x204   :  { %10963 = vmatpush1.bf16.msra.mxu1 %v10962_v4  ;;  %10197 = vmatprep.subr.bf16.mxu0 %v10196_v13  ;;  %v10970_v4 = vpack.c.bf16 %v20228_v46, %v20227_v17  ;;  %v20229_v13 = vpack.c.bf16 %v20015_v5, %v20014_v50 }
 0x205   :  { %10965 = vmatprep.subr.bf16.mxu1 %v10964_v60  ;;  %v20230_v60 = vpack.c.bf16 %v20017_v30, %v20016_v10 }
 0x207   :  { %10199 = vmatpush1.bf16.msra.mxu0 %v10198_v41  ;;  %v20231_v41 = vpack.c.bf16 %v20103_v12, %v20102_v21 }
 0x208   :  { %10967 = vmatpush1.bf16.msra.mxu1 %v10966_v59  ;;  %10201 = vmatprep.subr.bf16.mxu0 %v10200_v11  ;;  %v20232_v11 = vpack.c.bf16 %v20104_v53, %v20026_v16  ;;  %v20235_v59 = vpack.c.bf16 %v20049_v7, %v20046_v28  ;;  %v20241_v53 = vld [vmem:[#allocation183_spill] sm:$0xff]  ;;  %v20250_v28 = vld [vmem:[#allocation188_spill] sm:$0xff] }
 0x209   :  { %10969 = vmatprep.subr.bf16.mxu1 %v10968_v14  ;;  %v20233_v14 = vpack.c.bf16 %v20037_v22, %v20036_v36  ;;  %v20244_v36 = vld [vmem:[#allocation185_spill] sm:$0xff] }
 0x20b   :  { %10203 = vmatpush1.bf16.msra.mxu0 %v10202_v26  ;;  %v20234_v26 = vpack.c.bf16 %v20041_v35, %v20040_v57  ;;  %v20247_v57 = vld [vmem:[#allocation39_spill] sm:$0xff] }
 0x20c   :  { %10971 = vmatpush1.bf16.msra.mxu1 %v10970_v4  ;;  %10205 = vmatprep.subr.bf16.mxu0 %v20229_v13  ;;  %v20236_v4 = vpack.c.bf16 %v20056_v58, %v20054_v31  ;;  %v20237_v13 = vld [vmem:[#allocation36_spill] sm:$0xff]  ;;  %v20253_v31 = vld [vmem:[#allocation191_spill] sm:$0xff] }
 0x20d   :  { %10973 = vmatprep.subr.bf16.mxu1 %v20230_v60  ;;  %v20238_v60 = vld [vmem:[#allocation35_spill] sm:$0xff] }
 0x20f   :  { %10207 = vmatpush1.bf16.msra.mxu0 %v20231_v41  ;;  %v20239_v41 = vpack.c.bf16 %v20237_v13, %v20238_v60  ;;  %v20256_v60 = vld [vmem:[#allocation43_spill] sm:$0xff] }
 0x210   :  { %10975 = vmatpush1.bf16.msra.mxu1 %v20232_v11  ;;  %10209 = vmatprep.subr.bf16.mxu0 %v20233_v14  ;;  %v20240_v11 = vld [vmem:[#allocation184_spill] sm:$0xff]  ;;  %v20243_v14 = vld [vmem:[#allocation186_spill] sm:$0xff] }
 0x211   :  { %10977 = vmatprep.subr.bf16.mxu1 %v20234_v26  ;;  %v20242_v22 = vpack.c.bf16 %v20240_v11, %v20241_v53  ;;  %v20245_v35 = vpack.c.bf16 %v20243_v14, %v20244_v36  ;;  %v20246_v26 = vld [vmem:[#allocation40_spill] sm:$0xff]  ;;  %v20259_v53 = vld [vmem:[#allocation193_spill] sm:$0xff]  ;;  %v20262_v36 = vld [vmem:[#allocation195_spill] sm:$0xff] }
 0x212   :  { %v20248_v7 = vpack.c.bf16 %v20246_v26, %v20247_v57  ;;  %v20265_v57 = vld [vmem:[#allocation47_spill] sm:$0xff] }
 0x213   :  { %10211 = vmatpush1.bf16.msra.mxu0 %v20235_v59  ;;  %v20249_v59 = vld [vmem:[#allocation189_spill] sm:$0xff] }
 0x214   :  { %10979 = vmatpush1.bf16.msra.mxu1 %v20236_v4  ;;  %10213 = vmatprep.subr.bf16.mxu0 %v20239_v41  ;;  %v20251_v58 = vpack.c.bf16 %v20249_v59, %v20250_v28  ;;  %v20252_v4 = vld [vmem:[#allocation41_spill] sm:$0xff]  ;;  %v20255_v41 = vld [vmem:[#allocation44_spill] sm:$0xff]  ;;  %v20268_v28 = vld [vmem:[#allocation198_spill] sm:$0xff] }
 0x215   :  { %10981 = vmatprep.subr.bf16.mxu1 %v20242_v22  ;;  %v20254_v13 = vpack.c.bf16 %v20252_v4, %v20253_v31  ;;  %v20257_v11 = vpack.c.bf16 %v20255_v41, %v20256_v60  ;;  %v20258_v22 = vld [vmem:[#allocation194_spill] sm:$0xff] }
 0x216   :  { %v20260_v14 = vpack.c.bf16 %v20258_v22, %v20259_v53 }
 0x217   :  { %10215 = vmatpush1.bf16.msra.mxu0 %v20245_v35  ;;  %v20261_v35 = vld [vmem:[#allocation196_spill] sm:$0xff] }
 0x218   :  { %10983 = vmatpush1.bf16.msra.mxu1 %v20248_v7  ;;  %10217 = vmatprep.subr.bf16.mxu0 %v20251_v58  ;;  %v20263_v26 = vpack.c.bf16 %v20261_v35, %v20262_v36  ;;  %v20264_v7 = vld [vmem:[#allocation50_spill] sm:$0xff]  ;;  %v20267_v58 = vld [vmem:[#allocation199_spill] sm:$0xff] }
 0x219   :  { %10985 = vmatprep.subr.bf16.mxu1 %v20254_v13  ;;  %v20266_v59 = vpack.c.bf16 %v20264_v7, %v20265_v57  ;;  %v20269_v4 = vpack.c.bf16 %v20267_v58, %v20268_v28  ;;  %v20270_v13 = vpack.c.bf16 %v20110_v48, %v20109_v34 }
 0x21b   :  { %10219 = vmatpush1.bf16.msra.mxu0 %v20257_v11  ;;  %v20271_v11 = vpack.c.bf16 %v20112_v19, %v20111_v43  ;;  %v20315_v43 = vld [vmem:[#allocation137_spill] sm:$0xff] }
 0x21c   :  { %10987 = vmatpush1.bf16.msra.mxu1 %v20260_v14  ;;  %10221 = vmatprep.subr.bf16.mxu0 %v20263_v26  ;;  %v20272_v14 = vpack.c.bf16 %v20114_v55, %v20113_v33  ;;  %v20273_v26 = vpack.c.bf16 %v20116_v27, %v20115_v62 }
 0x21d   :  { %10989 = vmatprep.subr.bf16.mxu1 %v20266_v59  ;;  %v20274_v59 = vpack.c.bf16 %v20118_v38, %v20117_v3  ;;  %v20282_v38 = vld [vmem:[#allocation53_spill] sm:$0xff]  ;;  %v20309_v3 = vld [vmem:[#allocation120_spill] sm:$0xff] }
 0x21f   :  { %10223 = vmatpush1.bf16.msra.mxu0 %v20269_v4  ;;  %v20275_v4 = vld [vmem:[#allocation212_spill] sm:$0xff] }
 0x220   :  { %10991 = vmatpush1.bf16.msra.mxu1 %v20270_v13  ;;  %10225 = vmatprep.subr.bf16.mxu0 %v20271_v11  ;;  %v20276_v48 = vpack.c.bf16 %v20120_v44, %v20275_v4  ;;  %v20277_v13 = vld [vmem:[#allocation214_spill] sm:$0xff]  ;;  %v20279_v11 = vpack.c.bf16 %v20124_v47, %v20123_v9  ;;  %v20284_v44 = vld [vmem:[#allocation60_spill] sm:$0xff]  ;;  %v20287_v47 = vld [vmem:[#allocation83_spill] sm:$0xff] }
 0x221   :  { %10993 = vmatprep.subr.bf16.mxu1 %v20272_v14  ;;  %v20278_v19 = vpack.c.bf16 %v20122_v40, %v20277_v13  ;;  %v20280_v14 = vpack.c.bf16 %v20126_v32, %v20125_v2  ;;  %v187_v32 = vlaneseq  ;;  %v20297_v2 = vld [vmem:[#allocation98_spill] sm:$0xff]  ;;  %v20308_v13 = vld [vmem:[#allocation117_spill] sm:$0xff] }
 0x222   :  { %v20307_v9 = vld [vmem:[#allocation114_spill] sm:$0xff] }
 0x223   :  { %10227 = vmatpush1.bf16.msra.mxu0 %v20273_v26  ;;  %v20281_v26 = vld [vmem:[#allocation49_spill] sm:$0xff] }
 0x224   :  { %10995 = vmatpush1.bf16.msra.mxu1 %v20274_v59  ;;  %10229 = vmatprep.subr.bf16.mxu0 %v20276_v48  ;;  %v20283_v59 = vld [vmem:[#allocation210_spill] sm:$0xff]  ;;  %v20285_v48 = vld [vmem:[#allocation64_spill] sm:$0xff] }
 0x225   :  { %10997 = vmatprep.subr.bf16.mxu1 %v20278_v19  ;;  %v20286_v19 = vld [vmem:[#allocation76_spill] sm:$0xff] }
 0x227   :  { %10231 = vmatpush1.bf16.msra.mxu0 %v20279_v11  ;;  %v20288_v11 = vld [vmem:[#allocation221_spill] sm:$0xff] }
 0x228   :  { %10999 = vmatpush1.bf16.msra.mxu1 %v20280_v14  ;;  %10233 = vmatprep.subr.bf16.mxu0 %v20281_v26  ;;  %v20289_v14 = vld [vmem:[#allocation228_spill] sm:$0xff]  ;;  %v20295_v26 = vld [vmem:[#allocation78_spill] sm:$0xff] }
 0x229   :  { %11001 = vmatprep.subr.bf16.mxu1 %v20282_v38  ;;  %v20290_v38 = vld [vmem:[#allocation23_spill] sm:$0xff] }
 0x22a   :  { %3068 = vmatmul.mubr.f32.vlgmr.msra.gmra.mrb[4].mxu0 %v20283_v59 }
 0x22b   :  { %10235 = vmatpush1.bf16.msra.mxu0 %v20284_v44  ;;  %5760 = vmatmul.mubr.f32.vlgmr.msra.gmra.mrb[4].mxu1 %v20283_v59  ;;  %v20291_v44 = vld [vmem:[#allocation69_spill] sm:$0xff]  ;;  %v20292_v59 = vld [vmem:[#allocation26_spill] sm:$0xff] }
 0x22c   :  { %11003 = vmatpush1.bf16.msra.mxu1 %v20285_v48  ;;  %10237 = vmatprep.subr.bf16.mxu0 %v20286_v19  ;;  %v20293_v48 = vld [vmem:[#allocation31_spill] sm:$0xff]  ;;  %v20294_v19 = vld [vmem:[#allocation80_spill] sm:$0xff] }
 0x22d   :  { %11005 = vmatprep.subr.bf16.mxu1 %v20287_v47  ;;  %3075 = vmatprep.mubr.f32.mxu0 %v20288_v11  ;;  %v188_v47 = vshrl.u32 %v187_v32, 7 }
 0x22e   :  { %5767 = vmatprep.mubr.f32.mxu1 %v20288_v11  ;;  %3078 = vmatmul.mubr.f32.gmra.mrb[6].mxu0 %v20289_v14  ;;  %v20296_v11 = vld [vmem:[#allocation95_spill] sm:$0xff] }
 0x22f   :  { %10239 = vmatpush1.bf16.msra.mxu0 %v20290_v38  ;;  %5770 = vmatmul.mubr.f32.gmra.mrb[6].mxu1 %v20289_v14  ;;  %v20298_v38 = vld [vmem:[#allocation100_spill] sm:$0xff]  ;;  %v14946_v14 = vsub.s32 0, %v188_v47  ;;  %v14954_v32 = vsub.s32 1, %v188_v47 }
 0x230   :  { %11007 = vmatpush1.bf16.msra.mxu1 %v20291_v44  ;;  %10241 = vmatprep.subr.bf16.mxu0 %v20292_v59  ;;  %v20300_v44 = vld [vmem:[#allocation103_spill] sm:$0xff]  ;;  %v14952_v59 = vsub.s32 2, %v188_v47 }
 0x231   :  { %11009 = vmatprep.subr.bf16.mxu1 %v20293_v48  ;;  %3215 = vmatprep.mubr.f32.mxu0 %v20294_v19  ;;  %20299 = vst [vmem:[#allocation223_spill] sm:$0xff] %v14946_v14  ;;  %v185_v48 = vld [vmem:[%s18213_s6] sm:$0xf]  ;;  %20302 = vst [vmem:[#allocation170_spill] sm:$0xff] %v14954_v32 }
 0x232   :  { %5907 = vmatprep.mubr.f32.mxu1 %v20294_v19  ;;  %20301 = vst [vmem:[#allocation169_spill] sm:$0xff] %v14952_v59  ;;  %v20303_v19 = vld [vmem:[#allocation106_spill] sm:$0xff]  ;;  %v194_v40 = vrot.slane %v185_v48, %v14954_v32  ;;  %v20312_v32 = vld [vmem:[#allocation129_spill] sm:$0xff] }
 0x233   :  { %10243 = vmatpush1.bf16.msra.mxu0 %v20295_v26  ;;  %v20304_v26 = vld [vmem:[#allocation109_spill] sm:$0xff] }
 0x234   :  { %11011 = vmatpush1.bf16.msra.mxu1 %v20296_v11  ;;  %10245 = vmatprep.subr.bf16.mxu0 %v20297_v2  ;;  %v14958_v11 = vsub.s32 3, %v188_v47  ;;  %v20306_v2 = vld [vmem:[#allocation111_spill] sm:$0xff] }
 0x235   :  { %11013 = vmatprep.subr.bf16.mxu1 %v20298_v38  ;;  %v190_v38 = vrot.slane %v185_v48, %v14946_v14 }
 0x236   :  { %20305 = vst [vmem:[#allocation224_spill] sm:$0xff] %v14958_v11  ;;  %v202_v4 = vrot.slane %v185_v48, %v14958_v11  ;;  %v20314_v11 = vld [vmem:[#allocation135_spill] sm:$0xff] }
 0x237   :  { %10247 = vmatpush1.bf16.msra.mxu0 %v20300_v44  ;;  %v198_v44 = vrot.slane %v185_v48, %v14952_v59 }
 0x238   :  { %11015 = vmatpush1.bf16.msra.mxu1 %v20303_v19  ;;  %10249 = vmatprep.subr.bf16.mxu0 %v20304_v26  ;;  %v20310_v26 = vld [vmem:[#allocation122_spill] sm:$0xff] }
 0x239   :  { %11017 = vmatprep.subr.bf16.mxu1 %v20306_v2 }
 0x23b   :  { %10251 = vmatpush1.bf16.msra.mxu0 %v20307_v9  ;;  %v20311_v9 = vld [vmem:[#allocation125_spill] sm:$0xff] }
 0x23c   :  { %11019 = vmatpush1.bf16.msra.mxu1 %v20308_v13  ;;  %10253 = vmatprep.subr.bf16.mxu0 %v20309_v3  ;;  %v1099_v19 = vpop.f32.mrb[0].mxu0  ;;  %v2003_v27 = vpop.f32.mrb[0].mxu1  ;;  %v20313_v13 = vld [vmem:[#allocation131_spill] sm:$0xff] }
 0x23d   :  { %11021 = vmatprep.subr.bf16.mxu1 %v20310_v26  ;;  %v11960_v47 = vadd.f32 %v1099_v19, %v190_v38  ;;  %v1101_v2 = vpop.f32.mrb[1].mxu0  ;;  %v11964_v62 = vadd.f32 %v2003_v27, %v198_v44  ;;  %v2005_v55 = vpop.f32.mrb[1].mxu1 }
 0x23e   :  { %v11961_v14 = vadd.f32 %v1101_v2, %v194_v40  ;;  %v11965_v59 = vadd.f32 %v2005_v55, %v202_v4 }
 0x23f   :  { %10255 = vmatpush1.bf16.msra.mxu0 %v20311_v9  ;;  %2015 = vst [vmem:[#allocation13] sm:$0xff] %v11960_v47  ;;  %2017 = vst [vmem:[#allocation13 + $0x10] sm:$0xff] %v11964_v62  ;;  %v20316_v47 = vld [vmem:[#allocation140_spill] sm:$0xff]  ;;  %v20318_v62 = vld [vmem:[#allocation146_spill] sm:$0xff] }
 0x240   :  { %11023 = vmatpush1.bf16.msra.mxu1 %v20312_v32  ;;  %10257 = vmatprep.subr.bf16.mxu0 %v20313_v13  ;;  %2016 = vst [vmem:[#allocation13 + $0x8] sm:$0xff] %v11961_v14  ;;  %v1106_v48 = vpop.f32.mrb[2].mxu0  ;;  %2018 = vst [vmem:[#allocation13 + $0x18] sm:$0xff] %v11965_v59  ;;  %v2010_v26 = vpop.f32.mrb[2].mxu1  ;;  %v20317_v32 = vld [vmem:[#allocation143_spill] sm:$0xff]  ;;  %v20319_v59 = vld [vmem:[#allocation149_spill] sm:$0xff] }
 0x241   :  { %11025 = vmatprep.subr.bf16.mxu1 %v20314_v11  ;;  %v11962_v19 = vadd.f32 %v1106_v48, %v190_v38  ;;  %v1108_v3 = vpop.f32.mrb[3].mxu0  ;;  %v11966_v27 = vadd.f32 %v2010_v26, %v198_v44  ;;  %v2012_v33 = vpop.f32.mrb[3].mxu1  ;;  %v20320_v38 = vld [vmem:[#allocation152_spill] sm:$0xff]  ;;  %v20321_v44 = vld [vmem:[#allocation155_spill] sm:$0xff] }
 0x242   :  { %v11963_v2 = vadd.f32 %v1108_v3, %v194_v40  ;;  %v11967_v55 = vadd.f32 %v2012_v33, %v202_v4  ;;  %v20322_v40 = vld [vmem:[#allocation158_spill] sm:$0xff]  ;;  %v20323_v3 = vld [vmem:[#allocation72_spill] sm:$0xff]  ;;  %v20324_v33 = vld [vmem:[#allocation75_spill] sm:$0xff] }
 0x243   :  { %10259 = vmatpush1.bf16.msra.mxu0 %v20315_v43  ;;  %2019 = vst [vmem:[#allocation13 + $0x20] sm:$0xff] %v11962_v19  ;;  %2021 = vst [vmem:[#allocation13 + $0x30] sm:$0xff] %v11966_v27  ;;  %v20325_v4 = vld [vmem:[#allocation164_spill] sm:$0xff]  ;;  %v20326_v26 = vld [vmem:[#allocation167_spill] sm:$0xff] }
 0x244   :  { %11027 = vmatpush1.bf16.msra.mxu1 %v20316_v47  ;;  %10261 = vmatprep.subr.bf16.mxu0 %v20317_v32  ;;  %2020 = vst [vmem:[#allocation13 + $0x28] sm:$0xff] %v11963_v2  ;;  %2022 = vst [vmem:[#allocation13 + $0x38] sm:$0xff] %v11967_v55  ;;  %v20327_v14 = vld [vmem:[#allocation168_spill] sm:$0xff]  ;;  %v20329_v19 = vld [vmem:[#allocation174_spill] sm:$0xff] }
 0x245   :  { %11029 = vmatprep.subr.bf16.mxu1 %v20318_v62  ;;  %v20328_v48 = vld [vmem:[#allocation172_spill] sm:$0xff]  ;;  %v20330_v27 = vld [vmem:[#allocation177_spill] sm:$0xff]  ;;  %v20331_v2 = vld [vmem:[#allocation179_spill] sm:$0xff] }
 0x246   :  { %v20332_v55 = vld [vmem:[#allocation181_spill] sm:$0xff] }
 0x247   :  { %10263 = vmatpush1.bf16.msra.mxu0 %v20319_v59 }
 0x248   :  { %11031 = vmatpush1.bf16.msra.mxu1 %v20320_v38  ;;  %10265 = vmatprep.subr.bf16.mxu0 %v20321_v44  ;;  %v20355_v44 = vld [vmem:[#allocation216_spill] sm:$0xff] }
 0x249   :  { %11033 = vmatprep.subr.bf16.mxu1 %v20322_v40  ;;  %v20333_v40 = vld [vmem:[#allocation32_spill] sm:$0xff] }
 0x24b   :  { %10267 = vmatpush1.bf16.msra.mxu0 %v20323_v3  ;;  %v20334_v3 = vld [vmem:[#allocation55_spill] sm:$0xff] }
 0x24c   :  { %11035 = vmatpush1.bf16.msra.mxu1 %v20324_v33  ;;  %10269 = vmatprep.subr.bf16.mxu0 %v20325_v4  ;;  %v20335_v33 = vld [vmem:[#allocation37_spill] sm:$0xff]  ;;  %v20336_v4 = vld [vmem:[#allocation38_spill] sm:$0xff] }
 0x24d   :  { %11037 = vmatprep.subr.bf16.mxu1 %v20326_v26  ;;  %v20337_v26 = vld [vmem:[#allocation187_spill] sm:$0xff] }
 0x24f   :  { %10271 = vmatpush1.bf16.msra.mxu0 %v20327_v14  ;;  %v20338_v14 = vld [vmem:[#allocation190_spill] sm:$0xff] }
 0x250   :  { %11039 = vmatpush1.bf16.msra.mxu1 %v20328_v48  ;;  %10273 = vmatprep.subr.bf16.mxu0 %v20329_v19  ;;  %v20339_v48 = vld [vmem:[#allocation42_spill] sm:$0xff]  ;;  %v20340_v19 = vld [vmem:[#allocation192_spill] sm:$0xff] }
 0x251   :  { %11041 = vmatprep.subr.bf16.mxu1 %v20330_v27  ;;  %v20341_v27 = vld [vmem:[#allocation45_spill] sm:$0xff] }
 0x253   :  { %10275 = vmatpush1.bf16.msra.mxu0 %v20331_v2  ;;  %v20342_v2 = vld [vmem:[#allocation197_spill] sm:$0xff] }
 0x254   :  { %11043 = vmatpush1.bf16.msra.mxu1 %v20332_v55  ;;  %10277 = vmatprep.subr.bf16.mxu0 %v20333_v40  ;;  %v20343_v55 = vld [vmem:[#allocation54_spill] sm:$0xff]  ;;  %v20344_v40 = vld [vmem:[#allocation200_spill] sm:$0xff] }
 0x255   :  { %11045 = vmatprep.subr.bf16.mxu1 %v20334_v3  ;;  %v20345_v3 = vld [vmem:[#allocation59_spill] sm:$0xff] }
 0x257   :  { %10279 = vmatpush1.bf16.msra.mxu0 %v20335_v33  ;;  %v20346_v33 = vld [vmem:[#allocation66_spill] sm:$0xff] }
 0x258   :  { %11047 = vmatpush1.bf16.msra.mxu1 %v20336_v4  ;;  %10281 = vmatprep.subr.bf16.mxu0 %v20337_v26  ;;  %v20347_v4 = vld [vmem:[#allocation207_spill] sm:$0xff]  ;;  %v20348_v26 = vld [vmem:[#allocation68_spill] sm:$0xff] }
 0x259   :  { %11049 = vmatprep.subr.bf16.mxu1 %v20338_v14  ;;  %v20349_v14 = vld [vmem:[#allocation79_spill] sm:$0xff] }
 0x25b   :  { %10283 = vmatpush1.bf16.msra.mxu0 %v20339_v48 }
 0x25c   :  { %11051 = vmatpush1.bf16.msra.mxu1 %v20340_v19  ;;  %10285 = vmatprep.subr.bf16.mxu0 %v20341_v27  ;;  %v20350_v19 = vand.u32 4294901760, %v20153_v54  ;;  %v20351_v27 = vand.u32 4294901760, %v20154_v61  ;;  %v20359_v54 = vand.u32 4294901760, %v20159_v23  ;;  %v20360_v61 = vand.u32 4294901760, %v20160_v25  ;;  %v20366_v23 = vld [vmem:[#allocation89_spill] sm:$0xff]  ;;  %v20368_v25 = vld [vmem:[#allocation91_spill] sm:$0xff] }
 0x25d   :  { %11053 = vmatprep.subr.bf16.mxu1 %v20342_v2  ;;  %v20352_v2 = vld [vmem:[#allocation85_spill] sm:$0xff] }
 0x25e   :  { %v10296_v48 = vpack.c.bf16 %v20351_v27, %v20350_v19  ;;  %v11066_v19 = vpack.c.bf16 %v20360_v61, %v20359_v54  ;;  %v20363_v27 = vand.u32 4294901760, %v20163_v63  ;;  %v20374_v61 = vld [vmem:[#allocation28_spill] sm:$0xff] }
 0x25f   :  { %10287 = vmatpush1.bf16.msra.mxu0 %v20343_v55  ;;  %v20353_v55 = vand.u32 4294901760, %v20155_v52  ;;  %v20361_v52 = vand.u32 4294901760, %v20161_v0  ;;  %v20370_v0 = vld [vmem:[#allocation24_spill] sm:$0xff] }
 0x260   :  { %11055 = vmatpush1.bf16.msra.mxu1 %v20344_v40  ;;  %10289 = vmatprep.subr.bf16.mxu0 %v20345_v3  ;;  %v20354_v40 = vand.u32 4294901760, %v20156_v39  ;;  %v20362_v39 = vand.u32 4294901760, %v20162_v42  ;;  %v20371_v42 = vand.u32 4294901760, %v20370_v0 }
 0x261   :  { %11057 = vmatprep.subr.bf16.mxu1 %v20346_v33 }
 0x262   :  { %v11064_v3 = vpack.c.bf16 %v20354_v40, %v20353_v55  ;;  %v10300_v40 = vpack.c.bf16 %v20362_v39, %v20361_v52  ;;  %v20376_v52 = vld [vmem:[#allocation30_spill] sm:$0xff] }
 0x263   :  { %10291 = vmatpush1.bf16.msra.mxu0 %v20347_v4  ;;  %v20356_v4 = vand.u32 4294901760, %v20157_v49  ;;  %v20364_v49 = vand.u32 4294901760, %v20164_v1  ;;  %v20375_v1 = vand.u32 4294901760, %v20374_v61  ;;  %v20377_v39 = vand.u32 4294901760, %v20376_v52  ;;  %v20392_v52 = vld [vmem:[#allocation81_spill] sm:$0xff] }
 0x264   :  { %11059 = vmatpush1.bf16.msra.mxu1 %v20348_v26  ;;  %10293 = vmatprep.subr.bf16.mxu0 %v20349_v14  ;;  %v20357_v26 = vand.u32 4294901760, %v20158_v45  ;;  %v20358_v14 = vld [vmem:[#allocation219_spill] sm:$0xff] }
 0x265   :  { %11061 = vmatprep.subr.bf16.mxu1 %v20352_v2  ;;  %v11068_v45 = vpack.c.bf16 %v20364_v49, %v20363_v27  ;;  %v10304_v27 = vpack.c.bf16 %v20377_v39, %v20375_v1  ;;  %v20393_v39 = vand.u32 4294901760, %v20392_v52  ;;  %v2179_v2 = vld [vmem:[#allocation10 + $0x4a0] sm:$0xff] }
 0x266   :  { %v10298_v33 = vpack.c.bf16 %v20357_v26, %v20356_v4  ;;  %v20365_v4 = vld [vmem:[#allocation84_spill] sm:$0xff]  ;;  %v20367_v26 = vand.u32 4294901760, %v20366_v23 }
 0x267   :  { %10295 = vmatpush1.bf16.msra.mxu0 %v20355_v44 }
 0x268   :  { %11063 = vmatpush1.bf16.msra.mxu1 %v20358_v14  ;;  %10297 = vmatprep.subr.bf16.mxu0 %v10296_v48  ;;  %v20369_v48 = vand.u32 4294901760, %v20368_v25  ;;  %v20382_v25 = vld [vmem:[#allocation226_spill] sm:$0xff] }
 0x269   :  { %11065 = vmatprep.subr.bf16.mxu1 %v11064_v3  ;;  %v20372_v3 = vld [vmem:[#allocation25_spill] sm:$0xff] }
 0x26a   :  { %3219 = vmatmul.mubr.f32.vlgmr.msra.gmra.mrb[4].mxu0 %v20365_v4  ;;  %v10302_v55 = vpack.c.bf16 %v20369_v48, %v20367_v26  ;;  %v20373_v54 = vand.u32 4294901760, %v20372_v3  ;;  %v20386_v48 = vld [vmem:[#allocation94_spill] sm:$0xff] }
 0x26b   :  { %10299 = vmatpush1.bf16.msra.mxu0 %v10298_v33  ;;  %5911 = vmatmul.mubr.f32.vlgmr.msra.gmra.mrb[4].mxu1 %v20365_v4  ;;  %v20378_v33 = vld [vmem:[#allocation33_spill] sm:$0xff]  ;;  %v20380_v4 = vld [vmem:[#allocation34_spill] sm:$0xff]  ;;  %v20387_v0 = vand.u32 4294901760, %v20386_v48  ;;  %v20400_v48 = vld [vmem:[#allocation204_spill] sm:$0xff] }
 0x26c   :  { %11067 = vmatpush1.bf16.msra.mxu1 %v11066_v19  ;;  %10301 = vmatprep.subr.bf16.mxu0 %v10300_v40  ;;  %v11070_v63 = vpack.c.bf16 %v20373_v54, %v20371_v42  ;;  %v20379_v49 = vand.u32 4294901760, %v20378_v33  ;;  %v20381_v23 = vand.u32 4294901760, %v20380_v4  ;;  %v20383_v19 = vld [vmem:[#allocation230_spill] sm:$0xff]  ;;  %v20384_v40 = vld [vmem:[#allocation93_spill] sm:$0xff]  ;;  %v20394_v33 = vld [vmem:[#allocation99_spill] sm:$0xff] }
 0x26d   :  { %11069 = vmatprep.subr.bf16.mxu1 %v11068_v45  ;;  %3227 = vmatprep.mubr.f32.mxu0 %v20382_v25  ;;  %v20385_v26 = vand.u32 4294901760, %v20384_v40  ;;  %v20388_v45 = vld [vmem:[#allocation96_spill] sm:$0xff]  ;;  %v20390_v54 = vld [vmem:[#allocation97_spill] sm:$0xff] }
 0x26e   :  { %v11072_v14 = vpack.c.bf16 %v20381_v23, %v20379_v49  ;;  %5919 = vmatprep.mubr.f32.mxu1 %v20382_v25  ;;  %3231 = vmatmul.mubr.f32.gmra.mrb[6].mxu0 %v20383_v19  ;;  %v20389_v3 = vand.u32 4294901760, %v20388_v45  ;;  %v20391_v61 = vand.u32 4294901760, %v20390_v54  ;;  %v20395_v49 = vand.u32 4294901760, %v20394_v33  ;;  %v20398_v25 = vld [vmem:[#allocation102_spill] sm:$0xff] }
 0x26f   :  { %10303 = vmatpush1.bf16.msra.mxu0 %v10302_v55  ;;  %v10306_v42 = vpack.c.bf16 %v20387_v0, %v20385_v26  ;;  %5923 = vmatmul.mubr.f32.gmra.mrb[6].mxu1 %v20383_v19  ;;  %v20396_v55 = vld [vmem:[#allocation101_spill] sm:$0xff]  ;;  %v20399_v40 = vand.u32 4294901760, %v20398_v25  ;;  %v20413_v25 = vld [vmem:[#allocation112_spill] sm:$0xff] }
 0x270   :  { %11071 = vmatpush1.bf16.msra.mxu1 %v11070_v63  ;;  %10305 = vmatprep.subr.bf16.mxu0 %v10304_v27  ;;  %v11074_v1 = vpack.c.bf16 %v20391_v61, %v20389_v3  ;;  %v10308_v4 = vpack.c.bf16 %v20395_v49, %v20393_v39  ;;  %v20397_v23 = vand.u32 4294901760, %v20396_v55  ;;  %v20401_v63 = vld [vmem:[#allocation104_spill] sm:$0xff]  ;;  %v20403_v19 = vld [vmem:[#allocation105_spill] sm:$0xff]  ;;  %v20405_v3 = vld [vmem:[#allocation107_spill] sm:$0xff] }
 0x271   :  { %11073 = vmatprep.subr.bf16.mxu1 %v11072_v14  ;;  %3494 = vmatprep.mubr.f32.mxu0 %v20400_v48  ;;  %v20402_v27 = vand.u32 4294901760, %v20401_v63  ;;  %v20404_v0 = vand.u32 4294901760, %v20403_v19  ;;  %v20406_v54 = vand.u32 4294901760, %v20405_v3  ;;  %v20407_v14 = vld [vmem:[#allocation108_spill] sm:$0xff]  ;;  %v20409_v39 = vld [vmem:[#allocation110_spill] sm:$0xff] }
 0x272   :  { %v11076_v26 = vpack.c.bf16 %v20399_v40, %v20397_v23  ;;  %6186 = vmatprep.mubr.f32.mxu1 %v20400_v48  ;;  %v20408_v61 = vand.u32 4294901760, %v20407_v14  ;;  %v20410_v33 = vand.u32 4294901760, %v20409_v39  ;;  %v20411_v49 = vld [vmem:[#allocation92_spill] sm:$0xff]  ;;  %v20415_v40 = vld [vmem:[#allocation113_spill] sm:$0xff]  ;;  %v20421_v3 = vld [vmem:[#allocation118_spill] sm:$0xff] }
 0x273   :  { %10307 = vmatpush1.bf16.msra.mxu0 %v10306_v42  ;;  %v10310_v45 = vpack.c.bf16 %v20404_v0, %v20402_v27  ;;  %v20412_v55 = vand.u32 4294901760, %v20411_v49  ;;  %v20414_v42 = vand.u32 4294901760, %v20413_v25  ;;  %v20416_v63 = vand.u32 4294901760, %v20415_v40  ;;  %v20417_v27 = vld [vmem:[#allocation115_spill] sm:$0xff]  ;;  %v20427_v49 = vld [vmem:[#allocation121_spill] sm:$0xff]  ;;  %v20431_v40 = vld [vmem:[#allocation124_spill] sm:$0xff] }
 0x274   :  { %11075 = vmatpush1.bf16.msra.mxu1 %v11074_v1  ;;  %10309 = vmatprep.subr.bf16.mxu0 %v10308_v4  ;;  %v11078_v52 = vpack.c.bf16 %v20408_v61, %v20406_v54  ;;  %v20418_v1 = vand.u32 4294901760, %v20417_v27  ;;  %v20419_v4 = vld [vmem:[#allocation116_spill] sm:$0xff]  ;;  %v20422_v54 = vand.u32 4294901760, %v20421_v3  ;;  %v20423_v14 = vld [vmem:[#allocation119_spill] sm:$0xff] }
 0x275   :  { %v10312_v23 = vpack.c.bf16 %v20412_v55, %v20410_v33  ;;  %11077 = vmatprep.subr.bf16.mxu1 %v11076_v26  ;;  %v11080_v44 = vpack.c.bf16 %v20416_v63, %v20414_v42  ;;  %v20420_v19 = vand.u32 4294901760, %v20419_v4  ;;  %v20424_v61 = vand.u32 4294901760, %v20423_v14  ;;  %v20425_v33 = vld [vmem:[#allocation70_spill] sm:$0xff]  ;;  %v20429_v42 = vld [vmem:[#allocation123_spill] sm:$0xff]  ;;  %v20437_v3 = vld [vmem:[#allocation128_spill] sm:$0xff] }
 0x276   :  { %v20426_v26 = vand.u32 4294901760, %v20425_v33  ;;  %v20428_v55 = vand.u32 4294901760, %v20427_v49  ;;  %v20432_v63 = vand.u32 4294901760, %v20431_v40  ;;  %v20439_v14 = vld [vmem:[#allocation130_spill] sm:$0xff]  ;;  %v20443_v49 = vld [vmem:[#allocation133_spill] sm:$0xff]  ;;  %v20447_v40 = vld [vmem:[#allocation136_spill] sm:$0xff] }
 0x277   :  { %10311 = vmatpush1.bf16.msra.mxu0 %v10310_v45  ;;  %v10314_v0 = vpack.c.bf16 %v20420_v19, %v20418_v1  ;;  %v11082_v39 = vpack.c.bf16 %v20424_v61, %v20422_v54  ;;  %v20430_v45 = vand.u32 4294901760, %v20429_v42  ;;  %v20433_v1 = vld [vmem:[#allocation126_spill] sm:$0xff]  ;;  %v20438_v54 = vand.u32 4294901760, %v20437_v3  ;;  %v20453_v3 = vld [vmem:[#allocation141_spill] sm:$0xff] }
 0x278   :  { %11079 = vmatpush1.bf16.msra.mxu1 %v11078_v52  ;;  %10313 = vmatprep.subr.bf16.mxu0 %v10312_v23  ;;  %v10316_v25 = vpack.c.bf16 %v20428_v55, %v20426_v26  ;;  %v20434_v52 = vand.u32 4294901760, %v20433_v1  ;;  %v20435_v23 = vld [vmem:[#allocation127_spill] sm:$0xff]  ;;  %v20440_v61 = vand.u32 4294901760, %v20439_v14  ;;  %v20441_v26 = vld [vmem:[#allocation132_spill] sm:$0xff]  ;;  %v20444_v55 = vand.u32 4294901760, %v20443_v49  ;;  %v20455_v14 = vld [vmem:[#allocation142_spill] sm:$0xff] }
 0x279   :  { %11081 = vmatprep.subr.bf16.mxu1 %v11080_v44  ;;  %v11084_v27 = vpack.c.bf16 %v20432_v63, %v20430_v45  ;;  %v20436_v4 = vand.u32 4294901760, %v20435_v23  ;;  %v20442_v44 = vand.u32 4294901760, %v20441_v26  ;;  %v20445_v45 = vld [vmem:[#allocation134_spill] sm:$0xff]  ;;  %v20448_v63 = vand.u32 4294901760, %v20447_v40  ;;  %v20459_v49 = vld [vmem:[#allocation145_spill] sm:$0xff] }
 0x27a   :  { %v11086_v33 = vpack.c.bf16 %v20440_v61, %v20438_v54  ;;  %v20454_v54 = vand.u32 4294901760, %v20453_v3  ;;  %v20456_v61 = vand.u32 4294901760, %v20455_v14 }
 0x27b   :  { %10315 = vmatpush1.bf16.msra.mxu0 %v10314_v0  ;;  %v10318_v19 = vpack.c.bf16 %v20436_v4, %v20434_v52  ;;  %v10320_v42 = vpack.c.bf16 %v20444_v55, %v20442_v44  ;;  %v20446_v0 = vand.u32 4294901760, %v20445_v45  ;;  %v20449_v52 = vld [vmem:[#allocation138_spill] sm:$0xff]  ;;  %v20457_v44 = vld [vmem:[#allocation144_spill] sm:$0xff]  ;;  %v20460_v55 = vand.u32 4294901760, %v20459_v49 }
 0x27c   :  { %11083 = vmatpush1.bf16.msra.mxu1 %v11082_v39  ;;  %10317 = vmatprep.subr.bf16.mxu0 %v10316_v25  ;;  %v20450_v39 = vand.u32 4294901760, %v20449_v52  ;;  %v20451_v25 = vld [vmem:[#allocation139_spill] sm:$0xff]  ;;  %v11090_v26 = vpack.c.bf16 %v20456_v61, %v20454_v54  ;;  %v20473_v61 = vand.u32 4294901760, %v20225_v37  ;;  %v20480_v37 = vand.u32 4294901760, %v20017_v30  ;;  %v20492_v30 = vld [vmem:[#allocation178_spill] sm:$0xff] }
 0x27d   :  { %11085 = vmatprep.subr.bf16.mxu1 %v11084_v27  ;;  %v11088_v1 = vpack.c.bf16 %v20448_v63, %v20446_v0  ;;  %v20452_v23 = vand.u32 4294901760, %v20451_v25  ;;  %v20458_v27 = vand.u32 4294901760, %v20457_v44  ;;  %v20462_v0 = vld [vmem:[#allocation148_spill] sm:$0xff]  ;;  %v20467_v25 = vand.u32 4294901760, %v20219_v20 }
 0x27e   :  { %v20463_v40 = vand.u32 4294901760, %v20462_v0  ;;  %v20477_v44 = vand.u32 4294901760, %v20014_v50  ;;  %v20486_v50 = vld [vmem:[#allocation175_spill] sm:$0xff] }
 0x27f   :  { %10319 = vmatpush1.bf16.msra.mxu0 %v10318_v19  ;;  %v10322_v4 = vpack.c.bf16 %v20452_v23, %v20450_v39  ;;  %v10324_v45 = vpack.c.bf16 %v20460_v55, %v20458_v27  ;;  %v20461_v19 = vand.u32 4294901760, %v20215_v51  ;;  %v20468_v23 = vand.u32 4294901760, %v20220_v8 }
 0x280   :  { %11087 = vmatpush1.bf16.msra.mxu1 %v11086_v33  ;;  %10321 = vmatprep.subr.bf16.mxu0 %v10320_v42  ;;  %v20464_v33 = vand.u32 4294901760, %v20217_v56  ;;  %v20465_v42 = vld [vmem:[#allocation151_spill] sm:$0xff]  ;;  %v20470_v51 = vand.u32 4294901760, %v20222_v6  ;;  %v20472_v56 = vand.u32 4294901760, %v20224_v24  ;;  %v20475_v8 = vand.u32 4294901760, %v20227_v17 }
 0x281   :  { %11089 = vmatprep.subr.bf16.mxu1 %v11088_v1  ;;  %v11092_v63 = vpack.c.bf16 %v20463_v40, %v20461_v19  ;;  %v20466_v52 = vand.u32 4294901760, %v20465_v42  ;;  %v11094_v3 = vpack.c.bf16 %v20468_v23, %v20467_v25  ;;  %v20469_v1 = vand.u32 4294901760, %v20221_v29 }
 0x282   :  { %v20476_v29 = vand.u32 4294901760, %v20228_v46  ;;  %v20479_v24 = vand.u32 4294901760, %v20016_v10  ;;  %v20482_v55 = vand.u32 4294901760, %v20103_v12  ;;  %v20483_v17 = vand.u32 4294901760, %v20026_v16  ;;  %v20484_v46 = vld [vmem:[#allocation173_spill] sm:$0xff]  ;;  %v20490_v10 = vld [vmem:[#allocation27_spill] sm:$0xff] }
 0x283   :  { %10323 = vmatpush1.bf16.msra.mxu0 %v10322_v4  ;;  %v10326_v39 = vpack.c.bf16 %v20466_v52, %v20464_v33  ;;  %v10328_v54 = vpack.c.bf16 %v20470_v51, %v20469_v1  ;;  %v20471_v4 = vand.u32 4294901760, %v20223_v18  ;;  %v20478_v18 = vand.u32 4294901760, %v20015_v5  ;;  %v20488_v5 = vld [vmem:[#allocation176_spill] sm:$0xff]  ;;  %v20496_v12 = vld [vmem:[#allocation90_spill] sm:$0xff]  ;;  %v20498_v16 = vld [vmem:[#allocation29_spill] sm:$0xff] }
 0x284   :  { %11091 = vmatpush1.bf16.msra.mxu1 %v11090_v26  ;;  %10325 = vmatprep.subr.bf16.mxu0 %v10324_v45  ;;  %v20474_v26 = vand.u32 4294901760, %v20226_v15  ;;  %v11098_v6 = vpack.c.bf16 %v20476_v29, %v20475_v8  ;;  %v11100_v49 = vpack.c.bf16 %v20480_v37, %v20479_v24  ;;  %v20481_v15 = vand.u32 4294901760, %v20102_v21  ;;  %v20494_v21 = vld [vmem:[#allocation180_spill] sm:$0xff]  ;;  %v20500_v51 = vld [vmem:[#allocation182_spill] sm:$0xff]  ;;  %v20506_v8 = vld [vmem:[#allocation183_spill] sm:$0xff] }
 0x285   :  { %11093 = vmatprep.subr.bf16.mxu1 %v11092_v63  ;;  %v11096_v14 = vpack.c.bf16 %v20472_v56, %v20471_v4  ;;  %v10332_v27 = vpack.c.bf16 %v20478_v18, %v20477_v44  ;;  %v20485_v19 = vand.u32 4294901760, %v20484_v46  ;;  %v20487_v40 = vand.u32 4294901760, %v20486_v50  ;;  %v20502_v56 = vld [vmem:[#allocation35_spill] sm:$0xff]  ;;  %v20508_v44 = vld [vmem:[#allocation184_spill] sm:$0xff]  ;;  %v20510_v37 = vld [vmem:[#allocation185_spill] sm:$0xff] }
 0x286   :  { %v10330_v20 = vpack.c.bf16 %v20474_v26, %v20473_v61  ;;  %v10334_v45 = vpack.c.bf16 %v20482_v55, %v20481_v15  ;;  %v20489_v63 = vand.u32 4294901760, %v20488_v5  ;;  %v20491_v42 = vand.u32 4294901760, %v20490_v10  ;;  %v20504_v61 = vld [vmem:[#allocation36_spill] sm:$0xff]  ;;  %v20512_v55 = vld [vmem:[#allocation186_spill] sm:$0xff] }
 0x287   :  { %10327 = vmatpush1.bf16.msra.mxu0 %v10326_v39  ;;  %v11102_v0 = vpack.c.bf16 %v20485_v19, %v20483_v17  ;;  %v20493_v52 = vand.u32 4294901760, %v20492_v30  ;;  %v20495_v25 = vand.u32 4294901760, %v20494_v21  ;;  %v20497_v23 = vand.u32 4294901760, %v20496_v12  ;;  %v20514_v19 = vld [vmem:[#allocation39_spill] sm:$0xff]  ;;  %v2160_v10 = vld [vmem:[#allocation10 + $0x408] sm:$0xff]  ;;  %v20520_v30 = vld [vmem:[#allocation189_spill] sm:$0xff] }
 0x288   :  { %11095 = vmatpush1.bf16.msra.mxu1 %v11094_v3  ;;  %10329 = vmatprep.subr.bf16.mxu0 %v10328_v54  ;;  %v10336_v33 = vpack.c.bf16 %v20489_v63, %v20487_v40  ;;  %v20499_v1 = vand.u32 4294901760, %v20498_v16  ;;  %v20501_v54 = vand.u32 4294901760, %v20500_v51  ;;  %v20505_v26 = vand.u32 4294901760, %v20504_v61  ;;  %v20516_v40 = vld [vmem:[#allocation40_spill] sm:$0xff]  ;;  %v20523_v12 = vld [vmem:[#allocation41_spill] sm:$0xff]  ;;  %v2162_v61 = vld [vmem:[#allocation10 + $0x418] sm:$0xff] }
 0x289   :  { %11097 = vmatprep.subr.bf16.mxu1 %v11096_v14  ;;  %v11104_v39 = vpack.c.bf16 %v20493_v52, %v20491_v42  ;;  %v10338_v3 = vpack.c.bf16 %v20497_v23, %v20495_v25  ;;  %v20503_v14 = vand.u32 4294901760, %v20502_v56  ;;  %v20507_v29 = vand.u32 4294901760, %v20506_v8 }
 0x28a   :  { %v11106_v4 = vpack.c.bf16 %v20501_v54, %v20499_v1  ;;  %v20509_v18 = vand.u32 4294901760, %v20508_v44  ;;  %v20511_v15 = vand.u32 4294901760, %v20510_v37  ;;  %v20513_v17 = vand.u32 4294901760, %v20512_v55 }
 0x28b   :  { %10331 = vmatpush1.bf16.msra.mxu0 %v10330_v20  ;;  %v10340_v20 = vpack.c.bf16 %v20505_v26, %v20503_v14  ;;  %v20515_v50 = vand.u32 4294901760, %v20514_v19  ;;  %v20517_v5 = vand.u32 4294901760, %v20516_v40  ;;  %v20521_v52 = vand.u32 4294901760, %v20520_v30  ;;  %v2166_v26 = vld [vmem:[#allocation10 + $0x438] sm:$0xff] }
 0x28c   :  { %11099 = vmatpush1.bf16.msra.mxu1 %v11098_v6  ;;  %10333 = vmatprep.subr.bf16.mxu0 %v10332_v27  ;;  %v11108_v24 = vpack.c.bf16 %v20509_v18, %v20507_v29  ;;  %v15207_v46 = vpack.c.bf16 %v20513_v17, %v20511_v15  ;;  %v2164_v6 = vld [vmem:[#allocation10 + $0x428] sm:$0xff]  ;;  %v20522_v25 = vand.u32 4294901760, %v20253_v31  ;;  %v20524_v23 = vand.u32 4294901760, %v20523_v12  ;;  %v20536_v15 = vld [vmem:[#allocation201_spill] sm:$0xff]  ;;  %v2163_v17 = vld [vmem:[#allocation10 + $0x420] sm:$0xff] }
 0x28d   :  { %v15213_v63 = vpack.c.bf16 %v20517_v5, %v20515_v50  ;;  %11101 = vmatprep.subr.bf16.mxu1 %v11100_v49  ;;  %v20518_v27 = vld [vmem:[#allocation188_spill] sm:$0xff]  ;;  %v20525_v1 = vand.u32 4294901760, %v20256_v60  ;;  %v20526_v51 = vand.u32 4294901760, %v20255_v41  ;;  %v20527_v49 = vand.u32 4294901760, %v20259_v53 }
 0x28e   :  { %v20519_v42 = vand.u32 4294901760, %v20518_v27  ;;  %v15225_v16 = vpack.c.bf16 %v20524_v23, %v20522_v25  ;;  %v20528_v56 = vand.u32 4294901760, %v20258_v22  ;;  %v20529_v31 = vand.u32 4294901760, %v20262_v36  ;;  %v2165_v25 = vld [vmem:[#allocation10 + $0x430] sm:$0xff]  ;;  %v20546_v12 = vld [vmem:[#allocation208_spill] sm:$0xff] }
 0x28f   :  { %v15231_v54 = vpack.c.bf16 %v20526_v51, %v20525_v1  ;;  %v20530_v8 = vand.u32 4294901760, %v20261_v35  ;;  %v20531_v60 = vand.u32 4294901760, %v20265_v57  ;;  %v20532_v41 = vand.u32 4294901760, %v20264_v7  ;;  %v2159_v35 = vld [vmem:[#allocation10 + $0x400] sm:$0xff]  ;;  %10335 = vmatpush1.bf16.msra.mxu0 %v10334_v45  ;;  %v20538_v57 = vld [vmem:[#allocation62_spill] sm:$0xff]  ;;  %v20548_v23 = vld [vmem:[#allocation209_spill] sm:$0xff] }
 0x290   :  { %v15219_v21 = vpack.c.bf16 %v20521_v52, %v20519_v42  ;;  %v15237_v14 = vpack.c.bf16 %v20528_v56, %v20527_v49  ;;  %v20533_v53 = vand.u32 4294901760, %v20268_v28  ;;  %v20534_v22 = vand.u32 4294901760, %v20267_v58  ;;  %v20540_v7 = vld [vmem:[#allocation202_spill] sm:$0xff]  ;;  %v20542_v28 = vld [vmem:[#allocation203_spill] sm:$0xff]  ;;  %v2161_v52 = vld [vmem:[#allocation10 + $0x410] sm:$0xff]  ;;  %11103 = vmatpush1.bf16.msra.mxu1 %v11102_v0  ;;  %10337 = vmatprep.subr.bf16.mxu0 %v10336_v33 }
 0x291   :  { %v15243_v29 = vpack.c.bf16 %v20530_v8, %v20529_v31  ;;  %v15249_v44 = vpack.c.bf16 %v20532_v41, %v20531_v60  ;;  %v20535_v37 = vand.u32 4294901760, %v20109_v34  ;;  %v20537_v36 = vand.u32 4294901760, %v20536_v15  ;;  %v20544_v58 = vld [vmem:[#allocation206_spill] sm:$0xff]  ;;  %v20550_v49 = vld [vmem:[#allocation71_spill] sm:$0xff]  ;;  %11105 = vmatprep.subr.bf16.mxu1 %v11104_v39  ;;  %v20556_v15 = vld [vmem:[#allocation213_spill] sm:$0xff] }
 0x292   :  { %v15255_v18 = vpack.c.bf16 %v20534_v22, %v20533_v53  ;;  %v20539_v19 = vand.u32 4294901760, %v20538_v57  ;;  %v20541_v50 = vand.u32 4294901760, %v20540_v7  ;;  %v20543_v5 = vand.u32 4294901760, %v20542_v28  ;;  %v20552_v31 = vld [vmem:[#allocation211_spill] sm:$0xff]  ;;  %v20554_v22 = vld [vmem:[#allocation212_spill] sm:$0xff] }
 0x293   :  { %v15261_v55 = vpack.c.bf16 %v20537_v36, %v20535_v37  ;;  %v20545_v27 = vand.u32 4294901760, %v20544_v58  ;;  %v3655_v34 = vand.u32 4294901760, %v2160_v10  ;;  %v3659_v30 = vand.u32 4294901760, %v2164_v6  ;;  %v20558_v36 = vld [vmem:[#allocation214_spill] sm:$0xff]  ;;  %v2168_v58 = vld [vmem:[#allocation10 + $0x448] sm:$0xff]  ;;  %10339 = vmatpush1.bf16.msra.mxu0 %v10338_v3  ;;  %v2173_v3 = vld [vmem:[#allocation10 + $0x470] sm:$0xff] }
 0x294   :  { %v15267_v40 = vpack.c.bf16 %v20541_v50, %v20539_v19  ;;  %v20547_v45 = vand.u32 4294901760, %v20546_v12  ;;  %v20549_v1 = vand.u32 4294901760, %v20548_v23  ;;  %v20551_v56 = vand.u32 4294901760, %v20550_v49  ;;  %v20560_v19 = vld [vmem:[#allocation215_spill] sm:$0xff]  ;;  %v20564_v23 = vld [vmem:[#allocation217_spill] sm:$0xff]  ;;  %v20566_v49 = vld [vmem:[#allocation218_spill] sm:$0xff]  ;;  %11107 = vmatpush1.bf16.msra.mxu1 %v11106_v4  ;;  %10341 = vmatprep.subr.bf16.mxu0 %v10340_v20 }
 0x295   :  { %v15273_v42 = vpack.c.bf16 %v20545_v27, %v20543_v5  ;;  %v20553_v8 = vand.u32 4294901760, %v20552_v31  ;;  %v6347_v41 = vand.u32 4294901760, %v2162_v61  ;;  %v6351_v53 = vand.u32 4294901760, %v2166_v26  ;;  %v2172_v27 = vld [vmem:[#allocation10 + $0x468] sm:$0xff]  ;;  %v20562_v12 = vld [vmem:[#allocation87_spill] sm:$0xff]  ;;  %11109 = vmatprep.subr.bf16.mxu1 %v11108_v24 }
 0x296   :  { %v15279_v51 = vpack.c.bf16 %v20549_v1, %v20547_v45  ;;  %v20555_v37 = vand.u32 4294901760, %v20554_v22  ;;  %v20557_v0 = vand.u32 4294901760, %v20556_v15  ;;  %v20559_v57 = vand.u32 4294901760, %v20558_v36  ;;  %v20568_v31 = vld [vmem:[#allocation220_spill] sm:$0xff]  ;;  %v2174_v36 = vld [vmem:[#allocation10 + $0x478] sm:$0xff] }
 0x297   :  { %v15285_v60 = vpack.c.bf16 %v20553_v8, %v20551_v56  ;;  %v20561_v7 = vand.u32 4294901760, %v20560_v19  ;;  %v3657_v28 = vand.u32 4294901760, %v2159_v35  ;;  %v3661_v5 = vand.u32 4294901760, %v2163_v17  ;;  %10343 = vmatpush1.bf16.msra.mxu0 %v15207_v46 }
 0x298   :  { %v15291_v33 = vpack.c.bf16 %v20557_v0, %v20555_v37  ;;  %v20563_v45 = vand.u32 4294901760, %v20562_v12  ;;  %v20565_v39 = vand.u32 4294901760, %v20564_v23  ;;  %v20567_v56 = vand.u32 4294901760, %v20566_v49  ;;  %v2170_v0 = vld [vmem:[#allocation10 + $0x458] sm:$0xff]  ;;  %11111 = vmatpush1.bf16.msra.mxu1 %v15213_v63  ;;  %10345 = vmatprep.subr.bf16.mxu0 %v15219_v21 }
 0x299   :  { %v15297_v50 = vpack.c.bf16 %v20561_v7, %v20559_v57  ;;  %v20569_v8 = vand.u32 4294901760, %v20568_v31  ;;  %v6349_v37 = vand.u32 4294901760, %v2161_v52  ;;  %v6353_v15 = vand.u32 4294901760, %v2165_v25  ;;  %v2171_v31 = vld [vmem:[#allocation10 + $0x460] sm:$0xff]  ;;  %11113 = vmatprep.subr.bf16.mxu1 %v15225_v16 }
 0x29a   :  { %v15303_v1 = vpack.c.bf16 %v20565_v39, %v20563_v45  ;;  %v15311_v57 = vpack.c.bf16 %v3659_v30, %v3655_v34  ;;  %v15313_v19 = vsub.f32 %v2160_v10, %v3655_v34  ;;  %v15315_v7 = vsub.f32 %v2164_v6, %v3659_v30  ;;  %v2167_v45 = vld [vmem:[#allocation10 + $0x440] sm:$0xff]  ;;  %v2176_v30 = vld [vmem:[#allocation10 + $0x488] sm:$0xff] }
 0x29b   :  { %v15309_v22 = vpack.c.bf16 %v20569_v8, %v20567_v56  ;;  %v15317_v12 = vsub.f32 %v2162_v61, %v6347_v41  ;;  %v15319_v23 = vpack.c.bf16 %v6351_v53, %v6347_v41  ;;  %v15321_v39 = vsub.f32 %v2166_v26, %v6351_v53  ;;  %v2169_v8 = vld [vmem:[#allocation10 + $0x450] sm:$0xff]  ;;  %v2180_v41 = vld [vmem:[#allocation10 + $0x4a8] sm:$0xff]  ;;  %10347 = vmatpush1.bf16.msra.mxu0 %v15231_v54 }
 0x29c   :  { %20570 = vst [vmem:[#allocation225_spill] sm:$0xff] %v15311_v57  ;;  %20571 = vst [vmem:[#allocation165_spill] sm:$0xff] %v15313_v19  ;;  %v3663_v49 = vand.u32 4294901760, %v2168_v58  ;;  %v3667_v56 = vand.u32 4294901760, %v2172_v27  ;;  %v15323_v57 = vpack.c.bf16 %v3661_v5, %v3657_v28  ;;  %v15325_v10 = vsub.f32 %v2159_v35, %v3657_v28  ;;  %v2178_v35 = vld [vmem:[#allocation10 + $0x498] sm:$0xff]  ;;  %11115 = vmatpush1.bf16.msra.mxu1 %v15237_v14 }
 0x29d   :  { %20572 = vst [vmem:[#allocation56_spill] sm:$0xff] %v15315_v7  ;;  %20573 = vst [vmem:[#allocation166_spill] sm:$0xff] %v15317_v12  ;;  %v6355_v6 = vand.u32 4294901760, %v2170_v0  ;;  %v6359_v61 = vand.u32 4294901760, %v2174_v36  ;;  %v15327_v34 = vsub.f32 %v2163_v17, %v3661_v5  ;;  %v15329_v4 = vpack.c.bf16 %v6353_v15, %v6349_v37  ;;  %v2182_v28 = vld [vmem:[#allocation10 + $0x4b8] sm:$0xff]  ;;  %10349 = vmatprep.subr.bf16.mxu0 %v15243_v29 }
 0x29e   :  { %20574 = vst [vmem:[#allocation48_spill] sm:$0xff] %v15319_v23  ;;  %20575 = vst [vmem:[#allocation171_spill] sm:$0xff] %v15321_v39  ;;  %v15331_v20 = vsub.f32 %v2161_v52, %v6349_v37  ;;  %v15333_v26 = vsub.f32 %v2165_v25, %v6353_v15  ;;  %v3665_v53 = vand.u32 4294901760, %v2167_v45  ;;  %v3669_v24 = vand.u32 4294901760, %v2171_v31  ;;  %11117 = vmatprep.subr.bf16.mxu1 %v15249_v44 }
 0x29f   :  { %20576 = vst [vmem:[#allocation227_spill] sm:$0xff] %v15323_v57  ;;  %20577 = vst [vmem:[#allocation229_spill] sm:$0xff] %v15325_v10  ;;  %v6357_v23 = vand.u32 4294901760, %v2169_v8  ;;  %v6361_v57 = vand.u32 4294901760, %v2173_v3  ;;  %v15338_v17 = vpack.c.bf16 %v3667_v56, %v3663_v49  ;;  %v15340_v52 = vsub.f32 %v2168_v58, %v3663_v49  ;;  %v2177_v58 = vld [vmem:[#allocation10 + $0x490] sm:$0xff]  ;;  %10351 = vmatpush1.bf16.msra.mxu0 %v15255_v18  ;;  %v2196_v18 = vld [vmem:[#allocation10 + $0x528] sm:$0xff] }
 0x2a0   :  { %20578 = vst [vmem:[#allocation231_spill] sm:$0xff] %v15327_v34  ;;  %20579 = vst [vmem:[#allocation232_spill] sm:$0xff] %v15329_v4  ;;  %v15342_v25 = vsub.f32 %v2172_v27, %v3667_v56  ;;  %v15345_v5 = vpack.c.bf16 %v6359_v61, %v6355_v6  ;;  %v15347_v46 = vsub.f32 %v2170_v0, %v6355_v6  ;;  %v3671_v37 = vand.u32 4294901760, %v2176_v30  ;;  %v2175_v4 = vld [vmem:[#allocation10 + $0x480] sm:$0xff]  ;;  %v2181_v49 = vld [vmem:[#allocation10 + $0x4b0] sm:$0xff] }
 0x2a1   :  { %20580 = vst [vmem:[#allocation233_spill] sm:$0xff] %v15331_v20  ;;  %20581 = vst [vmem:[#allocation234_spill] sm:$0xff] %v15333_v26  ;;  %v3675_v15 = vand.u32 4294901760, %v2180_v41  ;;  %v15349_v26 = vsub.f32 %v2174_v36, %v6359_v61  ;;  %v15351_v63 = vsub.f32 %v2167_v45, %v3665_v53  ;;  %v6363_v21 = vand.u32 4294901760, %v2178_v35  ;;  %v2184_v6 = vld [vmem:[#allocation10 + $0x4c8] sm:$0xff]  ;;  %11119 = vmatpush1.bf16.msra.mxu1 %v15261_v55 }
 0x2a2   :  { %20582 = vst [vmem:[#allocation51_spill] sm:$0xff] %v15338_v17  ;;  %20583 = vst [vmem:[#allocation52_spill] sm:$0xff] %v15340_v52  ;;  %v6367_v17 = vand.u32 4294901760, %v2182_v28  ;;  %v15354_v27 = vpack.c.bf16 %v3669_v24, %v3665_v53  ;;  %v15356_v16 = vsub.f32 %v2171_v31, %v3669_v24  ;;  %v15358_v0 = vpack.c.bf16 %v6361_v57, %v6357_v23  ;;  %v2186_v53 = vld [vmem:[#allocation10 + $0x4d8] sm:$0xff] }
 0x2a3   :  { %20584 = vst [vmem:[#allocation57_spill] sm:$0xff] %v15342_v25  ;;  %20585 = vst [vmem:[#allocation58_spill] sm:$0xff] %v15345_v5  ;;  %v15360_v56 = vsub.f32 %v2169_v8, %v6357_v23  ;;  %v2188_v5 = vld [vmem:[#allocation10 + $0x4e8] sm:$0xff]  ;;  %v15364_v36 = vsub.f32 %v2173_v3, %v6361_v57  ;;  %v15366_v45 = vsub.f32 %v2176_v30, %v3671_v37  ;;  %v3673_v61 = vand.u32 4294901760, %v2175_v4  ;;  %v2183_v3 = vld [vmem:[#allocation10 + $0x4c0] sm:$0xff] }
 0x2a4   :  { %20586 = vst [vmem:[#allocation61_spill] sm:$0xff] %v15347_v46  ;;  %20587 = vst [vmem:[#allocation63_spill] sm:$0xff] %v15349_v26  ;;  %v3677_v54 = vand.u32 4294901760, %v2179_v2  ;;  %v15369_v31 = vpack.c.bf16 %v3675_v15, %v3671_v37  ;;  %v15371_v23 = vsub.f32 %v2180_v41, %v3675_v15  ;;  %v6365_v8 = vand.u32 4294901760, %v2177_v58  ;;  %v2187_v30 = vld [vmem:[#allocation10 + $0x4e0] sm:$0xff]  ;;  %v2185_v41 = vld [vmem:[#allocation10 + $0x4d0] sm:$0xff]  ;;  %10353 = vmatprep.subr.bf16.mxu0 %v15267_v40 }
 0x2a5   :  { %20588 = vst [vmem:[#allocation65_spill] sm:$0xff] %v15351_v63  ;;  %20589 = vst [vmem:[#allocation67_spill] sm:$0xff] %v15354_v27  ;;  %v2190_v27 = vld [vmem:[#allocation10 + $0x4f8] sm:$0xff]  ;;  %v6369_v24 = vand.u32 4294901760, %v2181_v49  ;;  %v15375_v14 = vsub.f32 %v2178_v35, %v6363_v21  ;;  %v3679_v29 = vand.u32 4294901760, %v2184_v6  ;;  %v3683_v57 = vand.u32 4294901760, %v2188_v5  ;;  %11121 = vmatprep.subr.bf16.mxu1 %v15273_v42  ;;  %10355 = vmatpush1.bf16.msra.mxu0 %v15279_v51 }
 0x2a6   :  { %20590 = vst [vmem:[#allocation77_spill] sm:$0xff] %v15356_v16  ;;  %20591 = vst [vmem:[#allocation82_spill] sm:$0xff] %v15358_v0  ;;  %v15373_v0 = vpack.c.bf16 %v6367_v17, %v6363_v21  ;;  %v6371_v44 = vand.u32 4294901760, %v2186_v53  ;;  %v6375_v37 = vand.u32 4294901760, %v2190_v27  ;;  %v2189_v15 = vld [vmem:[#allocation10 + $0x4f0] sm:$0xff]  ;;  %v15384_v35 = vpack.c.bf16 %v3677_v54, %v3673_v61  ;;  %11123 = vmatpush1.bf16.msra.mxu1 %v15285_v60 }
 0x2a7   :  { %20592 = vst [vmem:[#allocation86_spill] sm:$0xff] %v15360_v56  ;;  %20593 = vst [vmem:[#allocation88_spill] sm:$0xff] %v15364_v36  ;;  %v15380_v36 = vsub.f32 %v2175_v4, %v3673_v61  ;;  %v15386_v21 = vsub.f32 %v2179_v2, %v3677_v54  ;;  %v15391_v4 = vpack.c.bf16 %v6369_v24, %v6365_v8  ;;  %v6373_v40 = vand.u32 4294901760, %v2185_v41  ;;  %v2194_v2 = vld [vmem:[#allocation10 + $0x518] sm:$0xff]  ;;  %v2197_v51 = vld [vmem:[#allocation10 + $0x530] sm:$0xff] }
 0x2a8   :  { %20594 = vst [vmem:[#allocation74_spill] sm:$0xff] %v15366_v45  ;;  %20595 = vst [vmem:[#allocation147_spill] sm:$0xff] %v15369_v31  ;;  %v15378_v45 = vsub.f32 %v2182_v28, %v6367_v17  ;;  %v2192_v31 = vld [vmem:[#allocation10 + $0x508] sm:$0xff]  ;;  %v15393_v28 = vsub.f32 %v2181_v49, %v6369_v24  ;;  %v3681_v17 = vand.u32 4294901760, %v2183_v3  ;;  %v15397_v55 = vsub.f32 %v2184_v6, %v3679_v29  ;;  %v2198_v54 = vld [vmem:[#allocation10 + $0x538] sm:$0xff] }
 0x2a9   :  { %20596 = vst [vmem:[#allocation150_spill] sm:$0xff] %v15371_v23  ;;  %20597 = vst [vmem:[#allocation153_spill] sm:$0xff] %v15373_v0  ;;  %v15388_v0 = vsub.f32 %v2177_v58, %v6365_v8  ;;  %v6377_v61 = vand.u32 4294901760, %v2189_v15  ;;  %v15400_v58 = vsub.f32 %v2188_v5, %v3683_v57  ;;  %v3687_v42 = vand.u32 4294901760, %v2192_v31  ;;  %v2191_v49 = vld [vmem:[#allocation10 + $0x500] sm:$0xff]  ;;  %10357 = vmatprep.subr.bf16.mxu0 %v15291_v33 }
 0x2aa   :  { %20598 = vst [vmem:[#allocation154_spill] sm:$0xff] %v15375_v14  ;;  %20599 = vst [vmem:[#allocation156_spill] sm:$0xff] %v15378_v45  ;;  %v15395_v45 = vpack.c.bf16 %v3683_v57, %v3679_v29  ;;  %v3691_v8 = vand.u32 4294901760, %v2196_v18  ;;  %v2195_v24 = vld [vmem:[#allocation10 + $0x520] sm:$0xff]  ;;  %v15406_v6 = vsub.f32 %v2186_v53, %v6371_v44  ;;  %v15408_v29 = vsub.f32 %v2190_v27, %v6375_v37  ;;  %v2200_v27 = vld [vmem:[#allocation10 + $0x548] sm:$0xff] }
 0x2ab   :  { %20600 = vst [vmem:[#allocation157_spill] sm:$0xff] %v15380_v36  ;;  %20601 = vst [vmem:[#allocation159_spill] sm:$0xff] %v15384_v35  ;;  %v3685_v36 = vand.u32 4294901760, %v2187_v30  ;;  %v15402_v35 = vpack.c.bf16 %v6375_v37, %v6371_v44  ;;  %11125 = vmatprep.subr.bf16.mxu1 %v15297_v50  ;;  %v15419_v60 = vsub.f32 %v2185_v41, %v6373_v40  ;;  %v3689_v33 = vand.u32 4294901760, %v2191_v49  ;;  %v2204_v44 = vld [vmem:[#allocation10 + $0x568] sm:$0xff] }
 0x2ac   :  { %20602 = vst [vmem:[#allocation160_spill] sm:$0xff] %v15386_v21  ;;  %20603 = vst [vmem:[#allocation73_spill] sm:$0xff] %v15388_v0  ;;  %v3693_v53 = vand.u32 4294901760, %v2195_v24  ;;  %10359 = vmatpush1.bf16.msra.mxu0 %v15303_v1  ;;  %v15424_v37 = vpack.c.bf16 %v3691_v8, %v3687_v42  ;;  %11127 = vmatpush1.bf16.msra.mxu1 %v15309_v22  ;;  %v15428_v41 = vsub.f32 %v2192_v31, %v3687_v42 }
 0x2ad   :  { %20604 = vst [vmem:[#allocation161_spill] sm:$0xff] %v15391_v4  ;;  %20605 = vst [vmem:[#allocation162_spill] sm:$0xff] %v15393_v28  ;;  %v15413_v5 = vpack.c.bf16 %v3685_v36, %v3681_v17  ;;  %v15415_v57 = vsub.f32 %v2187_v30, %v3685_v36  ;;  %v15417_v4 = vpack.c.bf16 %v6377_v61, %v6373_v40  ;;  %v2202_v36 = vld [vmem:[#allocation10 + $0x558] sm:$0xff] }
 0x2ae   :  { %20606 = vst [vmem:[#allocation163_spill] sm:$0xff] %v15395_v45  ;;  %20607 = vst [vmem:[#allocation191_spill] sm:$0xff] %v15397_v55  ;;  %v15410_v55 = vsub.f32 %v2183_v3, %v3681_v17  ;;  %v2193_v45 = vld [vmem:[#allocation10 + $0x510] sm:$0xff]  ;;  %v15422_v3 = vsub.f32 %v2189_v15, %v6377_v61  ;;  %v6385_v17 = vand.u32 4294901760, %v2197_v51  ;;  %v2206_v30 = vld [vmem:[#allocation10 + $0x578] sm:$0xff]  ;;  %v15430_v40 = vsub.f32 %v2196_v18, %v3691_v8 }
 0x2af   :  { %20608 = vst [vmem:[#allocation44_spill] sm:$0xff] %v15400_v58  ;;  %20609 = vst [vmem:[#allocation43_spill] sm:$0xff] %v15402_v35  ;;  %v6379_v58 = vand.u32 4294901760, %v2194_v2  ;;  %v6383_v35 = vand.u32 4294901760, %v2198_v54  ;;  %v6381_v50 = vand.u32 4294901760, %v2193_v45  ;;  %v3695_v61 = vand.u32 4294901760, %v2200_v27 }
 0x2b0   :  { %20610 = vst [vmem:[#allocation194_spill] sm:$0xff] %v15406_v6  ;;  %20611 = vst [vmem:[#allocation193_spill] sm:$0xff] %v15408_v29  ;;  %v2199_v29 = vld [vmem:[#allocation10 + $0x540] sm:$0xff]  ;;  %v15440_v22 = vpack.c.bf16 %v3693_v53, %v3689_v33  ;;  %v15442_v31 = vsub.f32 %v2191_v49, %v3689_v33  ;;  %v6387_v18 = vand.u32 4294901760, %v2202_v36  ;;  %v6391_v42 = vand.u32 4294901760, %v2206_v30  ;;  %v2205_v8 = vld [vmem:[#allocation10 + $0x570] sm:$0xff] }
 0x2b1   :  { %20612 = vst [vmem:[#allocation196_spill] sm:$0xff] %v15410_v55  ;;  %20613 = vst [vmem:[#allocation195_spill] sm:$0xff] %v15413_v5  ;;  %v20623_v55 = vld [vmem:[#allocation53_spill] sm:$0xff]  ;;  %v15435_v1 = vpack.c.bf16 %v6383_v35, %v6379_v58  ;;  %v15437_v15 = vsub.f32 %v2198_v54, %v6383_v35  ;;  %v2203_v6 = vld [vmem:[#allocation10 + $0x560] sm:$0xff]  ;;  %v15446_v35 = vsub.f32 %v2195_v24, %v3693_v53 }
 0x2b2   :  { %20614 = vst [vmem:[#allocation50_spill] sm:$0xff] %v15415_v57  ;;  %20615 = vst [vmem:[#allocation47_spill] sm:$0xff] %v15417_v4  ;;  %v20619_v57 = vld [vmem:[#allocation49_spill] sm:$0xff]  ;;  %11129 = vmatprep.subr.bf16.mxu1 %v20623_v55  ;;  %v15448_v55 = vpack.c.bf16 %v6385_v17, %v6381_v50  ;;  %v15450_v54 = vsub.f32 %v2193_v45, %v6381_v50  ;;  %v20634_v49 = vld [vmem:[#allocation76_spill] sm:$0xff]  ;;  %v15454_v33 = vsub.f32 %v2197_v51, %v6385_v17 }
 0x2b3   :  { %20616 = vst [vmem:[#allocation199_spill] sm:$0xff] %v15419_v60  ;;  %20617 = vst [vmem:[#allocation198_spill] sm:$0xff] %v15422_v3  ;;  %10361 = vmatprep.subr.bf16.mxu0 %v20619_v57  ;;  %v15432_v60 = vsub.f32 %v2194_v2, %v6379_v58  ;;  %v3699_v3 = vand.u32 4294901760, %v2204_v44  ;;  %v2201_v2 = vld [vmem:[#allocation10 + $0x550] sm:$0xff]  ;;  %v20629_v57 = vld [vmem:[#allocation60_spill] sm:$0xff]  ;;  %v15468_v17 = vsub.f32 %v2202_v36, %v6387_v18 }
 0x2b4   :  { %20618 = vst [vmem:[#allocation210_spill] sm:$0xff] %v15424_v37  ;;  %20620 = vst [vmem:[#allocation221_spill] sm:$0xff] %v15428_v41  ;;  %v20626_v37 = vld [vmem:[#allocation205_spill] sm:$0xff]  ;;  %v2208_v58 = vld [vmem:[#allocation10 + $0x588] sm:$0xff] }
 0x2b5   :  { %20621 = vst [vmem:[#allocation228_spill] sm:$0xff] %v15430_v40  ;;  %20622 = vst [vmem:[#allocation80_spill] sm:$0xff] %v15432_v60  ;;  %3496 = vmatmul.mubr.f32.vlgmr.msra.gmra.mrb[4].mxu0 %v20626_v37  ;;  %6188 = vmatmul.mubr.f32.vlgmr.msra.gmra.mrb[4].mxu1 %v20626_v37  ;;  %v20633_v60 = vld [vmem:[#allocation64_spill] sm:$0xff]  ;;  %v3697_v40 = vand.u32 4294901760, %v2199_v29  ;;  %v2210_v41 = vld [vmem:[#allocation10 + $0x598] sm:$0xff]  ;;  %v15460_v45 = vpack.c.bf16 %v3699_v3, %v3695_v61  ;;  %v15462_v50 = vsub.f32 %v2204_v44, %v3699_v3 }
 0x2b6   :  { %20624 = vst [vmem:[#allocation125_spill] sm:$0xff] %v15435_v1  ;;  %20625 = vst [vmem:[#allocation131_spill] sm:$0xff] %v15437_v15  ;;  %10363 = vmatpush1.bf16.msra.mxu0 %v20629_v57  ;;  %v2212_v15 = vld [vmem:[#allocation10 + $0x5a8] sm:$0xff]  ;;  %11131 = vmatpush1.bf16.msra.mxu1 %v20633_v60  ;;  %v3701_v57 = vand.u32 4294901760, %v2203_v6  ;;  %v20637_v24 = vld [vmem:[#allocation83_spill] sm:$0xff]  ;;  %v6393_v60 = vand.u32 4294901760, %v2205_v8  ;;  %v15472_v44 = vsub.f32 %v2206_v30, %v6391_v42 }
 0x2b7   :  { %20627 = vst [vmem:[#allocation135_spill] sm:$0xff] %v15440_v22  ;;  %20628 = vst [vmem:[#allocation137_spill] sm:$0xff] %v15442_v31  ;;  %10365 = vmatprep.subr.bf16.mxu0 %v20634_v49  ;;  %v15456_v31 = vsub.f32 %v2200_v27, %v3695_v61  ;;  %v2214_v22 = vld [vmem:[#allocation10 + $0x5b8] sm:$0xff]  ;;  %11133 = vmatprep.subr.bf16.mxu1 %v20637_v24  ;;  %v15466_v27 = vpack.c.bf16 %v6391_v42, %v6387_v18  ;;  %v3703_v49 = vand.u32 4294901760, %v2208_v58  ;;  %v2211_v24 = vld [vmem:[#allocation10 + $0x5a0] sm:$0xff] }
 0x2b8   :  { %20630 = vst [vmem:[#allocation140_spill] sm:$0xff] %v15446_v35  ;;  %20631 = vst [vmem:[#allocation143_spill] sm:$0xff] %v15448_v55  ;;  %v20638_v53 = vld [vmem:[#allocation46_spill] sm:$0xff]  ;;  %v20644_v35 = vld [vmem:[#allocation23_spill] sm:$0xff]  ;;  %v15474_v3 = vsub.f32 %v2199_v29, %v3697_v40  ;;  %v6395_v61 = vand.u32 4294901760, %v2210_v41  ;;  %v15478_v18 = vpack.c.bf16 %v3701_v57, %v3697_v40  ;;  %v15488_v42 = vsub.f32 %v2205_v8, %v6393_v60 }
 0x2b9   :  { %20632 = vst [vmem:[#allocation146_spill] sm:$0xff] %v15450_v54  ;;  %20635 = vst [vmem:[#allocation149_spill] sm:$0xff] %v15454_v33  ;;  %3502 = vmatprep.mubr.f32.mxu0 %v20638_v53  ;;  %v6389_v54 = vand.u32 4294901760, %v2201_v2  ;;  %6194 = vmatprep.mubr.f32.mxu1 %v20638_v53  ;;  %v20641_v51 = vld [vmem:[#allocation222_spill] sm:$0xff]  ;;  %v2207_v33 = vld [vmem:[#allocation10 + $0x580] sm:$0xff]  ;;  %v15493_v40 = vsub.f32 %v2208_v58, %v3703_v49 }
 0x2ba   :  { %20636 = vst [vmem:[#allocation152_spill] sm:$0xff] %v15456_v31  ;;  %20639 = vst [vmem:[#allocation84_spill] sm:$0xff] %v15460_v45  ;;  %3504 = vmatmul.mubr.f32.gmra.mrb[6].mxu0 %v20641_v51  ;;  %v3707_v31 = vand.u32 4294901760, %v2212_v15  ;;  %6196 = vmatmul.mubr.f32.gmra.mrb[6].mxu1 %v20641_v51  ;;  %v2209_v45 = vld [vmem:[#allocation10 + $0x590] sm:$0xff]  ;;  %v20648_v36 = vld [vmem:[#allocation26_spill] sm:$0xff] }
 0x2bb   :  { %20640 = vst [vmem:[#allocation89_spill] sm:$0xff] %v15462_v50  ;;  %20642 = vst [vmem:[#allocation91_spill] sm:$0xff] %v15466_v27  ;;  %10367 = vmatpush1.bf16.msra.mxu0 %v20644_v35  ;;  %v6399_v50 = vand.u32 4294901760, %v2214_v22  ;;  %v2213_v55 = vld [vmem:[#allocation10 + $0x5b0] sm:$0xff]  ;;  %v15482_v27 = vsub.f32 %v2201_v2, %v6389_v54  ;;  %v2216_v35 = vld [vmem:[#allocation10 + $0x5c8] sm:$0xff]  ;;  %3639 = vmatprep.mubr.f32.mxu0 %v20400_v48  ;;  %v15486_v29 = vpack.c.bf16 %v6393_v60, %v6389_v54 }
 0x2bc   :  { %20643 = vst [vmem:[#allocation24_spill] sm:$0xff] %v15468_v17  ;;  %20645 = vst [vmem:[#allocation25_spill] sm:$0xff] %v15472_v44  ;;  %v20647_v1 = vld [vmem:[#allocation69_spill] sm:$0xff]  ;;  %10369 = vmatprep.subr.bf16.mxu0 %v20648_v36  ;;  %v15480_v17 = vsub.f32 %v2203_v6, %v3701_v57  ;;  %v2220_v4 = vld [vmem:[#allocation10 + $0x5e8] sm:$0xff]  ;;  %6331 = vmatprep.mubr.f32.mxu1 %v20400_v48  ;;  %v15491_v6 = vpack.c.bf16 %v3707_v31, %v3703_v49  ;;  %v6397_v2 = vand.u32 4294901760, %v2209_v45 }
 0x2bd   :  { %20646 = vst [vmem:[#allocation28_spill] sm:$0xff] %v15474_v3  ;;  %11135 = vmatpush1.bf16.msra.mxu1 %v20647_v1  ;;  %20649 = vst [vmem:[#allocation30_spill] sm:$0xff] %v15478_v18  ;;  %v20652_v30 = vld [vmem:[#allocation31_spill] sm:$0xff]  ;;  %v3705_v3 = vand.u32 4294901760, %v2207_v33  ;;  %v3709_v1 = vand.u32 4294901760, %v2211_v24  ;;  %v2218_v44 = vld [vmem:[#allocation10 + $0x5d8] sm:$0xff]  ;;  %v15498_v54 = vpack.c.bf16 %v6399_v50, %v6395_v61  ;;  %v15502_v48 = vsub.f32 %v2210_v41, %v6395_v61 }
 0x2be   :  { %20650 = vst [vmem:[#allocation33_spill] sm:$0xff] %v15480_v17  ;;  %20651 = vst [vmem:[#allocation34_spill] sm:$0xff] %v15482_v27  ;;  %11137 = vmatprep.subr.bf16.mxu1 %v20652_v30  ;;  %v2222_v36 = vld [vmem:[#allocation10 + $0x5f8] sm:$0xff]  ;;  %v6401_v57 = vand.u32 4294901760, %v2213_v55  ;;  %v15496_v30 = vsub.f32 %v2212_v15, %v3707_v31  ;;  %v3711_v8 = vand.u32 4294901760, %v2216_v35  ;;  %v3715_v60 = vand.u32 4294901760, %v2220_v4 }
 0x2bf   :  { %20653 = vst [vmem:[#allocation226_spill] sm:$0xff] %v15486_v29  ;;  %20654 = vst [vmem:[#allocation230_spill] sm:$0xff] %v15488_v42  ;;  %v20657_v27 = vld [vmem:[#allocation78_spill] sm:$0xff]  ;;  %v2215_v42 = vld [vmem:[#allocation10 + $0x5c0] sm:$0xff]  ;;  %v15504_v58 = vsub.f32 %v2214_v22, %v6399_v50  ;;  %v6403_v49 = vand.u32 4294901760, %v2218_v44  ;;  %v15507_v31 = vpack.c.bf16 %v3709_v1, %v3705_v3  ;;  %v15513_v5 = vsub.f32 %v2209_v45, %v6397_v2 }
 0x2c0   :  { %20655 = vst [vmem:[#allocation93_spill] sm:$0xff] %v15491_v6  ;;  %20656 = vst [vmem:[#allocation94_spill] sm:$0xff] %v15493_v40  ;;  %10371 = vmatpush1.bf16.msra.mxu0 %v20657_v27  ;;  %v2219_v17 = vld [vmem:[#allocation10 + $0x5e0] sm:$0xff]  ;;  %v20661_v18 = vld [vmem:[#allocation98_spill] sm:$0xff]  ;;  %v6407_v40 = vand.u32 4294901760, %v2222_v36  ;;  %v15517_v41 = vsub.f32 %v2213_v55, %v6401_v57  ;;  %v3713_v22 = vand.u32 4294901760, %v2215_v42  ;;  %v15526_v55 = vsub.f32 %v2220_v4, %v3715_v60 }
 0x2c1   :  { %20658 = vst [vmem:[#allocation96_spill] sm:$0xff] %v15496_v30  ;;  %20659 = vst [vmem:[#allocation97_spill] sm:$0xff] %v15498_v54  ;;  %v20660_v29 = vld [vmem:[#allocation95_spill] sm:$0xff]  ;;  %10373 = vmatprep.subr.bf16.mxu0 %v20661_v18  ;;  %v2217_v6 = vld [vmem:[#allocation10 + $0x5d0] sm:$0xff]  ;;  %v15509_v30 = vsub.f32 %v2207_v33, %v3705_v3  ;;  %v15511_v54 = vsub.f32 %v2211_v24, %v3709_v1  ;;  %v3717_v50 = vand.u32 4294901760, %v2219_v17 }
 0x2c2   :  { %11139 = vmatpush1.bf16.msra.mxu1 %v20660_v29  ;;  %20662 = vst [vmem:[#allocation81_spill] sm:$0xff] %v15502_v48  ;;  %20663 = vst [vmem:[#allocation99_spill] sm:$0xff] %v15504_v58  ;;  %v2221_v27 = vld [vmem:[#allocation10 + $0x5f0] sm:$0xff]  ;;  %v20664_v15 = vld [vmem:[#allocation100_spill] sm:$0xff]  ;;  %v15515_v29 = vpack.c.bf16 %v6401_v57, %v6397_v2  ;;  %v15520_v48 = vpack.c.bf16 %v3715_v60, %v3711_v8  ;;  %v6405_v33 = vand.u32 4294901760, %v2217_v6 }
 0x2c3   :  { %11141 = vmatprep.subr.bf16.mxu1 %v20664_v15  ;;  %20665 = vst [vmem:[#allocation101_spill] sm:$0xff] %v15507_v31  ;;  %20666 = vst [vmem:[#allocation102_spill] sm:$0xff] %v15509_v30  ;;  %v2224_v61 = vld [vmem:[#allocation10 + $0x608] sm:$0xff]  ;;  %v20671_v58 = vld [vmem:[#allocation103_spill] sm:$0xff]  ;;  %v15522_v15 = vsub.f32 %v2216_v35, %v3711_v8  ;;  %v6409_v3 = vand.u32 4294901760, %v2221_v27  ;;  %v15528_v57 = vpack.c.bf16 %v6407_v40, %v6403_v49 }
 0x2c4   :  { %20667 = vst [vmem:[#allocation204_spill] sm:$0xff] %v15511_v54  ;;  %20668 = vst [vmem:[#allocation104_spill] sm:$0xff] %v15513_v5  ;;  %v2228_v18 = vld [vmem:[#allocation10 + $0x628] sm:$0xff]  ;;  %10375 = vmatpush1.bf16.msra.mxu0 %v20671_v58  ;;  %v2226_v24 = vld [vmem:[#allocation10 + $0x618] sm:$0xff]  ;;  %v15533_v35 = vsub.f32 %v2222_v36, %v6407_v40  ;;  %v15535_v8 = vsub.f32 %v2215_v42, %v3713_v22  ;;  %v15539_v4 = vsub.f32 %v2219_v17, %v3717_v50 }
 0x2c5   :  { %20669 = vst [vmem:[#allocation105_spill] sm:$0xff] %v15515_v29  ;;  %20670 = vst [vmem:[#allocation107_spill] sm:$0xff] %v15517_v41  ;;  %v2230_v1 = vld [vmem:[#allocation10 + $0x638] sm:$0xff]  ;;  %v20675_v2 = vld [vmem:[#allocation109_spill] sm:$0xff]  ;;  %v15530_v41 = vsub.f32 %v2218_v44, %v6403_v49  ;;  %v3723_v30 = vand.u32 4294901760, %v2228_v18  ;;  %v15537_v29 = vpack.c.bf16 %v3717_v50, %v3713_v22  ;;  %v6411_v60 = vand.u32 4294901760, %v2226_v24 }
 0x2c6   :  { %20672 = vst [vmem:[#allocation108_spill] sm:$0xff] %v15520_v48  ;;  %20673 = vst [vmem:[#allocation110_spill] sm:$0xff] %v15522_v15  ;;  %v20674_v45 = vld [vmem:[#allocation106_spill] sm:$0xff]  ;;  %10377 = vmatprep.subr.bf16.mxu0 %v20675_v2  ;;  %v2223_v5 = vld [vmem:[#allocation10 + $0x600] sm:$0xff]  ;;  %v3719_v15 = vand.u32 4294901760, %v2224_v61  ;;  %v6415_v2 = vand.u32 4294901760, %v2230_v1  ;;  %v15544_v36 = vsub.f32 %v2217_v6, %v6405_v33  ;;  %v15548_v17 = vsub.f32 %v2221_v27, %v6409_v3 }
 0x2c7   :  { %11143 = vmatpush1.bf16.msra.mxu1 %v20674_v45  ;;  %20676 = vst [vmem:[#allocation92_spill] sm:$0xff] %v15526_v55  ;;  %20677 = vst [vmem:[#allocation112_spill] sm:$0xff] %v15528_v57  ;;  %v2227_v58 = vld [vmem:[#allocation10 + $0x620] sm:$0xff]  ;;  %v2225_v48 = vld [vmem:[#allocation10 + $0x610] sm:$0xff]  ;;  %v15542_v55 = vpack.c.bf16 %v6409_v3, %v6405_v33  ;;  %v3721_v42 = vand.u32 4294901760, %v2223_v5  ;;  %v15555_v6 = vsub.f32 %v2228_v18, %v3723_v30 }
 0x2c8   :  { %20678 = vst [vmem:[#allocation113_spill] sm:$0xff] %v15530_v41  ;;  %v20679_v54 = vld [vmem:[#allocation111_spill] sm:$0xff]  ;;  %20680 = vst [vmem:[#allocation115_spill] sm:$0xff] %v15533_v35  ;;  %v2229_v45 = vld [vmem:[#allocation10 + $0x630] sm:$0xff]  ;;  %v3725_v40 = vand.u32 4294901760, %v2227_v58  ;;  %v15550_v50 = vsub.f32 %v2224_v61, %v3719_v15  ;;  %v15557_v28 = vpack.c.bf16 %v6415_v2, %v6411_v60 }
 0x2c9   :  { %11145 = vmatprep.subr.bf16.mxu1 %v20679_v54  ;;  %20681 = vst [vmem:[#allocation116_spill] sm:$0xff] %v15535_v8  ;;  %20682 = vst [vmem:[#allocation118_spill] sm:$0xff] %v15537_v29  ;;  %v2232_v44 = vld [vmem:[#allocation10 + $0x648] sm:$0xff]  ;;  %v20684_v41 = vld [vmem:[#allocation114_spill] sm:$0xff]  ;;  %v6417_v29 = vand.u32 4294901760, %v2229_v45 }
 0x2ca   :  { %20683 = vst [vmem:[#allocation119_spill] sm:$0xff] %v15539_v4  ;;  %v2236_v49 = vld [vmem:[#allocation10 + $0x668] sm:$0xff]  ;;  %10379 = vmatpush1.bf16.msra.mxu0 %v20684_v41  ;;  %20685 = vst [vmem:[#allocation70_spill] sm:$0xff] %v15542_v55  ;;  %v2234_v54 = vld [vmem:[#allocation10 + $0x658] sm:$0xff]  ;;  %v6413_v4 = vand.u32 4294901760, %v2225_v48  ;;  %v15553_v41 = vpack.c.bf16 %v3723_v30, %v3719_v15  ;;  %v3727_v33 = vand.u32 4294901760, %v2232_v44  ;;  %v15564_v15 = vpack.c.bf16 %v3725_v40, %v3721_v42 }
 0x2cb   :  { %20686 = vst [vmem:[#allocation121_spill] sm:$0xff] %v15544_v36  ;;  %v2238_v8 = vld [vmem:[#allocation10 + $0x678] sm:$0xff]  ;;  %v20687_v35 = vld [vmem:[#allocation117_spill] sm:$0xff]  ;;  %v20688_v22 = vld [vmem:[#allocation120_spill] sm:$0xff]  ;;  %v3731_v36 = vand.u32 4294901760, %v2236_v49  ;;  %v6419_v27 = vand.u32 4294901760, %v2234_v54  ;;  %v15566_v30 = vsub.f32 %v2223_v5, %v3721_v42  ;;  %v15568_v18 = vsub.f32 %v2227_v58, %v3725_v40 }
 0x2cc   :  { %11147 = vmatpush1.bf16.msra.mxu1 %v20687_v35  ;;  %10381 = vmatprep.subr.bf16.mxu0 %v20688_v22  ;;  %20689 = vst [vmem:[#allocation123_spill] sm:$0xff] %v15548_v17  ;;  %20690 = vst [vmem:[#allocation124_spill] sm:$0xff] %v15550_v50  ;;  %v20691_v57 = vld [vmem:[#allocation122_spill] sm:$0xff]  ;;  %v2231_v55 = vld [vmem:[#allocation10 + $0x640] sm:$0xff]  ;;  %v15559_v35 = vsub.f32 %v2226_v24, %v6411_v60  ;;  %v6423_v3 = vand.u32 4294901760, %v2238_v8  ;;  %v15562_v50 = vsub.f32 %v2230_v1, %v6415_v2 }
 0x2cd   :  { %11149 = vmatprep.subr.bf16.mxu1 %v20691_v57  ;;  %20692 = vst [vmem:[#allocation126_spill] sm:$0xff] %v15553_v41  ;;  %20693 = vst [vmem:[#allocation127_spill] sm:$0xff] %v15555_v6  ;;  %v2235_v31 = vld [vmem:[#allocation10 + $0x660] sm:$0xff]  ;;  %v2233_v61 = vld [vmem:[#allocation10 + $0x650] sm:$0xff]  ;;  %v15572_v24 = vpack.c.bf16 %v6417_v29, %v6413_v4  ;;  %v15574_v60 = vsub.f32 %v2225_v48, %v6413_v4  ;;  %v15577_v5 = vsub.f32 %v2229_v45, %v6417_v29 }
 0x2ce   :  { %20694 = vst [vmem:[#allocation128_spill] sm:$0xff] %v15557_v28  ;;  %20695 = vst [vmem:[#allocation130_spill] sm:$0xff] %v15559_v35  ;;  %v2237_v22 = vld [vmem:[#allocation10 + $0x670] sm:$0xff]  ;;  %10383 = vmatpush1.bf16.msra.mxu0 %v20311_v9  ;;  %v2240_v57 = vld [vmem:[#allocation10 + $0x688] sm:$0xff]  ;;  %v3729_v35 = vand.u32 4294901760, %v2231_v55  ;;  %v3733_v17 = vand.u32 4294901760, %v2235_v31  ;;  %v15579_v58 = vpack.c.bf16 %v3731_v36, %v3727_v33  ;;  %v15587_v48 = vsub.f32 %v2234_v54, %v6419_v27 }
 0x2cf   :  { %20696 = vst [vmem:[#allocation132_spill] sm:$0xff] %v15562_v50  ;;  %20697 = vst [vmem:[#allocation133_spill] sm:$0xff] %v15564_v15  ;;  %v20700_v6 = vld [vmem:[#allocation129_spill] sm:$0xff]  ;;  %10385 = vmatprep.subr.bf16.mxu0 %v20313_v13  ;;  %v2244_v9 = vld [vmem:[#allocation10 + $0x6a8] sm:$0xff]  ;;  %v6421_v42 = vand.u32 4294901760, %v2233_v61  ;;  %v6425_v40 = vand.u32 4294901760, %v2237_v22  ;;  %v15583_v13 = vsub.f32 %v2236_v49, %v3731_v36 }
 0x2d0   :  { %20698 = vst [vmem:[#allocation134_spill] sm:$0xff] %v15566_v30  ;;  %20699 = vst [vmem:[#allocation136_spill] sm:$0xff] %v15568_v18  ;;  %11151 = vmatpush1.bf16.msra.mxu1 %v20700_v6  ;;  %v2242_v1 = vld [vmem:[#allocation10 + $0x698] sm:$0xff]  ;;  %v15581_v6 = vsub.f32 %v2232_v44, %v3727_v33  ;;  %v15585_v18 = vpack.c.bf16 %v6423_v3, %v6419_v27  ;;  %v2239_v4 = vld [vmem:[#allocation10 + $0x680] sm:$0xff]  ;;  %v3735_v30 = vand.u32 4294901760, %v2240_v57 }
 0x2d1   :  { %20701 = vst [vmem:[#allocation138_spill] sm:$0xff] %v15572_v24  ;;  %20702 = vst [vmem:[#allocation139_spill] sm:$0xff] %v15574_v60  ;;  %v2246_v2 = vld [vmem:[#allocation10 + $0x6b8] sm:$0xff]  ;;  %11153 = vmatprep.subr.bf16.mxu1 %v20314_v11  ;;  %v2243_v60 = vld [vmem:[#allocation10 + $0x6a0] sm:$0xff]  ;;  %v3739_v11 = vand.u32 4294901760, %v2244_v9  ;;  %v6427_v29 = vand.u32 4294901760, %v2242_v1  ;;  %v15592_v44 = vsub.f32 %v2238_v8, %v6423_v3  ;;  %v15594_v49 = vpack.c.bf16 %v3733_v17, %v3729_v35 }
 0x2d2   :  { %20703 = vst [vmem:[#allocation141_spill] sm:$0xff] %v15577_v5  ;;  %20704 = vst [vmem:[#allocation142_spill] sm:$0xff] %v15579_v58  ;;  %10387 = vmatpush1.bf16.msra.mxu0 %v20315_v43  ;;  %v6431_v45 = vand.u32 4294901760, %v2246_v2  ;;  %v2241_v5 = vld [vmem:[#allocation10 + $0x690] sm:$0xff]  ;;  %v15596_v36 = vsub.f32 %v2231_v55, %v3729_v35  ;;  %v15599_v54 = vsub.f32 %v2235_v31, %v3733_v17  ;;  %v3737_v33 = vand.u32 4294901760, %v2239_v4  ;;  %v2250_v3 = vld [vmem:[#allocation10 + $0x6d8] sm:$0xff] }
 0x2d3   :  { %20705 = vst [vmem:[#allocation144_spill] sm:$0xff] %v15581_v6  ;;  %20706 = vst [vmem:[#allocation145_spill] sm:$0xff] %v15583_v13  ;;  %v2245_v50 = vld [vmem:[#allocation10 + $0x6b0] sm:$0xff]  ;;  %10389 = vmatprep.subr.bf16.mxu0 %v20317_v32  ;;  %v15601_v43 = vpack.c.bf16 %v6425_v40, %v6421_v42  ;;  %v3741_v27 = vand.u32 4294901760, %v2243_v60  ;;  %v2252_v13 = vld [vmem:[#allocation10 + $0x6e8] sm:$0xff]  ;;  %v15603_v6 = vsub.f32 %v2233_v61, %v6421_v42  ;;  %v6429_v32 = vand.u32 4294901760, %v2241_v5 }
 0x2d4   :  { %20707 = vst [vmem:[#allocation148_spill] sm:$0xff] %v15585_v18  ;;  %20708 = vst [vmem:[#allocation151_spill] sm:$0xff] %v15587_v48  ;;  %11155 = vmatpush1.bf16.msra.mxu1 %v20316_v47  ;;  %v2248_v48 = vld [vmem:[#allocation10 + $0x6c8] sm:$0xff]  ;;  %v15605_v47 = vsub.f32 %v2237_v22, %v6425_v40  ;;  %v6433_v8 = vand.u32 4294901760, %v2245_v50  ;;  %v15608_v55 = vpack.c.bf16 %v3739_v11, %v3735_v30  ;;  %v2247_v35 = vld [vmem:[#allocation10 + $0x6c0] sm:$0xff] }
 0x2d5   :  { %20709 = vst [vmem:[#allocation173_spill] sm:$0xff] %v15592_v44  ;;  %20710 = vst [vmem:[#allocation175_spill] sm:$0xff] %v15594_v49  ;;  %11157 = vmatprep.subr.bf16.mxu1 %v20318_v62  ;;  %v2254_v44 = vld [vmem:[#allocation10 + $0x6f8] sm:$0xff]  ;;  %v15610_v62 = vsub.f32 %v2240_v57, %v3735_v30  ;;  %v15612_v31 = vsub.f32 %v2244_v9, %v3739_v11  ;;  %v15614_v17 = vpack.c.bf16 %v6431_v45, %v6427_v29  ;;  %v20720_v61 = vld [vmem:[#allocation155_spill] sm:$0xff] }
 0x2d6   :  { %20711 = vst [vmem:[#allocation176_spill] sm:$0xff] %v15596_v36  ;;  %20712 = vst [vmem:[#allocation27_spill] sm:$0xff] %v15599_v54  ;;  %10391 = vmatpush1.bf16.msra.mxu0 %v20319_v59  ;;  %v2251_v54 = vld [vmem:[#allocation10 + $0x6e0] sm:$0xff]  ;;  %v15618_v22 = vsub.f32 %v2242_v1, %v6427_v29  ;;  %v15620_v42 = vsub.f32 %v2246_v2, %v6431_v45  ;;  %v3743_v40 = vand.u32 4294901760, %v2248_v48  ;;  %v3747_v59 = vand.u32 4294901760, %v2252_v13  ;;  %v20723_v30 = vld [vmem:[#allocation158_spill] sm:$0xff] }
 0x2d7   :  { %20713 = vst [vmem:[#allocation178_spill] sm:$0xff] %v15601_v43  ;;  %20714 = vst [vmem:[#allocation180_spill] sm:$0xff] %v15603_v6  ;;  %10393 = vmatprep.subr.bf16.mxu0 %v20720_v61  ;;  %v2253_v6 = vld [vmem:[#allocation10 + $0x6f0] sm:$0xff]  ;;  %v15623_v57 = vpack.c.bf16 %v3741_v27, %v3737_v33  ;;  %v15625_v9 = vsub.f32 %v2239_v4, %v3737_v33  ;;  %v6435_v11 = vand.u32 4294901760, %v2250_v3  ;;  %v3745_v2 = vand.u32 4294901760, %v2247_v35  ;;  %v20728_v45 = vld [vmem:[#allocation72_spill] sm:$0xff] }
 0x2d8   :  { %20715 = vst [vmem:[#allocation90_spill] sm:$0xff] %v15605_v47  ;;  %20716 = vst [vmem:[#allocation29_spill] sm:$0xff] %v15608_v55  ;;  %11159 = vmatpush1.bf16.msra.mxu1 %v20320_v38  ;;  %v2249_v47 = vld [vmem:[#allocation10 + $0x6d0] sm:$0xff]  ;;  %v2260_v38 = vld [vmem:[#allocation10 + $0x728] sm:$0xff]  ;;  %v15627_v36 = vsub.f32 %v2243_v60, %v3741_v27  ;;  %v15629_v1 = vpack.c.bf16 %v6433_v8, %v6429_v32  ;;  %v3749_v29 = vand.u32 4294901760, %v2251_v54 }
 0x2d9   :  { %20717 = vst [vmem:[#allocation182_spill] sm:$0xff] %v15610_v62  ;;  %20718 = vst [vmem:[#allocation35_spill] sm:$0xff] %v15612_v31  ;;  %11161 = vmatprep.subr.bf16.mxu1 %v20723_v30  ;;  %v6439_v31 = vand.u32 4294901760, %v2254_v44  ;;  %v2256_v62 = vld [vmem:[#allocation10 + $0x708] sm:$0xff]  ;;  %v15632_v61 = vsub.f32 %v2241_v5, %v6429_v32  ;;  %v6437_v30 = vand.u32 4294901760, %v2249_v47  ;;  %v2258_v4 = vld [vmem:[#allocation10 + $0x718] sm:$0xff]  ;;  %v15638_v60 = vpack.c.bf16 %v3747_v59, %v3743_v40 }
 0x2da   :  { %20719 = vst [vmem:[#allocation36_spill] sm:$0xff] %v15614_v17  ;;  %20721 = vst [vmem:[#allocation183_spill] sm:$0xff] %v15618_v22  ;;  %10395 = vmatpush1.bf16.msra.mxu0 %v20728_v45  ;;  %v6441_v22 = vand.u32 4294901760, %v2253_v6  ;;  %v2262_v33 = vld [vmem:[#allocation10 + $0x738] sm:$0xff]  ;;  %v15640_v27 = vsub.f32 %v2248_v48, %v3743_v40  ;;  %v2255_v17 = vld [vmem:[#allocation10 + $0x700] sm:$0xff]  ;;  %v6443_v48 = vand.u32 4294901760, %v2258_v4  ;;  %v15656_v55 = vsub.f32 %v2251_v54, %v3749_v29 }
 0x2db   :  { %20722 = vst [vmem:[#allocation184_spill] sm:$0xff] %v15620_v42  ;;  %20724 = vst [vmem:[#allocation185_spill] sm:$0xff] %v15623_v57  ;;  %v15634_v42 = vsub.f32 %v2245_v50, %v6433_v8  ;;  %v20732_v57 = vld [vmem:[#allocation164_spill] sm:$0xff]  ;;  %v2259_v45 = vld [vmem:[#allocation10 + $0x720] sm:$0xff]  ;;  %v15643_v50 = vsub.f32 %v2252_v13, %v3747_v59  ;;  %v15645_v32 = vpack.c.bf16 %v6439_v31, %v6435_v11  ;;  %v6447_v40 = vand.u32 4294901760, %v2262_v33 }
 0x2dc   :  { %20725 = vst [vmem:[#allocation186_spill] sm:$0xff] %v15625_v9  ;;  %20726 = vst [vmem:[#allocation39_spill] sm:$0xff] %v15627_v36  ;;  %v20731_v9 = vld [vmem:[#allocation75_spill] sm:$0xff]  ;;  %10397 = vmatprep.subr.bf16.mxu0 %v20732_v57  ;;  %v3751_v36 = vand.u32 4294901760, %v2256_v62  ;;  %v15647_v8 = vsub.f32 %v2250_v3, %v6435_v11  ;;  %v15653_v57 = vsub.f32 %v2247_v35, %v3745_v2  ;;  %v3753_v59 = vand.u32 4294901760, %v2255_v17  ;;  %v2264_v3 = vld [vmem:[#allocation10 + $0x748] sm:$0xff] }
 0x2dd   :  { %20727 = vst [vmem:[#allocation40_spill] sm:$0xff] %v15629_v1  ;;  %20729 = vst [vmem:[#allocation188_spill] sm:$0xff] %v15632_v61  ;;  %11163 = vmatpush1.bf16.msra.mxu1 %v20731_v9  ;;  %v3755_v1 = vand.u32 4294901760, %v2260_v38  ;;  %v20735_v5 = vld [vmem:[#allocation167_spill] sm:$0xff]  ;;  %v15651_v9 = vpack.c.bf16 %v3749_v29, %v3745_v2  ;;  %v2261_v61 = vld [vmem:[#allocation10 + $0x730] sm:$0xff]  ;;  %v15658_v13 = vpack.c.bf16 %v6441_v22, %v6437_v30 }
 0x2de   :  { %20730 = vst [vmem:[#allocation189_spill] sm:$0xff] %v15634_v42  ;;  %20733 = vst [vmem:[#allocation41_spill] sm:$0xff] %v15638_v60  ;;  %11165 = vmatprep.subr.bf16.mxu1 %v20735_v5  ;;  %v15649_v42 = vsub.f32 %v2254_v44, %v6439_v31  ;;  %v20742_v60 = vld [vmem:[#allocation168_spill] sm:$0xff]  ;;  %v3757_v5 = vand.u32 4294901760, %v2259_v45  ;;  %v20746_v31 = vld [vmem:[#allocation174_spill] sm:$0xff]  ;;  %v15662_v35 = vsub.f32 %v2249_v47, %v6437_v30 }
 0x2df   :  { %20734 = vst [vmem:[#allocation201_spill] sm:$0xff] %v15640_v27  ;;  %20736 = vst [vmem:[#allocation62_spill] sm:$0xff] %v15643_v50  ;;  %v2257_v27 = vld [vmem:[#allocation10 + $0x710] sm:$0xff]  ;;  %10399 = vmatpush1.bf16.msra.mxu0 %v20742_v60  ;;  %v2268_v11 = vld [vmem:[#allocation10 + $0x768] sm:$0xff]  ;;  %v15664_v2 = vsub.f32 %v2253_v6, %v6441_v22  ;;  %v15669_v29 = vsub.f32 %v2256_v62, %v3751_v36  ;;  %v6449_v50 = vand.u32 4294901760, %v2261_v61  ;;  %v3759_v6 = vand.u32 4294901760, %v2264_v3 }
 0x2e0   :  { %20737 = vst [vmem:[#allocation202_spill] sm:$0xff] %v15645_v32  ;;  %20738 = vst [vmem:[#allocation203_spill] sm:$0xff] %v15647_v8  ;;  %v20745_v44 = vld [vmem:[#allocation172_spill] sm:$0xff]  ;;  %10401 = vmatprep.subr.bf16.mxu0 %v20746_v31  ;;  %v2270_v60 = vld [vmem:[#allocation10 + $0x778] sm:$0xff]  ;;  %v6445_v8 = vand.u32 4294901760, %v2257_v27  ;;  %v15675_v47 = vsub.f32 %v2258_v4, %v6443_v48  ;;  %v3763_v22 = vand.u32 4294901760, %v2268_v11  ;;  %v15678_v31 = vsub.f32 %v2262_v33, %v6447_v40 }
 0x2e1   :  { %20739 = vst [vmem:[#allocation206_spill] sm:$0xff] %v15649_v42  ;;  %20740 = vst [vmem:[#allocation208_spill] sm:$0xff] %v15651_v9  ;;  %11167 = vmatpush1.bf16.msra.mxu1 %v20745_v44  ;;  %v2266_v42 = vld [vmem:[#allocation10 + $0x758] sm:$0xff]  ;;  %v20750_v54 = vld [vmem:[#allocation177_spill] sm:$0xff]  ;;  %v15673_v9 = vpack.c.bf16 %v6447_v40, %v6443_v48  ;;  %v6455_v62 = vand.u32 4294901760, %v2270_v60  ;;  %v15686_v4 = vsub.f32 %v2259_v45, %v3757_v5 }
 0x2e2   :  { %20741 = vst [vmem:[#allocation209_spill] sm:$0xff] %v15653_v57  ;;  %20743 = vst [vmem:[#allocation71_spill] sm:$0xff] %v15656_v55  ;;  %v15666_v57 = vpack.c.bf16 %v3755_v1, %v3751_v36  ;;  %11169 = vmatprep.subr.bf16.mxu1 %v20750_v54  ;;  %v15671_v55 = vsub.f32 %v2260_v38, %v3755_v1  ;;  %v2267_v44 = vld [vmem:[#allocation10 + $0x760] sm:$0xff]  ;;  %v6451_v36 = vand.u32 4294901760, %v2266_v42  ;;  %v2265_v38 = vld [vmem:[#allocation10 + $0x750] sm:$0xff] }
 0x2e3   :  { %20744 = vst [vmem:[#allocation211_spill] sm:$0xff] %v15658_v13  ;;  %20747 = vst [vmem:[#allocation212_spill] sm:$0xff] %v15662_v35  ;;  %v2263_v13 = vld [vmem:[#allocation10 + $0x740] sm:$0xff]  ;;  %v2269_v1 = vld [vmem:[#allocation10 + $0x770] sm:$0xff]  ;;  %v15689_v40 = vpack.c.bf16 %v6449_v50, %v6445_v8  ;;  %v15699_v45 = vsub.f32 %v2268_v11, %v3763_v22  ;;  %v15708_v11 = vsub.f32 %v2270_v60, %v6455_v62 }
 0x2e4   :  { %20748 = vst [vmem:[#allocation213_spill] sm:$0xff] %v15664_v2  ;;  %20749 = vst [vmem:[#allocation214_spill] sm:$0xff] %v15666_v57  ;;  %v20755_v30 = vld [vmem:[#allocation179_spill] sm:$0xff]  ;;  %v15680_v2 = vpack.c.bf16 %v3757_v5, %v3753_v59  ;;  %v20758_v54 = vld [vmem:[#allocation181_spill] sm:$0xff]  ;;  %v3761_v48 = vand.u32 4294901760, %v2263_v13  ;;  %v6457_v5 = vand.u32 4294901760, %v2269_v1 }
 0x2e5   :  { %20751 = vst [vmem:[#allocation215_spill] sm:$0xff] %v15669_v29  ;;  %20752 = vst [vmem:[#allocation87_spill] sm:$0xff] %v15671_v55  ;;  %10403 = vmatpush1.bf16.msra.mxu0 %v20755_v30  ;;  %11171 = vmatpush1.bf16.msra.mxu1 %v20758_v54  ;;  %v20759_v55 = vld [vmem:[#allocation32_spill] sm:$0xff]  ;;  %v15684_v29 = vsub.f32 %v2255_v17, %v3753_v59  ;;  %v20762_v33 = vld [vmem:[#allocation55_spill] sm:$0xff]  ;;  %v15697_v17 = vpack.c.bf16 %v3763_v22, %v3759_v6  ;;  %v6453_v59 = vand.u32 4294901760, %v2265_v38 }
 0x2e6   :  { %20753 = vst [vmem:[#allocation217_spill] sm:$0xff] %v15673_v9  ;;  %20754 = vst [vmem:[#allocation218_spill] sm:$0xff] %v15675_v47  ;;  %10405 = vmatprep.subr.bf16.mxu0 %v20759_v55  ;;  %v3765_v47 = vand.u32 4294901760, %v2267_v44  ;;  %v2272_v35 = vld [vmem:[#allocation10 + $0x788] sm:$0xff]  ;;  %11173 = vmatprep.subr.bf16.mxu1 %v20762_v33  ;;  %v15695_v9 = vsub.f32 %v2264_v3, %v3759_v6  ;;  %v2274_v54 = vld [vmem:[#allocation10 + $0x798] sm:$0xff]  ;;  %v15702_v33 = vpack.c.bf16 %v6455_v62, %v6451_v36 }
 0x2e7   :  { %20756 = vst [vmem:[#allocation220_spill] sm:$0xff] %v15678_v31  ;;  %20757 = vst [vmem:[#allocation49_spill] sm:$0xff] %v15680_v2  ;;  %v2276_v30 = vld [vmem:[#allocation10 + $0x7a8] sm:$0xff]  ;;  %v15691_v31 = vsub.f32 %v2257_v27, %v6445_v8  ;;  %v15693_v2 = vsub.f32 %v2261_v61, %v6449_v50  ;;  %v2278_v55 = vld [vmem:[#allocation10 + $0x7b8] sm:$0xff]  ;;  %v15704_v27 = vsub.f32 %v2266_v42, %v6451_v36  ;;  %v3767_v61 = vand.u32 4294901760, %v2272_v35 }
 0x2e8   :  { %20760 = vst [vmem:[#allocation53_spill] sm:$0xff] %v15684_v29  ;;  %20761 = vst [vmem:[#allocation205_spill] sm:$0xff] %v15686_v4  ;;  %v2271_v4 = vld [vmem:[#allocation10 + $0x780] sm:$0xff]  ;;  %v20769_v57 = vld [vmem:[#allocation37_spill] sm:$0xff]  ;;  %v3771_v50 = vand.u32 4294901760, %v2276_v30  ;;  %v15710_v22 = vpack.c.bf16 %v3765_v47, %v3761_v48  ;;  %v15715_v42 = vsub.f32 %v2267_v44, %v3765_v47 }
 0x2e9   :  { %20763 = vst [vmem:[#allocation60_spill] sm:$0xff] %v15689_v40  ;;  %20764 = vst [vmem:[#allocation64_spill] sm:$0xff] %v15691_v31  ;;  %v2275_v29 = vld [vmem:[#allocation10 + $0x7a0] sm:$0xff]  ;;  %10407 = vmatpush1.bf16.msra.mxu0 %v20769_v57  ;;  %v2273_v8 = vld [vmem:[#allocation10 + $0x790] sm:$0xff]  ;;  %v15713_v57 = vsub.f32 %v2263_v13, %v3761_v48  ;;  %v3769_v36 = vand.u32 4294901760, %v2271_v4  ;;  %v15726_v13 = vsub.f32 %v2272_v35, %v3767_v61 }
 0x2ea   :  { %20765 = vst [vmem:[#allocation76_spill] sm:$0xff] %v15693_v2  ;;  %20766 = vst [vmem:[#allocation83_spill] sm:$0xff] %v15695_v9  ;;  %v2277_v3 = vld [vmem:[#allocation10 + $0x7b0] sm:$0xff]  ;;  %v20772_v9 = vld [vmem:[#allocation38_spill] sm:$0xff]  ;;  %v6463_v2 = vand.u32 4294901760, %v2278_v55  ;;  %v15724_v40 = vpack.c.bf16 %v3771_v50, %v3767_v61  ;;  %v15728_v44 = vsub.f32 %v2276_v30, %v3771_v50 }
 0x2eb   :  { %20767 = vst [vmem:[#allocation46_spill] sm:$0xff] %v15697_v17  ;;  %20768 = vst [vmem:[#allocation222_spill] sm:$0xff] %v15699_v45  ;;  %11175 = vmatpush1.bf16.msra.mxu1 %v20772_v9  ;;  %v20773_v6 = vld [vmem:[#allocation187_spill] sm:$0xff]  ;;  %v6459_v45 = vand.u32 4294901760, %v2274_v54  ;;  %v20776_v31 = vld [vmem:[#allocation190_spill] sm:$0xff]  ;;  %v15717_v17 = vpack.c.bf16 %v6457_v5, %v6453_v59  ;;  %v15719_v9 = vsub.f32 %v2265_v38, %v6453_v59  ;;  %v6465_v60 = vand.u32 4294901760, %v2277_v3 }
 0x2ec   :  { %20770 = vst [vmem:[#allocation23_spill] sm:$0xff] %v15702_v33  ;;  %20771 = vst [vmem:[#allocation69_spill] sm:$0xff] %v15704_v27  ;;  %10409 = vmatprep.subr.bf16.mxu0 %v20773_v6  ;;  %11177 = vmatprep.subr.bf16.mxu1 %v20776_v31  ;;  %v3773_v27 = vand.u32 4294901760, %v2275_v29  ;;  %v2026_v33 = vld [vmem:[#allocation5 + $0x18] sm:$0xff]  ;;  %v6461_v6 = vand.u32 4294901760, %v2273_v8  ;;  %v20787_v48 = vld [vmem:[#allocation45_spill] sm:$0xff]  ;;  %v15743_v35 = vsub.f32 %v2271_v4, %v3769_v36 }
 0x2ed   :  { %20774 = vst [vmem:[#allocation26_spill] sm:$0xff] %v15708_v11  ;;  %20775 = vst [vmem:[#allocation31_spill] sm:$0xff] %v15710_v22  ;;  %v2280_v62 = vld [vmem:[#allocation10 + $0x7c8] sm:$0xff]  ;;  %v20781_v11 = vld [vmem:[#allocation42_spill] sm:$0xff]  ;;  %v15722_v22 = vsub.f32 %v2269_v1, %v6457_v5  ;;  %v15732_v38 = vpack.c.bf16 %v6463_v2, %v6459_v45  ;;  %v15734_v59 = vsub.f32 %v2274_v54, %v6459_v45 }
 0x2ee   :  { %20777 = vst [vmem:[#allocation78_spill] sm:$0xff] %v15713_v57  ;;  %20778 = vst [vmem:[#allocation95_spill] sm:$0xff] %v15715_v42  ;;  %10411 = vmatpush1.bf16.msra.mxu0 %v20781_v11  ;;  %v2284_v47 = vld [vmem:[#allocation10 + $0x7e8] sm:$0xff]  ;;  %v15738_v11 = vand.u32 4294901760, %v2026_v33  ;;  %v20792_v1 = vld [vmem:[#allocation197_spill] sm:$0xff]  ;;  %v15741_v5 = vpack.c.bf16 %v3773_v27, %v3769_v36  ;;  %v15745_v30 = vsub.f32 %v2275_v29, %v3773_v27  ;;  %v3775_v61 = vand.u32 4294901760, %v2280_v62 }
 0x2ef   :  { %20779 = vst [vmem:[#allocation98_spill] sm:$0xff] %v15717_v17  ;;  %20780 = vst [vmem:[#allocation100_spill] sm:$0xff] %v15719_v9  ;;  %v20786_v31 = vld [vmem:[#allocation192_spill] sm:$0xff]  ;;  %10413 = vmatprep.subr.bf16.mxu0 %v20787_v48  ;;  %v15736_v9 = vsub.f32 %v2278_v55, %v6463_v2  ;;  %v2282_v50 = vld [vmem:[#allocation10 + $0x7d8] sm:$0xff]  ;;  %v15747_v48 = vpack.c.bf16 %v6465_v60, %v6461_v6  ;;  %v15751_v54 = vsub.f32 %v2277_v3, %v6465_v60 }
 0x2f0   :  { %20782 = vst [vmem:[#allocation103_spill] sm:$0xff] %v15722_v22  ;;  %20783 = vst [vmem:[#allocation106_spill] sm:$0xff] %v15724_v40  ;;  %11179 = vmatpush1.bf16.msra.mxu1 %v20786_v31  ;;  %v2025_v31 = vld [vmem:[#allocation5 + $0x10] sm:$0xff]  ;;  %v3779_v2 = vand.u32 4294901760, %v2284_v47  ;;  %v2286_v55 = vld [vmem:[#allocation10 + $0x7f8] sm:$0xff]  ;;  %v15760_v3 = vsub.f32 %v2280_v62, %v3775_v61  ;;  %v15763_v60 = vsub.f32 %v2026_v33, %v15738_v11  ;;  %v20811_v27 = vand.u32 4294901760, %v15317_v12 }
 0x2f1   :  { %20784 = vst [vmem:[#allocation109_spill] sm:$0xff] %v15726_v13  ;;  %20785 = vst [vmem:[#allocation111_spill] sm:$0xff] %v15728_v44  ;;  %11181 = vmatprep.subr.bf16.mxu1 %v20792_v1  ;;  %v15749_v44 = vsub.f32 %v2273_v8, %v6461_v6  ;;  %v2279_v45 = vld [vmem:[#allocation10 + $0x7c0] sm:$0xff]  ;;  %v6467_v6 = vand.u32 4294901760, %v2282_v50  ;;  %v6471_v4 = vand.u32 4294901760, %v2286_v55  ;;  %v2285_v33 = vld [vmem:[#allocation10 + $0x7f0] sm:$0xff] }
 0x2f2   :  { %20788 = vst [vmem:[#allocation114_spill] sm:$0xff] %v15732_v38  ;;  %20789 = vst [vmem:[#allocation117_spill] sm:$0xff] %v15734_v59  ;;  %v2283_v1 = vld [vmem:[#allocation10 + $0x7e0] sm:$0xff]  ;;  %v2281_v59 = vld [vmem:[#allocation10 + $0x7d0] sm:$0xff]  ;;  %v3777_v29 = vand.u32 4294901760, %v2279_v45 }
 0x2f3   :  { %20790 = vst [vmem:[#allocation120_spill] sm:$0xff] %v15736_v9  ;;  %20791 = vst [vmem:[#allocation122_spill] sm:$0xff] %v15738_v11  ;;  %v20799_v9 = vld [vmem:[#allocation54_spill] sm:$0xff]  ;;  %v20801_v8 = vld [vmem:[#allocation59_spill] sm:$0xff]  ;;  %v3781_v62 = vand.u32 4294901760, %v2283_v1 }
 0x2f4   :  { %20793 = vst [vmem:[#allocation129_spill] sm:$0xff] %v15741_v5  ;;  %20794 = vst [vmem:[#allocation155_spill] sm:$0xff] %v15743_v35  ;;  %10415 = vmatpush1.bf16.msra.mxu0 %v20799_v9  ;;  %v15765_v9 = vand.u32 4294901760, %v2025_v31  ;;  %v20809_v35 = vand.u32 4294901760, %v15313_v19  ;;  %v20813_v36 = vld [vmem:[#allocation68_spill] sm:$0xff]  ;;  %v20818_v42 = vld [vmem:[#allocation85_spill] sm:$0xff] }
 0x2f5   :  { %20795 = vst [vmem:[#allocation158_spill] sm:$0xff] %v15745_v30  ;;  %20796 = vst [vmem:[#allocation72_spill] sm:$0xff] %v15747_v48  ;;  %v20800_v30 = vld [vmem:[#allocation200_spill] sm:$0xff]  ;;  %10417 = vmatprep.subr.bf16.mxu0 %v20801_v8  ;;  %v6469_v8 = vand.u32 4294901760, %v2281_v59  ;;  %v20827_v11 = vld [vmem:[#allocation219_spill] sm:$0xff] }
 0x2f6   :  { %20797 = vst [vmem:[#allocation75_spill] sm:$0xff] %v15749_v44  ;;  %20798 = vst [vmem:[#allocation164_spill] sm:$0xff] %v15751_v54  ;;  %11183 = vmatpush1.bf16.msra.mxu1 %v20800_v30  ;;  %v20805_v54 = vld [vmem:[#allocation66_spill] sm:$0xff]  ;;  %v15770_v44 = vpack.c.bf16 %v3779_v2, %v3775_v61  ;;  %v15772_v30 = vsub.f32 %v2284_v47, %v3779_v2  ;;  %v3819_v13 = vsub.f32 %v15313_v19, %v20809_v35 }
 0x2f7   :  { %20802 = vst [vmem:[#allocation167_spill] sm:$0xff] %v15760_v3  ;;  %20803 = vst [vmem:[#allocation168_spill] sm:$0xff] %v15763_v60  ;;  %11185 = vmatprep.subr.bf16.mxu1 %v20805_v54  ;;  %v20808_v3 = vld [vmem:[#allocation207_spill] sm:$0xff]  ;;  %v20810_v54 = vand.u32 4294901760, %v15315_v7  ;;  %v6511_v61 = vsub.f32 %v15317_v12, %v20811_v27  ;;  %v20812_v47 = vand.u32 4294901760, %v15321_v39  ;;  %v15793_v35 = vsub.f32 %v2025_v31, %v15765_v9 }
 0x2f8   :  { %20804 = vst [vmem:[#allocation172_spill] sm:$0xff] %v15765_v9  ;;  %20806 = vst [vmem:[#allocation174_spill] sm:$0xff] %v15770_v44  ;;  %10419 = vmatpush1.bf16.msra.mxu0 %v20808_v3  ;;  %v20814_v3 = vld [vmem:[#allocation79_spill] sm:$0xff]  ;;  %v15798_v27 = vpack.c.bf16 %v6471_v4, %v6467_v6  ;;  %v15800_v12 = vsub.f32 %v2282_v50, %v6467_v6  ;;  %v15808_v31 = vsub.f32 %v2286_v55, %v6471_v4 }
 0x2f9   :  { %20807 = vst [vmem:[#allocation177_spill] sm:$0xff] %v15772_v30  ;;  %v3831_v22 = vsub.f32 %v15315_v7, %v20810_v54  ;;  %v6523_v2 = vsub.f32 %v15321_v39, %v20812_v47  ;;  %10421 = vmatprep.subr.bf16.mxu0 %v20814_v3  ;;  %v15790_v30 = vand.u32 4294901760, %v15763_v60  ;;  %20816 = vst [vmem:[#allocation181_spill] sm:$0xff] %v15793_v35  ;;  %v20817_v7 = vld [vmem:[#allocation234_spill] sm:$0xff]  ;;  %v20822_v3 = vand.u32 4294901760, %v15327_v34 }
 0x2fa   :  { %11187 = vmatpush1.bf16.msra.mxu1 %v20813_v36  ;;  %20819 = vst [vmem:[#allocation32_spill] sm:$0xff] %v15798_v27  ;;  %20820 = vst [vmem:[#allocation55_spill] sm:$0xff] %v15800_v12  ;;  %v20821_v36 = vand.u32 4294901760, %v15325_v10  ;;  %v15810_v9 = vpack.c.bf16 %v3781_v62, %v3777_v29  ;;  %v15812_v54 = vsub.f32 %v2279_v45, %v3777_v29  ;;  %v6473_v19 = vand.u32 4294901760, %v2285_v33 }
 0x2fb   :  { %20815 = vst [vmem:[#allocation179_spill] sm:$0xff] %v15790_v30  ;;  %11189 = vmatprep.subr.bf16.mxu1 %v20818_v42  ;;  %v3837_v39 = vsub.f32 %v15327_v34, %v20822_v3  ;;  %20823 = vst [vmem:[#allocation37_spill] sm:$0xff] %v15808_v31  ;;  %v20826_v42 = vld [vmem:[#allocation216_spill] sm:$0xff]  ;;  %v3820_v57 = vand.u32 4294901760, %v3819_v13  ;;  %v3832_v50 = vand.u32 4294901760, %v3831_v22  ;;  %v6512_v6 = vand.u32 4294901760, %v6511_v61 }
 0x2fc   :  { %v3825_v47 = vsub.f32 %v15325_v10, %v20821_v36  ;;  %20824 = vst [vmem:[#allocation38_spill] sm:$0xff] %v15810_v9  ;;  %20825 = vst [vmem:[#allocation187_spill] sm:$0xff] %v15812_v54  ;;  %10423 = vmatpush1.bf16.msra.mxu0 %v20826_v42  ;;  %v6524_v12 = vand.u32 4294901760, %v6523_v2  ;;  %v20828_v36 = vld [vmem:[#allocation225_spill] sm:$0xff]  ;;  %v3786_v3 = vsub.f32 %v15763_v60, %v15790_v30  ;;  %v15820_v55 = vand.u32 4294901760, %v15793_v35  ;;  %v20832_v13 = vld [vmem:[#allocation48_spill] sm:$0xff] }
 0x2fd   :  { %10425 = vmatprep.subr.bf16.mxu0 %v20828_v36  ;;  %v20830_v45 = vand.u32 4294901760, %v15331_v20  ;;  %v20831_v29 = vand.u32 4294901760, %v20817_v7  ;;  %v15832_v30 = vsub.f32 %v2283_v1, %v3781_v62  ;;  %v15834_v36 = vpack.c.bf16 %v6473_v19, %v6469_v8  ;;  %v20838_v42 = vld [vmem:[#allocation232_spill] sm:$0xff]  ;;  %v20839_v1 = vld [vmem:[#allocation51_spill] sm:$0xff]  ;;  %v20840_v2 = vld [vmem:[#allocation58_spill] sm:$0xff] }
 0x2fe   :  { %11191 = vmatpush1.bf16.msra.mxu1 %v20827_v11  ;;  %20829 = vst [vmem:[#allocation190_spill] sm:$0xff] %v15820_v55  ;;  %v3826_v61 = vand.u32 4294901760, %v3825_v47  ;;  %v3838_v11 = vand.u32 4294901760, %v3837_v39  ;;  %v15836_v60 = vsub.f32 %v2281_v59, %v6469_v8  ;;  %v15841_v47 = vsub.f32 %v2285_v33, %v6473_v19  ;;  %v20952_v54 = vld [vmem:[#allocation185_spill] sm:$0xff] }
 0x2ff   :  { %v6517_v4 = vsub.f32 %v15331_v20, %v20830_v45  ;;  %v6529_v22 = vsub.f32 %v20817_v7, %v20831_v29  ;;  %11193 = vmatprep.subr.bf16.mxu1 %v20832_v13  ;;  %3641 = vmatmul.mubr.f32.vlgmr.msra.gmra.mrb[4].mxu0 %v20626_v37  ;;  %20833 = vst [vmem:[#allocation42_spill] sm:$0xff] %v15832_v30  ;;  %20834 = vst [vmem:[#allocation192_spill] sm:$0xff] %v15834_v36  ;;  %v20836_v20 = vld [vmem:[#allocation227_spill] sm:$0xff]  ;;  %v3787_v62 = vand.u32 4294901760, %v3786_v3 }
 0x300   :  { %20835 = vst [vmem:[#allocation45_spill] sm:$0xff] %v15836_v60  ;;  %10427 = vmatpush1.bf16.msra.mxu0 %v20836_v20  ;;  %20837 = vst [vmem:[#allocation197_spill] sm:$0xff] %v15841_v47  ;;  %v15843_v39 = vpack.c.bf16 %v3832_v50, %v3820_v57  ;;  %v15845_v29 = vpack.c.bf16 %v6524_v12, %v6512_v6  ;;  %3647 = vmatprep.mubr.f32.mxu0 %v20638_v53  ;;  %v20842_v57 = vand.u32 4294901760, %v15342_v25  ;;  %v20851_v20 = vld [vmem:[#allocation153_spill] sm:$0xff]  ;;  %v20857_v13 = vld [vmem:[#allocation159_spill] sm:$0xff] }
 0x301   :  { %6333 = vmatmul.mubr.f32.vlgmr.msra.gmra.mrb[4].mxu1 %v20626_v37  ;;  %10429 = vmatprep.subr.bf16.mxu0 %v20839_v1  ;;  %v6518_v8 = vand.u32 4294901760, %v6517_v4  ;;  %v6530_v45 = vand.u32 4294901760, %v6529_v22  ;;  %v15853_v19 = vpack.c.bf16 %v3838_v11, %v3826_v61  ;;  %v20841_v37 = vand.u32 4294901760, %v15340_v52  ;;  %v20844_v11 = vld [vmem:[#allocation67_spill] sm:$0xff]  ;;  %v20849_v22 = vld [vmem:[#allocation156_spill] sm:$0xff]  ;;  %v20909_v47 = vld [vmem:[#allocation105_spill] sm:$0xff] }
 0x302   :  { %11195 = vmatpush1.bf16.msra.mxu1 %v20838_v42  ;;  %v3855_v33 = vsub.f32 %v15342_v25, %v20842_v57  ;;  %6339 = vmatprep.mubr.f32.mxu1 %v20638_v53  ;;  %v20843_v6 = vand.u32 4294901760, %v15347_v46  ;;  %v20846_v53 = vld [vmem:[#allocation74_spill] sm:$0xff]  ;;  %v20848_v1 = vld [vmem:[#allocation147_spill] sm:$0xff]  ;;  %v20850_v42 = vld [vmem:[#allocation157_spill] sm:$0xff]  ;;  %v20852_v50 = vand.u32 4294901760, %v15349_v26 }
 0x303   :  { %11197 = vmatprep.subr.bf16.mxu1 %v20840_v2  ;;  %v3843_v12 = vsub.f32 %v15340_v52, %v20841_v37  ;;  %3649 = vmatmul.mubr.f32.gmra.mrb[6].mxu0 %v20641_v51  ;;  %v20845_v37 = vld [vmem:[#allocation88_spill] sm:$0xff]  ;;  %v15880_v4 = vpack.c.bf16 %v6530_v45, %v6518_v8  ;;  %v20854_v8 = vand.u32 4294901760, %v15351_v63  ;;  %v20872_v25 = vld [vmem:[#allocation210_spill] sm:$0xff]  ;;  %v20873_v7 = vld [vmem:[#allocation191_spill] sm:$0xff] }
 0x304   :  { %v15867_v3 = vsub.f32 %v15347_v46, %v20843_v6  ;;  %10431 = vmatpush1.bf16.msra.mxu0 %v20844_v11  ;;  %v20847_v6 = vld [vmem:[#allocation82_spill] sm:$0xff]  ;;  %3788 = vmatprep.mubr.f32.mxu0 %v3787_v62  ;;  %v6547_v2 = vsub.f32 %v15349_v26, %v20852_v50  ;;  %v3856_v45 = vand.u32 4294901760, %v3855_v33  ;;  %v20858_v50 = vand.u32 4294901760, %v20845_v37  ;;  %v20870_v46 = vld [vmem:[#allocation195_spill] sm:$0xff] }
 0x305   :  { %6341 = vmatmul.mubr.f32.gmra.mrb[6].mxu1 %v20641_v51  ;;  %10433 = vmatprep.subr.bf16.mxu0 %v20848_v1  ;;  %v3844_v59 = vand.u32 4294901760, %v3843_v12  ;;  %v3849_v11 = vsub.f32 %v15351_v63, %v20854_v8  ;;  %v20855_v51 = vand.u32 4294901760, %v15356_v16  ;;  %v20856_v12 = vand.u32 4294901760, %v15360_v56  ;;  %v20862_v63 = vld [vmem:[#allocation161_spill] sm:$0xff] }
 0x306   :  { %11199 = vmatpush1.bf16.msra.mxu1 %v20847_v6  ;;  %v20853_v6 = vld [vmem:[#allocation162_spill] sm:$0xff]  ;;  %6480 = vmatprep.mubr.f32.mxu1 %v3787_v62  ;;  %v6553_v1 = vsub.f32 %v20845_v37, %v20858_v50  ;;  %v20859_v62 = vand.u32 4294901760, %v20846_v53  ;;  %v20860_v8 = vand.u32 4294901760, %v15371_v23  ;;  %v20865_v37 = vand.u32 4294901760, %v20850_v42 }
 0x307   :  { %11201 = vmatprep.subr.bf16.mxu1 %v20851_v20  ;;  %v3861_v61 = vsub.f32 %v15356_v16, %v20855_v51  ;;  %v6541_v20 = vsub.f32 %v15360_v56, %v20856_v12  ;;  %v20861_v51 = vand.u32 4294901760, %v15375_v14  ;;  %v20863_v12 = vld [vmem:[#allocation163_spill] sm:$0xff]  ;;  %v20869_v56 = vand.u32 4294901760, %v20853_v6 }
 0x308   :  { %10435 = vmatpush1.bf16.msra.mxu0 %v20857_v13  ;;  %v3867_v33 = vsub.f32 %v20846_v53, %v20859_v62  ;;  %v3879_v57 = vsub.f32 %v15371_v23, %v20860_v8  ;;  %v20864_v13 = vand.u32 4294901760, %v20849_v22  ;;  %v3873_v62 = vsub.f32 %v20850_v42, %v20865_v37  ;;  %v20867_v23 = vld [vmem:[#allocation43_spill] sm:$0xff] }
 0x309   :  { %v6559_v16 = vsub.f32 %v15375_v14, %v20861_v51  ;;  %10437 = vmatprep.subr.bf16.mxu0 %v20863_v12  ;;  %v20866_v53 = vand.u32 4294901760, %v15386_v21  ;;  %v6536_v51 = vand.u32 4294901760, %v15867_v3  ;;  %v6548_v14 = vand.u32 4294901760, %v6547_v2  ;;  %v20871_v2 = vld [vmem:[#allocation47_spill] sm:$0xff] }
 0x30a   :  { %11203 = vmatpush1.bf16.msra.mxu1 %v20862_v63  ;;  %v6571_v50 = vsub.f32 %v20849_v22, %v20864_v13  ;;  %v20868_v63 = vand.u32 4294901760, %v15388_v0  ;;  %v6577_v13 = vsub.f32 %v20853_v6, %v20869_v56  ;;  %v15932_v22 = vpack.c.bf16 %v3856_v45, %v3844_v59  ;;  %v20874_v59 = vld [vmem:[#allocation125_spill] sm:$0xff] }
 0x30b   :  { %v3885_v8 = vsub.f32 %v15386_v21, %v20866_v53  ;;  %11205 = vmatprep.subr.bf16.mxu1 %v20867_v23  ;;  %v3850_v37 = vand.u32 4294901760, %v3849_v11  ;;  %v3862_v42 = vand.u32 4294901760, %v3861_v61  ;;  %v6542_v26 = vand.u32 4294901760, %v6541_v20  ;;  %v20875_v20 = vld [vmem:[#allocation44_spill] sm:$0xff] }
 0x30c   :  { %v6565_v12 = vsub.f32 %v15388_v0, %v20868_v63  ;;  %10439 = vmatpush1.bf16.msra.mxu0 %v20870_v46  ;;  %v6554_v53 = vand.u32 4294901760, %v6553_v1  ;;  %v3868_v23 = vand.u32 4294901760, %v3867_v33  ;;  %v3880_v21 = vand.u32 4294901760, %v3879_v57  ;;  %v20876_v46 = vld [vmem:[#allocation194_spill] sm:$0xff]  ;;  %v20877_v33 = vld [vmem:[#allocation193_spill] sm:$0xff]  ;;  %v20884_v1 = vld [vmem:[#allocation84_spill] sm:$0xff] }
 0x30d   :  { %v6560_v3 = vand.u32 4294901760, %v6559_v16  ;;  %10441 = vmatprep.subr.bf16.mxu0 %v20872_v25  ;;  %v6572_v63 = vand.u32 4294901760, %v6571_v50  ;;  %v3874_v0 = vand.u32 4294901760, %v3873_v62  ;;  %v3886_v52 = vand.u32 4294901760, %v3885_v8  ;;  %v20878_v16 = vld [vmem:[#allocation196_spill] sm:$0xff]  ;;  %v20880_v25 = vld [vmem:[#allocation199_spill] sm:$0xff] }
 0x30e   :  { %11207 = vmatpush1.bf16.msra.mxu1 %v20871_v2  ;;  %v6566_v11 = vand.u32 4294901760, %v6565_v12  ;;  %v6578_v61 = vand.u32 4294901760, %v6577_v13  ;;  %v20879_v2 = vld [vmem:[#allocation50_spill] sm:$0xff]  ;;  %v20881_v62 = vld [vmem:[#allocation135_spill] sm:$0xff]  ;;  %v15946_v8 = vpack.c.bf16 %v6548_v14, %v6536_v51  ;;  %v15948_v56 = vpack.c.bf16 %v3862_v42, %v3850_v37 }
 0x30f   :  { %11209 = vmatprep.subr.bf16.mxu1 %v20874_v59  ;;  %v15950_v12 = vpack.c.bf16 %v6554_v53, %v6542_v26  ;;  %v20882_v13 = vld [vmem:[#allocation198_spill] sm:$0xff]  ;;  %v20883_v59 = vld [vmem:[#allocation143_spill] sm:$0xff]  ;;  %v15955_v57 = vpack.c.bf16 %v3880_v21, %v3868_v23  ;;  %v15957_v6 = vpack.c.bf16 %v6572_v63, %v6560_v3  ;;  %v20885_v50 = vand.u32 4294901760, %v20873_v7 }
 0x310   :  { %10443 = vmatpush1.bf16.msra.mxu0 %v20881_v62  ;;  %v19029_v45 = vand.u32 4294901760, %v20882_v13  ;;  %v20886_v14 = vld [vmem:[#allocation91_spill] sm:$0xff]  ;;  %v15963_v42 = vpack.c.bf16 %v3886_v52, %v3874_v0  ;;  %v15965_v26 = vpack.c.bf16 %v6578_v61, %v6566_v11  ;;  %v20887_v51 = vand.u32 4294901760, %v20875_v20  ;;  %v20896_v62 = vld [vmem:[#allocation80_spill] sm:$0xff] }
 0x311   :  { %10445 = vmatprep.subr.bf16.mxu0 %v20884_v1  ;;  %v3891_v34 = vsub.f32 %v20873_v7, %v20885_v50  ;;  %v20888_v53 = vand.u32 4294901760, %v20876_v46  ;;  %v20889_v21 = vand.u32 4294901760, %v20877_v33  ;;  %v20890_v63 = vand.u32 4294901760, %v20878_v16  ;;  %v20895_v1 = vld [vmem:[#allocation228_spill] sm:$0xff]  ;;  %v20902_v7 = vld [vmem:[#allocation97_spill] sm:$0xff] }
 0x312   :  { %11211 = vmatpush1.bf16.msra.mxu1 %v20883_v59  ;;  %v3903_v37 = vsub.f32 %v20875_v20, %v20887_v51  ;;  %v20891_v52 = vand.u32 4294901760, %v20879_v2  ;;  %v20892_v11 = vand.u32 4294901760, %v20880_v25  ;;  %v20893_v51 = vld [vmem:[#allocation30_spill] sm:$0xff]  ;;  %v20904_v59 = vld [vmem:[#allocation149_spill] sm:$0xff]  ;;  %v20907_v20 = vand.u32 4294901760, %v20895_v1 }
 0x313   :  { %11213 = vmatprep.subr.bf16.mxu1 %v20886_v14  ;;  %v6583_v23 = vsub.f32 %v20876_v46, %v20888_v53  ;;  %v6595_v3 = vsub.f32 %v20877_v33, %v20889_v21  ;;  %v3897_v50 = vsub.f32 %v20878_v16, %v20890_v63  ;;  %v6601_v53 = vsub.f32 %v20882_v13, %v19029_v45  ;;  %v20894_v14 = vld [vmem:[#allocation221_spill] sm:$0xff]  ;;  %v20897_v16 = vld [vmem:[#allocation226_spill] sm:$0xff] }
 0x314   :  { %v3909_v0 = vsub.f32 %v20879_v2, %v20891_v52  ;;  %v6589_v61 = vsub.f32 %v20880_v25, %v20892_v11  ;;  %10447 = vmatpush1.bf16.msra.mxu0 %v20893_v51  ;;  %v20898_v33 = vld [vmem:[#allocation93_spill] sm:$0xff]  ;;  %v3892_v52 = vand.u32 4294901760, %v3891_v34  ;;  %v20899_v2 = vld [vmem:[#allocation131_spill] sm:$0xff]  ;;  %v20901_v51 = vld [vmem:[#allocation140_spill] sm:$0xff]  ;;  %v3904_v45 = vand.u32 4294901760, %v3903_v37 }
 0x315   :  { %10449 = vmatprep.subr.bf16.mxu0 %v20898_v33  ;;  %v20900_v11 = vld [vmem:[#allocation137_spill] sm:$0xff]  ;;  %v6584_v13 = vand.u32 4294901760, %v6583_v23  ;;  %v20903_v21 = vld [vmem:[#allocation146_spill] sm:$0xff]  ;;  %v6596_v63 = vand.u32 4294901760, %v6595_v3  ;;  %v3898_v60 = vand.u32 4294901760, %v3897_v50  ;;  %v6602_v34 = vand.u32 4294901760, %v6601_v53 }
 0x316   :  { %11215 = vmatpush1.bf16.msra.mxu1 %v20897_v16  ;;  %v3910_v16 = vand.u32 4294901760, %v3909_v0  ;;  %v6590_v30 = vand.u32 4294901760, %v6589_v61  ;;  %v20905_v33 = vld [vmem:[#allocation101_spill] sm:$0xff]  ;;  %v20906_v46 = vand.u32 4294901760, %v20894_v14  ;;  %v3927_v37 = vsub.f32 %v20895_v1, %v20907_v20  ;;  %v20910_v3 = vld [vmem:[#allocation108_spill] sm:$0xff] }
 0x317   :  { %11217 = vmatprep.subr.bf16.mxu1 %v20902_v7  ;;  %v20908_v23 = vand.u32 4294901760, %v20896_v62  ;;  %v20911_v50 = vsub.f32 %v15793_v35, %v15820_v55  ;;  %v20912_v61 = vand.u32 4294901760, %v20899_v2  ;;  %v20913_v53 = vand.u32 4294901760, %v20900_v11  ;;  %v20918_v35 = vld [vmem:[#allocation152_spill] sm:$0xff] }
 0x318   :  { %10451 = vmatpush1.bf16.msra.mxu0 %v20905_v33  ;;  %v3915_v25 = vsub.f32 %v20894_v14, %v20906_v46  ;;  %v20914_v33 = vand.u32 4294901760, %v20901_v51  ;;  %v20916_v55 = vand.u32 4294901760, %v20903_v21  ;;  %v20917_v7 = vand.u32 4294901760, %v20904_v59  ;;  %v20922_v14 = vld [vmem:[#allocation70_spill] sm:$0xff] }
 0x319   :  { %v6607_v10 = vsub.f32 %v20896_v62, %v20908_v23  ;;  %10453 = vmatprep.subr.bf16.mxu0 %v20910_v3  ;;  %v16015_v0 = vand.u32 4294901760, %v20911_v50  ;;  %v6619_v46 = vsub.f32 %v20899_v2, %v20912_v61  ;;  %v3921_v20 = vsub.f32 %v20900_v11, %v20913_v53  ;;  %v20919_v11 = vld [vmem:[#allocation89_spill] sm:$0xff] }
 0x31a   :  { %11219 = vmatpush1.bf16.msra.mxu1 %v20909_v47  ;;  %v3933_v23 = vsub.f32 %v20901_v51, %v20914_v33  ;;  %v20915_v47 = vld [vmem:[#allocation112_spill] sm:$0xff]  ;;  %v16027_v3 = vpack.c.bf16 %v3904_v45, %v3892_v52  ;;  %v6613_v50 = vsub.f32 %v20903_v21, %v20916_v55  ;;  %v6625_v61 = vsub.f32 %v20904_v59, %v20917_v7  ;;  %v20921_v45 = vld [vmem:[#allocation118_spill] sm:$0xff] }
 0x31b   :  { %11221 = vmatprep.subr.bf16.mxu1 %v20915_v47  ;;  %v19051_v2 = vand.u32 4294901760, %v20918_v35  ;;  %v16036_v62 = vpack.c.bf16 %v6596_v63, %v6584_v13  ;;  %v16038_v53 = vpack.c.bf16 %v3910_v16, %v3898_v60  ;;  %v20920_v51 = vld [vmem:[#allocation24_spill] sm:$0xff]  ;;  %v16043_v52 = vpack.c.bf16 %v6602_v34, %v6590_v30  ;;  %v20923_v60 = vld [vmem:[#allocation25_spill] sm:$0xff] }
 0x31c   :  { %10455 = vmatpush1.bf16.msra.mxu0 %v20921_v45  ;;  %v3916_v1 = vand.u32 4294901760, %v3915_v25  ;;  %v3928_v55 = vand.u32 4294901760, %v3927_v37  ;;  %v6608_v21 = vand.u32 4294901760, %v6607_v10  ;;  %v6620_v7 = vand.u32 4294901760, %v6619_v46  ;;  %v20924_v25 = vld [vmem:[#allocation28_spill] sm:$0xff]  ;;  %v20933_v16 = vld [vmem:[#allocation81_spill] sm:$0xff] }
 0x31d   :  { %10457 = vmatprep.subr.bf16.mxu0 %v15553_v41  ;;  %v3922_v13 = vand.u32 4294901760, %v3921_v20  ;;  %v3934_v63 = vand.u32 4294901760, %v3933_v23  ;;  %v6614_v33 = vand.u32 4294901760, %v6613_v50  ;;  %v6626_v47 = vand.u32 4294901760, %v6625_v61  ;;  %v20927_v23 = vld [vmem:[#allocation33_spill] sm:$0xff]  ;;  %v20928_v41 = vld [vmem:[#allocation34_spill] sm:$0xff] }
 0x31e   :  { %11223 = vmatpush1.bf16.msra.mxu1 %v20922_v14  ;;  %v3939_v30 = vsub.f32 %v20918_v35, %v19051_v2  ;;  %v20925_v10 = vand.u32 4294901760, %v20919_v11  ;;  %v20926_v46 = vand.u32 4294901760, %v20920_v51  ;;  %v16062_v50 = vpack.c.bf16 %v3928_v55, %v3916_v1  ;;  %v20929_v61 = vld [vmem:[#allocation230_spill] sm:$0xff]  ;;  %v20931_v45 = vld [vmem:[#allocation96_spill] sm:$0xff]  ;;  %v20934_v1 = vld [vmem:[#allocation99_spill] sm:$0xff] }
 0x31f   :  { %11225 = vmatprep.subr.bf16.mxu1 %v15557_v28  ;;  %v20930_v14 = vld [vmem:[#allocation94_spill] sm:$0xff]  ;;  %v16077_v2 = vpack.c.bf16 %v3934_v63, %v3922_v13  ;;  %v16079_v34 = vpack.c.bf16 %v6626_v47, %v6614_v33  ;;  %v20938_v47 = vand.u32 4294901760, %v20929_v61  ;;  %v20940_v63 = vand.u32 4294901760, %v20931_v45 }
 0x320   :  { %v3951_v37 = vsub.f32 %v20919_v11, %v20925_v10  ;;  %v6631_v20 = vsub.f32 %v20920_v51, %v20926_v46  ;;  %10459 = vmatpush1.bf16.msra.mxu0 %v15564_v15  ;;  %v16069_v10 = vpack.c.bf16 %v6620_v7, %v6608_v21  ;;  %v20932_v46 = vand.u32 4294901760, %v20923_v60  ;;  %v20950_v11 = vld [vmem:[#allocation92_spill] sm:$0xff] }
 0x321   :  { %10461 = vmatprep.subr.bf16.mxu0 %v15579_v58  ;;  %v3940_v35 = vand.u32 4294901760, %v3939_v30  ;;  %v20936_v51 = vand.u32 4294901760, %v20927_v23  ;;  %v20937_v15 = vand.u32 4294901760, %v20928_v41  ;;  %v6649_v33 = vsub.f32 %v20929_v61, %v20938_v47 }
 0x322   :  { %11227 = vmatpush1.bf16.msra.mxu1 %v15572_v24  ;;  %v6643_v28 = vsub.f32 %v20923_v60, %v20932_v46  ;;  %v20935_v24 = vand.u32 4294901760, %v20924_v25  ;;  %v3952_v7 = vand.u32 4294901760, %v3951_v37  ;;  %v6632_v58 = vand.u32 4294901760, %v6631_v20  ;;  %v20941_v37 = vld [vmem:[#allocation102_spill] sm:$0xff]  ;;  %v20942_v20 = vld [vmem:[#allocation29_spill] sm:$0xff] }
 0x323   :  { %11229 = vmatprep.subr.bf16.mxu1 %v15585_v18  ;;  %v3957_v46 = vsub.f32 %v20927_v23, %v20936_v51  ;;  %v6637_v55 = vsub.f32 %v20928_v41, %v20937_v15  ;;  %v20939_v13 = vand.u32 4294901760, %v20930_v14  ;;  %v3975_v30 = vsub.f32 %v20931_v45, %v20940_v63  ;;  %v20946_v41 = vld [vmem:[#allocation36_spill] sm:$0xff]  ;;  %v20948_v23 = vld [vmem:[#allocation107_spill] sm:$0xff] }
 0x324   :  { %v3945_v21 = vsub.f32 %v20924_v25, %v20935_v24  ;;  %10463 = vmatpush1.bf16.msra.mxu0 %v15594_v49  ;;  %v6644_v15 = vand.u32 4294901760, %v6643_v28  ;;  %v20943_v49 = vand.u32 4294901760, %v20933_v16  ;;  %v20944_v47 = vand.u32 4294901760, %v20934_v1  ;;  %v20947_v45 = vld [vmem:[#allocation104_spill] sm:$0xff]  ;;  %v20949_v25 = vld [vmem:[#allocation110_spill] sm:$0xff] }
 0x325   :  { %v3963_v24 = vsub.f32 %v20930_v14, %v20939_v13  ;;  %10465 = vmatprep.subr.bf16.mxu0 %v20942_v20  ;;  %v20945_v13 = vld [vmem:[#allocation204_spill] sm:$0xff]  ;;  %v3958_v28 = vand.u32 4294901760, %v3957_v46  ;;  %v6638_v60 = vand.u32 4294901760, %v6637_v55  ;;  %v3976_v14 = vand.u32 4294901760, %v3975_v30 }
 0x326   :  { %11231 = vmatpush1.bf16.msra.mxu1 %v15601_v43  ;;  %v6655_v18 = vsub.f32 %v20933_v16, %v20943_v49  ;;  %v6667_v61 = vsub.f32 %v20934_v1, %v20944_v47  ;;  %v3946_v63 = vand.u32 4294901760, %v3945_v21  ;;  %v20951_v49 = vld [vmem:[#allocation113_spill] sm:$0xff]  ;;  %v6650_v47 = vand.u32 4294901760, %v6649_v33  ;;  %v20954_v51 = vld [vmem:[#allocation40_spill] sm:$0xff]  ;;  %v20957_v16 = vld [vmem:[#allocation115_spill] sm:$0xff] }
 0x327   :  { %11233 = vmatprep.subr.bf16.mxu1 %v20946_v41  ;;  %v3964_v1 = vand.u32 4294901760, %v3963_v24  ;;  %v20953_v41 = vand.u32 4294901760, %v20941_v37  ;;  %v20955_v43 = vld [vmem:[#allocation41_spill] sm:$0xff]  ;;  %v20956_v55 = vand.u32 4294901760, %v20945_v13  ;;  %v16127_v33 = vpack.c.bf16 %v3952_v7, %v3940_v35 }
 0x328   :  { %10467 = vmatpush1.bf16.msra.mxu0 %v20952_v54  ;;  %v6656_v20 = vand.u32 4294901760, %v6655_v18  ;;  %v6668_v46 = vand.u32 4294901760, %v6667_v61  ;;  %v20958_v24 = vand.u32 4294901760, %v20947_v45  ;;  %v20959_v30 = vand.u32 4294901760, %v20948_v23 }
 0x329   :  { %v3969_v21 = vsub.f32 %v20941_v37, %v20953_v41  ;;  %10469 = vmatprep.subr.bf16.mxu0 %v20955_v43  ;;  %v3981_v59 = vsub.f32 %v20945_v13, %v20956_v55  ;;  %v20960_v18 = vand.u32 4294901760, %v20949_v25  ;;  %v16140_v55 = vpack.c.bf16 %v3958_v28, %v3946_v63  ;;  %v20968_v63 = vld [vmem:[#allocation214_spill] sm:$0xff]  ;;  %v20981_v37 = vld [vmem:[#allocation60_spill] sm:$0xff] }
 0x32a   :  { %11235 = vmatpush1.bf16.msra.mxu1 %v20954_v51  ;;  %v6661_v41 = vsub.f32 %v20947_v45, %v20958_v24  ;;  %v6673_v43 = vsub.f32 %v20948_v23, %v20959_v30  ;;  %v16138_v51 = vpack.c.bf16 %v6644_v15, %v6632_v58  ;;  %v20961_v31 = vand.u32 4294901760, %v20950_v11  ;;  %v20967_v15 = vld [vmem:[#allocation211_spill] sm:$0xff]  ;;  %v20984_v58 = vld [vmem:[#allocation134_spill] sm:$0xff] }
 0x32b   :  { %11237 = vmatprep.subr.bf16.mxu1 %v15645_v32  ;;  %v3987_v61 = vsub.f32 %v20949_v25, %v20960_v18  ;;  %v20962_v7 = vand.u32 4294901760, %v20951_v49  ;;  %v20963_v32 = vld [vmem:[#allocation208_spill] sm:$0xff]  ;;  %v16149_v54 = vpack.c.bf16 %v6650_v47, %v6638_v60  ;;  %v16151_v30 = vpack.c.bf16 %v3976_v14, %v3964_v1  ;;  %v20972_v60 = vld [vmem:[#allocation217_spill] sm:$0xff]  ;;  %v20974_v45 = vld [vmem:[#allocation123_spill] sm:$0xff] }
 0x32c   :  { %v3999_v35 = vsub.f32 %v20950_v11, %v20961_v31  ;;  %10471 = vmatpush1.bf16.msra.mxu0 %v20963_v32  ;;  %v3970_v23 = vand.u32 4294901760, %v3969_v21  ;;  %v20966_v18 = vld [vmem:[#allocation116_spill] sm:$0xff]  ;;  %v16156_v28 = vpack.c.bf16 %v6668_v46, %v6656_v20  ;;  %v3982_v31 = vand.u32 4294901760, %v3981_v59  ;;  %v20973_v21 = vld [vmem:[#allocation121_spill] sm:$0xff]  ;;  %v20978_v32 = vld [vmem:[#allocation127_spill] sm:$0xff] }
 0x32d   :  { %v6679_v24 = vsub.f32 %v20951_v49, %v20962_v7  ;;  %20964 = vst [vmem:[#allocation54_spill] sm:$0xff] %v16149_v54  ;;  %20965 = vst [vmem:[#allocation200_spill] sm:$0xff] %v16151_v30  ;;  %10473 = vmatprep.subr.bf16.mxu0 %v20968_v63  ;;  %v20970_v11 = vand.u32 4294901760, %v20957_v16  ;;  %v20971_v49 = vld [vmem:[#allocation119_spill] sm:$0xff]  ;;  %v6662_v14 = vand.u32 4294901760, %v6661_v41  ;;  %v6674_v1 = vand.u32 4294901760, %v6673_v43 }
 0x32e   :  { %11239 = vmatpush1.bf16.msra.mxu1 %v20967_v15  ;;  %20969 = vst [vmem:[#allocation59_spill] sm:$0xff] %v16156_v28  ;;  %v3988_v47 = vand.u32 4294901760, %v3987_v61  ;;  %v4000_v25 = vand.u32 4294901760, %v3999_v35  ;;  %v20975_v20 = vld [vmem:[#allocation124_spill] sm:$0xff]  ;;  %v20976_v59 = vld [vmem:[#allocation49_spill] sm:$0xff]  ;;  %v20977_v13 = vand.u32 4294901760, %v20966_v18 }
 0x32f   :  { %v6691_v7 = vsub.f32 %v20957_v16, %v20970_v11  ;;  %11241 = vmatprep.subr.bf16.mxu1 %v20972_v60  ;;  %v6680_v15 = vand.u32 4294901760, %v6679_v24  ;;  %v20979_v60 = vld [vmem:[#allocation130_spill] sm:$0xff]  ;;  %v20980_v43 = vld [vmem:[#allocation132_spill] sm:$0xff]  ;;  %v20983_v63 = vand.u32 4294901760, %v20971_v49  ;;  %v16181_v16 = vpack.c.bf16 %v3982_v31, %v3970_v23  ;;  %v20987_v61 = vld [vmem:[#allocation139_spill] sm:$0xff] }
 0x330   :  { %10475 = vmatpush1.bf16.msra.mxu0 %v20976_v59  ;;  %v3993_v11 = vsub.f32 %v20966_v18, %v20977_v13  ;;  %v20982_v35 = vld [vmem:[#allocation46_spill] sm:$0xff]  ;;  %v20985_v28 = vld [vmem:[#allocation136_spill] sm:$0xff]  ;;  %v20986_v13 = vld [vmem:[#allocation23_spill] sm:$0xff]  ;;  %v16183_v41 = vpack.c.bf16 %v6674_v1, %v6662_v14  ;;  %v20990_v59 = vand.u32 4294901760, %v20974_v45  ;;  %v20993_v54 = vand.u32 4294901760, %v20978_v32 }
 0x331   :  { %10477 = vmatprep.subr.bf16.mxu0 %v20982_v35  ;;  %v6692_v24 = vand.u32 4294901760, %v6691_v7  ;;  %v4005_v46 = vsub.f32 %v20971_v49, %v20983_v63  ;;  %v16187_v35 = vpack.c.bf16 %v4000_v25, %v3988_v47  ;;  %v20989_v7 = vand.u32 4294901760, %v20973_v21  ;;  %v2030_v31 = vld [vmem:[#allocation5 + $0x38] sm:$0xff]  ;;  %v20992_v14 = vld [vmem:[#allocation31_spill] sm:$0xff] }
 0x332   :  { %11243 = vmatpush1.bf16.msra.mxu1 %v20981_v37  ;;  %v20988_v37 = vld [vmem:[#allocation141_spill] sm:$0xff]  ;;  %v6697_v30 = vsub.f32 %v20974_v45, %v20990_v59  ;;  %v3994_v1 = vand.u32 4294901760, %v3993_v11  ;;  %v4023_v25 = vsub.f32 %v20978_v32, %v20993_v54  ;;  %v20994_v47 = vand.u32 4294901760, %v20979_v60  ;;  %v21051_v49 = vld [vmem:[#allocation71_spill] sm:$0xff] }
 0x333   :  { %11245 = vmatprep.subr.bf16.mxu1 %v20986_v13  ;;  %v6685_v63 = vsub.f32 %v20973_v21, %v20989_v7  ;;  %v20991_v13 = vand.u32 4294901760, %v20975_v20  ;;  %v20995_v18 = vand.u32 4294901760, %v20980_v43  ;;  %v20996_v11 = vand.u32 4294901760, %v20984_v58  ;;  %v21002_v45 = vld [vmem:[#allocation145_spill] sm:$0xff] }
 0x334   :  { %10479 = vmatpush1.bf16.msra.mxu0 %v20992_v14  ;;  %v6703_v7 = vsub.f32 %v20979_v60, %v20994_v47  ;;  %v4006_v14 = vand.u32 4294901760, %v4005_v46  ;;  %v20997_v54 = vand.u32 4294901760, %v20985_v28  ;;  %v20998_v47 = vand.u32 4294901760, %v20987_v61 }
 0x335   :  { %v4011_v23 = vsub.f32 %v20975_v20, %v20991_v13  ;;  %v6715_v59 = vsub.f32 %v20980_v43, %v20995_v18  ;;  %10481 = vmatprep.subr.bf16.mxu0 %v15724_v40  ;;  %v16210_v13 = vpack.c.bf16 %v6692_v24, %v6680_v15  ;;  %v4017_v20 = vsub.f32 %v20984_v58, %v20996_v11  ;;  %v21000_v24 = vld [vmem:[#allocation144_spill] sm:$0xff]  ;;  %v2029_v43 = vld [vmem:[#allocation5 + $0x30] sm:$0xff] }
 0x336   :  { %11247 = vmatpush1.bf16.msra.mxu1 %v15717_v17  ;;  %v4029_v32 = vsub.f32 %v20985_v28, %v20997_v54  ;;  %v6709_v18 = vsub.f32 %v20987_v61, %v20998_v47  ;;  %v20999_v17 = vand.u32 4294901760, %v20988_v37  ;;  %v16226_v40 = vand.u32 4294901760, %v2030_v31  ;;  %v21043_v61 = vld [vmem:[#allocation62_spill] sm:$0xff] }
 0x337   :  { %11249 = vmatprep.subr.bf16.mxu1 %v15732_v38  ;;  %v6686_v11 = vand.u32 4294901760, %v6685_v63  ;;  %v6698_v58 = vand.u32 4294901760, %v6697_v30  ;;  %v4012_v60 = vand.u32 4294901760, %v4011_v23  ;;  %v4024_v38 = vand.u32 4294901760, %v4023_v25 }
 0x338   :  { %v6721_v15 = vsub.f32 %v20988_v37, %v20999_v17  ;;  %21001 = vst [vmem:[#allocation66_spill] sm:$0xff] %v16226_v40  ;;  %10483 = vmatpush1.bf16.msra.mxu0 %v15741_v5  ;;  %v6704_v28 = vand.u32 4294901760, %v6703_v7  ;;  %v6716_v21 = vand.u32 4294901760, %v6715_v59  ;;  %v16231_v47 = vsub.f32 %v2030_v31, %v16226_v40  ;;  %v21004_v37 = vld [vmem:[#allocation151_spill] sm:$0xff] }
 0x339   :  { %10485 = vmatprep.subr.bf16.mxu0 %v15770_v44  ;;  %v4018_v17 = vand.u32 4294901760, %v4017_v20  ;;  %v4030_v46 = vand.u32 4294901760, %v4029_v32  ;;  %v16236_v30 = vand.u32 4294901760, %v2029_v43  ;;  %v6710_v23 = vand.u32 4294901760, %v6709_v18  ;;  %v21045_v40 = vld [vmem:[#allocation203_spill] sm:$0xff] }
 0x33a   :  { %21003 = vst [vmem:[#allocation207_spill] sm:$0xff] %v16231_v47  ;;  %11251 = vmatpush1.bf16.msra.mxu1 %v15747_v48  ;;  %v6722_v54 = vand.u32 4294901760, %v6721_v15  ;;  %v21006_v25 = vand.u32 4294901760, %v21000_v24  ;;  %v16243_v31 = vand.u32 4294901760, %v16231_v47  ;;  %v16245_v59 = vpack.c.bf16 %v4006_v14, %v3994_v1 }
 0x33b   :  { %21005 = vst [vmem:[#allocation68_spill] sm:$0xff] %v16236_v30  ;;  %11253 = vmatprep.subr.bf16.mxu1 %v15798_v27  ;;  %v16247_v44 = vpack.c.bf16 %v6698_v58, %v6686_v11  ;;  %v21008_v32 = vand.u32 4294901760, %v21002_v45  ;;  %v16253_v63 = vsub.f32 %v2029_v43, %v16236_v30  ;;  %v16256_v18 = vpack.c.bf16 %v4024_v38, %v4012_v60  ;;  %v21014_v38 = vld [vmem:[#allocation176_spill] sm:$0xff]  ;;  %v21023_v27 = vld [vmem:[#allocation183_spill] sm:$0xff]  ;;  %v21044_v30 = vld [vmem:[#allocation122_spill] sm:$0xff] }
 0x33c   :  { %v4035_v7 = vsub.f32 %v21000_v24, %v21006_v25  ;;  %21007 = vst [vmem:[#allocation79_spill] sm:$0xff] %v16243_v31  ;;  %10487 = vmatpush1.bf16.msra.mxu0 %v15810_v9  ;;  %v16258_v15 = vpack.c.bf16 %v6716_v21, %v6704_v28  ;;  %v21011_v25 = vld [vmem:[#allocation173_spill] sm:$0xff]  ;;  %v3802_v14 = vsub.f32 %v16231_v47, %v16243_v31  ;;  %v21013_v43 = vand.u32 4294901760, %v21004_v37 }
 0x33d   :  { %v4047_v20 = vsub.f32 %v21002_v45, %v21008_v32  ;;  %21009 = vst [vmem:[#allocation85_spill] sm:$0xff] %v16253_v63  ;;  %10489 = vmatprep.subr.bf16.mxu0 %v15843_v39  ;;  %v16265_v58 = vpack.c.bf16 %v4030_v46, %v4018_v17  ;;  %v16274_v28 = vand.u32 4294901760, %v16253_v63  ;;  %v16277_v21 = vpack.c.bf16 %v6722_v54, %v6710_v23  ;;  %v21017_v32 = vld [vmem:[#allocation27_spill] sm:$0xff]  ;;  %v21018_v17 = vld [vmem:[#allocation180_spill] sm:$0xff]  ;;  %v21021_v23 = vld [vmem:[#allocation182_spill] sm:$0xff] }
 0x33e   :  { %21010 = vst [vmem:[#allocation216_spill] sm:$0xff] %v16258_v15  ;;  %11255 = vmatpush1.bf16.msra.mxu1 %v15834_v36  ;;  %v16270_v1 = vsub.f32 %v21004_v37, %v21013_v43  ;;  %v4036_v11 = vand.u32 4294901760, %v4035_v7  ;;  %v3803_v39 = vand.u32 4294901760, %v3802_v14  ;;  %v21019_v43 = vld [vmem:[#allocation90_spill] sm:$0xff]  ;;  %v21022_v14 = vld [vmem:[#allocation35_spill] sm:$0xff]  ;;  %v21024_v36 = vld [vmem:[#allocation184_spill] sm:$0xff] }
 0x33f   :  { %21012 = vst [vmem:[#allocation219_spill] sm:$0xff] %v16265_v58  ;;  %21015 = vst [vmem:[#allocation235_spill] sm:$0xff] %v16274_v28  ;;  %11257 = vmatprep.subr.bf16.mxu1 %v15845_v29  ;;  %3794 = vmatmul.mubr.f32.vlgmr.msra.gmra.mrb[4].mxu0 %v16015_v0  ;;  %v4048_v46 = vand.u32 4294901760, %v4047_v20  ;;  %v3808_v60 = vsub.f32 %v16253_v63, %v16274_v28  ;;  %v21020_v29 = vand.u32 4294901760, %v21011_v25  ;;  %v21028_v31 = vand.u32 4294901760, %v21017_v32  ;;  %v21030_v28 = vld [vmem:[#allocation189_spill] sm:$0xff] }
 0x340   :  { %21016 = vst [vmem:[#allocation236_spill] sm:$0xff] %v16277_v21  ;;  %10491 = vmatpush1.bf16.msra.mxu0 %v15853_v19  ;;  %v21025_v19 = vld [vmem:[#allocation186_spill] sm:$0xff]  ;;  %3804 = vmatprep.mubr.f32.mxu0 %v3803_v39  ;;  %v21034_v63 = vand.u32 4294901760, %v21021_v23  ;;  %v21036_v20 = vand.u32 4294901760, %v21023_v27  ;;  %v21042_v47 = vld [vmem:[#allocation201_spill] sm:$0xff]  ;;  %v21074_v37 = vld [vmem:[#allocation155_spill] sm:$0xff] }
 0x341   :  { %6486 = vmatmul.mubr.f32.vlgmr.msra.gmra.mrb[4].mxu1 %v16015_v0  ;;  %v16290_v54 = vsub.f32 %v21011_v25, %v21020_v29  ;;  %10493 = vmatprep.subr.bf16.mxu0 %v15932_v22  ;;  %v21026_v0 = vld [vmem:[#allocation39_spill] sm:$0xff]  ;;  %v3809_v5 = vand.u32 4294901760, %v3808_v60  ;;  %v21027_v29 = vand.u32 4294901760, %v21014_v38  ;;  %v21029_v22 = vld [vmem:[#allocation188_spill] sm:$0xff]  ;;  %v16313_v9 = vpack.c.bf16 %v4048_v46, %v4036_v11  ;;  %v21046_v21 = vld [vmem:[#allocation206_spill] sm:$0xff] }
 0x342   :  { %11259 = vmatpush1.bf16.msra.mxu1 %v15880_v4  ;;  %v16309_v4 = vsub.f32 %v21017_v32, %v21028_v31  ;;  %v21032_v60 = vand.u32 4294901760, %v21018_v17  ;;  %6496 = vmatprep.mubr.f32.mxu1 %v3803_v39  ;;  %v16330_v11 = vsub.f32 %v21021_v23, %v21034_v63  ;;  %v21035_v46 = vand.u32 4294901760, %v21022_v14  ;;  %v21078_v45 = vld [vmem:[#allocation167_spill] sm:$0xff]  ;;  %v21083_v23 = vld [vmem:[#allocation42_spill] sm:$0xff]  ;;  %v21087_v24 = vld [vmem:[#allocation197_spill] sm:$0xff] }
 0x343   :  { %11261 = vmatprep.subr.bf16.mxu1 %v15946_v8  ;;  %v16304_v7 = vsub.f32 %v21014_v38, %v21027_v29  ;;  %21031 = vst [vmem:[#allocation237_spill] sm:$0xff] %v16313_v9  ;;  %v21033_v29 = vand.u32 4294901760, %v21019_v43  ;;  %3810 = vmatmul.mubr.f32.gmra.mrb[6].mxu0 %v3809_v5  ;;  %v21037_v63 = vand.u32 4294901760, %v21024_v36  ;;  %v19131_v9 = vand.u32 4294901760, %v21045_v40  ;;  %v21072_v38 = vld [vmem:[#allocation117_spill] sm:$0xff]  ;;  %v21082_v15 = vld [vmem:[#allocation187_spill] sm:$0xff] }
 0x344   :  { %v16318_v8 = vsub.f32 %v21018_v17, %v21032_v60  ;;  %10495 = vmatpush1.bf16.msra.mxu0 %v15948_v56  ;;  %v16335_v60 = vsub.f32 %v21022_v14, %v21035_v46  ;;  %v21038_v46 = vand.u32 4294901760, %v21025_v19  ;;  %4201 = vmatprep.mubr.f32.mxu0 %v21044_v30  ;;  %v21047_v58 = vand.u32 4294901760, %v21042_v47  ;;  %v21081_v14 = vld [vmem:[#allocation37_spill] sm:$0xff] }
 0x345   :  { %v16323_v48 = vsub.f32 %v21019_v43, %v21033_v29  ;;  %v16340_v29 = vsub.f32 %v21023_v27, %v21036_v20  ;;  %6502 = vmatmul.mubr.f32.gmra.mrb[6].mxu1 %v3809_v5  ;;  %10497 = vmatprep.subr.bf16.mxu0 %v15955_v57  ;;  %v16348_v39 = vsub.f32 %v21024_v36, %v21037_v63  ;;  %v21039_v20 = vand.u32 4294901760, %v21026_v0  ;;  %v21060_v27 = vld [vmem:[#allocation64_spill] sm:$0xff]  ;;  %v21066_v36 = vld [vmem:[#allocation78_spill] sm:$0xff] }
 0x346   :  { %11263 = vmatpush1.bf16.msra.mxu1 %v15950_v12  ;;  %v16353_v31 = vsub.f32 %v21025_v19, %v21038_v46  ;;  %v21040_v57 = vand.u32 4294901760, %v21029_v22  ;;  %v21041_v63 = vand.u32 4294901760, %v21030_v28  ;;  %6893 = vmatprep.mubr.f32.mxu1 %v21044_v30  ;;  %v21055_v30 = vld [vmem:[#allocation87_spill] sm:$0xff]  ;;  %v21056_v19 = vld [vmem:[#allocation218_spill] sm:$0xff]  ;;  %v21085_v32 = vand.u32 4294901760, %v16290_v54 }
 0x347   :  { %v16358_v5 = vsub.f32 %v21026_v0, %v21039_v20  ;;  %11265 = vmatprep.subr.bf16.mxu1 %v15957_v6  ;;  %v4042_v20 = vand.u32 4294901760, %v16304_v7  ;;  %v4054_v6 = vand.u32 4294901760, %v16309_v4  ;;  %v6746_v46 = vand.u32 4294901760, %v16323_v48  ;;  %v21057_v0 = vld [vmem:[#allocation220_spill] sm:$0xff]  ;;  %v21086_v4 = vld [vmem:[#allocation45_spill] sm:$0xff] }
 0x348   :  { %v16364_v12 = vsub.f32 %v21029_v22, %v21040_v57  ;;  %v16369_v56 = vsub.f32 %v21030_v28, %v21041_v63  ;;  %10499 = vmatpush1.bf16.msra.mxu0 %v15963_v42  ;;  %v6734_v63 = vand.u32 4294901760, %v16318_v8  ;;  %v16406_v42 = vsub.f32 %v21045_v40, %v19131_v9  ;;  %v21052_v9 = vld [vmem:[#allocation212_spill] sm:$0xff]  ;;  %v21054_v57 = vld [vmem:[#allocation215_spill] sm:$0xff]  ;;  %v21058_v22 = vld [vmem:[#allocation53_spill] sm:$0xff] }
 0x349   :  { %10501 = vmatprep.subr.bf16.mxu0 %v16027_v3  ;;  %v21048_v3 = vand.u32 4294901760, %v21043_v61  ;;  %v21063_v40 = vld [vmem:[#allocation222_spill] sm:$0xff]  ;;  %v21070_v28 = vld [vmem:[#allocation109_spill] sm:$0xff]  ;;  %v16484_v25 = vpack.c.bf16 %v4054_v6, %v4042_v20 }
 0x34a   :  { %11267 = vmatpush1.bf16.msra.mxu1 %v15965_v26  ;;  %v6770_v8 = vand.u32 4294901760, %v16369_v56  ;;  %v16396_v26 = vsub.f32 %v21042_v47, %v21047_v58  ;;  %v21050_v56 = vld [vmem:[#allocation209_spill] sm:$0xff]  ;;  %v21090_v20 = vld [vmem:[#allocation54_spill] sm:$0xff]  ;;  %v6776_v6 = vand.u32 4294901760, %v16406_v42  ;;  %v21097_v42 = vand.u32 4294901760, %v16348_v39 }
 0x34b   :  { %11269 = vmatprep.subr.bf16.mxu1 %v16036_v62  ;;  %v16401_v7 = vsub.f32 %v21043_v61, %v21048_v3  ;;  %v21049_v62 = vand.u32 4294901760, %v21046_v21  ;;  %v21053_v58 = vld [vmem:[#allocation213_spill] sm:$0xff]  ;;  %v21065_v61 = vld [vmem:[#allocation26_spill] sm:$0xff]  ;;  %v21088_v43 = vand.u32 4294901760, %v21050_v56  ;;  %v21098_v3 = vand.u32 4294901760, %v16353_v31 }
 0x34c   :  { %10503 = vmatpush1.bf16.msra.mxu0 %v16038_v53  ;;  %v21075_v53 = vld [vmem:[#allocation158_spill] sm:$0xff]  ;;  %v4084_v47 = vand.u32 4294901760, %v16396_v26  ;;  %v19154_v39 = vand.u32 4294901760, %v21057_v0 }
 0x34d   :  { %v16411_v48 = vsub.f32 %v21046_v21, %v21049_v62  ;;  %10505 = vmatprep.subr.bf16.mxu0 %v16062_v50  ;;  %v21061_v62 = vld [vmem:[#allocation76_spill] sm:$0xff]  ;;  %v21064_v21 = vld [vmem:[#allocation69_spill] sm:$0xff]  ;;  %v4096_v17 = vand.u32 4294901760, %v16401_v7 }
 0x34e   :  { %11271 = vmatpush1.bf16.msra.mxu1 %v16043_v52  ;;  %v21062_v52 = vld [vmem:[#allocation83_spill] sm:$0xff] }
 0x34f   :  { %11273 = vmatprep.subr.bf16.mxu1 %v16069_v10  ;;  %v21059_v10 = vld [vmem:[#allocation205_spill] sm:$0xff] }
 0x350   :  { %10507 = vmatpush1.bf16.msra.mxu0 %v16077_v2  ;;  %v21084_v2 = vand.u32 4294901760, %v16270_v1  ;;  %v4089_v1 = vsub.f32 %v21050_v56, %v21088_v43  ;;  %v21093_v43 = vld [vmem:[#allocation59_spill] sm:$0xff] }
 0x351   :  { %10509 = vmatprep.subr.bf16.mxu0 %v16127_v33  ;;  %v21080_v33 = vld [vmem:[#allocation55_spill] sm:$0xff] }
 0x352   :  { %11275 = vmatpush1.bf16.msra.mxu1 %v16079_v34  ;;  %v21079_v34 = vld [vmem:[#allocation177_spill] sm:$0xff]  ;;  %v16482_v50 = vpack.c.bf16 %v21085_v32, %v21084_v2  ;;  %v21089_v32 = vand.u32 4294901760, %v21051_v49  ;;  %v21094_v2 = vand.u32 4294901760, %v16330_v11  ;;  %v19159_v11 = vand.u32 4294901760, %v21054_v57 }
 0x353   :  { %11277 = vmatprep.subr.bf16.mxu1 %v16138_v51  ;;  %v16486_v51 = vpack.c.bf16 %v6746_v46, %v6734_v63  ;;  %v21091_v46 = vld [vmem:[#allocation200_spill] sm:$0xff]  ;;  %v21092_v63 = vand.u32 4294901760, %v21052_v9  ;;  %v4090_v31 = vand.u32 4294901760, %v4089_v1 }
 0x354   :  { %10511 = vmatpush1.bf16.msra.mxu0 %v16140_v55  ;;  %v4101_v54 = vsub.f32 %v21051_v49, %v21089_v32  ;;  %v6788_v55 = vand.u32 4294901760, %v16411_v48  ;;  %v21095_v32 = vand.u32 4294901760, %v16335_v60  ;;  %v19158_v60 = vand.u32 4294901760, %v21055_v30 }
 0x355   :  { %10513 = vmatprep.subr.bf16.mxu0 %v21091_v46  ;;  %v16506_v7 = vsub.f32 %v21052_v9, %v21092_v63  ;;  %v21096_v46 = vand.u32 4294901760, %v16340_v29  ;;  %v21099_v63 = vand.u32 4294901760, %v16358_v5  ;;  %v19157_v29 = vand.u32 4294901760, %v21056_v19 }
 0x356   :  { %11279 = vmatpush1.bf16.msra.mxu1 %v21090_v20  ;;  %v16514_v20 = vpack.c.bf16 %v21095_v32, %v21094_v2  ;;  %v16537_v2 = vpack.c.bf16 %v4096_v17, %v4084_v47  ;;  %v4102_v5 = vand.u32 4294901760, %v4101_v54  ;;  %v21101_v32 = vand.u32 4294901760, %v21053_v58 }
 0x357   :  { %11281 = vmatprep.subr.bf16.mxu1 %v21093_v43  ;;  %v16520_v48 = vpack.c.bf16 %v21097_v42, %v21096_v46  ;;  %v16526_v9 = vpack.c.bf16 %v21099_v63, %v21098_v3  ;;  %v21100_v43 = vand.u32 4294901760, %v16364_v12  ;;  %v19155_v3 = vand.u32 4294901760, %v21058_v22 }
 0x358   :  { %10515 = vmatpush1.bf16.msra.mxu0 %v16181_v16  ;;  %v16542_v12 = vpack.c.bf16 %v6788_v55, %v6776_v6  ;;  %v6793_v46 = vsub.f32 %v21053_v58, %v21101_v32  ;;  %v19156_v16 = vand.u32 4294901760, %v21059_v10  ;;  %v19160_v47 = vand.u32 4294901760, %v21060_v27 }
 0x359   :  { %v16530_v26 = vpack.c.bf16 %v6770_v8, %v21100_v43  ;;  %10517 = vmatprep.subr.bf16.mxu0 %v16187_v35  ;;  %v6782_v8 = vand.u32 4294901760, %v16506_v7  ;;  %v19161_v17 = vand.u32 4294901760, %v21061_v62  ;;  %v19164_v35 = vand.u32 4294901760, %v21063_v40 }
 0x35a   :  { %11283 = vmatpush1.bf16.msra.mxu1 %v16183_v41  ;;  %v19162_v41 = vand.u32 4294901760, %v21062_v52  ;;  %v4107_v1 = vsub.f32 %v21054_v57, %v19159_v11  ;;  %v4119_v54 = vsub.f32 %v21055_v30, %v19158_v60  ;;  %v6811_v6 = vsub.f32 %v21057_v0, %v19154_v39  ;;  %v21103_v39 = vld [vmem:[#allocation216_spill] sm:$0xff]  ;;  %v21104_v11 = vld [vmem:[#allocation219_spill] sm:$0xff] }
 0x35b   :  { %11285 = vmatprep.subr.bf16.mxu1 %v16210_v13  ;;  %v6799_v13 = vsub.f32 %v21056_v19, %v19157_v29  ;;  %v16567_v55 = vpack.c.bf16 %v4102_v5, %v4090_v31  ;;  %v4113_v7 = vsub.f32 %v21058_v22, %v19155_v3  ;;  %v19165_v42 = vand.u32 4294901760, %v21064_v21  ;;  %v21102_v31 = vld [vmem:[#allocation95_spill] sm:$0xff] }
 0x35c   :  { %10519 = vmatpush1.bf16.msra.mxu0 %v16245_v59  ;;  %v19166_v63 = vand.u32 4294901760, %v21065_v61  ;;  %v6794_v43 = vand.u32 4294901760, %v6793_v46  ;;  %v4125_v32 = vsub.f32 %v21059_v10, %v19156_v16  ;;  %v6805_v3 = vsub.f32 %v21060_v27, %v19160_v47 }
 0x35d   :  { %10521 = vmatprep.subr.bf16.mxu0 %v16256_v18  ;;  %v4131_v18 = vsub.f32 %v21062_v52, %v19162_v41  ;;  %v4143_v46 = vsub.f32 %v21063_v40, %v19164_v35  ;;  %v4108_v16 = vand.u32 4294901760, %v4107_v1  ;;  %v4120_v29 = vand.u32 4294901760, %v4119_v54  ;;  %v21105_v41 = vld [vmem:[#allocation100_spill] sm:$0xff]  ;;  %v21107_v35 = vld [vmem:[#allocation237_spill] sm:$0xff] }
 0x35e   :  { %11287 = vmatpush1.bf16.msra.mxu1 %v16247_v44  ;;  %v6817_v44 = vsub.f32 %v21061_v62, %v19161_v17  ;;  %v6800_v60 = vand.u32 4294901760, %v6799_v13  ;;  %v4114_v5 = vand.u32 4294901760, %v4113_v7  ;;  %v6823_v47 = vsub.f32 %v21064_v21, %v19165_v42  ;;  %v21106_v52 = vld [vmem:[#allocation236_spill] sm:$0xff]  ;;  %v21110_v7 = vld [vmem:[#allocation103_spill] sm:$0xff] }
 0x35f   :  { %11289 = vmatprep.subr.bf16.mxu1 %v21103_v39  ;;  %v6812_v39 = vand.u32 4294901760, %v6811_v6  ;;  %v6835_v17 = vsub.f32 %v21065_v61, %v19166_v63  ;;  %v4126_v1 = vand.u32 4294901760, %v4125_v32  ;;  %v21108_v54 = vand.u32 4294901760, %v21066_v36  ;;  %v21111_v32 = vld [vmem:[#allocation111_spill] sm:$0xff] }
 0x360   :  { %10523 = vmatpush1.bf16.msra.mxu0 %v21104_v11  ;;  %v21109_v13 = vand.u32 4294901760, %v21102_v31  ;;  %v6806_v63 = vand.u32 4294901760, %v6805_v3  ;;  %v6818_v21 = vand.u32 4294901760, %v6817_v44  ;;  %v4132_v59 = vand.u32 4294901760, %v4131_v18 }
 0x361   :  { %10525 = vmatprep.subr.bf16.mxu0 %v21107_v35  ;;  %v4137_v11 = vsub.f32 %v21066_v36, %v21108_v54  ;;  %v4144_v61 = vand.u32 4294901760, %v4143_v46  ;;  %v10536_v40 = vpack.c.bf16 %v4120_v29, %v4108_v16  ;;  %v19188_v35 = vand.u32 4294901760, %v21070_v28 }
 0x362   :  { %11291 = vmatpush1.bf16.msra.mxu1 %v21106_v52  ;;  %v4149_v6 = vsub.f32 %v21102_v31, %v21109_v13  ;;  %v11302_v52 = vpack.c.bf16 %v6794_v43, %v6782_v8  ;;  %v19187_v27 = vand.u32 4294901760, %v21111_v32  ;;  %v11304_v54 = vpack.c.bf16 %v6812_v39, %v6800_v60 }
 0x363   :  { %11293 = vmatprep.subr.bf16.mxu1 %v16482_v50  ;;  %v6824_v36 = vand.u32 4294901760, %v6823_v47  ;;  %v6836_v62 = vand.u32 4294901760, %v6835_v17  ;;  %v21112_v13 = vand.u32 4294901760, %v21105_v41  ;;  %v10538_v50 = vpack.c.bf16 %v4126_v1, %v4114_v5  ;;  %v21114_v17 = vld [vmem:[#allocation120_spill] sm:$0xff] }
 0x364   :  { %10527 = vmatpush1.bf16.msra.mxu0 %v16484_v25  ;;  %v4138_v3 = vand.u32 4294901760, %v4137_v11  ;;  %v4150_v29 = vand.u32 4294901760, %v4149_v6  ;;  %v21113_v8 = vand.u32 4294901760, %v21110_v7  ;;  %v11306_v25 = vpack.c.bf16 %v6818_v21, %v6806_v63 }
 0x365   :  { %v6829_v42 = vsub.f32 %v21105_v41, %v21112_v13  ;;  %10529 = vmatprep.subr.bf16.mxu0 %v16514_v20  ;;  %v10540_v60 = vpack.c.bf16 %v4144_v61, %v4132_v59  ;;  %v19180_v47 = vand.u32 4294901760, %v21072_v38  ;;  %v19178_v43 = vand.u32 4294901760, %v21114_v17  ;;  %v21116_v59 = vld [vmem:[#allocation164_spill] sm:$0xff] }
 0x366   :  { %11295 = vmatpush1.bf16.msra.mxu1 %v16486_v51  ;;  %v6841_v16 = vsub.f32 %v21110_v7, %v21113_v8  ;;  %v4155_v51 = vsub.f32 %v21070_v28, %v19188_v35  ;;  %v4167_v20 = vsub.f32 %v21111_v32, %v19187_v27  ;;  %v19177_v5 = vand.u32 4294901760, %v21074_v37  ;;  %v21145_v27 = vld [vmem:[#allocation44_spill] sm:$0xff] }
 0x367   :  { %11297 = vmatprep.subr.bf16.mxu1 %v16520_v48  ;;  %v19176_v44 = vand.u32 4294901760, %v21075_v53  ;;  %v11308_v21 = vpack.c.bf16 %v6836_v62, %v6824_v36  ;;  %v6830_v61 = vand.u32 4294901760, %v6829_v42  ;;  %v21115_v48 = vld [vmem:[#allocation75_spill] sm:$0xff]  ;;  %v19173_v18 = vand.u32 4294901760, %v21116_v59 }
 0x368   :  { %10531 = vmatpush1.bf16.msra.mxu0 %v16526_v9  ;;  %v19174_v63 = vand.u32 4294901760, %v21115_v48  ;;  %v10542_v46 = vpack.c.bf16 %v4150_v29, %v4138_v3  ;;  %v6842_v39 = vand.u32 4294901760, %v6841_v16  ;;  %v19175_v1 = vand.u32 4294901760, %v21078_v45 }
 0x369   :  { %10533 = vmatprep.subr.bf16.mxu0 %v16537_v2  ;;  %v19179_v11 = vand.u32 4294901760, %v21079_v34  ;;  %v6847_v9 = vsub.f32 %v21072_v38, %v19180_v47  ;;  %v6859_v36 = vsub.f32 %v21114_v17, %v19178_v43  ;;  %v19181_v62 = vand.u32 4294901760, %v21080_v33 }
 0x36a   :  { %11299 = vmatpush1.bf16.msra.mxu1 %v16530_v26  ;;  %v19186_v26 = vand.u32 4294901760, %v21081_v14  ;;  %v4156_v2 = vand.u32 4294901760, %v4155_v51  ;;  %v4168_v42 = vand.u32 4294901760, %v4167_v20  ;;  %v4161_v6 = vsub.f32 %v21074_v37, %v19177_v5 }
 0x36b   :  { %11301 = vmatprep.subr.bf16.mxu1 %v16542_v12  ;;  %v4173_v12 = vsub.f32 %v21075_v53, %v19176_v44  ;;  %v6853_v13 = vsub.f32 %v21115_v48, %v19174_v63  ;;  %v6865_v3 = vsub.f32 %v21116_v59, %v19173_v18  ;;  %v19185_v29 = vand.u32 4294901760, %v21082_v15 }
 0x36c   :  { %10535 = vmatpush1.bf16.msra.mxu0 %v16567_v55  ;;  %v19184_v8 = vand.u32 4294901760, %v21083_v23  ;;  %v4179_v16 = vsub.f32 %v21078_v45, %v19175_v1  ;;  %v4191_v55 = vsub.f32 %v21079_v34, %v19179_v11  ;;  %v19182_v51 = vand.u32 4294901760, %v21086_v4 }
 0x36d   :  { %10537 = vmatprep.subr.bf16.mxu0 %v10536_v40  ;;  %v19183_v20 = vand.u32 4294901760, %v21087_v24  ;;  %v6848_v18 = vand.u32 4294901760, %v6847_v9  ;;  %v6860_v63 = vand.u32 4294901760, %v6859_v36  ;;  %v6883_v40 = vsub.f32 %v21081_v14, %v19186_v26  ;;  %v21144_v26 = vld [vmem:[#allocation191_spill] sm:$0xff] }
 0x36e   :  { %11303 = vmatpush1.bf16.msra.mxu1 %v11302_v52  ;;  %v6871_v52 = vsub.f32 %v21080_v33, %v19181_v62  ;;  %v11310_v1 = vpack.c.bf16 %v6842_v39, %v6830_v61  ;;  %v10544_v44 = vpack.c.bf16 %v4168_v42, %v4156_v2  ;;  %v4162_v5 = vand.u32 4294901760, %v4161_v6 }
 0x36f   :  { %11305 = vmatprep.subr.bf16.mxu1 %v11304_v54  ;;  %v4174_v43 = vand.u32 4294901760, %v4173_v12  ;;  %v6854_v11 = vand.u32 4294901760, %v6853_v13  ;;  %v6866_v47 = vand.u32 4294901760, %v6865_v3  ;;  %v4185_v54 = vsub.f32 %v21082_v15, %v19185_v29  ;;  %v21143_v29 = vld [vmem:[#allocation162_spill] sm:$0xff] }
 0x370   :  { %10539 = vmatpush1.bf16.msra.mxu0 %v10538_v50  ;;  %v4197_v9 = vsub.f32 %v21083_v23, %v19184_v8  ;;  %v4180_v36 = vand.u32 4294901760, %v4179_v16  ;;  %v4192_v62 = vand.u32 4294901760, %v4191_v55  ;;  %v6877_v61 = vsub.f32 %v21086_v4, %v19182_v51  ;;  %v21142_v8 = vld [vmem:[#allocation73_spill] sm:$0xff] }
 0x371   :  { %10541 = vmatprep.subr.bf16.mxu0 %v10540_v60  ;;  %v6889_v50 = vsub.f32 %v21087_v24, %v19183_v20  ;;  %v11312_v39 = vpack.c.bf16 %v6860_v63, %v6848_v18  ;;  %v6872_v2 = vand.u32 4294901760, %v6871_v52  ;;  %v6884_v42 = vand.u32 4294901760, %v6883_v40  ;;  %v21117_v63 = vld [vmem:[#allocation165_spill] sm:$0xff]  ;;  %v21118_v18 = vld [vmem:[#allocation56_spill] sm:$0xff] }
 0x372   :  { %11307 = vmatpush1.bf16.msra.mxu1 %v11306_v25  ;;  %v10546_v6 = vpack.c.bf16 %v4174_v43, %v4162_v5  ;;  %v4186_v12 = vand.u32 4294901760, %v4185_v54  ;;  %v4198_v13 = vand.u32 4294901760, %v4197_v9  ;;  %v11314_v25 = vpack.c.bf16 %v6866_v47, %v6854_v11  ;;  %v21119_v43 = vld [vmem:[#allocation166_spill] sm:$0xff]  ;;  %v21120_v5 = vld [vmem:[#allocation171_spill] sm:$0xff]  ;;  %v21123_v11 = vld [vmem:[#allocation233_spill] sm:$0xff] }
 0x373   :  { %11309 = vmatprep.subr.bf16.mxu1 %v11308_v21  ;;  %v10548_v60 = vpack.c.bf16 %v4192_v62, %v4180_v36  ;;  %v6878_v3 = vand.u32 4294901760, %v6877_v61  ;;  %v6890_v16 = vand.u32 4294901760, %v6889_v50  ;;  %v11316_v55 = vpack.c.bf16 %v6884_v42, %v6872_v2  ;;  %v21122_v47 = vld [vmem:[#allocation231_spill] sm:$0xff]  ;;  %v21124_v62 = vld [vmem:[#allocation234_spill] sm:$0xff]  ;;  %v21125_v54 = vld [vmem:[#allocation52_spill] sm:$0xff] }
 0x374   :  { %10543 = vmatpush1.bf16.msra.mxu0 %v10542_v46  ;;  %v10550_v51 = vpack.c.bf16 %v4198_v13, %v4186_v12  ;;  %v10552_v52 = vpack.c.bf16 %v21118_v18, %v21117_v63  ;;  %v11320_v46 = vpack.c.bf16 %v21120_v5, %v21119_v43  ;;  %v11322_v40 = vpack.c.bf16 %v21124_v62, %v21123_v11  ;;  %v21126_v9 = vld [vmem:[#allocation57_spill] sm:$0xff]  ;;  %v21128_v50 = vld [vmem:[#allocation63_spill] sm:$0xff]  ;;  %v21129_v2 = vld [vmem:[#allocation172_spill] sm:$0xff] }
 0x375   :  { %10545 = vmatprep.subr.bf16.mxu0 %v10544_v44  ;;  %v11318_v21 = vpack.c.bf16 %v6890_v16, %v6878_v3  ;;  %v21121_v44 = vld [vmem:[#allocation229_spill] sm:$0xff]  ;;  %v10556_v36 = vpack.c.bf16 %v21126_v9, %v21125_v54  ;;  %v21132_v12 = vld [vmem:[#allocation86_spill] sm:$0xff]  ;;  %v21133_v13 = vld [vmem:[#allocation88_spill] sm:$0xff]  ;;  %v10564_v35 = vpack.c.bf16 %v21145_v27, %v21144_v26 }
 0x376   :  { %11311 = vmatpush1.bf16.msra.mxu1 %v11310_v1  ;;  %v10554_v1 = vpack.c.bf16 %v21122_v47, %v21121_v44  ;;  %v21127_v61 = vld [vmem:[#allocation61_spill] sm:$0xff]  ;;  %v21135_v3 = vld [vmem:[#allocation150_spill] sm:$0xff]  ;;  %v21156_v26 = vld [vmem:[#allocation131_spill] sm:$0xff] }
 0x377   :  { %11313 = vmatprep.subr.bf16.mxu1 %v11312_v39  ;;  %v11324_v39 = vpack.c.bf16 %v21128_v50, %v21127_v61  ;;  %v21131_v42 = vld [vmem:[#allocation77_spill] sm:$0xff] }
 0x378   :  { %10547 = vmatpush1.bf16.msra.mxu0 %v10546_v6  ;;  %v21140_v20 = vld [vmem:[#allocation157_spill] sm:$0xff] }
 0x379   :  { %10549 = vmatprep.subr.bf16.mxu0 %v10548_v60  ;;  %v21134_v60 = vld [vmem:[#allocation74_spill] sm:$0xff] }
 0x37a   :  { %11315 = vmatpush1.bf16.msra.mxu1 %v11314_v25  ;;  %v11326_v25 = vpack.c.bf16 %v21133_v13, %v21132_v12  ;;  %v10560_v16 = vpack.c.bf16 %v21135_v3, %v21134_v60  ;;  %v21158_v3 = vld [vmem:[#allocation140_spill] sm:$0xff] }
 0x37b   :  { %11317 = vmatprep.subr.bf16.mxu1 %v11316_v55  ;;  %v21136_v55 = vld [vmem:[#allocation154_spill] sm:$0xff] }
 0x37c   :  { %10551 = vmatpush1.bf16.msra.mxu0 %v10550_v51  ;;  %v21130_v51 = vld [vmem:[#allocation65_spill] sm:$0xff] }
 0x37d   :  { %10553 = vmatprep.subr.bf16.mxu0 %v10552_v52  ;;  %v10558_v6 = vpack.c.bf16 %v21131_v42, %v21130_v51 }
 0x37e   :  { %11319 = vmatpush1.bf16.msra.mxu1 %v11318_v21  ;;  %v21137_v21 = vld [vmem:[#allocation156_spill] sm:$0xff] }
 0x37f   :  { %11321 = vmatprep.subr.bf16.mxu1 %v11320_v46  ;;  %4203 = vmatmul.mubr.f32.vlgmr.msra.gmra.mrb[4].mxu0 %v21129_v2  ;;  %v11328_v52 = vpack.c.bf16 %v21137_v21, %v21136_v55  ;;  %v21138_v46 = vld [vmem:[#allocation66_spill] sm:$0xff]  ;;  %v21147_v21 = vld [vmem:[#allocation193_spill] sm:$0xff]  ;;  %v21148_v55 = vld [vmem:[#allocation168_spill] sm:$0xff] }
 0x380   :  { %10555 = vmatpush1.bf16.msra.mxu0 %v10554_v1  ;;  %4209 = vmatprep.mubr.f32.mxu0 %v21138_v46  ;;  %v21139_v1 = vld [vmem:[#allocation68_spill] sm:$0xff] }
 0x381   :  { %6895 = vmatmul.mubr.f32.vlgmr.msra.gmra.mrb[4].mxu1 %v21129_v2  ;;  %10557 = vmatprep.subr.bf16.mxu0 %v10556_v36  ;;  %v21146_v2 = vld [vmem:[#allocation194_spill] sm:$0xff] }
 0x382   :  { %11323 = vmatpush1.bf16.msra.mxu1 %v11322_v40  ;;  %6901 = vmatprep.mubr.f32.mxu1 %v21138_v46  ;;  %v21141_v40 = vld [vmem:[#allocation160_spill] sm:$0xff]  ;;  %v11332_v46 = vpack.c.bf16 %v21147_v21, %v21146_v2  ;;  %v21157_v2 = vld [vmem:[#allocation137_spill] sm:$0xff] }
 0x383   :  { %11325 = vmatprep.subr.bf16.mxu1 %v11324_v39  ;;  %4211 = vmatmul.mubr.f32.gmra.mrb[6].mxu0 %v21139_v1  ;;  %v10562_v36 = vpack.c.bf16 %v21141_v40, %v21140_v20  ;;  %v11330_v39 = vpack.c.bf16 %v21143_v29, %v21142_v8  ;;  %v21150_v40 = vld [vmem:[#allocation50_spill] sm:$0xff]  ;;  %v21153_v8 = vld [vmem:[#allocation221_spill] sm:$0xff]  ;;  %v21154_v20 = vld [vmem:[#allocation228_spill] sm:$0xff] }
 0x384   :  { %10559 = vmatpush1.bf16.msra.mxu0 %v10558_v6  ;;  %4411 = vmatprep.mubr.f32.mxu0 %v21148_v55  ;;  %v21149_v6 = vld [vmem:[#allocation196_spill] sm:$0xff]  ;;  %v10568_v27 = vpack.c.bf16 %v21154_v20, %v21153_v8  ;;  %v21166_v8 = vld [vmem:[#allocation33_spill] sm:$0xff] }
 0x385   :  { %6903 = vmatmul.mubr.f32.gmra.mrb[6].mxu1 %v21139_v1  ;;  %10561 = vmatprep.subr.bf16.mxu0 %v10560_v16  ;;  %v10566_v1 = vpack.c.bf16 %v21150_v40, %v21149_v6  ;;  %v21152_v16 = vld [vmem:[#allocation198_spill] sm:$0xff]  ;;  %v21160_v40 = vld [vmem:[#allocation149_spill] sm:$0xff] }
 0x386   :  { %11327 = vmatpush1.bf16.msra.mxu1 %v11326_v25  ;;  %7103 = vmatprep.mubr.f32.mxu1 %v21148_v55  ;;  %v21151_v25 = vld [vmem:[#allocation199_spill] sm:$0xff]  ;;  %v10570_v55 = vpack.c.bf16 %v21158_v3, %v21157_v2  ;;  %v21162_v6 = vld [vmem:[#allocation89_spill] sm:$0xff]  ;;  %v21168_v3 = vld [vmem:[#allocation230_spill] sm:$0xff] }
 0x387   :  { %11329 = vmatprep.subr.bf16.mxu1 %v11328_v52  ;;  %v11334_v29 = vpack.c.bf16 %v21152_v16, %v21151_v25  ;;  %v21155_v52 = vld [vmem:[#allocation80_spill] sm:$0xff]  ;;  %v21164_v25 = vld [vmem:[#allocation25_spill] sm:$0xff] }
 0x388   :  { %10563 = vmatpush1.bf16.msra.mxu0 %v10562_v36  ;;  %v11336_v21 = vpack.c.bf16 %v21156_v26, %v21155_v52  ;;  %v21159_v36 = vld [vmem:[#allocation146_spill] sm:$0xff]  ;;  %v21163_v16 = vld [vmem:[#allocation24_spill] sm:$0xff] }
 0x389   :  { %10565 = vmatprep.subr.bf16.mxu0 %v10564_v35  ;;  %v21161_v35 = vld [vmem:[#allocation152_spill] sm:$0xff]  ;;  %v11340_v20 = vpack.c.bf16 %v21164_v25, %v21163_v16 }
 0x38a   :  { %11331 = vmatpush1.bf16.msra.mxu1 %v11330_v39  ;;  %v11338_v39 = vpack.c.bf16 %v21160_v40, %v21159_v36  ;;  %v10572_v60 = vpack.c.bf16 %v21162_v6, %v21161_v35  ;;  %v21170_v2 = vld [vmem:[#allocation96_spill] sm:$0xff]  ;;  %v21171_v40 = vld [vmem:[#allocation81_spill] sm:$0xff]  ;;  %v21172_v36 = vld [vmem:[#allocation99_spill] sm:$0xff] }
 0x38b   :  { %11333 = vmatprep.subr.bf16.mxu1 %v11332_v46  ;;  %v21165_v46 = vld [vmem:[#allocation28_spill] sm:$0xff]  ;;  %v11344_v6 = vpack.c.bf16 %v21172_v36, %v21171_v40 }
 0x38c   :  { %10567 = vmatpush1.bf16.msra.mxu0 %v10566_v1  ;;  %v10574_v26 = vpack.c.bf16 %v21166_v8, %v21165_v46  ;;  %v21167_v1 = vld [vmem:[#allocation34_spill] sm:$0xff]  ;;  %v21174_v35 = vld [vmem:[#allocation204_spill] sm:$0xff]  ;;  %v21176_v8 = vld [vmem:[#allocation107_spill] sm:$0xff] }
 0x38d   :  { %10569 = vmatprep.subr.bf16.mxu0 %v10568_v27  ;;  %v21169_v27 = vld [vmem:[#allocation94_spill] sm:$0xff]  ;;  %v21178_v46 = vld [vmem:[#allocation92_spill] sm:$0xff] }
 0x38e   :  { %11335 = vmatpush1.bf16.msra.mxu1 %v11334_v29  ;;  %v11342_v29 = vpack.c.bf16 %v21168_v3, %v21167_v1  ;;  %v10576_v52 = vpack.c.bf16 %v21170_v2, %v21169_v27  ;;  %v21179_v3 = vld [vmem:[#allocation113_spill] sm:$0xff]  ;;  %v21180_v1 = vld [vmem:[#allocation115_spill] sm:$0xff] }
 0x38f   :  { %11337 = vmatprep.subr.bf16.mxu1 %v11336_v21  ;;  %v21173_v21 = vld [vmem:[#allocation102_spill] sm:$0xff]  ;;  %v11348_v2 = vpack.c.bf16 %v21180_v1, %v21179_v3  ;;  %v21182_v27 = vld [vmem:[#allocation119_spill] sm:$0xff] }
 0x390   :  { %10571 = vmatpush1.bf16.msra.mxu0 %v10570_v55  ;;  %v10578_v25 = vpack.c.bf16 %v21174_v35, %v21173_v21  ;;  %v21175_v55 = vld [vmem:[#allocation104_spill] sm:$0xff]  ;;  %v21184_v35 = vld [vmem:[#allocation123_spill] sm:$0xff] }
 0x391   :  { %10573 = vmatprep.subr.bf16.mxu0 %v10572_v60  ;;  %v21177_v60 = vld [vmem:[#allocation110_spill] sm:$0xff]  ;;  %v21186_v21 = vld [vmem:[#allocation127_spill] sm:$0xff] }
 0x392   :  { %11339 = vmatpush1.bf16.msra.mxu1 %v11338_v39  ;;  %v11346_v39 = vpack.c.bf16 %v21176_v8, %v21175_v55  ;;  %v10580_v16 = vpack.c.bf16 %v21178_v46, %v21177_v60  ;;  %v21187_v8 = vld [vmem:[#allocation130_spill] sm:$0xff]  ;;  %v21188_v55 = vld [vmem:[#allocation132_spill] sm:$0xff] }
 0x393   :  { %11341 = vmatprep.subr.bf16.mxu1 %v11340_v20  ;;  %v21181_v20 = vld [vmem:[#allocation116_spill] sm:$0xff]  ;;  %v11352_v46 = vpack.c.bf16 %v21188_v55, %v21187_v8 }
 0x394   :  { %10575 = vmatpush1.bf16.msra.mxu0 %v10574_v26  ;;  %v10582_v36 = vpack.c.bf16 %v21182_v27, %v21181_v20  ;;  %v21183_v26 = vld [vmem:[#allocation121_spill] sm:$0xff]  ;;  %v21190_v60 = vld [vmem:[#allocation136_spill] sm:$0xff] }
 0x395   :  { %10577 = vmatprep.subr.bf16.mxu0 %v10576_v52  ;;  %v21185_v52 = vld [vmem:[#allocation124_spill] sm:$0xff]  ;;  %v21192_v27 = vld [vmem:[#allocation141_spill] sm:$0xff] }
 0x396   :  { %11343 = vmatpush1.bf16.msra.mxu1 %v11342_v29  ;;  %v11350_v29 = vpack.c.bf16 %v21184_v35, %v21183_v26  ;;  %v10584_v40 = vpack.c.bf16 %v21186_v21, %v21185_v52  ;;  %v21194_v35 = vld [vmem:[#allocation144_spill] sm:$0xff]  ;;  %v21197_v21 = vld [vmem:[#allocation151_spill] sm:$0xff] }
 0x397   :  { %11345 = vmatprep.subr.bf16.mxu1 %v11344_v6  ;;  %v21189_v6 = vld [vmem:[#allocation134_spill] sm:$0xff]  ;;  %v21200_v55 = vld [vmem:[#allocation176_spill] sm:$0xff] }
 0x398   :  { %10579 = vmatpush1.bf16.msra.mxu0 %v10578_v25  ;;  %v10586_v1 = vpack.c.bf16 %v21190_v60, %v21189_v6  ;;  %v21191_v25 = vld [vmem:[#allocation139_spill] sm:$0xff] }
 0x399   :  { %10581 = vmatprep.subr.bf16.mxu0 %v10580_v16  ;;  %v21193_v16 = vld [vmem:[#allocation145_spill] sm:$0xff] }
 0x39a   :  { %11347 = vmatpush1.bf16.msra.mxu1 %v11346_v39  ;;  %v11354_v39 = vpack.c.bf16 %v21192_v27, %v21191_v25  ;;  %v21195_v26 = vpack.c.bf16 %v21193_v16, %v21194_v35  ;;  %v21205_v27 = vld [vmem:[#allocation35_spill] sm:$0xff]  ;;  %v21212_v35 = vld [vmem:[#allocation186_spill] sm:$0xff] }
 0x39b   :  { %11349 = vmatprep.subr.bf16.mxu1 %v11348_v2  ;;  %v21196_v2 = vld [vmem:[#allocation173_spill] sm:$0xff]  ;;  %v21209_v25 = vld [vmem:[#allocation183_spill] sm:$0xff] }
 0x39c   :  { %10583 = vmatpush1.bf16.msra.mxu0 %v10582_v36  ;;  %v21198_v52 = vpack.c.bf16 %v21196_v2, %v21197_v21  ;;  %v21199_v36 = vld [vmem:[#allocation27_spill] sm:$0xff]  ;;  %v21215_v21 = vld [vmem:[#allocation188_spill] sm:$0xff] }
 0x39d   :  { %10585 = vmatprep.subr.bf16.mxu0 %v10584_v40  ;;  %v21201_v8 = vpack.c.bf16 %v21199_v36, %v21200_v55  ;;  %v21203_v40 = vld [vmem:[#allocation180_spill] sm:$0xff]  ;;  %v21218_v55 = vld [vmem:[#allocation201_spill] sm:$0xff] }
 0x39e   :  { %11351 = vmatpush1.bf16.msra.mxu1 %v11350_v29  ;;  %v21202_v29 = vld [vmem:[#allocation90_spill] sm:$0xff] }
 0x39f   :  { %11353 = vmatprep.subr.bf16.mxu1 %v11352_v46  ;;  %v21204_v60 = vpack.c.bf16 %v21202_v29, %v21203_v40  ;;  %v21206_v46 = vld [vmem:[#allocation182_spill] sm:$0xff]  ;;  %v21221_v40 = vld [vmem:[#allocation203_spill] sm:$0xff] }
 0x3a0   :  { %10587 = vmatpush1.bf16.msra.mxu0 %v10586_v1  ;;  %v21207_v1 = vpack.c.bf16 %v21205_v27, %v21206_v46 }
 0x3a1   :  { %10589 = vmatprep.subr.bf16.mxu0 %v21195_v26  ;;  %v21211_v26 = vld [vmem:[#allocation39_spill] sm:$0xff] }
 0x3a2   :  { %11355 = vmatpush1.bf16.msra.mxu1 %v11354_v39  ;;  %v21208_v39 = vld [vmem:[#allocation184_spill] sm:$0xff]  ;;  %v21213_v2 = vpack.c.bf16 %v21211_v26, %v21212_v35 }
 0x3a3   :  { %11357 = vmatprep.subr.bf16.mxu1 %v21198_v52  ;;  %v21210_v16 = vpack.c.bf16 %v21208_v39, %v21209_v25  ;;  %v21214_v52 = vld [vmem:[#allocation189_spill] sm:$0xff] }
 0x3a4   :  { %10591 = vmatpush1.bf16.msra.mxu0 %v21201_v8  ;;  %v21216_v36 = vpack.c.bf16 %v21214_v52, %v21215_v21  ;;  %v21217_v8 = vld [vmem:[#allocation62_spill] sm:$0xff] }
 0x3a5   :  { %10593 = vmatprep.subr.bf16.mxu0 %v21207_v1  ;;  %v21219_v29 = vpack.c.bf16 %v21217_v8, %v21218_v55  ;;  %v21223_v1 = vpack.c.bf16 %v21051_v49, %v21050_v56  ;;  %v21233_v56 = vld [vmem:[#allocation83_spill] sm:$0xff] }
 0x3a6   :  { %11359 = vmatpush1.bf16.msra.mxu1 %v21204_v60  ;;  %v21220_v60 = vld [vmem:[#allocation206_spill] sm:$0xff] }
 0x3a7   :  { %11361 = vmatprep.subr.bf16.mxu1 %v21210_v16  ;;  %v21222_v27 = vpack.c.bf16 %v21220_v60, %v21221_v40  ;;  %v21224_v16 = vld [vmem:[#allocation212_spill] sm:$0xff] }
 0x3a8   :  { %10595 = vmatpush1.bf16.msra.mxu0 %v21213_v2  ;;  %v21225_v26 = vpack.c.bf16 %v21053_v58, %v21224_v16  ;;  %v21226_v2 = vpack.c.bf16 %v21055_v30, %v21054_v57  ;;  %v21230_v60 = vld [vmem:[#allocation64_spill] sm:$0xff]  ;;  %v21236_v16 = vld [vmem:[#allocation69_spill] sm:$0xff] }
 0x3a9   :  { %10597 = vmatprep.subr.bf16.mxu0 %v21219_v29  ;;  %v21228_v29 = vpack.c.bf16 %v21059_v10, %v21058_v22 }
 0x3aa   :  { %11363 = vmatpush1.bf16.msra.mxu1 %v21216_v36  ;;  %v21227_v36 = vpack.c.bf16 %v21057_v0, %v21056_v19 }
 0x3ab   :  { %11365 = vmatprep.subr.bf16.mxu1 %v21222_v27  ;;  %v21229_v27 = vld [vmem:[#allocation76_spill] sm:$0xff] }
 0x3ac   :  { %10599 = vmatpush1.bf16.msra.mxu0 %v21223_v1  ;;  %v21231_v49 = vpack.c.bf16 %v21229_v27, %v21230_v60  ;;  %v21232_v1 = vld [vmem:[#allocation222_spill] sm:$0xff] }
 0x3ad   :  { %10601 = vmatprep.subr.bf16.mxu0 %v21226_v2  ;;  %v21234_v58 = vpack.c.bf16 %v21232_v1, %v21233_v56  ;;  %v21238_v2 = vld [vmem:[#allocation78_spill] sm:$0xff] }
 0x3ae   :  { %11367 = vmatpush1.bf16.msra.mxu1 %v21225_v26  ;;  %v21235_v26 = vld [vmem:[#allocation26_spill] sm:$0xff]  ;;  %v21239_v0 = vpack.c.bf16 %v21102_v31, %v21238_v2 }
 0x3af   :  { %11369 = vmatprep.subr.bf16.mxu1 %v21227_v36  ;;  %v21237_v30 = vpack.c.bf16 %v21235_v26, %v21236_v16  ;;  %v21240_v36 = vpack.c.bf16 %v21110_v7, %v21105_v41 }
 0x3b0   :  { %10603 = vmatpush1.bf16.msra.mxu0 %v21228_v29  ;;  %v21241_v29 = vpack.c.bf16 %v21111_v32, %v21070_v28 }
 0x3b1   :  { %10605 = vmatprep.subr.bf16.mxu0 %v21234_v58  ;;  %v21243_v58 = vpack.c.bf16 %v21075_v53, %v21074_v37 }
 0x3b2   :  { %11371 = vmatpush1.bf16.msra.mxu1 %v21231_v49  ;;  %v21242_v49 = vpack.c.bf16 %v21114_v17, %v21072_v38 }
 0x3b3   :  { %11373 = vmatprep.subr.bf16.mxu1 %v21237_v30  ;;  %v21244_v30 = vpack.c.bf16 %v21116_v59, %v21115_v48  ;;  %v21250_v59 = vld [vmem:[#allocation48_spill] sm:$0xff] }
 0x3b4   :  { %10607 = vmatpush1.bf16.msra.mxu0 %v21239_v0  ;;  %v21245_v0 = vpack.c.bf16 %v21079_v34, %v21078_v45  ;;  %v21252_v34 = vld [vmem:[#allocation227_spill] sm:$0xff] }
 0x3b5   :  { %10609 = vmatprep.subr.bf16.mxu0 %v21241_v29  ;;  %v21247_v29 = vpack.c.bf16 %v21083_v23, %v21082_v15  ;;  %v21255_v23 = vld [vmem:[#allocation58_spill] sm:$0xff] }
 0x3b6   :  { %11375 = vmatpush1.bf16.msra.mxu1 %v21240_v36  ;;  %v21246_v36 = vpack.c.bf16 %v21081_v14, %v21080_v33  ;;  %v21319_v15 = vld [vmem:[#allocation38_spill] sm:$0xff] }
 0x3b7   :  { %11377 = vmatprep.subr.bf16.mxu1 %v21242_v49  ;;  %v21248_v49 = vpack.c.bf16 %v21087_v24, %v21086_v4  ;;  %v21266_v24 = vld [vmem:[#allocation43_spill] sm:$0xff] }
 0x3b8   :  { %10611 = vmatpush1.bf16.msra.mxu0 %v21243_v58  ;;  %v21249_v58 = vld [vmem:[#allocation225_spill] sm:$0xff]  ;;  %v21272_v4 = vld [vmem:[#allocation143_spill] sm:$0xff] }
 0x3b9   :  { %10613 = vmatprep.subr.bf16.mxu0 %v21245_v0  ;;  %v21253_v0 = vld [vmem:[#allocation232_spill] sm:$0xff] }
 0x3ba   :  { %11379 = vmatpush1.bf16.msra.mxu1 %v21244_v30  ;;  %v21251_v30 = vld [vmem:[#allocation181_spill] sm:$0xff] }
 0x3bb   :  { %11381 = vmatprep.subr.bf16.mxu1 %v21246_v36  ;;  %v21254_v36 = vld [vmem:[#allocation51_spill] sm:$0xff] }
 0x3bc   :  { %10615 = vmatpush1.bf16.msra.mxu0 %v21247_v29  ;;  %v21256_v29 = vld [vmem:[#allocation207_spill] sm:$0xff] }
 0x3bd   :  { %10617 = vmatprep.subr.bf16.mxu0 %v21249_v58  ;;  %v21258_v58 = vld [vmem:[#allocation67_spill] sm:$0xff] }
 0x3be   :  { %11383 = vmatpush1.bf16.msra.mxu1 %v21248_v49  ;;  %v21257_v49 = vld [vmem:[#allocation85_spill] sm:$0xff] }
 0x3bf   :  { %11385 = vmatprep.subr.bf16.mxu1 %v21250_v59  ;;  %4414 = vmatmul.mubr.f32.vlgmr.msra.gmra.mrb[4].mxu0 %v21251_v30  ;;  %v21259_v59 = vld [vmem:[#allocation82_spill] sm:$0xff] }
 0x3c0   :  { %10619 = vmatpush1.bf16.msra.mxu0 %v21252_v34  ;;  %4421 = vmatprep.mubr.f32.mxu0 %v21256_v29  ;;  %v21260_v34 = vld [vmem:[#allocation147_spill] sm:$0xff] }
 0x3c1   :  { %7106 = vmatmul.mubr.f32.vlgmr.msra.gmra.mrb[4].mxu1 %v21251_v30  ;;  %10621 = vmatprep.subr.bf16.mxu0 %v21254_v36  ;;  %v21261_v30 = vld [vmem:[#allocation153_spill] sm:$0xff] }
 0x3c2   :  { %11387 = vmatpush1.bf16.msra.mxu1 %v21253_v0  ;;  %7113 = vmatprep.mubr.f32.mxu1 %v21256_v29  ;;  %v21262_v0 = vld [vmem:[#allocation179_spill] sm:$0xff]  ;;  %v21264_v36 = vld [vmem:[#allocation161_spill] sm:$0xff] }
 0x3c3   :  { %11389 = vmatprep.subr.bf16.mxu1 %v21255_v23  ;;  %4424 = vmatmul.mubr.f32.gmra.mrb[6].mxu0 %v21257_v49  ;;  %v21263_v23 = vld [vmem:[#allocation159_spill] sm:$0xff] }
 0x3c4   :  { %10623 = vmatpush1.bf16.msra.mxu0 %v21258_v58  ;;  %4561 = vmatprep.mubr.f32.mxu0 %v21262_v0  ;;  %v21265_v29 = vld [vmem:[#allocation163_spill] sm:$0xff] }
 0x3c5   :  { %7116 = vmatmul.mubr.f32.gmra.mrb[6].mxu1 %v21257_v49  ;;  %10625 = vmatprep.subr.bf16.mxu0 %v21260_v34  ;;  %v21267_v58 = vld [vmem:[#allocation195_spill] sm:$0xff]  ;;  %v21270_v34 = vld [vmem:[#allocation125_spill] sm:$0xff] }
 0x3c6   :  { %11391 = vmatpush1.bf16.msra.mxu1 %v21259_v59  ;;  %7253 = vmatprep.mubr.f32.mxu1 %v21262_v0  ;;  %v21268_v49 = vld [vmem:[#allocation47_spill] sm:$0xff]  ;;  %v21269_v59 = vld [vmem:[#allocation210_spill] sm:$0xff]  ;;  %v21273_v0 = vld [vmem:[#allocation84_spill] sm:$0xff] }
 0x3c7   :  { %11393 = vmatprep.subr.bf16.mxu1 %v21261_v30  ;;  %v21271_v30 = vld [vmem:[#allocation135_spill] sm:$0xff] }
 0x3c8   :  { %10627 = vmatpush1.bf16.msra.mxu0 %v21263_v23  ;;  %v21274_v23 = vld [vmem:[#allocation91_spill] sm:$0xff] }
 0x3c9   :  { %10629 = vmatprep.subr.bf16.mxu0 %v21265_v29  ;;  %v21276_v29 = vld [vmem:[#allocation226_spill] sm:$0xff] }
 0x3ca   :  { %11395 = vmatpush1.bf16.msra.mxu1 %v21264_v36  ;;  %v21275_v36 = vld [vmem:[#allocation30_spill] sm:$0xff] }
 0x3cb   :  { %11397 = vmatprep.subr.bf16.mxu1 %v21266_v24  ;;  %v21277_v24 = vld [vmem:[#allocation93_spill] sm:$0xff] }
 0x3cc   :  { %10631 = vmatpush1.bf16.msra.mxu0 %v21267_v58  ;;  %v21278_v58 = vld [vmem:[#allocation97_spill] sm:$0xff] }
 0x3cd   :  { %10633 = vmatprep.subr.bf16.mxu0 %v21269_v59  ;;  %v21280_v59 = vld [vmem:[#allocation105_spill] sm:$0xff] }
 0x3ce   :  { %11399 = vmatpush1.bf16.msra.mxu1 %v21268_v49  ;;  %v21279_v49 = vld [vmem:[#allocation101_spill] sm:$0xff] }
 0x3cf   :  { %11401 = vmatprep.subr.bf16.mxu1 %v21270_v34  ;;  %v21281_v34 = vld [vmem:[#allocation108_spill] sm:$0xff] }
 0x3d0   :  { %10635 = vmatpush1.bf16.msra.mxu0 %v21271_v30  ;;  %v21282_v30 = vld [vmem:[#allocation112_spill] sm:$0xff] }
 0x3d1   :  { %10637 = vmatprep.subr.bf16.mxu0 %v21273_v0  ;;  %v21284_v0 = vld [vmem:[#allocation70_spill] sm:$0xff] }
 0x3d2   :  { %11403 = vmatpush1.bf16.msra.mxu1 %v21272_v4  ;;  %v21283_v4 = vld [vmem:[#allocation118_spill] sm:$0xff] }
 0x3d3   :  { %11405 = vmatprep.subr.bf16.mxu1 %v21274_v23  ;;  %v21285_v23 = vld [vmem:[#allocation126_spill] sm:$0xff] }
 0x3d4   :  { %10639 = vmatpush1.bf16.msra.mxu0 %v21275_v36  ;;  %v21286_v36 = vld [vmem:[#allocation128_spill] sm:$0xff] }
 0x3d5   :  { %10641 = vmatprep.subr.bf16.mxu0 %v21277_v24  ;;  %v21288_v24 = vld [vmem:[#allocation138_spill] sm:$0xff] }
 0x3d6   :  { %11407 = vmatpush1.bf16.msra.mxu1 %v21276_v29  ;;  %v21287_v29 = vld [vmem:[#allocation133_spill] sm:$0xff] }
 0x3d7   :  { %11409 = vmatprep.subr.bf16.mxu1 %v21278_v58  ;;  %v21289_v58 = vld [vmem:[#allocation142_spill] sm:$0xff] }
 0x3d8   :  { %10643 = vmatpush1.bf16.msra.mxu0 %v21279_v49  ;;  %v21290_v49 = vld [vmem:[#allocation148_spill] sm:$0xff] }
 0x3d9   :  { %10645 = vmatprep.subr.bf16.mxu0 %v21281_v34  ;;  %v21292_v34 = vld [vmem:[#allocation178_spill] sm:$0xff] }
 0x3da   :  { %11411 = vmatpush1.bf16.msra.mxu1 %v21280_v59  ;;  %v21291_v59 = vld [vmem:[#allocation175_spill] sm:$0xff] }
 0x3db   :  { %11413 = vmatprep.subr.bf16.mxu1 %v21282_v30  ;;  %v21293_v30 = vld [vmem:[#allocation29_spill] sm:$0xff] }
 0x3dc   :  { %10647 = vmatpush1.bf16.msra.mxu0 %v21283_v4  ;;  %v21294_v4 = vld [vmem:[#allocation36_spill] sm:$0xff] }
 0x3dd   :  { %10649 = vmatprep.subr.bf16.mxu0 %v21285_v23  ;;  %v21296_v23 = vld [vmem:[#allocation40_spill] sm:$0xff] }
 0x3de   :  { %11415 = vmatpush1.bf16.msra.mxu1 %v21284_v0  ;;  %v21295_v0 = vld [vmem:[#allocation185_spill] sm:$0xff] }
 0x3df   :  { %11417 = vmatprep.subr.bf16.mxu1 %v21286_v36  ;;  %v21297_v36 = vld [vmem:[#allocation41_spill] sm:$0xff] }
 0x3e0   :  { %10651 = vmatpush1.bf16.msra.mxu0 %v21287_v29  ;;  %v21298_v29 = vld [vmem:[#allocation202_spill] sm:$0xff] }
 0x3e1   :  { %10653 = vmatprep.subr.bf16.mxu0 %v21289_v58  ;;  %v21300_v58 = vld [vmem:[#allocation211_spill] sm:$0xff] }
 0x3e2   :  { %11419 = vmatpush1.bf16.msra.mxu1 %v21288_v24  ;;  %v21299_v24 = vld [vmem:[#allocation208_spill] sm:$0xff] }
 0x3e3   :  { %11421 = vmatprep.subr.bf16.mxu1 %v21290_v49  ;;  %v21301_v49 = vld [vmem:[#allocation214_spill] sm:$0xff] }
 0x3e4   :  { %10655 = vmatpush1.bf16.msra.mxu0 %v21291_v59  ;;  %v21302_v59 = vld [vmem:[#allocation217_spill] sm:$0xff] }
 0x3e5   :  { %10657 = vmatprep.subr.bf16.mxu0 %v21293_v30  ;;  %v21304_v30 = vld [vmem:[#allocation60_spill] sm:$0xff] }
 0x3e6   :  { %11423 = vmatpush1.bf16.msra.mxu1 %v21292_v34  ;;  %v21303_v34 = vld [vmem:[#allocation49_spill] sm:$0xff] }
 0x3e7   :  { %11425 = vmatprep.subr.bf16.mxu1 %v21294_v4  ;;  %v21305_v4 = vld [vmem:[#allocation46_spill] sm:$0xff] }
 0x3e8   :  { %10659 = vmatpush1.bf16.msra.mxu0 %v21295_v0  ;;  %v21306_v0 = vld [vmem:[#allocation23_spill] sm:$0xff] }
 0x3e9   :  { %10661 = vmatprep.subr.bf16.mxu0 %v21297_v36  ;;  %v21308_v36 = vld [vmem:[#allocation98_spill] sm:$0xff] }
 0x3ea   :  { %11427 = vmatpush1.bf16.msra.mxu1 %v21296_v23  ;;  %v21307_v23 = vld [vmem:[#allocation31_spill] sm:$0xff] }
 0x3eb   :  { %11429 = vmatprep.subr.bf16.mxu1 %v21298_v29  ;;  %v21309_v29 = vld [vmem:[#allocation106_spill] sm:$0xff] }
 0x3ec   :  { %10663 = vmatpush1.bf16.msra.mxu0 %v21299_v24  ;;  %v21310_v24 = vld [vmem:[#allocation114_spill] sm:$0xff] }
 0x3ed   :  { %10665 = vmatprep.subr.bf16.mxu0 %v21301_v49  ;;  %v21312_v49 = vld [vmem:[#allocation72_spill] sm:$0xff] }
 0x3ee   :  { %11431 = vmatpush1.bf16.msra.mxu1 %v21300_v58  ;;  %v21311_v58 = vld [vmem:[#allocation129_spill] sm:$0xff] }
 0x3ef   :  { %11433 = vmatprep.subr.bf16.mxu1 %v21302_v59  ;;  %v21313_v59 = vld [vmem:[#allocation174_spill] sm:$0xff] }
 0x3f0   :  { %10667 = vmatpush1.bf16.msra.mxu0 %v21303_v34 }
 0x3f1   :  { %10669 = vmatprep.subr.bf16.mxu0 %v21305_v4  ;;  %v21315_v4 = vand.u32 4294901760, %v21118_v18 }
 0x3f2   :  { %11435 = vmatpush1.bf16.msra.mxu1 %v21304_v30  ;;  %v21314_v30 = vand.u32 4294901760, %v21117_v63  ;;  %v21323_v63 = vand.u32 4294901760, %v21123_v11  ;;  %v21331_v11 = vand.u32 4294901760, %v21131_v42  ;;  %v21342_v42 = vld [vmem:[#allocation79_spill] sm:$0xff] }
 0x3f3   :  { %11437 = vmatprep.subr.bf16.mxu1 %v21306_v0  ;;  %v21316_v0 = vld [vmem:[#allocation32_spill] sm:$0xff] }
 0x3f4   :  { %10671 = vmatpush1.bf16.msra.mxu0 %v21307_v23  ;;  %v10680_v34 = vpack.c.bf16 %v21315_v4, %v21314_v30  ;;  %v21317_v23 = vand.u32 4294901760, %v21119_v43  ;;  %v21324_v4 = vand.u32 4294901760, %v21124_v62  ;;  %v21325_v43 = vand.u32 4294901760, %v21125_v54  ;;  %v21334_v30 = vld [vmem:[#allocation74_spill] sm:$0xff] }
 0x3f5   :  { %10673 = vmatprep.subr.bf16.mxu0 %v21309_v29  ;;  %v21332_v54 = vand.u32 4294901760, %v21132_v12  ;;  %v21344_v12 = vld [vmem:[#allocation157_spill] sm:$0xff] }
 0x3f6   :  { %11439 = vmatpush1.bf16.msra.mxu1 %v21308_v36  ;;  %v21318_v36 = vand.u32 4294901760, %v21120_v5  ;;  %v11450_v18 = vpack.c.bf16 %v21324_v4, %v21323_v63  ;;  %v21326_v5 = vand.u32 4294901760, %v21126_v9  ;;  %v21333_v9 = vand.u32 4294901760, %v21133_v13 }
 0x3f7   :  { %11441 = vmatprep.subr.bf16.mxu1 %v21310_v24  ;;  %v21345_v13 = vand.u32 4294901760, %v21344_v12 }
 0x3f8   :  { %10675 = vmatpush1.bf16.msra.mxu0 %v21311_v58  ;;  %v11448_v29 = vpack.c.bf16 %v21318_v36, %v21317_v23  ;;  %v21320_v58 = vand.u32 4294901760, %v21121_v44  ;;  %v10684_v23 = vpack.c.bf16 %v21326_v5, %v21325_v43  ;;  %v21327_v36 = vand.u32 4294901760, %v21127_v61  ;;  %v21340_v43 = vld [vmem:[#allocation156_spill] sm:$0xff] }
 0x3f9   :  { %10677 = vmatprep.subr.bf16.mxu0 %v21313_v59  ;;  %v21322_v59 = vld [vmem:[#allocation192_spill] sm:$0xff]  ;;  %v21328_v44 = vand.u32 4294901760, %v21128_v50  ;;  %v11454_v61 = vpack.c.bf16 %v21333_v9, %v21332_v54  ;;  %v21335_v50 = vand.u32 4294901760, %v21334_v30  ;;  %v21352_v9 = vld [vmem:[#allocation191_spill] sm:$0xff] }
 0x3fa   :  { %11443 = vmatpush1.bf16.msra.mxu1 %v21312_v49  ;;  %v21321_v49 = vand.u32 4294901760, %v21122_v47  ;;  %v21353_v30 = vand.u32 4294901760, %v21352_v9  ;;  %v21371_v9 = vld [vmem:[#allocation228_spill] sm:$0xff] }
 0x3fb   :  { %11445 = vmatprep.subr.bf16.mxu1 %v21316_v0  ;;  %v11452_v47 = vpack.c.bf16 %v21328_v44, %v21327_v36 }
 0x3fc   :  { %10679 = vmatpush1.bf16.msra.mxu0 %v21319_v15  ;;  %v10682_v24 = vpack.c.bf16 %v21321_v49, %v21320_v58  ;;  %v21329_v58 = vld [vmem:[#allocation190_spill] sm:$0xff] }
 0x3fd   :  { %10681 = vmatprep.subr.bf16.mxu0 %v10680_v34  ;;  %v21330_v34 = vand.u32 4294901760, %v21130_v51  ;;  %v21341_v51 = vand.u32 4294901760, %v21340_v43 }
 0x3fe   :  { %11447 = vmatpush1.bf16.msra.mxu1 %v21322_v59 }
 0x3ff   :  { %11449 = vmatprep.subr.bf16.mxu1 %v11448_v29  ;;  %4565 = vmatmul.mubr.f32.vlgmr.msra.gmra.mrb[4].mxu0 %v21329_v58  ;;  %v10686_v62 = vpack.c.bf16 %v21331_v11, %v21330_v34  ;;  %v21336_v29 = vld [vmem:[#allocation150_spill] sm:$0xff] }
 0x400   :  { %10683 = vmatpush1.bf16.msra.mxu0 %v10682_v24  ;;  %v21337_v49 = vand.u32 4294901760, %v21336_v29  ;;  %v21338_v24 = vld [vmem:[#allocation154_spill] sm:$0xff]  ;;  %4573 = vmatprep.mubr.f32.mxu0 %v21342_v42 }
 0x401   :  { %7257 = vmatmul.mubr.f32.vlgmr.msra.gmra.mrb[4].mxu1 %v21329_v58  ;;  %10685 = vmatprep.subr.bf16.mxu0 %v10684_v23  ;;  %v21339_v4 = vand.u32 4294901760, %v21338_v24  ;;  %v21346_v23 = vld [vmem:[#allocation160_spill] sm:$0xff]  ;;  %v21350_v34 = vld [vmem:[#allocation162_spill] sm:$0xff] }
 0x402   :  { %11451 = vmatpush1.bf16.msra.mxu1 %v11450_v18  ;;  %v10688_v63 = vpack.c.bf16 %v21337_v49, %v21335_v50  ;;  %7265 = vmatprep.mubr.f32.mxu1 %v21342_v42  ;;  %v21343_v18 = vld [vmem:[#allocation235_spill] sm:$0xff]  ;;  %v21347_v36 = vand.u32 4294901760, %v21346_v23  ;;  %v21351_v11 = vand.u32 4294901760, %v21350_v34  ;;  %v21354_v50 = vld [vmem:[#allocation44_spill] sm:$0xff]  ;;  %v21360_v42 = vld [vmem:[#allocation122_spill] sm:$0xff] }
 0x403   :  { %11453 = vmatprep.subr.bf16.mxu1 %v11452_v47  ;;  %v11456_v5 = vpack.c.bf16 %v21341_v51, %v21339_v4  ;;  %4577 = vmatmul.mubr.f32.gmra.mrb[6].mxu0 %v21343_v18  ;;  %v21348_v47 = vld [vmem:[#allocation73_spill] sm:$0xff]  ;;  %v21355_v29 = vand.u32 4294901760, %v21354_v50  ;;  %v21365_v23 = vld [vmem:[#allocation199_spill] sm:$0xff] }
 0x404   :  { %10687 = vmatpush1.bf16.msra.mxu0 %v10686_v62  ;;  %v10690_v44 = vpack.c.bf16 %v21347_v36, %v21345_v13  ;;  %v21349_v58 = vand.u32 4294901760, %v21348_v47  ;;  %v21356_v62 = vld [vmem:[#allocation194_spill] sm:$0xff]  ;;  %v21358_v4 = vld [vmem:[#allocation193_spill] sm:$0xff]  ;;  %4840 = vmatprep.mubr.f32.mxu0 %v21360_v42  ;;  %v21366_v36 = vand.u32 4294901760, %v21365_v23 }
 0x405   :  { %7269 = vmatmul.mubr.f32.gmra.mrb[6].mxu1 %v21343_v18  ;;  %10689 = vmatprep.subr.bf16.mxu0 %v10688_v63  ;;  %v10692_v49 = vpack.c.bf16 %v21355_v29, %v21353_v30  ;;  %v21357_v24 = vand.u32 4294901760, %v21356_v62  ;;  %v21359_v43 = vand.u32 4294901760, %v21358_v4  ;;  %v21363_v18 = vld [vmem:[#allocation50_spill] sm:$0xff]  ;;  %v21369_v34 = vld [vmem:[#allocation221_spill] sm:$0xff]  ;;  %v21372_v30 = vand.u32 4294901760, %v21371_v9  ;;  %v21373_v29 = vld [vmem:[#allocation80_spill] sm:$0xff] }
 0x406   :  { %11455 = vmatpush1.bf16.msra.mxu1 %v11454_v61  ;;  %v11458_v54 = vpack.c.bf16 %v21351_v11, %v21349_v58  ;;  %7532 = vmatprep.mubr.f32.mxu1 %v21360_v42  ;;  %v21361_v61 = vld [vmem:[#allocation196_spill] sm:$0xff]  ;;  %v21364_v12 = vand.u32 4294901760, %v21363_v18  ;;  %v21370_v11 = vand.u32 4294901760, %v21369_v34  ;;  %v21375_v62 = vld [vmem:[#allocation131_spill] sm:$0xff]  ;;  %v21381_v18 = vld [vmem:[#allocation146_spill] sm:$0xff] }
 0x407   :  { %11457 = vmatprep.subr.bf16.mxu1 %v11456_v5  ;;  %v11460_v51 = vpack.c.bf16 %v21359_v43, %v21357_v24  ;;  %v21362_v63 = vand.u32 4294901760, %v21361_v61  ;;  %v21367_v5 = vld [vmem:[#allocation198_spill] sm:$0xff]  ;;  %v21376_v24 = vand.u32 4294901760, %v21375_v62  ;;  %v21377_v43 = vld [vmem:[#allocation137_spill] sm:$0xff] }
 0x408   :  { %10691 = vmatpush1.bf16.msra.mxu0 %v10690_v44  ;;  %v21368_v47 = vand.u32 4294901760, %v21367_v5  ;;  %v10696_v50 = vpack.c.bf16 %v21372_v30, %v21370_v11  ;;  %v21374_v44 = vand.u32 4294901760, %v21373_v29  ;;  %v21383_v23 = vld [vmem:[#allocation149_spill] sm:$0xff]  ;;  %v21389_v30 = vld [vmem:[#allocation24_spill] sm:$0xff] }
 0x409   :  { %v10694_v13 = vpack.c.bf16 %v21364_v12, %v21362_v63  ;;  %10693 = vmatprep.subr.bf16.mxu0 %v10692_v49  ;;  %v21379_v49 = vld [vmem:[#allocation140_spill] sm:$0xff]  ;;  %v21382_v12 = vand.u32 4294901760, %v21381_v18  ;;  %v21387_v34 = vld [vmem:[#allocation89_spill] sm:$0xff]  ;;  %v21399_v18 = vld [vmem:[#allocation230_spill] sm:$0xff] }
 0x40a   :  { %11459 = vmatpush1.bf16.msra.mxu1 %v11458_v54  ;;  %v11462_v58 = vpack.c.bf16 %v21368_v47, %v21366_v36  ;;  %v11464_v4 = vpack.c.bf16 %v21376_v24, %v21374_v44  ;;  %v21378_v54 = vand.u32 4294901760, %v21377_v43  ;;  %v21380_v61 = vand.u32 4294901760, %v21379_v49  ;;  %v21385_v47 = vld [vmem:[#allocation152_spill] sm:$0xff]  ;;  %v21391_v29 = vld [vmem:[#allocation25_spill] sm:$0xff]  ;;  %v21397_v49 = vld [vmem:[#allocation34_spill] sm:$0xff] }
 0x40b   :  { %11461 = vmatprep.subr.bf16.mxu1 %v11460_v51  ;;  %v21384_v36 = vand.u32 4294901760, %v21383_v23  ;;  %v21386_v51 = vand.u32 4294901760, %v21385_v47  ;;  %v21388_v11 = vand.u32 4294901760, %v21387_v34  ;;  %v21392_v44 = vand.u32 4294901760, %v21391_v29  ;;  %v21393_v24 = vld [vmem:[#allocation28_spill] sm:$0xff] }
 0x40c   :  { %10695 = vmatpush1.bf16.msra.mxu0 %v10694_v13  ;;  %v10698_v63 = vpack.c.bf16 %v21380_v61, %v21378_v54  ;;  %v21390_v13 = vand.u32 4294901760, %v21389_v30  ;;  %v21398_v61 = vand.u32 4294901760, %v21397_v49  ;;  %v21403_v47 = vld [vmem:[#allocation96_spill] sm:$0xff]  ;;  %v21407_v30 = vld [vmem:[#allocation99_spill] sm:$0xff] }
 0x40d   :  { %10697 = vmatprep.subr.bf16.mxu0 %v10696_v50  ;;  %v11466_v5 = vpack.c.bf16 %v21384_v36, %v21382_v12  ;;  %v10700_v9 = vpack.c.bf16 %v21388_v11, %v21386_v51  ;;  %v21395_v50 = vld [vmem:[#allocation33_spill] sm:$0xff]  ;;  %v21400_v12 = vand.u32 4294901760, %v21399_v18  ;;  %v21401_v36 = vld [vmem:[#allocation94_spill] sm:$0xff]  ;;  %v21404_v51 = vand.u32 4294901760, %v21403_v47  ;;  %v21415_v49 = vld [vmem:[#allocation107_spill] sm:$0xff] }
 0x40e   :  { %11463 = vmatpush1.bf16.msra.mxu1 %v11462_v58  ;;  %v11468_v62 = vpack.c.bf16 %v21392_v44, %v21390_v13  ;;  %v21394_v58 = vand.u32 4294901760, %v21393_v24  ;;  %v21396_v43 = vand.u32 4294901760, %v21395_v50  ;;  %v21405_v11 = vld [vmem:[#allocation81_spill] sm:$0xff]  ;;  %v21408_v13 = vand.u32 4294901760, %v21407_v30  ;;  %v21409_v44 = vld [vmem:[#allocation102_spill] sm:$0xff]  ;;  %v21413_v50 = vld [vmem:[#allocation104_spill] sm:$0xff] }
 0x40f   :  { %11465 = vmatprep.subr.bf16.mxu1 %v11464_v4  ;;  %v11470_v23 = vpack.c.bf16 %v21400_v12, %v21398_v61  ;;  %v21402_v4 = vand.u32 4294901760, %v21401_v36  ;;  %v21416_v61 = vand.u32 4294901760, %v21415_v49  ;;  %v21417_v12 = vld [vmem:[#allocation110_spill] sm:$0xff]  ;;  %v21419_v36 = vld [vmem:[#allocation92_spill] sm:$0xff]  ;;  %v21433_v49 = vld [vmem:[#allocation127_spill] sm:$0xff] }
 0x410   :  { %10699 = vmatpush1.bf16.msra.mxu0 %v10698_v63  ;;  %v10702_v54 = vpack.c.bf16 %v21396_v43, %v21394_v58  ;;  %v21406_v63 = vand.u32 4294901760, %v21405_v11  ;;  %v21414_v43 = vand.u32 4294901760, %v21413_v50 }
 0x411   :  { %10701 = vmatprep.subr.bf16.mxu0 %v10700_v9  ;;  %v10704_v34 = vpack.c.bf16 %v21404_v51, %v21402_v4  ;;  %v21411_v9 = vld [vmem:[#allocation204_spill] sm:$0xff]  ;;  %v21420_v4 = vand.u32 4294901760, %v21419_v36  ;;  %v21422_v51 = vld [vmem:[#allocation115_spill] sm:$0xff] }
 0x412   :  { %11467 = vmatpush1.bf16.msra.mxu1 %v11466_v5  ;;  %v11472_v29 = vpack.c.bf16 %v21408_v13, %v21406_v63  ;;  %v21410_v5 = vand.u32 4294901760, %v21409_v44  ;;  %v21412_v24 = vand.u32 4294901760, %v21411_v9  ;;  %v11474_v18 = vpack.c.bf16 %v21416_v61, %v21414_v43  ;;  %v21427_v44 = vld [vmem:[#allocation121_spill] sm:$0xff]  ;;  %v21429_v9 = vld [vmem:[#allocation123_spill] sm:$0xff]  ;;  %v21431_v43 = vld [vmem:[#allocation124_spill] sm:$0xff] }
 0x413   :  { %11469 = vmatprep.subr.bf16.mxu1 %v11468_v62  ;;  %v21418_v62 = vand.u32 4294901760, %v21417_v12  ;;  %v21423_v11 = vand.u32 4294901760, %v21422_v51  ;;  %v21435_v12 = vld [vmem:[#allocation130_spill] sm:$0xff]  ;;  %v21442_v51 = vld [vmem:[#allocation139_spill] sm:$0xff] }
 0x414   :  { %10703 = vmatpush1.bf16.msra.mxu0 %v10702_v54  ;;  %v10706_v58 = vpack.c.bf16 %v21412_v24, %v21410_v5  ;;  %v21421_v54 = vand.u32 4294901760, %v21179_v3  ;;  %v21428_v5 = vand.u32 4294901760, %v21427_v44  ;;  %v21430_v24 = vand.u32 4294901760, %v21429_v9  ;;  %v21446_v44 = vld [vmem:[#allocation144_spill] sm:$0xff] }
 0x415   :  { %10705 = vmatprep.subr.bf16.mxu0 %v10704_v34  ;;  %v10708_v47 = vpack.c.bf16 %v21420_v4, %v21418_v62  ;;  %v21425_v34 = vld [vmem:[#allocation119_spill] sm:$0xff]  ;;  %v21434_v3 = vand.u32 4294901760, %v21433_v49  ;;  %v21437_v62 = vld [vmem:[#allocation132_spill] sm:$0xff] }
 0x416   :  { %11471 = vmatpush1.bf16.msra.mxu1 %v11470_v23  ;;  %v11476_v63 = vpack.c.bf16 %v21423_v11, %v21421_v54  ;;  %v21424_v23 = vand.u32 4294901760, %v21181_v20  ;;  %v21426_v30 = vand.u32 4294901760, %v21425_v34  ;;  %v11478_v50 = vpack.c.bf16 %v21430_v24, %v21428_v5  ;;  %v21440_v4 = vld [vmem:[#allocation136_spill] sm:$0xff]  ;;  %v21448_v5 = vld [vmem:[#allocation145_spill] sm:$0xff] }
 0x417   :  { %11473 = vmatprep.subr.bf16.mxu1 %v11472_v29  ;;  %v21432_v29 = vand.u32 4294901760, %v21431_v43  ;;  %v21438_v20 = vand.u32 4294901760, %v21437_v62  ;;  %v21443_v11 = vand.u32 4294901760, %v21442_v51  ;;  %v21449_v9 = vand.u32 4294901760, %v21448_v5  ;;  %v21450_v43 = vld [vmem:[#allocation151_spill] sm:$0xff]  ;;  %v21458_v62 = vld [vmem:[#allocation180_spill] sm:$0xff] }
 0x418   :  { %10707 = vmatpush1.bf16.msra.mxu0 %v10706_v58  ;;  %v10710_v13 = vpack.c.bf16 %v21426_v30, %v21424_v23  ;;  %v21436_v58 = vand.u32 4294901760, %v21435_v12  ;;  %v21444_v23 = vld [vmem:[#allocation141_spill] sm:$0xff]  ;;  %v21463_v51 = vld [vmem:[#allocation35_spill] sm:$0xff] }
 0x419   :  { %10709 = vmatprep.subr.bf16.mxu0 %v10708_v47  ;;  %v10712_v61 = vpack.c.bf16 %v21434_v3, %v21432_v29  ;;  %v21441_v47 = vand.u32 4294901760, %v21440_v4  ;;  %v21445_v34 = vand.u32 4294901760, %v21444_v23  ;;  %v21452_v29 = vld [vmem:[#allocation173_spill] sm:$0xff]  ;;  %v21454_v3 = vld [vmem:[#allocation176_spill] sm:$0xff] }
 0x41a   :  { %11475 = vmatpush1.bf16.msra.mxu1 %v11474_v18  ;;  %v11480_v36 = vpack.c.bf16 %v21438_v20, %v21436_v58  ;;  %v21439_v18 = vand.u32 4294901760, %v21189_v6  ;;  %v21453_v6 = vand.u32 4294901760, %v21452_v29  ;;  %v21459_v20 = vand.u32 4294901760, %v21458_v62 }
 0x41b   :  { %11477 = vmatprep.subr.bf16.mxu1 %v11476_v63  ;;  %v11482_v30 = vpack.c.bf16 %v21445_v34, %v21443_v11  ;;  %v21447_v63 = vand.u32 4294901760, %v21446_v44  ;;  %v21464_v11 = vand.u32 4294901760, %v21463_v51  ;;  %v21466_v34 = vand.u32 4294901760, %v21208_v39 }
 0x41c   :  { %10711 = vmatpush1.bf16.msra.mxu0 %v10710_v13  ;;  %v10714_v54 = vpack.c.bf16 %v21441_v47, %v21439_v18  ;;  %v21451_v13 = vand.u32 4294901760, %v21450_v43  ;;  %v21460_v18 = vld [vmem:[#allocation90_spill] sm:$0xff]  ;;  %v21474_v39 = vand.u32 4294901760, %v21221_v40 }
 0x41d   :  { %10713 = vmatprep.subr.bf16.mxu0 %v10712_v61  ;;  %v10716_v24 = vpack.c.bf16 %v21449_v9, %v21447_v63  ;;  %v21456_v61 = vld [vmem:[#allocation27_spill] sm:$0xff]  ;;  %v21461_v4 = vand.u32 4294901760, %v21460_v18 }
 0x41e   :  { %11479 = vmatpush1.bf16.msra.mxu1 %v11478_v50  ;;  %v11484_v49 = vpack.c.bf16 %v21453_v6, %v21451_v13  ;;  %v21455_v50 = vand.u32 4294901760, %v21454_v3  ;;  %v21457_v12 = vand.u32 4294901760, %v21456_v61  ;;  %v21468_v63 = vld [vmem:[#allocation39_spill] sm:$0xff]  ;;  %v21472_v13 = vand.u32 4294901760, %v21218_v55  ;;  %v21475_v6 = vld [vmem:[#allocation206_spill] sm:$0xff]  ;;  %v21477_v3 = vld [vmem:[#allocation209_spill] sm:$0xff] }
 0x41f   :  { %11481 = vmatprep.subr.bf16.mxu1 %v11480_v36  ;;  %v11486_v47 = vpack.c.bf16 %v21461_v4, %v21459_v20  ;;  %v21462_v36 = vand.u32 4294901760, %v21206_v46  ;;  %v21469_v5 = vand.u32 4294901760, %v21468_v63  ;;  %v21471_v46 = vand.u32 4294901760, %v21214_v52  ;;  %v21479_v61 = vld [vmem:[#allocation71_spill] sm:$0xff]  ;;  %v21481_v52 = vld [vmem:[#allocation212_spill] sm:$0xff]  ;;  %v21483_v55 = vld [vmem:[#allocation213_spill] sm:$0xff] }
 0x420   :  { %10715 = vmatpush1.bf16.msra.mxu0 %v10714_v54  ;;  %v10718_v58 = vpack.c.bf16 %v21457_v12, %v21455_v50  ;;  %v21465_v54 = vand.u32 4294901760, %v21209_v25  ;;  %v21473_v25 = vand.u32 4294901760, %v21217_v8  ;;  %v21478_v50 = vand.u32 4294901760, %v21477_v3  ;;  %v21486_v18 = vld [vmem:[#allocation87_spill] sm:$0xff] }
 0x421   :  { %10717 = vmatprep.subr.bf16.mxu0 %v10716_v24  ;;  %v10720_v23 = vpack.c.bf16 %v21464_v11, %v21462_v36  ;;  %v21470_v24 = vand.u32 4294901760, %v21215_v21  ;;  %v21480_v12 = vand.u32 4294901760, %v21479_v61  ;;  %v21484_v62 = vand.u32 4294901760, %v21483_v55  ;;  %v21489_v36 = vld [vmem:[#allocation220_spill] sm:$0xff]  ;;  %v21519_v61 = vld [vmem:[#allocation42_spill] sm:$0xff] }
 0x422   :  { %11483 = vmatpush1.bf16.msra.mxu1 %v11482_v30  ;;  %v11488_v44 = vpack.c.bf16 %v21466_v34, %v21465_v54  ;;  %v21467_v30 = vand.u32 4294901760, %v21212_v35  ;;  %v10724_v29 = vpack.c.bf16 %v21473_v25, %v21472_v13  ;;  %v21476_v35 = vand.u32 4294901760, %v21475_v6 }
 0x423   :  { %11485 = vmatprep.subr.bf16.mxu1 %v11484_v49  ;;  %v11490_v43 = vpack.c.bf16 %v21471_v46, %v21470_v24  ;;  %v10726_v21 = vpack.c.bf16 %v21480_v12, %v21478_v50  ;;  %v21485_v20 = vand.u32 4294901760, %v21054_v57  ;;  %v21487_v40 = vand.u32 4294901760, %v21486_v18  ;;  %v21530_v18 = vld [vmem:[#allocation51_spill] sm:$0xff] }
 0x424   :  { %10719 = vmatpush1.bf16.msra.mxu0 %v10718_v58  ;;  %v10722_v9 = vpack.c.bf16 %v21469_v5, %v21467_v30  ;;  %v11492_v49 = vpack.c.bf16 %v21476_v35, %v21474_v39  ;;  %v21482_v58 = vand.u32 4294901760, %v21481_v52  ;;  %v21490_v51 = vand.u32 4294901760, %v21489_v36  ;;  %v21513_v35 = vld [vmem:[#allocation177_spill] sm:$0xff]  ;;  %v21534_v36 = vld [vmem:[#allocation67_spill] sm:$0xff] }
 0x425   :  { %10721 = vmatprep.subr.bf16.mxu0 %v10720_v23  ;;  %v10728_v4 = vpack.c.bf16 %v21487_v40, %v21485_v20  ;;  %v21491_v23 = vand.u32 4294901760, %v21058_v22  ;;  %v21492_v54 = vand.u32 4294901760, %v21059_v10  ;;  %v21494_v57 = vand.u32 4294901760, %v21229_v27  ;;  %v21529_v20 = vld [vmem:[#allocation232_spill] sm:$0xff]  ;;  %v21531_v40 = vld [vmem:[#allocation58_spill] sm:$0xff] }
 0x426   :  { %11487 = vmatpush1.bf16.msra.mxu1 %v11486_v47  ;;  %v11494_v8 = vpack.c.bf16 %v21484_v62, %v21482_v58  ;;  %v21488_v47 = vand.u32 4294901760, %v21056_v19  ;;  %v21495_v63 = vand.u32 4294901760, %v21233_v56  ;;  %v21496_v19 = vand.u32 4294901760, %v21232_v1  ;;  %v21527_v62 = vld [vmem:[#allocation172_spill] sm:$0xff] }
 0x427   :  { %11489 = vmatprep.subr.bf16.mxu1 %v11488_v44  ;;  %v10730_v34 = vpack.c.bf16 %v21492_v54, %v21491_v23  ;;  %v21493_v44 = vand.u32 4294901760, %v21230_v60  ;;  %v21498_v22 = vand.u32 4294901760, %v21235_v26  ;;  %v21499_v10 = vand.u32 4294901760, %v21238_v2  ;;  %v21537_v23 = vld [vmem:[#allocation153_spill] sm:$0xff]  ;;  %v21538_v54 = vld [vmem:[#allocation159_spill] sm:$0xff] }
 0x428   :  { %10723 = vmatpush1.bf16.msra.mxu0 %v10722_v9  ;;  %v11496_v11 = vpack.c.bf16 %v21490_v51, %v21488_v47  ;;  %v10732_v5 = vpack.c.bf16 %v21496_v19, %v21495_v63  ;;  %v21497_v9 = vand.u32 4294901760, %v21236_v16  ;;  %v21500_v46 = vand.u32 4294901760, %v21102_v31  ;;  %v21533_v47 = vld [vmem:[#allocation68_spill] sm:$0xff]  ;;  %v21535_v51 = vld [vmem:[#allocation82_spill] sm:$0xff] }
 0x429   :  { %10725 = vmatprep.subr.bf16.mxu0 %v10724_v29  ;;  %v11498_v30 = vpack.c.bf16 %v21494_v57, %v21493_v44  ;;  %v21501_v27 = vand.u32 4294901760, %v21105_v41  ;;  %v21502_v56 = vand.u32 4294901760, %v21110_v7  ;;  %v21504_v16 = vand.u32 4294901760, %v21111_v32  ;;  %v21540_v44 = vld [vmem:[#allocation163_spill] sm:$0xff]  ;;  %v7708_v63 = vld [vmem:[#allocation11 + $0x28] sm:$0xff]  ;;  %v7706_v19 = vld [vmem:[#allocation11 + $0x18] sm:$0xff] }
 0x42a   :  { %11491 = vmatpush1.bf16.msra.mxu1 %v11490_v43  ;;  %v11500_v24 = vpack.c.bf16 %v21498_v22, %v21497_v9  ;;  %v10734_v60 = vpack.c.bf16 %v21500_v46, %v21499_v10  ;;  %v21503_v43 = vand.u32 4294901760, %v21070_v28  ;;  %v21505_v26 = vand.u32 4294901760, %v21072_v38  ;;  %v21510_v28 = vld [vmem:[#allocation164_spill] sm:$0xff]  ;;  %v21541_v57 = vld [vmem:[#allocation43_spill] sm:$0xff]  ;;  %v7710_v9 = vld [vmem:[#allocation11 + $0x38] sm:$0xff] }
 0x42b   :  { %11493 = vmatprep.subr.bf16.mxu1 %v11492_v49  ;;  %v11502_v1 = vpack.c.bf16 %v21502_v56, %v21501_v27  ;;  %v21506_v2 = vand.u32 4294901760, %v21114_v17  ;;  %v21507_v31 = vand.u32 4294901760, %v21074_v37  ;;  %v21508_v29 = vand.u32 4294901760, %v21075_v53  ;;  %v21517_v53 = vld [vmem:[#allocation187_spill] sm:$0xff]  ;;  %v21544_v46 = vld [vmem:[#allocation210_spill] sm:$0xff] }
 0x42c   :  { %10727 = vmatpush1.bf16.msra.mxu0 %v10726_v21  ;;  %v10736_v13 = vpack.c.bf16 %v21504_v16, %v21503_v43  ;;  %v21509_v7 = vand.u32 4294901760, %v21115_v48  ;;  %v21511_v39 = vand.u32 4294901760, %v21510_v28  ;;  %v21512_v6 = vand.u32 4294901760, %v21078_v45  ;;  %v21521_v21 = vld [vmem:[#allocation45_spill] sm:$0xff]  ;;  %v7703_v22 = vld [vmem:[#allocation11] sm:$0xff] }
 0x42d   :  { %10729 = vmatprep.subr.bf16.mxu0 %v10728_v4  ;;  %v11504_v25 = vpack.c.bf16 %v21506_v2, %v21505_v26  ;;  %v10738_v41 = vpack.c.bf16 %v21508_v29, %v21507_v31  ;;  %v21514_v38 = vand.u32 4294901760, %v21513_v35  ;;  %v21515_v17 = vand.u32 4294901760, %v21080_v33  ;;  %v21523_v45 = vld [vmem:[#allocation197_spill] sm:$0xff]  ;;  %v21532_v4 = vld [vmem:[#allocation66_spill] sm:$0xff]  ;;  %v21543_v10 = vld [vmem:[#allocation47_spill] sm:$0xff] }
 0x42e   :  { %11495 = vmatpush1.bf16.msra.mxu1 %v11494_v8  ;;  %v11506_v32 = vpack.c.bf16 %v21511_v39, %v21509_v7  ;;  %v21516_v37 = vand.u32 4294901760, %v21081_v14  ;;  %v21518_v50 = vand.u32 4294901760, %v21517_v53  ;;  %v21520_v12 = vand.u32 4294901760, %v21519_v61  ;;  %v21525_v33 = vld [vmem:[#allocation225_spill] sm:$0xff]  ;;  %v21526_v14 = vld [vmem:[#allocation48_spill] sm:$0xff]  ;;  %v21528_v8 = vld [vmem:[#allocation227_spill] sm:$0xff] }
 0x42f   :  { %11497 = vmatprep.subr.bf16.mxu1 %v11496_v11  ;;  %v10740_v49 = vpack.c.bf16 %v21514_v38, %v21512_v6  ;;  %v21522_v52 = vand.u32 4294901760, %v21521_v21  ;;  %v21524_v58 = vand.u32 4294901760, %v21523_v45  ;;  %v21536_v11 = vld [vmem:[#allocation147_spill] sm:$0xff]  ;;  %v7793_v27 = vand.u32 4294901760, %v7708_v63  ;;  %v7709_v26 = vld [vmem:[#allocation11 + $0x30] sm:$0xff]  ;;  %v7712_v2 = vld [vmem:[#allocation11 + $0x48] sm:$0xff] }
 0x430   :  { %10731 = vmatpush1.bf16.msra.mxu0 %v10730_v34  ;;  %v11508_v3 = vpack.c.bf16 %v21516_v37, %v21515_v17  ;;  %v10742_v48 = vpack.c.bf16 %v21520_v12, %v21518_v50  ;;  %v21539_v34 = vld [vmem:[#allocation161_spill] sm:$0xff]  ;;  %v8693_v56 = vand.u32 4294901760, %v7706_v19  ;;  %v8697_v43 = vand.u32 4294901760, %v7710_v9  ;;  %v21546_v31 = vld [vmem:[#allocation135_spill] sm:$0xff]  ;;  %v7714_v35 = vld [vmem:[#allocation11 + $0x58] sm:$0xff] }
 0x431   :  { %10733 = vmatprep.subr.bf16.mxu0 %v10732_v5  ;;  %v11510_v55 = vpack.c.bf16 %v21524_v58, %v21522_v52  ;;  %v21542_v5 = vld [vmem:[#allocation195_spill] sm:$0xff]  ;;  %v7791_v16 = vand.u32 4294901760, %v7703_v22  ;;  %v8699_v39 = vand.u32 4294901760, %v7709_v26  ;;  %v7718_v38 = vld [vmem:[#allocation11 + $0x78] sm:$0xff]  ;;  %v17230_v50 = vsub.f32 %v7708_v63, %v7793_v27  ;;  %v7713_v52 = vld [vmem:[#allocation11 + $0x50] sm:$0xff] }
 0x432   :  { %11499 = vmatpush1.bf16.msra.mxu1 %v11498_v30  ;;  %v7704_v30 = vld [vmem:[#allocation11 + $0x8] sm:$0xff]  ;;  %v21547_v29 = vld [vmem:[#allocation143_spill] sm:$0xff]  ;;  %v17223_v17 = vpack.c.bf16 %v8697_v43, %v8693_v56  ;;  %v17232_v61 = vsub.f32 %v7706_v19, %v8693_v56  ;;  %v17234_v12 = vsub.f32 %v7710_v9, %v8697_v43  ;;  %v21558_v45 = vld [vmem:[#allocation226_spill] sm:$0xff] }
 0x433   :  { %11501 = vmatprep.subr.bf16.mxu1 %v11500_v24  ;;  %v7707_v24 = vld [vmem:[#allocation11 + $0x20] sm:$0xff]  ;;  %21555 = vst [vmem:[#allocation109_spill] sm:$0xff] %v17230_v50  ;;  %v21559_v58 = vld [vmem:[#allocation93_spill] sm:$0xff]  ;;  %v7726_v19 = vld [vmem:[#allocation11 + $0xb8] sm:$0xff] }
 0x434   :  { %10735 = vmatpush1.bf16.msra.mxu0 %v10734_v60  ;;  %v7789_v60 = vand.u32 4294901760, %v7704_v30  ;;  %v21549_v7 = vld [vmem:[#allocation91_spill] sm:$0xff]  ;;  %21551 = vst [vmem:[#allocation218_spill] sm:$0xff] %v17223_v17  ;;  %21556 = vst [vmem:[#allocation117_spill] sm:$0xff] %v17232_v61 }
 0x435   :  { %10737 = vmatprep.subr.bf16.mxu0 %v10736_v13  ;;  %v7795_v13 = vand.u32 4294901760, %v7707_v24  ;;  %21557 = vst [vmem:[#allocation155_spill] sm:$0xff] %v17234_v12  ;;  %v7715_v21 = vld [vmem:[#allocation11 + $0x60] sm:$0xff] }
 0x436   :  { %11503 = vmatpush1.bf16.msra.mxu1 %v11502_v1  ;;  %v7705_v1 = vld [vmem:[#allocation11 + $0x10] sm:$0xff]  ;;  %v17228_v53 = vsub.f32 %v7704_v30, %v7789_v60  ;;  %v7803_v63 = vand.u32 4294901760, %v7715_v21  ;;  %v7723_v9 = vld [vmem:[#allocation11 + $0xa0] sm:$0xff] }
 0x437   :  { %11505 = vmatprep.subr.bf16.mxu1 %v11504_v25  ;;  %v7716_v25 = vld [vmem:[#allocation11 + $0x68] sm:$0xff]  ;;  %v8695_v28 = vand.u32 4294901760, %v7705_v1  ;;  %v17225_v37 = vpack.c.bf16 %v7795_v13, %v7791_v16 }
 0x438   :  { %10739 = vmatpush1.bf16.msra.mxu0 %v10738_v41  ;;  %v21548_v41 = vld [vmem:[#allocation84_spill] sm:$0xff]  ;;  %v7801_v6 = vand.u32 4294901760, %v7716_v25  ;;  %21554 = vst [vmem:[#allocation205_spill] sm:$0xff] %v17228_v53 }
 0x439   :  { %10741 = vmatprep.subr.bf16.mxu0 %v10740_v49  ;;  %v17221_v49 = vpack.c.bf16 %v7793_v27, %v7789_v60  ;;  %21552 = vst [vmem:[#allocation53_spill] sm:$0xff] %v17225_v37  ;;  %v21570_v60 = vld [vmem:[#allocation105_spill] sm:$0xff]  ;;  %v21571_v27 = vld [vmem:[#allocation108_spill] sm:$0xff] }
 0x43a   :  { %11507 = vmatpush1.bf16.msra.mxu1 %v11506_v32  ;;  %v7797_v32 = vand.u32 4294901760, %v7712_v2 }
 0x43b   :  { %11509 = vmatprep.subr.bf16.mxu1 %v11508_v3  ;;  %21550 = vst [vmem:[#allocation215_spill] sm:$0xff] %v17221_v49  ;;  %v21553_v3 = vld [vmem:[#allocation30_spill] sm:$0xff] }
 0x43c   :  { %10743 = vmatpush1.bf16.msra.mxu0 %v10742_v48  ;;  %v7711_v48 = vld [vmem:[#allocation11 + $0x40] sm:$0xff] }
 0x43d   :  { %10745 = vmatprep.subr.bf16.mxu0 %v21525_v33  ;;  %v17240_v33 = vsub.f32 %v7707_v24, %v7795_v13  ;;  %v7799_v30 = vand.u32 4294901760, %v7711_v48  ;;  %v8703_v24 = vand.u32 4294901760, %v7713_v52 }
 0x43e   :  { %11511 = vmatpush1.bf16.msra.mxu1 %v11510_v55  ;;  %v17238_v55 = vsub.f32 %v7703_v22, %v7791_v16  ;;  %v21569_v22 = vld [vmem:[#allocation101_spill] sm:$0xff]  ;;  %v21575_v16 = vld [vmem:[#allocation112_spill] sm:$0xff] }
 0x43f   :  { %11513 = vmatprep.subr.bf16.mxu1 %v21526_v14  ;;  %4842 = vmatmul.mubr.f32.vlgmr.msra.gmra.mrb[4].mxu0 %v21527_v62  ;;  %21561 = vst [vmem:[#allocation167_spill] sm:$0xff] %v17240_v33  ;;  %v8701_v14 = vand.u32 4294901760, %v7714_v35 }
 0x440   :  { %10747 = vmatpush1.bf16.msra.mxu0 %v21528_v8  ;;  %4848 = vmatprep.mubr.f32.mxu0 %v21532_v4  ;;  %21560 = vst [vmem:[#allocation158_spill] sm:$0xff] %v17238_v55  ;;  %v8705_v8 = vand.u32 4294901760, %v7718_v38 }
 0x441   :  { %7534 = vmatmul.mubr.f32.vlgmr.msra.gmra.mrb[4].mxu1 %v21527_v62  ;;  %10749 = vmatprep.subr.bf16.mxu0 %v21530_v18  ;;  %v7720_v18 = vld [vmem:[#allocation11 + $0x88] sm:$0xff] }
 0x442   :  { %11515 = vmatpush1.bf16.msra.mxu1 %v21529_v20  ;;  %7540 = vmatprep.mubr.f32.mxu1 %v21532_v4  ;;  %v7717_v20 = vld [vmem:[#allocation11 + $0x70] sm:$0xff]  ;;  %v17258_v56 = vpack.c.bf16 %v8705_v8, %v8701_v14  ;;  %v17262_v43 = vsub.f32 %v7718_v38, %v8705_v8  ;;  %v7734_v8 = vld [vmem:[#allocation11 + $0xf8] sm:$0xff] }
 0x443   :  { %11517 = vmatprep.subr.bf16.mxu1 %v21531_v40  ;;  %4850 = vmatmul.mubr.f32.gmra.mrb[6].mxu0 %v21533_v47  ;;  %v7724_v40 = vld [vmem:[#allocation11 + $0xa8] sm:$0xff] }
 0x444   :  { %10751 = vmatpush1.bf16.msra.mxu0 %v21534_v36  ;;  %4985 = vmatprep.mubr.f32.mxu0 %v21360_v42  ;;  %v21562_v36 = vld [vmem:[#allocation97_spill] sm:$0xff]  ;;  %21572 = vst [vmem:[#allocation216_spill] sm:$0xff] %v17258_v56  ;;  %21574 = vst [vmem:[#allocation100_spill] sm:$0xff] %v17262_v43 }
 0x445   :  { %7542 = vmatmul.mubr.f32.gmra.mrb[6].mxu1 %v21533_v47  ;;  %10753 = vmatprep.subr.bf16.mxu0 %v21536_v11  ;;  %v17245_v11 = vsub.f32 %v7705_v1, %v8695_v28  ;;  %v17260_v1 = vsub.f32 %v7714_v35, %v8701_v14  ;;  %v7730_v14 = vld [vmem:[#allocation11 + $0xd8] sm:$0xff] }
 0x446   :  { %11519 = vmatpush1.bf16.msra.mxu1 %v21535_v51  ;;  %7677 = vmatprep.mubr.f32.mxu1 %v21360_v42  ;;  %v21545_v42 = vld [vmem:[#allocation125_spill] sm:$0xff]  ;;  %v17243_v51 = vpack.c.bf16 %v8699_v39, %v8695_v28  ;;  %v17269_v28 = vsub.f32 %v7715_v21, %v7803_v63  ;;  %v21586_v21 = vld [vmem:[#allocation126_spill] sm:$0xff] }
 0x447   :  { %11521 = vmatprep.subr.bf16.mxu1 %v21537_v23  ;;  %21564 = vst [vmem:[#allocation37_spill] sm:$0xff] %v17245_v11  ;;  %v17247_v23 = vsub.f32 %v7709_v26, %v8699_v39  ;;  %21573 = vst [vmem:[#allocation219_spill] sm:$0xff] %v17260_v1  ;;  %v8713_v26 = vand.u32 4294901760, %v7726_v19  ;;  %v17271_v39 = vsub.f32 %v7713_v52, %v8703_v24 }
 0x448   :  { %10755 = vmatpush1.bf16.msra.mxu0 %v21538_v54  ;;  %21563 = vst [vmem:[#allocation55_spill] sm:$0xff] %v17243_v51  ;;  %v17249_v54 = vpack.c.bf16 %v7801_v6, %v7797_v32  ;;  %21578 = vst [vmem:[#allocation103_spill] sm:$0xff] %v17269_v28 }
 0x449   :  { %10757 = vmatprep.subr.bf16.mxu0 %v21540_v44  ;;  %21565 = vst [vmem:[#allocation54_spill] sm:$0xff] %v17247_v23  ;;  %v17251_v44 = vsub.f32 %v7712_v2, %v7797_v32  ;;  %21579 = vst [vmem:[#allocation111_spill] sm:$0xff] %v17271_v39  ;;  %v7728_v32 = vld [vmem:[#allocation11 + $0xc8] sm:$0xff] }
 0x44a   :  { %11523 = vmatpush1.bf16.msra.mxu1 %v21539_v34  ;;  %21566 = vst [vmem:[#allocation200_spill] sm:$0xff] %v17249_v54  ;;  %v7722_v34 = vld [vmem:[#allocation11 + $0x98] sm:$0xff] }
 0x44b   :  { %11525 = vmatprep.subr.bf16.mxu1 %v21541_v57  ;;  %21567 = vst [vmem:[#allocation59_spill] sm:$0xff] %v17251_v44  ;;  %v17253_v57 = vsub.f32 %v7716_v25, %v7801_v6  ;;  %v8709_v13 = vand.u32 4294901760, %v7722_v34  ;;  %v7811_v25 = vand.u32 4294901760, %v7723_v9  ;;  %v21580_v6 = vld [vmem:[#allocation118_spill] sm:$0xff] }
 0x44c   :  { %10759 = vmatpush1.bf16.msra.mxu0 %v21542_v5  ;;  %v7719_v5 = vld [vmem:[#allocation11 + $0x80] sm:$0xff] }
 0x44d   :  { %10761 = vmatprep.subr.bf16.mxu0 %v21544_v46  ;;  %21568 = vst [vmem:[#allocation95_spill] sm:$0xff] %v17253_v57  ;;  %v7805_v46 = vand.u32 4294901760, %v7720_v18  ;;  %v7807_v2 = vand.u32 4294901760, %v7719_v5 }
 0x44e   :  { %11527 = vmatpush1.bf16.msra.mxu1 %v21543_v10  ;;  %v8707_v10 = vand.u32 4294901760, %v7717_v20 }
 0x44f   :  { %11529 = vmatprep.subr.bf16.mxu1 %v21545_v42  ;;  %v7809_v42 = vand.u32 4294901760, %v7724_v40 }
 0x450   :  { %10763 = vmatpush1.bf16.msra.mxu0 %v21546_v31  ;;  %v7721_v31 = vld [vmem:[#allocation11 + $0x90] sm:$0xff]  ;;  %v17274_v35 = vpack.c.bf16 %v8707_v10, %v8703_v24  ;;  %v17276_v38 = vsub.f32 %v7717_v20, %v8707_v10  ;;  %v7731_v20 = vld [vmem:[#allocation11 + $0xe0] sm:$0xff]  ;;  %v21589_v24 = vld [vmem:[#allocation128_spill] sm:$0xff]  ;;  %v17289_v10 = vpack.c.bf16 %v8713_v26, %v8709_v13 }
 0x451   :  { %10765 = vmatprep.subr.bf16.mxu0 %v21548_v41  ;;  %v17265_v41 = vpack.c.bf16 %v7803_v63, %v7799_v30  ;;  %v17284_v52 = vsub.f32 %v7724_v40, %v7809_v42  ;;  %v7813_v40 = vand.u32 4294901760, %v7728_v32 }
 0x452   :  { %11531 = vmatpush1.bf16.msra.mxu1 %v21547_v29  ;;  %v7725_v29 = vld [vmem:[#allocation11 + $0xb0] sm:$0xff]  ;;  %21581 = vst [vmem:[#allocation120_spill] sm:$0xff] %v17274_v35  ;;  %21582 = vst [vmem:[#allocation75_spill] sm:$0xff] %v17276_v38  ;;  %v7748_v35 = vld [vmem:[#allocation11 + $0x168] sm:$0xff] }
 0x453   :  { %11533 = vmatprep.subr.bf16.mxu1 %v21549_v7  ;;  %21576 = vst [vmem:[#allocation236_spill] sm:$0xff] %v17265_v41  ;;  %v17267_v7 = vsub.f32 %v7711_v48, %v7799_v30  ;;  %v21585_v48 = vld [vmem:[#allocation70_spill] sm:$0xff]  ;;  %21587 = vst [vmem:[#allocation166_spill] sm:$0xff] %v17284_v52  ;;  %v8711_v30 = vand.u32 4294901760, %v7721_v31  ;;  %v8715_v63 = vand.u32 4294901760, %v7725_v29  ;;  %v17298_v52 = vsub.f32 %v7723_v9, %v7811_v25 }
 0x454   :  { %10767 = vmatpush1.bf16.msra.mxu0 %v21553_v3  ;;  %v17278_v3 = vpack.c.bf16 %v7809_v42, %v7805_v46  ;;  %21590 = vst [vmem:[#allocation229_spill] sm:$0xff] %v17289_v10  ;;  %v7742_v10 = vld [vmem:[#allocation11 + $0x138] sm:$0xff] }
 0x455   :  { %10769 = vmatprep.subr.bf16.mxu0 %v21559_v58  ;;  %21577 = vst [vmem:[#allocation237_spill] sm:$0xff] %v17267_v7  ;;  %v7732_v58 = vld [vmem:[#allocation11 + $0xe8] sm:$0xff]  ;;  %21595 = vst [vmem:[#allocation52_spill] sm:$0xff] %v17298_v52  ;;  %v7739_v52 = vld [vmem:[#allocation11 + $0x120] sm:$0xff] }
 0x456   :  { %11535 = vmatpush1.bf16.msra.mxu1 %v21558_v45  ;;  %21583 = vst [vmem:[#allocation165_spill] sm:$0xff] %v17278_v3  ;;  %v17280_v45 = vsub.f32 %v7720_v18, %v7805_v46  ;;  %v17291_v18 = vsub.f32 %v7726_v19, %v8713_v26  ;;  %v17293_v46 = vpack.c.bf16 %v7811_v25, %v7807_v2  ;;  %v7817_v42 = vand.u32 4294901760, %v7732_v58  ;;  %v7744_v3 = vld [vmem:[#allocation11 + $0x148] sm:$0xff] }
 0x457   :  { %11537 = vmatprep.subr.bf16.mxu1 %v21562_v36  ;;  %v17286_v36 = vsub.f32 %v7722_v34, %v8709_v13  ;;  %v8717_v34 = vand.u32 4294901760, %v7730_v14  ;;  %v17300_v13 = vsub.f32 %v7721_v31, %v8711_v30  ;;  %v7819_v26 = vand.u32 4294901760, %v7731_v20 }
 0x458   :  { %10771 = vmatpush1.bf16.msra.mxu0 %v21569_v22  ;;  %21584 = vst [vmem:[#allocation56_spill] sm:$0xff] %v17280_v45  ;;  %v7727_v22 = vld [vmem:[#allocation11 + $0xc0] sm:$0xff]  ;;  %21591 = vst [vmem:[#allocation231_spill] sm:$0xff] %v17291_v18  ;;  %v7738_v18 = vld [vmem:[#allocation11 + $0x118] sm:$0xff]  ;;  %v17311_v38 = vpack.c.bf16 %v7817_v42, %v7813_v40 }
 0x459   :  { %10773 = vmatprep.subr.bf16.mxu0 %v21571_v27  ;;  %21588 = vst [vmem:[#allocation171_spill] sm:$0xff] %v17286_v36  ;;  %21592 = vst [vmem:[#allocation233_spill] sm:$0xff] %v17293_v46  ;;  %v7729_v27 = vld [vmem:[#allocation11 + $0xd0] sm:$0xff]  ;;  %v7815_v19 = vand.u32 4294901760, %v7727_v22  ;;  %v17306_v46 = vsub.f32 %v7725_v29, %v8715_v63  ;;  %v21602_v45 = vld [vmem:[#allocation148_spill] sm:$0xff]  ;;  %v17317_v29 = vsub.f32 %v7730_v14, %v8717_v34 }
 0x45a   :  { %11539 = vmatpush1.bf16.msra.mxu1 %v21570_v60  ;;  %v17295_v60 = vsub.f32 %v7719_v5, %v7807_v2  ;;  %v21594_v36 = vld [vmem:[#allocation133_spill] sm:$0xff]  ;;  %21596 = vst [vmem:[#allocation57_spill] sm:$0xff] %v17300_v13  ;;  %v21598_v5 = vld [vmem:[#allocation142_spill] sm:$0xff]  ;;  %v17304_v2 = vpack.c.bf16 %v8715_v63, %v8711_v30  ;;  %v8719_v9 = vand.u32 4294901760, %v7729_v27  ;;  %v7735_v13 = vld [vmem:[#allocation11 + $0x100] sm:$0xff]  ;;  %v17328_v14 = vsub.f32 %v7731_v20, %v7819_v26 }
 0x45b   :  { %11541 = vmatprep.subr.bf16.mxu1 %v21575_v16  ;;  %v7733_v16 = vld [vmem:[#allocation11 + $0xf0] sm:$0xff]  ;;  %21600 = vst [vmem:[#allocation63_spill] sm:$0xff] %v17306_v46  ;;  %21603 = vst [vmem:[#allocation77_spill] sm:$0xff] %v17311_v38  ;;  %v21607_v63 = vld [vmem:[#allocation175_spill] sm:$0xff] }
 0x45c   :  { %10775 = vmatpush1.bf16.msra.mxu0 %v21580_v6  ;;  %21593 = vst [vmem:[#allocation234_spill] sm:$0xff] %v17295_v60  ;;  %v8721_v6 = vand.u32 4294901760, %v7734_v8  ;;  %21599 = vst [vmem:[#allocation61_spill] sm:$0xff] %v17304_v2  ;;  %v17308_v60 = vsub.f32 %v7728_v32, %v7813_v40  ;;  %v8723_v25 = vand.u32 4294901760, %v7733_v16  ;;  %v7737_v32 = vld [vmem:[#allocation11 + $0x110] sm:$0xff]  ;;  %v8725_v2 = vand.u32 4294901760, %v7738_v18 }
 0x45d   :  { %10777 = vmatprep.subr.bf16.mxu0 %v21586_v21  ;;  %v7740_v21 = vld [vmem:[#allocation11 + $0x128] sm:$0xff]  ;;  %21606 = vst [vmem:[#allocation168_spill] sm:$0xff] %v17317_v29  ;;  %v7741_v46 = vld [vmem:[#allocation11 + $0x130] sm:$0xff]  ;;  %v21610_v40 = vld [vmem:[#allocation178_spill] sm:$0xff]  ;;  %v7827_v29 = vand.u32 4294901760, %v7739_v52 }
 0x45e   :  { %11543 = vmatpush1.bf16.msra.mxu1 %v21585_v48  ;;  %v7736_v48 = vld [vmem:[#allocation11 + $0x108] sm:$0xff]  ;;  %21601 = vst [vmem:[#allocation65_spill] sm:$0xff] %v17308_v60  ;;  %v17315_v30 = vpack.c.bf16 %v8721_v6, %v8717_v34  ;;  %v8729_v60 = vand.u32 4294901760, %v7742_v10  ;;  %21613 = vst [vmem:[#allocation182_spill] sm:$0xff] %v17328_v14  ;;  %v7823_v34 = vand.u32 4294901760, %v7735_v13  ;;  %v7743_v20 = vld [vmem:[#allocation11 + $0x140] sm:$0xff] }
 0x45f   :  { %11545 = vmatprep.subr.bf16.mxu1 %v21589_v24  ;;  %v21597_v24 = vld [vmem:[#allocation138_spill] sm:$0xff]  ;;  %v7821_v31 = vand.u32 4294901760, %v7736_v48  ;;  %v21619_v14 = vld [vmem:[#allocation185_spill] sm:$0xff] }
 0x460   :  { %10779 = vmatpush1.bf16.msra.mxu0 %v21594_v36  ;;  %v7825_v36 = vand.u32 4294901760, %v7740_v21  ;;  %21605 = vst [vmem:[#allocation88_spill] sm:$0xff] %v17315_v30  ;;  %v7746_v30 = vld [vmem:[#allocation11 + $0x158] sm:$0xff]  ;;  %v7745_v38 = vld [vmem:[#allocation11 + $0x150] sm:$0xff] }
 0x461   :  { %10781 = vmatprep.subr.bf16.mxu0 %v21598_v5  ;;  %v17320_v5 = vsub.f32 %v7734_v8, %v8721_v6  ;;  %v17331_v8 = vpack.c.bf16 %v8723_v25, %v8719_v9  ;;  %v17333_v6 = vsub.f32 %v7729_v27, %v8719_v9  ;;  %v17344_v27 = vpack.c.bf16 %v8729_v60, %v8725_v2  ;;  %v21624_v9 = vld [vmem:[#allocation40_spill] sm:$0xff] }
 0x462   :  { %11547 = vmatpush1.bf16.msra.mxu1 %v21597_v24  ;;  %v17313_v24 = vsub.f32 %v7732_v58, %v7817_v42  ;;  %v21611_v58 = vld [vmem:[#allocation29_spill] sm:$0xff]  ;;  %v17326_v42 = vsub.f32 %v7727_v22, %v7815_v19  ;;  %v7829_v22 = vand.u32 4294901760, %v7744_v3 }
 0x463   :  { %11549 = vmatprep.subr.bf16.mxu1 %v21602_v45  ;;  %21608 = vst [vmem:[#allocation113_spill] sm:$0xff] %v17320_v5  ;;  %v17322_v45 = vpack.c.bf16 %v7819_v26, %v7815_v19  ;;  %21615 = vst [vmem:[#allocation184_spill] sm:$0xff] %v17331_v8  ;;  %v17335_v5 = vsub.f32 %v7733_v16, %v8723_v25  ;;  %v7833_v19 = vand.u32 4294901760, %v7748_v35  ;;  %v7747_v26 = vld [vmem:[#allocation11 + $0x160] sm:$0xff]  ;;  %v21625_v25 = vld [vmem:[#allocation41_spill] sm:$0xff] }
 0x464   :  { %21604 = vst [vmem:[#allocation86_spill] sm:$0xff] %v17313_v24  ;;  %10783 = vmatpush1.bf16.msra.mxu0 %v21607_v63  ;;  %21612 = vst [vmem:[#allocation134_spill] sm:$0xff] %v17326_v42  ;;  %v21614_v63 = vld [vmem:[#allocation36_spill] sm:$0xff]  ;;  %v8727_v24 = vand.u32 4294901760, %v7737_v32  ;;  %v17340_v42 = vsub.f32 %v7736_v48, %v7821_v31  ;;  %v17346_v16 = vsub.f32 %v7738_v18, %v8725_v2  ;;  %v21628_v48 = vld [vmem:[#allocation202_spill] sm:$0xff]  ;;  %v7831_v18 = vand.u32 4294901760, %v7743_v20 }
 0x465   :  { %21609 = vst [vmem:[#allocation116_spill] sm:$0xff] %v17322_v45  ;;  %10785 = vmatprep.subr.bf16.mxu0 %v21611_v58  ;;  %21616 = vst [vmem:[#allocation183_spill] sm:$0xff] %v17333_v6  ;;  %v17337_v45 = vpack.c.bf16 %v7825_v36, %v7821_v31  ;;  %v8731_v58 = vand.u32 4294901760, %v7741_v46  ;;  %v17352_v6 = vpack.c.bf16 %v7827_v29, %v7823_v34  ;;  %v7835_v2 = vand.u32 4294901760, %v7747_v26 }
 0x466   :  { %11551 = vmatpush1.bf16.msra.mxu1 %v21610_v40  ;;  %21617 = vst [vmem:[#allocation186_spill] sm:$0xff] %v17335_v5  ;;  %v7750_v40 = vld [vmem:[#allocation11 + $0x178] sm:$0xff]  ;;  %21620 = vst [vmem:[#allocation188_spill] sm:$0xff] %v17340_v42  ;;  %v17350_v5 = vsub.f32 %v7742_v10, %v8729_v60  ;;  %v17357_v31 = vsub.f32 %v7739_v52, %v7827_v29  ;;  %v17361_v10 = vsub.f32 %v7737_v32, %v8727_v24  ;;  %v21635_v42 = vld [vmem:[#allocation208_spill] sm:$0xff] }
 0x467   :  { %11553 = vmatprep.subr.bf16.mxu1 %v21614_v63  ;;  %21618 = vst [vmem:[#allocation189_spill] sm:$0xff] %v17337_v45  ;;  %v17342_v63 = vsub.f32 %v7740_v21, %v7825_v36  ;;  %21622 = vst [vmem:[#allocation201_spill] sm:$0xff] %v17344_v27  ;;  %v8733_v45 = vand.u32 4294901760, %v7746_v30  ;;  %v8737_v8 = vand.u32 4294901760, %v7750_v40  ;;  %v17355_v21 = vsub.f32 %v7735_v13, %v7823_v34  ;;  %v7752_v36 = vld [vmem:[#allocation11 + $0x188] sm:$0xff] }
 0x468   :  { %10787 = vmatpush1.bf16.msra.mxu0 %v21619_v14  ;;  %21623 = vst [vmem:[#allocation203_spill] sm:$0xff] %v17346_v16  ;;  %21626 = vst [vmem:[#allocation76_spill] sm:$0xff] %v17350_v5  ;;  %v7749_v14 = vld [vmem:[#allocation11 + $0x170] sm:$0xff]  ;;  %v17359_v16 = vpack.c.bf16 %v8731_v58, %v8727_v24  ;;  %v17363_v60 = vsub.f32 %v7741_v46, %v8731_v58  ;;  %v7754_v5 = vld [vmem:[#allocation11 + $0x198] sm:$0xff]  ;;  %v17368_v13 = vsub.f32 %v7744_v3, %v7829_v22 }
 0x469   :  { %21621 = vst [vmem:[#allocation62_spill] sm:$0xff] %v17342_v63  ;;  %10789 = vmatprep.subr.bf16.mxu0 %v21625_v25  ;;  %21627 = vst [vmem:[#allocation64_spill] sm:$0xff] %v17352_v6  ;;  %v17365_v25 = vpack.c.bf16 %v7833_v19, %v7829_v22  ;;  %v7758_v63 = vld [vmem:[#allocation11 + $0x1b8] sm:$0xff]  ;;  %v17370_v52 = vsub.f32 %v7748_v35, %v7833_v19  ;;  %v8735_v29 = vand.u32 4294901760, %v7745_v38  ;;  %v8739_v34 = vand.u32 4294901760, %v7749_v14  ;;  %v21642_v3 = vld [vmem:[#allocation217_spill] sm:$0xff] }
 0x46a   :  { %11555 = vmatpush1.bf16.msra.mxu1 %v21624_v9  ;;  %21629 = vst [vmem:[#allocation222_spill] sm:$0xff] %v17355_v21  ;;  %21630 = vst [vmem:[#allocation83_spill] sm:$0xff] %v17357_v31  ;;  %v7756_v9 = vld [vmem:[#allocation11 + $0x1a8] sm:$0xff]  ;;  %v21638_v31 = vld [vmem:[#allocation211_spill] sm:$0xff]  ;;  %v17374_v24 = vpack.c.bf16 %v8737_v8, %v8733_v45  ;;  %v17376_v46 = vsub.f32 %v7746_v30, %v8733_v45  ;;  %v7837_v32 = vand.u32 4294901760, %v7752_v36  ;;  %v8741_v19 = vand.u32 4294901760, %v7754_v5 }
 0x46b   :  { %11557 = vmatprep.subr.bf16.mxu1 %v21628_v48  ;;  %21631 = vst [vmem:[#allocation26_spill] sm:$0xff] %v17359_v16  ;;  %21632 = vst [vmem:[#allocation69_spill] sm:$0xff] %v17361_v10  ;;  %v7751_v48 = vld [vmem:[#allocation11 + $0x180] sm:$0xff]  ;;  %v21639_v21 = vld [vmem:[#allocation214_spill] sm:$0xff]  ;;  %v7841_v58 = vand.u32 4294901760, %v7756_v9  ;;  %v17379_v35 = vsub.f32 %v7750_v40, %v8737_v8  ;;  %v17381_v22 = vpack.c.bf16 %v7835_v2, %v7831_v18 }
 0x46c   :  { %21633 = vst [vmem:[#allocation78_spill] sm:$0xff] %v17363_v60  ;;  %21634 = vst [vmem:[#allocation181_spill] sm:$0xff] %v17365_v25  ;;  %10791 = vmatpush1.bf16.msra.mxu0 %v21635_v42  ;;  %v7755_v60 = vld [vmem:[#allocation11 + $0x1a0] sm:$0xff]  ;;  %v7753_v10 = vld [vmem:[#allocation11 + $0x190] sm:$0xff]  ;;  %v7839_v30 = vand.u32 4294901760, %v7751_v48 }
 0x46d   :  { %21636 = vst [vmem:[#allocation207_spill] sm:$0xff] %v17368_v13  ;;  %21637 = vst [vmem:[#allocation85_spill] sm:$0xff] %v17370_v52  ;;  %10793 = vmatprep.subr.bf16.mxu0 %v21639_v21  ;;  %v7757_v42 = vld [vmem:[#allocation11 + $0x1b0] sm:$0xff]  ;;  %v8745_v52 = vand.u32 4294901760, %v7758_v63  ;;  %v17385_v21 = vsub.f32 %v7747_v26, %v7835_v2  ;;  %v17387_v13 = vsub.f32 %v7745_v38, %v8735_v29  ;;  %v8743_v25 = vand.u32 4294901760, %v7753_v10  ;;  %v7760_v8 = vld [vmem:[#allocation11 + $0x1c8] sm:$0xff] }
 0x46e   :  { %11559 = vmatpush1.bf16.msra.mxu1 %v21638_v31  ;;  %21640 = vst [vmem:[#allocation179_spill] sm:$0xff] %v17374_v24  ;;  %21641 = vst [vmem:[#allocation32_spill] sm:$0xff] %v17376_v46  ;;  %v17383_v31 = vsub.f32 %v7743_v20, %v7831_v18  ;;  %v21647_v45 = vld [vmem:[#allocation49_spill] sm:$0xff]  ;;  %v17390_v46 = vpack.c.bf16 %v8739_v34, %v8735_v29  ;;  %v7843_v24 = vand.u32 4294901760, %v7755_v60  ;;  %v7764_v40 = vld [vmem:[#allocation11 + $0x1e8] sm:$0xff] }
 0x46f   :  { %11561 = vmatprep.subr.bf16.mxu1 %v21642_v3  ;;  %21643 = vst [vmem:[#allocation38_spill] sm:$0xff] %v17379_v35  ;;  %21644 = vst [vmem:[#allocation192_spill] sm:$0xff] %v17381_v22  ;;  %v8747_v3 = vand.u32 4294901760, %v7757_v42  ;;  %v7701_v35 = vld [vmem:[#allocation7] sm:$0xff]  ;;  %v21649_v22 = vld [vmem:[#allocation60_spill] sm:$0xff]  ;;  %v17394_v20 = vsub.f32 %v7749_v14, %v8739_v34  ;;  %v17396_v26 = vpack.c.bf16 %v7841_v58, %v7837_v32  ;;  %v7849_v14 = vand.u32 4294901760, %v7764_v40 }
 0x470   :  { %21645 = vst [vmem:[#allocation190_spill] sm:$0xff] %v17385_v21  ;;  %21646 = vst [vmem:[#allocation74_spill] sm:$0xff] %v17387_v13  ;;  %10795 = vmatpush1.bf16.msra.mxu0 %v21647_v45  ;;  %v21650_v16 = vld [vmem:[#allocation46_spill] sm:$0xff]  ;;  %v17398_v38 = vsub.f32 %v7752_v36, %v7837_v32  ;;  %v21653_v18 = vld [vmem:[#allocation23_spill] sm:$0xff]  ;;  %v17401_v2 = vsub.f32 %v7756_v9, %v7841_v58  ;;  %v17403_v29 = vpack.c.bf16 %v8745_v52, %v8741_v19 }
 0x471   :  { %21648 = vst [vmem:[#allocation150_spill] sm:$0xff] %v17390_v46  ;;  %10797 = vmatprep.subr.bf16.mxu0 %v21650_v16  ;;  %21651 = vst [vmem:[#allocation154_spill] sm:$0xff] %v17394_v20  ;;  %v17405_v45 = vsub.f32 %v7754_v5, %v8741_v19  ;;  %v17407_v13 = vsub.f32 %v7758_v63, %v8745_v52  ;;  %v7762_v21 = vld [vmem:[#allocation11 + $0x1d8] sm:$0xff]  ;;  %v7845_v16 = vand.u32 4294901760, %v7760_v8  ;;  %v17411_v34 = vand.u32 4294901760, %v7701_v35  ;;  %v21659_v20 = vld [vmem:[#allocation31_spill] sm:$0xff] }
 0x472   :  { %11563 = vmatpush1.bf16.msra.mxu1 %v21649_v22  ;;  %21652 = vst [vmem:[#allocation156_spill] sm:$0xff] %v17396_v26  ;;  %21654 = vst [vmem:[#allocation79_spill] sm:$0xff] %v17401_v2  ;;  %v17409_v22 = vsub.f32 %v7751_v48, %v7839_v30  ;;  %v17414_v36 = vpack.c.bf16 %v7843_v24, %v7839_v30  ;;  %v17416_v32 = vsub.f32 %v7755_v60, %v7843_v24  ;;  %v21664_v5 = vld [vmem:[#allocation98_spill] sm:$0xff]  ;;  %v7759_v60 = vld [vmem:[#allocation11 + $0x1c0] sm:$0xff] }
 0x473   :  { %11565 = vmatprep.subr.bf16.mxu1 %v21653_v18  ;;  %21655 = vst [vmem:[#allocation235_spill] sm:$0xff] %v17403_v29  ;;  %21656 = vst [vmem:[#allocation157_spill] sm:$0xff] %v17405_v45  ;;  %v17418_v9 = vpack.c.bf16 %v8747_v3, %v8743_v25  ;;  %v17420_v58 = vsub.f32 %v7753_v10, %v8743_v25  ;;  %v21665_v63 = vld [vmem:[#allocation106_spill] sm:$0xff]  ;;  %v17424_v52 = vsub.f32 %v7757_v42, %v8747_v3  ;;  %v7763_v24 = vld [vmem:[#allocation11 + $0x1e0] sm:$0xff] }
 0x474   :  { %21657 = vst [vmem:[#allocation160_spill] sm:$0xff] %v17409_v22  ;;  %21658 = vst [vmem:[#allocation73_spill] sm:$0xff] %v17411_v34  ;;  %10799 = vmatpush1.bf16.msra.mxu0 %v21659_v20  ;;  %v7766_v48 = vld [vmem:[#allocation11 + $0x1f8] sm:$0xff]  ;;  %v8749_v19 = vand.u32 4294901760, %v7762_v21  ;;  %v17433_v42 = vpack.c.bf16 %v7849_v14, %v7845_v16  ;;  %v17436_v3 = vsub.f32 %v7701_v35, %v17411_v34  ;;  %v7761_v25 = vld [vmem:[#allocation11 + $0x1d0] sm:$0xff]  ;;  %v7847_v35 = vand.u32 4294901760, %v7759_v60 }
 0x475   :  { %21660 = vst [vmem:[#allocation162_spill] sm:$0xff] %v17414_v36  ;;  %21661 = vst [vmem:[#allocation191_spill] sm:$0xff] %v17416_v32  ;;  %10801 = vmatprep.subr.bf16.mxu0 %v21665_v63  ;;  %v21667_v30 = vld [vmem:[#allocation114_spill] sm:$0xff]  ;;  %v17441_v18 = vsub.f32 %v7760_v8, %v7845_v16  ;;  %v17443_v32 = vsub.f32 %v7764_v40, %v7849_v14  ;;  %v8753_v10 = vand.u32 4294901760, %v7766_v48  ;;  %v7851_v34 = vand.u32 4294901760, %v7763_v24  ;;  %v7765_v22 = vld [vmem:[#allocation11 + $0x1f0] sm:$0xff] }
 0x476   :  { %21662 = vst [vmem:[#allocation44_spill] sm:$0xff] %v17418_v9  ;;  %21663 = vst [vmem:[#allocation194_spill] sm:$0xff] %v17420_v58  ;;  %11567 = vmatpush1.bf16.msra.mxu1 %v21664_v5  ;;  %v21674_v5 = vld [vmem:[#allocation72_spill] sm:$0xff]  ;;  %v21675_v58 = vld [vmem:[#allocation174_spill] sm:$0xff]  ;;  %v21676_v63 = vand.u32 4294901760, %v17228_v53  ;;  %v21677_v8 = vand.u32 4294901760, %v17230_v50 }
 0x477   :  { %21666 = vst [vmem:[#allocation193_spill] sm:$0xff] %v17424_v52  ;;  %11569 = vmatprep.subr.bf16.mxu1 %v21667_v30  ;;  %21668 = vst [vmem:[#allocation122_spill] sm:$0xff] %v17433_v42  ;;  %v21670_v30 = vld [vmem:[#allocation129_spill] sm:$0xff]  ;;  %v17445_v52 = vsub.f32 %v7762_v21, %v8749_v19  ;;  %v21678_v21 = vand.u32 4294901760, %v17232_v61  ;;  %v21679_v14 = vand.u32 4294901760, %v17234_v12 }
 0x478   :  { %21669 = vst [vmem:[#allocation196_spill] sm:$0xff] %v17436_v3  ;;  %10803 = vmatpush1.bf16.msra.mxu0 %v21670_v30  ;;  %21671 = vst [vmem:[#allocation50_spill] sm:$0xff] %v17441_v18  ;;  %v7911_v20 = vsub.f32 %v17228_v53, %v21676_v63  ;;  %v7923_v40 = vsub.f32 %v17230_v50, %v21677_v8  ;;  %v21681_v63 = vand.u32 4294901760, %v17240_v33  ;;  %v17469_v8 = vand.u32 4294901760, %v17436_v3 }
 0x479   :  { %21672 = vst [vmem:[#allocation199_spill] sm:$0xff] %v17443_v32  ;;  %21673 = vst [vmem:[#allocation198_spill] sm:$0xff] %v17445_v52  ;;  %10805 = vmatprep.subr.bf16.mxu0 %v21675_v58  ;;  %v8815_v16 = vsub.f32 %v17232_v61, %v21678_v21  ;;  %v8827_v58 = vsub.f32 %v17234_v12, %v21679_v14  ;;  %v8751_v32 = vand.u32 4294901760, %v7761_v25  ;;  %v21684_v61 = vand.u32 4294901760, %v17247_v23 }
 0x47a   :  { %11571 = vmatpush1.bf16.msra.mxu1 %v21674_v5  ;;  %v21680_v5 = vand.u32 4294901760, %v17238_v55  ;;  %v7929_v53 = vsub.f32 %v17240_v33, %v21681_v63  ;;  %21682 = vst [vmem:[#allocation221_spill] sm:$0xff] %v17469_v8  ;;  %v17478_v12 = vpack.c.bf16 %v8753_v10, %v8749_v19  ;;  %v17485_v33 = vpack.c.bf16 %v7851_v34, %v7847_v35 }
 0x47b   :  { %11573 = vmatprep.subr.bf16.mxu1 %v21316_v0  ;;  %v21683_v0 = vand.u32 4294901760, %v17245_v11  ;;  %v8833_v14 = vsub.f32 %v17247_v23, %v21684_v61  ;;  %v19274_v50 = vand.u32 4294901760, %v17253_v57  ;;  %v8828_v61 = vand.u32 4294901760, %v8827_v58  ;;  %v21735_v23 = vld [vmem:[#allocation179_spill] sm:$0xff] }
 0x47c   :  { %v7917_v30 = vsub.f32 %v17238_v55, %v21680_v5  ;;  %10807 = vmatpush1.bf16.msra.mxu0 %v21319_v15  ;;  %21685 = vst [vmem:[#allocation228_spill] sm:$0xff] %v17478_v12  ;;  %v17480_v5 = vsub.f32 %v7766_v48, %v8753_v10  ;;  %v8755_v55 = vand.u32 4294901760, %v7765_v22  ;;  %21686 = vst [vmem:[#allocation80_spill] sm:$0xff] %v17485_v33  ;;  %v8816_v15 = vand.u32 4294901760, %v8815_v16 }
 0x47d   :  { %v8821_v21 = vsub.f32 %v17245_v11, %v21683_v0  ;;  %11577 = vmatprep.subr.bf16.mxu0 %v17221_v49  ;;  %v7912_v0 = vand.u32 4294901760, %v7911_v20  ;;  %v7924_v11 = vand.u32 4294901760, %v7923_v40  ;;  %v7930_v48 = vand.u32 4294901760, %v7929_v53 }
 0x47e   :  { %11575 = vmatpush1.bf16.msra.mxu1 %v21322_v59  ;;  %v7918_v19 = vand.u32 4294901760, %v7917_v30  ;;  %v7889_v10 = vsub.f32 %v17436_v3, %v17469_v8  ;;  %v8834_v63 = vand.u32 4294901760, %v8833_v14  ;;  %v19273_v49 = vand.u32 4294901760, %v17260_v1  ;;  %v21706_v3 = vld [vmem:[#allocation61_spill] sm:$0xff] }
 0x47f   :  { %11769 = vmatprep.subr.bf16.mxu1 %v17223_v17  ;;  %4987 = vmatmul.mubr.f32.vlgmr.msra.gmra.mrb[4].mxu0 %v21527_v62  ;;  %v8822_v59 = vand.u32 4294901760, %v8821_v21  ;;  %v17495_v20 = vsub.f32 %v7759_v60, %v7847_v35  ;;  %v17497_v40 = vsub.f32 %v7763_v24, %v7851_v34  ;;  %v21687_v16 = vand.u32 4294901760, %v17251_v44  ;;  %v21710_v17 = vld [vmem:[#allocation86_spill] sm:$0xff] }
 0x480   :  { %11579 = vmatpush1.bf16.msra.mxu0 %v17225_v37  ;;  %v19272_v58 = vand.u32 4294901760, %v17262_v43  ;;  %4993 = vmatprep.mubr.f32.mxu0 %v21532_v4  ;;  %v17505_v30 = vpack.c.bf16 %v8755_v55, %v8751_v32  ;;  %v17507_v21 = vsub.f32 %v7761_v25, %v8751_v32  ;;  %v19277_v34 = vand.u32 4294901760, %v17267_v7  ;;  %v21705_v37 = vld [vmem:[#allocation65_spill] sm:$0xff] }
 0x481   :  { %7679 = vmatmul.mubr.f32.vlgmr.msra.gmra.mrb[4].mxu1 %v21527_v62  ;;  %v7935_v53 = vsub.f32 %v17251_v44, %v21687_v16  ;;  %v7947_v62 = vsub.f32 %v17253_v57, %v19274_v50  ;;  %11581 = vmatprep.subr.bf16.mxu0 %v17249_v54  ;;  %v17515_v60 = vsub.f32 %v7765_v22, %v8755_v55  ;;  %v17523_v32 = vand.u32 4294901760, %v7889_v10  ;;  %v21692_v10 = vld [vmem:[#allocation56_spill] sm:$0xff]  ;;  %v21693_v16 = vld [vmem:[#allocation229_spill] sm:$0xff]  ;;  %v21696_v50 = vld [vmem:[#allocation171_spill] sm:$0xff] }
 0x482   :  { %11771 = vmatpush1.bf16.msra.mxu1 %v17243_v51  ;;  %21688 = vst [vmem:[#allocation131_spill] sm:$0xff] %v17505_v30  ;;  %7685 = vmatprep.mubr.f32.mxu1 %v21532_v4  ;;  %v17517_v24 = vpack.c.bf16 %v7924_v11, %v7912_v0  ;;  %v17519_v35 = vpack.c.bf16 %v8828_v61, %v8816_v15  ;;  %v21689_v0 = vld [vmem:[#allocation120_spill] sm:$0xff]  ;;  %v21690_v15 = vld [vmem:[#allocation165_spill] sm:$0xff]  ;;  %v21697_v22 = vld [vmem:[#allocation231_spill] sm:$0xff] }
 0x483   :  { %4995 = vmatmul.mubr.f32.gmra.mrb[6].mxu0 %v21533_v47  ;;  %11773 = vmatprep.subr.bf16.mxu1 %v17258_v56  ;;  %v17525_v25 = vpack.c.bf16 %v7930_v48, %v7918_v19  ;;  %v17527_v14 = vpack.c.bf16 %v8834_v63, %v8822_v59  ;;  %v17532_v4 = vsub.f32 %v17260_v1, %v19273_v49  ;;  %v7936_v55 = vand.u32 4294901760, %v7935_v53  ;;  %v21691_v19 = vld [vmem:[#allocation75_spill] sm:$0xff]  ;;  %v21702_v54 = vld [vmem:[#allocation233_spill] sm:$0xff] }
 0x484   :  { %11583 = vmatpush1.bf16.msra.mxu0 %v17265_v41  ;;  %v17539_v11 = vsub.f32 %v17262_v43, %v19272_v58  ;;  %v7948_v61 = vand.u32 4294901760, %v7947_v62  ;;  %v21694_v53 = vmov 0.0   ;;  %v21695_v58 = vld [vmem:[#allocation166_spill] sm:$0xff]  ;;  %v21700_v41 = vld [vmem:[#allocation57_spill] sm:$0xff]  ;;  %v21701_v56 = vld [vmem:[#allocation63_spill] sm:$0xff]  ;;  %v21703_v63 = vand.u32 4294901760, %v17269_v28 }
 0x485   :  { %7687 = vmatmul.mubr.f32.gmra.mrb[6].mxu1 %v21533_v47  ;;  %11585 = vmatprep.subr.bf16.mxu0 %v21690_v15  ;;  %v17548_v47 = vsub.f32 %v17267_v7, %v19277_v34  ;;  %v21698_v62 = vld [vmem:[#allocation234_spill] sm:$0xff]  ;;  %v8840_v34 = vand.u32 4294901760, %v17532_v4  ;;  %v21704_v15 = vand.u32 4294901760, %v17271_v39  ;;  %v21707_v48 = vld [vmem:[#allocation77_spill] sm:$0xff]  ;;  %v21711_v7 = vld [vmem:[#allocation88_spill] sm:$0xff]  ;;  %v21724_v1 = vand.u32 4294901760, %v21710_v17 }
 0x486   :  { %11775 = vmatpush1.bf16.msra.mxu1 %v21689_v0  ;;  %7885 = vmatprep.mubr.f32.mxu0 %v21694_v53  ;;  %v21699_v0 = vld [vmem:[#allocation52_spill] sm:$0xff]  ;;  %v8852_v49 = vand.u32 4294901760, %v17539_v11  ;;  %v7953_v8 = vsub.f32 %v17269_v28, %v21703_v63  ;;  %v17574_v59 = vpack.c.bf16 %v7948_v61, %v7936_v55  ;;  %v21714_v61 = vand.u32 4294901760, %v21697_v22  ;;  %v7702_v43 = vld [vmem:[#allocation7 + $0x8] sm:$0xff] }
 0x487   :  { %11777 = vmatprep.subr.bf16.mxu1 %v21693_v16  ;;  %8789 = vmatprep.mubr.f32.mxu1 %v21694_v53  ;;  %v8845_v51 = vsub.f32 %v17271_v39, %v21704_v15  ;;  %v21708_v16 = vand.u32 4294901760, %v21691_v19  ;;  %v21712_v15 = vand.u32 4294901760, %v21695_v58  ;;  %v7942_v28 = vand.u32 4294901760, %v17548_v47 }
 0x488   :  { %11587 = vmatpush1.bf16.msra.mxu0 %v21702_v54  ;;  %v21709_v54 = vand.u32 4294901760, %v21692_v10 }
 0x489   :  { %11589 = vmatprep.subr.bf16.mxu0 %v21707_v48  ;;  %v8857_v11 = vsub.f32 %v21691_v19, %v21708_v16  ;;  %v7971_v4 = vsub.f32 %v21695_v58, %v21712_v15  ;;  %v21713_v48 = vand.u32 4294901760, %v21696_v50  ;;  %v8875_v16 = vsub.f32 %v21697_v22, %v21714_v61  ;;  %v21719_v19 = vld [vmem:[#allocation116_spill] sm:$0xff] }
 0x48a   :  { %11779 = vmatpush1.bf16.msra.mxu1 %v21706_v3  ;;  %v7959_v63 = vsub.f32 %v21692_v10, %v21709_v54  ;;  %v21715_v3 = vand.u32 4294901760, %v21698_v62  ;;  %v21717_v15 = vand.u32 4294901760, %v21700_v41  ;;  %v7954_v61 = vand.u32 4294901760, %v7953_v8 }
 0x48b   :  { %11781 = vmatprep.subr.bf16.mxu1 %v21711_v7  ;;  %v8863_v55 = vsub.f32 %v21696_v50, %v21713_v48  ;;  %v21716_v7 = vand.u32 4294901760, %v21699_v0  ;;  %v21718_v48 = vand.u32 4294901760, %v21701_v56  ;;  %v8846_v22 = vand.u32 4294901760, %v8845_v51 }
 0x48c   :  { %v7965_v54 = vsub.f32 %v21698_v62, %v21715_v3  ;;  %v8869_v58 = vsub.f32 %v21700_v41, %v21717_v15  ;;  %11591 = vmatpush1.bf16.msra.mxu0 %v21719_v19  ;;  %v21720_v3 = vand.u32 4294901760, %v21705_v37  ;;  %v21721_v62 = vld [vmem:[#allocation168_spill] sm:$0xff]  ;;  %v8858_v15 = vand.u32 4294901760, %v8857_v11  ;;  %v21725_v19 = vld [vmem:[#allocation113_spill] sm:$0xff] }
 0x48d   :  { %v7977_v10 = vsub.f32 %v21699_v0, %v21716_v7  ;;  %v8881_v50 = vsub.f32 %v21701_v56, %v21718_v48  ;;  %v21722_v7 = vld [vmem:[#allocation184_spill] sm:$0xff]  ;;  %v21723_v0 = vld [vmem:[#allocation189_spill] sm:$0xff]  ;;  %v7960_v41 = vand.u32 4294901760, %v7959_v63  ;;  %v7995_v48 = vsub.f32 %v21710_v17, %v21724_v1  ;;  %v21729_v17 = vld [vmem:[#allocation182_spill] sm:$0xff] }
 0x48e   :  { %v7983_v47 = vsub.f32 %v21705_v37, %v21720_v3  ;;  %11783 = vmatpush1.bf16.msra.mxu1 %v21722_v7  ;;  %11593 = vmatprep.subr.bf16.mxu0 %v21723_v0  ;;  %v7972_v51 = vand.u32 4294901760, %v7971_v4  ;;  %v8864_v56 = vand.u32 4294901760, %v8863_v55  ;;  %v8876_v3 = vand.u32 4294901760, %v8875_v16  ;;  %v21728_v0 = vld [vmem:[#allocation134_spill] sm:$0xff]  ;;  %v21731_v55 = vld [vmem:[#allocation181_spill] sm:$0xff]  ;;  %v21733_v16 = vld [vmem:[#allocation183_spill] sm:$0xff] }
 0x48f   :  { %11785 = vmatprep.subr.bf16.mxu1 %v17344_v27  ;;  %v7966_v37 = vand.u32 4294901760, %v7965_v54  ;;  %v7978_v39 = vand.u32 4294901760, %v7977_v10  ;;  %v8870_v57 = vand.u32 4294901760, %v8869_v58  ;;  %v8882_v44 = vand.u32 4294901760, %v8881_v50  ;;  %v21730_v4 = vld [vmem:[#allocation26_spill] sm:$0xff] }
 0x490   :  { %v17618_v7 = vand.u32 4294901760, %v7702_v43  ;;  %11595 = vmatpush1.bf16.msra.mxu0 %v17352_v6  ;;  %v7984_v11 = vand.u32 4294901760, %v7983_v47  ;;  %v21727_v63 = vand.u32 4294901760, %v21721_v62  ;;  %v7996_v10 = vand.u32 4294901760, %v7995_v48  ;;  %v21734_v47 = vld [vmem:[#allocation186_spill] sm:$0xff]  ;;  %v21737_v6 = vld [vmem:[#allocation192_spill] sm:$0xff] }
 0x491   :  { %11597 = vmatprep.subr.bf16.mxu0 %v21731_v55  ;;  %v21732_v50 = vand.u32 4294901760, %v21725_v19  ;;  %v17636_v8 = vpack.c.bf16 %v7954_v61, %v7942_v28  ;;  %v17638_v27 = vpack.c.bf16 %v8858_v15, %v8846_v22  ;;  %v17642_v55 = vpack.c.bf16 %v8876_v3, %v8864_v56  ;;  %v21743_v15 = vld [vmem:[#allocation62_spill] sm:$0xff]  ;;  %v21744_v3 = vld [vmem:[#allocation203_spill] sm:$0xff] }
 0x492   :  { %21726 = vst [vmem:[#allocation137_spill] sm:$0xff] %v17618_v7  ;;  %v8887_v1 = vsub.f32 %v21721_v62, %v21727_v63  ;;  %11787 = vmatpush1.bf16.msra.mxu1 %v21730_v4  ;;  %v17634_v63 = vpack.c.bf16 %v8852_v49, %v8840_v34  ;;  %v17640_v4 = vpack.c.bf16 %v7972_v51, %v7960_v41  ;;  %v21738_v49 = vand.u32 4294901760, %v21728_v0 }
 0x493   :  { %v8899_v58 = vsub.f32 %v21725_v19, %v21732_v50  ;;  %11789 = vmatprep.subr.bf16.mxu1 %v21735_v23  ;;  %v17644_v48 = vpack.c.bf16 %v7978_v39, %v7966_v37  ;;  %v17646_v62 = vpack.c.bf16 %v8882_v44, %v8870_v57  ;;  %v17649_v50 = vsub.f32 %v7702_v43, %v17618_v7  ;;  %v21740_v37 = vld [vmem:[#allocation188_spill] sm:$0xff]  ;;  %v21751_v39 = vld [vmem:[#allocation78_spill] sm:$0xff] }
 0x494   :  { %11599 = vmatpush1.bf16.msra.mxu0 %v21737_v6  ;;  %v8888_v54 = vand.u32 4294901760, %v8887_v1  ;;  %v17655_v28 = vsub.f32 %v21728_v0, %v21738_v49  ;;  %v21739_v41 = vand.u32 4294901760, %v21729_v17  ;;  %v17665_v44 = vpack.c.bf16 %v7996_v10, %v7984_v11  ;;  %v21745_v49 = vld [vmem:[#allocation76_spill] sm:$0xff]  ;;  %v21746_v10 = vld [vmem:[#allocation222_spill] sm:$0xff]  ;;  %v21750_v1 = vld [vmem:[#allocation69_spill] sm:$0xff] }
 0x495   :  { %21736 = vst [vmem:[#allocation140_spill] sm:$0xff] %v17649_v50  ;;  %11601 = vmatprep.subr.bf16.mxu0 %v17396_v26  ;;  %v8900_v57 = vand.u32 4294901760, %v8899_v58  ;;  %v21741_v43 = vand.u32 4294901760, %v21733_v16  ;;  %v21742_v22 = vand.u32 4294901760, %v21734_v47  ;;  %v21752_v6 = vand.u32 4294901760, %v17445_v52 }
 0x496   :  { %v17660_v56 = vsub.f32 %v21729_v17, %v21739_v41  ;;  %11791 = vmatpush1.bf16.msra.mxu1 %v17390_v46  ;;  %v21747_v41 = vld [vmem:[#allocation83_spill] sm:$0xff]  ;;  %v17686_v46 = vand.u32 4294901760, %v17649_v50  ;;  %v21756_v11 = vand.u32 4294901760, %v21744_v3 }
 0x497   :  { %v17670_v34 = vsub.f32 %v21733_v16, %v21741_v43  ;;  %v17675_v61 = vsub.f32 %v21734_v47, %v21742_v22  ;;  %11793 = vmatprep.subr.bf16.mxu1 %v17403_v29  ;;  %v21749_v22 = vand.u32 4294901760, %v21740_v37  ;;  %v21755_v29 = vand.u32 4294901760, %v21743_v15 }
 0x498   :  { %21748 = vst [vmem:[#allocation146_spill] sm:$0xff] %v17686_v46  ;;  %11603 = vmatpush1.bf16.msra.mxu0 %v17414_v36  ;;  %v8911_v26 = vsub.f32 %v21744_v3, %v21756_v11  ;;  %v21757_v43 = vand.u32 4294901760, %v21745_v49  ;;  %v7900_v11 = vsub.f32 %v17649_v50, %v17686_v46  ;;  %v21763_v3 = vand.u32 4294901760, %v17507_v21 }
 0x499   :  { %v8007_v51 = vsub.f32 %v21740_v37, %v21749_v22  ;;  %11605 = vmatprep.subr.bf16.mxu0 %v17433_v42  ;;  %v21753_v22 = vand.u32 4294901760, %v17480_v5  ;;  %v8019_v58 = vsub.f32 %v21743_v15, %v21755_v29  ;;  %v21758_v42 = vand.u32 4294901760, %v17495_v20 }
 0x49a   :  { %11795 = vmatpush1.bf16.msra.mxu1 %v17418_v9  ;;  %v8923_v36 = vsub.f32 %v21745_v49, %v21757_v43  ;;  %v21759_v9 = vand.u32 4294901760, %v17497_v40  ;;  %v21762_v29 = vand.u32 4294901760, %v21747_v41  ;;  %v21764_v43 = vand.u32 4294901760, %v17515_v60 }
 0x49b   :  { %v17704_v23 = vpack.c.bf16 %v21753_v22, %v21752_v6  ;;  %11797 = vmatprep.subr.bf16.mxu1 %v17478_v12  ;;  %v21761_v22 = vand.u32 4294901760, %v21746_v10  ;;  %v8002_v46 = vand.u32 4294901760, %v17660_v56  ;;  %v7901_v50 = vand.u32 4294901760, %v7900_v11 }
 0x49c   :  { %v17720_v6 = vpack.c.bf16 %v21759_v9, %v21758_v42  ;;  %v8025_v12 = vsub.f32 %v21747_v41, %v21762_v29  ;;  %v17734_v49 = vpack.c.bf16 %v21764_v43, %v21763_v3  ;;  %11607 = vmatpush1.bf16.msra.mxu0 %v17485_v33  ;;  %v17737_v9 = vpack.c.bf16 %v8900_v57, %v8888_v54  ;;  %v21767_v29 = vld [vmem:[#allocation207_spill] sm:$0xff]  ;;  %v21769_v57 = vld [vmem:[#allocation85_spill] sm:$0xff] }
 0x49d   :  { %21754 = vst [vmem:[#allocation149_spill] sm:$0xff] %v17704_v23  ;;  %v8013_v23 = vsub.f32 %v21746_v10, %v21761_v22  ;;  %v7990_v42 = vand.u32 4294901760, %v17655_v28  ;;  %v21766_v22 = vand.u32 4294901760, %v21750_v1  ;;  %11609 = vmatprep.subr.bf16.mxu0 %v17517_v24  ;;  %v8894_v3 = vand.u32 4294901760, %v17670_v34 }
 0x49e   :  { %21760 = vst [vmem:[#allocation152_spill] sm:$0xff] %v17720_v6  ;;  %21765 = vst [vmem:[#allocation89_spill] sm:$0xff] %v17734_v49  ;;  %11799 = vmatpush1.bf16.msra.mxu1 %v17505_v30  ;;  %v21768_v43 = vand.u32 4294901760, %v21751_v39  ;;  %v19350_v28 = vand.u32 4294901760, %v21769_v57  ;;  %v8008_v49 = vand.u32 4294901760, %v8007_v51  ;;  %v8020_v41 = vand.u32 4294901760, %v8019_v58 }
 0x49f   :  { %v8917_v6 = vsub.f32 %v21750_v1, %v21766_v22  ;;  %11801 = vmatprep.subr.bf16.mxu1 %v17519_v35  ;;  %v8906_v22 = vand.u32 4294901760, %v17675_v61  ;;  %v8912_v33 = vand.u32 4294901760, %v8911_v26  ;;  %7891 = vmatmul.mubr.f32.vlgmr.msra.gmra.mrb[8].mxu0 %v17523_v32  ;;  %v8924_v24 = vand.u32 4294901760, %v8923_v36  ;;  %v21771_v61 = vld [vmem:[#allocation32_spill] sm:$0xff]  ;;  %v21772_v58 = vld [vmem:[#allocation38_spill] sm:$0xff] }
 0x4a0   :  { %v8929_v54 = vsub.f32 %v21751_v39, %v21768_v43  ;;  %v8014_v30 = vand.u32 4294901760, %v8013_v23  ;;  %v8026_v56 = vand.u32 4294901760, %v8025_v12  ;;  %11611 = vmatpush1.bf16.msra.mxu0 %v17525_v25  ;;  %v21770_v43 = vand.u32 4294901760, %v21767_v29  ;;  %v21775_v26 = vld [vmem:[#allocation154_spill] sm:$0xff]  ;;  %7896 = vmatprep.mubr.f32.mxu0 %v21694_v53 }
 0x4a1   :  { %8795 = vmatmul.mubr.f32.vlgmr.msra.gmra.mrb[8].mxu1 %v17523_v32  ;;  %v8918_v34 = vand.u32 4294901760, %v8917_v6  ;;  %11613 = vmatprep.subr.bf16.mxu0 %v17574_v59  ;;  %v8043_v23 = vsub.f32 %v21769_v57, %v19350_v28  ;;  %v19354_v36 = vand.u32 4294901760, %v17383_v31  ;;  %v21773_v32 = vld [vmem:[#allocation190_spill] sm:$0xff]  ;;  %v11622_v6 = vpack.c.bf16 %v8002_v46, %v7990_v42 }
 0x4a2   :  { %v17760_v35 = vsub.f32 %v21767_v29, %v21770_v43  ;;  %11803 = vmatpush1.bf16.msra.mxu1 %v17527_v14  ;;  %v8930_v12 = vand.u32 4294901760, %v8929_v54  ;;  %v19353_v25 = vand.u32 4294901760, %v21773_v32  ;;  %v11814_v11 = vpack.c.bf16 %v8906_v22, %v8894_v3  ;;  %v21774_v43 = vld [vmem:[#allocation74_spill] sm:$0xff]  ;;  %8800 = vmatprep.mubr.f32.mxu1 %v21694_v53 }
 0x4a3   :  { %11805 = vmatprep.subr.bf16.mxu1 %v17634_v63  ;;  %v19352_v51 = vand.u32 4294901760, %v21774_v43  ;;  %v19351_v29 = vand.u32 4294901760, %v21775_v26  ;;  %v11624_v14 = vpack.c.bf16 %v8020_v41, %v8008_v49  ;;  %v11816_v59 = vpack.c.bf16 %v8924_v24, %v8912_v33  ;;  %7902 = vmatmul.mubr.f32.gmra.mrb[10].mxu0 %v7901_v50  ;;  %v21782_v24 = vld [vmem:[#allocation199_spill] sm:$0xff] }
 0x4a4   :  { %v19355_v54 = vand.u32 4294901760, %v17398_v38  ;;  %v19356_v28 = vand.u32 4294901760, %v17401_v2  ;;  %11615 = vmatpush1.bf16.msra.mxu0 %v17636_v8  ;;  %v11626_v63 = vpack.c.bf16 %v8026_v56, %v8014_v30  ;;  %v8032_v46 = vand.u32 4294901760, %v17760_v35  ;;  %8132 = vmatprep.mubr.f32.mxu0 %v21694_v53 }
 0x4a5   :  { %v21776_v42 = vand.u32 4294901760, %v21771_v61  ;;  %v21777_v22 = vand.u32 4294901760, %v21772_v58  ;;  %8806 = vmatmul.mubr.f32.gmra.mrb[10].mxu1 %v7901_v50  ;;  %11617 = vmatprep.subr.bf16.mxu0 %v17640_v4  ;;  %v11818_v49 = vpack.c.bf16 %v8930_v12, %v8918_v34  ;;  %v8044_v41 = vand.u32 4294901760, %v8043_v23  ;;  %v21778_v34 = vld [vmem:[#allocation160_spill] sm:$0xff]  ;;  %v21779_v12 = vld [vmem:[#allocation191_spill] sm:$0xff] }
 0x4a6   :  { %11807 = vmatpush1.bf16.msra.mxu1 %v17638_v27  ;;  %v8037_v30 = vsub.f32 %v17383_v31, %v19354_v36  ;;  %v8049_v8 = vsub.f32 %v21773_v32, %v19353_v25  ;;  %v8941_v50 = vsub.f32 %v21774_v43, %v19352_v51  ;;  %v8953_v27 = vsub.f32 %v21775_v26, %v19351_v29  ;;  %v21780_v29 = vld [vmem:[#allocation194_spill] sm:$0xff]  ;;  %v21781_v25 = vld [vmem:[#allocation193_spill] sm:$0xff] }
 0x4a7   :  { %v8935_v3 = vsub.f32 %v21771_v61, %v21776_v42  ;;  %v8947_v33 = vsub.f32 %v21772_v58, %v21777_v22  ;;  %11809 = vmatprep.subr.bf16.mxu1 %v17642_v55  ;;  %v8055_v56 = vsub.f32 %v17398_v38, %v19355_v54  ;;  %v8067_v55 = vsub.f32 %v17401_v2, %v19356_v28 }
 0x4a8   :  { %9036 = vmatprep.mubr.f32.mxu1 %v21694_v53  ;;  %11619 = vmatpush1.bf16.msra.mxu0 %v17644_v48  ;;  %v8038_v54 = vand.u32 4294901760, %v8037_v30  ;;  %v8050_v28 = vand.u32 4294901760, %v8049_v8  ;;  %v8942_v4 = vand.u32 4294901760, %v8941_v50  ;;  %v8954_v48 = vand.u32 4294901760, %v8953_v27 }
 0x4a9   :  { %v8936_v42 = vand.u32 4294901760, %v8935_v3  ;;  %v8948_v22 = vand.u32 4294901760, %v8947_v33  ;;  %11621 = vmatprep.subr.bf16.mxu0 %v17665_v44  ;;  %v21783_v3 = vand.u32 4294901760, %v17405_v45  ;;  %v21784_v36 = vand.u32 4294901760, %v17407_v13 }
 0x4aa   :  { %11811 = vmatpush1.bf16.msra.mxu1 %v17646_v62  ;;  %v8056_v51 = vand.u32 4294901760, %v8055_v56  ;;  %v8068_v44 = vand.u32 4294901760, %v8067_v55  ;;  %v21785_v30 = vand.u32 4294901760, %v21778_v34  ;;  %v21786_v23 = vand.u32 4294901760, %v21779_v12 }
 0x4ab   :  { %11813 = vmatprep.subr.bf16.mxu1 %v17737_v9  ;;  %v8959_v33 = vsub.f32 %v17405_v45, %v21783_v3  ;;  %v8971_v62 = vsub.f32 %v17407_v13, %v21784_v36  ;;  %v11628_v50 = vpack.c.bf16 %v8044_v41, %v8032_v46  ;;  %v11820_v27 = vpack.c.bf16 %v8948_v22, %v8936_v42 }
 0x4ac   :  { %v8061_v8 = vsub.f32 %v21778_v34, %v21785_v30  ;;  %v8073_v9 = vsub.f32 %v21779_v12, %v21786_v23  ;;  %11623 = vmatpush1.bf16.msra.mxu0 %v11622_v6  ;;  %v21787_v35 = vand.u32 4294901760, %v21780_v29  ;;  %v21788_v45 = vand.u32 4294901760, %v21781_v25 }
 0x4ad   :  { %11625 = vmatprep.subr.bf16.mxu0 %v11624_v14  ;;  %v11630_v56 = vpack.c.bf16 %v8050_v28, %v8038_v54  ;;  %v21789_v55 = vand.u32 4294901760, %v17441_v18  ;;  %v21790_v23 = vand.u32 4294901760, %v21782_v24  ;;  %v8960_v46 = vand.u32 4294901760, %v8959_v33 }
 0x4ae   :  { %v8965_v3 = vsub.f32 %v21780_v29, %v21787_v35  ;;  %v8977_v36 = vsub.f32 %v21781_v25, %v21788_v45  ;;  %11815 = vmatpush1.bf16.msra.mxu1 %v11814_v11  ;;  %v8972_v41 = vand.u32 4294901760, %v8971_v62  ;;  %v21791_v35 = vand.u32 4294901760, %v17445_v52 }
 0x4af   :  { %v8079_v30 = vsub.f32 %v17441_v18, %v21789_v55  ;;  %v8091_v6 = vsub.f32 %v21782_v24, %v21790_v23  ;;  %11817 = vmatprep.subr.bf16.mxu1 %v11816_v59  ;;  %v21792_v45 = vand.u32 4294901760, %v17480_v5  ;;  %v11822_v28 = vpack.c.bf16 %v8954_v48, %v8942_v4 }
 0x4b0   :  { %v8983_v42 = vsub.f32 %v17445_v52, %v21791_v35  ;;  %v11632_v14 = vpack.c.bf16 %v8068_v44, %v8056_v51  ;;  %v8062_v54 = vand.u32 4294901760, %v8061_v8  ;;  %v8074_v22 = vand.u32 4294901760, %v8073_v9  ;;  %11627 = vmatpush1.bf16.msra.mxu0 %v11626_v63 }
 0x4b1   :  { %v8995_v11 = vsub.f32 %v17480_v5, %v21792_v45  ;;  %v8966_v55 = vand.u32 4294901760, %v8965_v3  ;;  %v8978_v18 = vand.u32 4294901760, %v8977_v36  ;;  %v21793_v23 = vand.u32 4294901760, %v17495_v20  ;;  %11629 = vmatprep.subr.bf16.mxu0 %v11628_v50 }
 0x4b2   :  { %v21794_v33 = vand.u32 4294901760, %v17497_v40  ;;  %11819 = vmatpush1.bf16.msra.mxu1 %v11818_v49  ;;  %v8080_v35 = vand.u32 4294901760, %v8079_v30  ;;  %v8092_v52 = vand.u32 4294901760, %v8091_v6  ;;  %v21795_v4 = vand.u32 4294901760, %v17507_v21 }
 0x4b3   :  { %v8085_v59 = vsub.f32 %v17495_v20, %v21793_v23  ;;  %v21796_v63 = vand.u32 4294901760, %v17515_v60  ;;  %11821 = vmatprep.subr.bf16.mxu1 %v11820_v27  ;;  %v11824_v44 = vpack.c.bf16 %v8972_v41, %v8960_v46  ;;  %v8984_v8 = vand.u32 4294901760, %v8983_v42  ;;  %v21797_v46 = vld [vmem:[#allocation205_spill] sm:$0xff] }
 0x4b4   :  { %v8097_v62 = vsub.f32 %v17497_v40, %v21794_v33  ;;  %v8989_v51 = vsub.f32 %v17507_v21, %v21795_v4  ;;  %v8996_v9 = vand.u32 4294901760, %v8995_v11  ;;  %11631 = vmatpush1.bf16.msra.mxu0 %v11630_v56  ;;  %v11634_v3 = vpack.c.bf16 %v8074_v22, %v8062_v54  ;;  %v21798_v41 = vld [vmem:[#allocation109_spill] sm:$0xff]  ;;  %v21800_v11 = vld [vmem:[#allocation155_spill] sm:$0xff]  ;;  %v21804_v22 = vld [vmem:[#allocation54_spill] sm:$0xff] }
 0x4b5   :  { %v9001_v48 = vsub.f32 %v17515_v60, %v21796_v63  ;;  %v8086_v36 = vand.u32 4294901760, %v8085_v59  ;;  %11633 = vmatprep.subr.bf16.mxu0 %v11632_v14  ;;  %v11826_v49 = vpack.c.bf16 %v8978_v18, %v8966_v55  ;;  %v11636_v50 = vpack.c.bf16 %v8092_v52, %v8080_v35  ;;  %v21799_v56 = vld [vmem:[#allocation117_spill] sm:$0xff]  ;;  %v21802_v18 = vld [vmem:[#allocation167_spill] sm:$0xff] }
 0x4b6   :  { %v8098_v45 = vand.u32 4294901760, %v8097_v62  ;;  %11823 = vmatpush1.bf16.msra.mxu1 %v11822_v28  ;;  %v8990_v30 = vand.u32 4294901760, %v8989_v51  ;;  %v11828_v23 = vpack.c.bf16 %v8996_v9, %v8984_v8  ;;  %v11640_v42 = vpack.c.bf16 %v21798_v41, %v21797_v46  ;;  %v21801_v28 = vld [vmem:[#allocation158_spill] sm:$0xff]  ;;  %v21803_v14 = vld [vmem:[#allocation37_spill] sm:$0xff]  ;;  %v21805_v59 = vld [vmem:[#allocation59_spill] sm:$0xff] }
 0x4b7   :  { %v9002_v6 = vand.u32 4294901760, %v9001_v48  ;;  %11825 = vmatprep.subr.bf16.mxu1 %v11824_v44  ;;  %v11832_v54 = vpack.c.bf16 %v21800_v11, %v21799_v56  ;;  %v11642_v52 = vpack.c.bf16 %v21802_v18, %v21801_v28  ;;  %v11834_v55 = vpack.c.bf16 %v21804_v22, %v21803_v14  ;;  %v21806_v62 = vld [vmem:[#allocation95_spill] sm:$0xff]  ;;  %v21808_v51 = vld [vmem:[#allocation100_spill] sm:$0xff]  ;;  %v21809_v48 = vld [vmem:[#allocation73_spill] sm:$0xff] }
 0x4b8   :  { %11635 = vmatpush1.bf16.msra.mxu0 %v11634_v3  ;;  %v11638_v33 = vpack.c.bf16 %v8098_v45, %v8086_v36  ;;  %v11644_v35 = vpack.c.bf16 %v21806_v62, %v21805_v59  ;;  %v21807_v4 = vld [vmem:[#allocation219_spill] sm:$0xff]  ;;  %v21810_v44 = vld [vmem:[#allocation237_spill] sm:$0xff] }
 0x4b9   :  { %11637 = vmatprep.subr.bf16.mxu0 %v11636_v50  ;;  %v11830_v27 = vpack.c.bf16 %v9002_v6, %v8990_v30  ;;  %v11836_v63 = vpack.c.bf16 %v21808_v51, %v21807_v4  ;;  %v21811_v8 = vld [vmem:[#allocation103_spill] sm:$0xff]  ;;  %v21815_v50 = vld [vmem:[#allocation166_spill] sm:$0xff] }
 0x4ba   :  { %11827 = vmatpush1.bf16.msra.mxu1 %v11826_v49  ;;  %v11646_v9 = vpack.c.bf16 %v21811_v8, %v21810_v44  ;;  %v21812_v3 = vld [vmem:[#allocation111_spill] sm:$0xff]  ;;  %v21814_v49 = vld [vmem:[#allocation56_spill] sm:$0xff] }
 0x4bb   :  { %11829 = vmatprep.subr.bf16.mxu1 %v11828_v23  ;;  %v21813_v36 = vld [vmem:[#allocation75_spill] sm:$0xff]  ;;  %v11648_v30 = vpack.c.bf16 %v21815_v50, %v21814_v49 }
 0x4bc   :  { %11639 = vmatpush1.bf16.msra.mxu0 %v11638_v33  ;;  %v11838_v45 = vpack.c.bf16 %v21813_v36, %v21812_v3  ;;  %v21816_v6 = vld [vmem:[#allocation171_spill] sm:$0xff] }
 0x4bd   :  { %11641 = vmatprep.subr.bf16.mxu0 %v11640_v42  ;;  %v21817_v23 = vld [vmem:[#allocation231_spill] sm:$0xff]  ;;  %v21819_v42 = vld [vmem:[#allocation52_spill] sm:$0xff] }
 0x4be   :  { %11831 = vmatpush1.bf16.msra.mxu1 %v11830_v27  ;;  %v11840_v33 = vpack.c.bf16 %v21817_v23, %v21816_v6  ;;  %v21818_v27 = vld [vmem:[#allocation234_spill] sm:$0xff]  ;;  %v21824_v6 = vld [vmem:[#allocation168_spill] sm:$0xff] }
 0x4bf   :  { %11833 = vmatprep.subr.bf16.mxu1 %v11832_v54  ;;  %8134 = vmatmul.mubr.f32.vlgmr.msra.gmra.mrb[8].mxu0 %v21809_v48  ;;  %v11650_v54 = vpack.c.bf16 %v21819_v42, %v21818_v27  ;;  %v11844_v50 = vpack.c.bf16 %v21725_v19, %v21824_v6  ;;  %v21827_v6 = vld [vmem:[#allocation83_spill] sm:$0xff] }
 0x4c0   :  { %11643 = vmatpush1.bf16.msra.mxu0 %v11642_v52  ;;  %8139 = vmatprep.mubr.f32.mxu0 %v21694_v53  ;;  %v21820_v52 = vld [vmem:[#allocation57_spill] sm:$0xff] }
 0x4c1   :  { %9038 = vmatmul.mubr.f32.vlgmr.msra.gmra.mrb[8].mxu1 %v21809_v48  ;;  %11645 = vmatprep.subr.bf16.mxu0 %v11644_v35  ;;  %v21823_v48 = vld [vmem:[#allocation86_spill] sm:$0xff] }
 0x4c2   :  { %11835 = vmatpush1.bf16.msra.mxu1 %v11834_v55  ;;  %9043 = vmatprep.mubr.f32.mxu1 %v21694_v53  ;;  %v21821_v55 = vld [vmem:[#allocation63_spill] sm:$0xff] }
 0x4c3   :  { %11837 = vmatprep.subr.bf16.mxu1 %v11836_v63  ;;  %8141 = vmatmul.mubr.f32.gmra.mrb[10].mxu0 %v17618_v7  ;;  %v11842_v35 = vpack.c.bf16 %v21821_v55, %v21820_v52  ;;  %v21822_v63 = vld [vmem:[#allocation65_spill] sm:$0xff] }
 0x4c4   :  { %11647 = vmatpush1.bf16.msra.mxu0 %v11646_v9  ;;  %v11652_v23 = vpack.c.bf16 %v21823_v48, %v21822_v63  ;;  %8275 = vmatprep.mubr.f32.mxu0 %v21694_v53  ;;  %v11654_v9 = vpack.c.bf16 %v21729_v17, %v21728_v0  ;;  %v11658_v48 = vpack.c.bf16 %v21827_v6, %v21746_v10 }
 0x4c5   :  { %9045 = vmatmul.mubr.f32.gmra.mrb[10].mxu1 %v17618_v7  ;;  %11649 = vmatprep.subr.bf16.mxu0 %v11648_v30  ;;  %v11656_v30 = vpack.c.bf16 %v21743_v15, %v21740_v37  ;;  %v21826_v7 = vld [vmem:[#allocation76_spill] sm:$0xff]  ;;  %v11852_v15 = vpack.c.bf16 %v21772_v58, %v21771_v61 }
 0x4c6   :  { %11839 = vmatpush1.bf16.msra.mxu1 %v11838_v45  ;;  %9179 = vmatprep.mubr.f32.mxu1 %v21694_v53  ;;  %v11846_v45 = vpack.c.bf16 %v21734_v47, %v21733_v16 }
 0x4c7   :  { %11841 = vmatprep.subr.bf16.mxu1 %v11840_v33  ;;  %v21825_v33 = vld [vmem:[#allocation203_spill] sm:$0xff] }
 0x4c8   :  { %11651 = vmatpush1.bf16.msra.mxu0 %v11650_v54  ;;  %v11848_v19 = vpack.c.bf16 %v21826_v7, %v21825_v33  ;;  %v11850_v54 = vpack.c.bf16 %v21751_v39, %v21750_v1 }
 0x4c9   :  { %11653 = vmatprep.subr.bf16.mxu0 %v11652_v23  ;;  %v21828_v23 = vld [vmem:[#allocation207_spill] sm:$0xff] }
 0x4ca   :  { %11843 = vmatpush1.bf16.msra.mxu1 %v11842_v35  ;;  %v11660_v35 = vpack.c.bf16 %v21769_v57, %v21828_v23 }
 0x4cb   :  { %11845 = vmatprep.subr.bf16.mxu1 %v11844_v50  ;;  %v11662_v50 = vpack.c.bf16 %v21773_v32, %v17383_v31 }
 0x4cc   :  { %11655 = vmatpush1.bf16.msra.mxu0 %v11654_v9  ;;  %v11854_v9 = vpack.c.bf16 %v21775_v26, %v21774_v43  ;;  %v21831_v26 = vld [vmem:[#allocation198_spill] sm:$0xff] }
 0x4cd   :  { %11657 = vmatprep.subr.bf16.mxu0 %v11656_v30  ;;  %v21829_v30 = vld [vmem:[#allocation157_spill] sm:$0xff] }
 0x4ce   :  { %11847 = vmatpush1.bf16.msra.mxu1 %v11846_v45  ;;  %v11664_v45 = vpack.c.bf16 %v17401_v2, %v17398_v38  ;;  %v11856_v57 = vpack.c.bf16 %v17407_v13, %v21829_v30  ;;  %v11860_v2 = vpack.c.bf16 %v17480_v5, %v21831_v26  ;;  %v21836_v5 = vld [vmem:[#allocation55_spill] sm:$0xff]  ;;  %v21842_v26 = vld [vmem:[#allocation165_spill] sm:$0xff] }
 0x4cf   :  { %11849 = vmatprep.subr.bf16.mxu1 %v11848_v19  ;;  %v11666_v19 = vpack.c.bf16 %v21779_v12, %v21778_v34 }
 0x4d0   :  { %11659 = vmatpush1.bf16.msra.mxu0 %v11658_v48  ;;  %v11858_v48 = vpack.c.bf16 %v21781_v25, %v21780_v29 }
 0x4d1   :  { %11661 = vmatprep.subr.bf16.mxu0 %v11660_v35 }
 0x4d2   :  { %11851 = vmatpush1.bf16.msra.mxu1 %v11850_v54  ;;  %v21830_v54 = vld [vmem:[#allocation50_spill] sm:$0xff] }
 0x4d3   :  { %11853 = vmatprep.subr.bf16.mxu1 %v11852_v15  ;;  %v11668_v35 = vpack.c.bf16 %v21782_v24, %v21830_v54  ;;  %v11670_v15 = vpack.c.bf16 %v17497_v40, %v17495_v20  ;;  %v21835_v24 = vld [vmem:[#allocation53_spill] sm:$0xff]  ;;  %v21837_v20 = vld [vmem:[#allocation200_spill] sm:$0xff] }
 0x4d4   :  { %11663 = vmatpush1.bf16.msra.mxu0 %v11662_v50  ;;  %v11862_v50 = vpack.c.bf16 %v17515_v60, %v17507_v21  ;;  %v21838_v40 = vld [vmem:[#allocation216_spill] sm:$0xff] }
 0x4d5   :  { %11665 = vmatprep.subr.bf16.mxu0 %v11664_v45  ;;  %v21833_v45 = vld [vmem:[#allocation218_spill] sm:$0xff]  ;;  %v21840_v21 = vld [vmem:[#allocation236_spill] sm:$0xff] }
 0x4d6   :  { %11855 = vmatpush1.bf16.msra.mxu1 %v11854_v9  ;;  %v21832_v9 = vld [vmem:[#allocation215_spill] sm:$0xff]  ;;  %v21841_v60 = vld [vmem:[#allocation120_spill] sm:$0xff] }
 0x4d7   :  { %11857 = vmatprep.subr.bf16.mxu1 %v11856_v57  ;;  %v21834_v57 = vld [vmem:[#allocation196_spill] sm:$0xff] }
 0x4d8   :  { %11667 = vmatpush1.bf16.msra.mxu0 %v11666_v19  ;;  %v21843_v19 = vld [vmem:[#allocation229_spill] sm:$0xff] }
 0x4d9   :  { %11669 = vmatprep.subr.bf16.mxu0 %v11668_v35  ;;  %v21845_v35 = vld [vmem:[#allocation61_spill] sm:$0xff] }
 0x4da   :  { %11859 = vmatpush1.bf16.msra.mxu1 %v11858_v48  ;;  %v21844_v48 = vld [vmem:[#allocation233_spill] sm:$0xff] }
 0x4db   :  { %11861 = vmatprep.subr.bf16.mxu1 %v11860_v2  ;;  %v21839_v2 = vld [vmem:[#allocation140_spill] sm:$0xff] }
 0x4dc   :  { %11671 = vmatpush1.bf16.msra.mxu0 %v11670_v15  ;;  %v21846_v15 = vld [vmem:[#allocation77_spill] sm:$0xff] }
 0x4dd   :  { %11673 = vmatprep.subr.bf16.mxu0 %v21832_v9 }
 0x4de   :  { %11863 = vmatpush1.bf16.msra.mxu1 %v11862_v50  ;;  %v21847_v50 = vld [vmem:[#allocation88_spill] sm:$0xff] }
 0x4df   :  { %11865 = vmatprep.subr.bf16.mxu1 %v21833_v45  ;;  %8278 = vmatmul.mubr.f32.vlgmr.msra.gmra.mrb[8].mxu0 %v21834_v57 }
 0x4e0   :  { %11675 = vmatpush1.bf16.msra.mxu0 %v21835_v24  ;;  %8283 = vmatprep.mubr.f32.mxu0 %v21694_v53 }
 0x4e1   :  { %9182 = vmatmul.mubr.f32.vlgmr.msra.gmra.mrb[8].mxu1 %v21834_v57  ;;  %11677 = vmatprep.subr.bf16.mxu0 %v21837_v20  ;;  %v21848_v57 = vld [vmem:[#allocation116_spill] sm:$0xff] }
 0x4e2   :  { %11867 = vmatpush1.bf16.msra.mxu1 %v21836_v5  ;;  %9187 = vmatprep.mubr.f32.mxu1 %v21694_v53  ;;  %v21868_v20 = vld [vmem:[#allocation80_spill] sm:$0xff] }
 0x4e3   :  { %11869 = vmatprep.subr.bf16.mxu1 %v21838_v40  ;;  %8286 = vmatmul.mubr.f32.gmra.mrb[10].mxu0 %v21839_v2  ;;  %v21854_v40 = vld [vmem:[#allocation181_spill] sm:$0xff] }
 0x4e4   :  { %11679 = vmatpush1.bf16.msra.mxu0 %v21840_v21  ;;  %8388 = vmatprep.mubr.f32.mxu0 %v21694_v53  ;;  %v21853_v21 = vld [vmem:[#allocation26_spill] sm:$0xff] }
 0x4e5   :  { %9190 = vmatmul.mubr.f32.gmra.mrb[10].mxu1 %v21839_v2  ;;  %11681 = vmatprep.subr.bf16.mxu0 %v21842_v26  ;;  %v21849_v2 = vld [vmem:[#allocation184_spill] sm:$0xff]  ;;  %v21851_v26 = vld [vmem:[#allocation201_spill] sm:$0xff] }
 0x4e6   :  { %11871 = vmatpush1.bf16.msra.mxu1 %v21841_v60  ;;  %9292 = vmatprep.mubr.f32.mxu1 %v21694_v53  ;;  %v21850_v60 = vld [vmem:[#allocation189_spill] sm:$0xff] }
 0x4e7   :  { %11873 = vmatprep.subr.bf16.mxu1 %v21843_v19  ;;  %v21852_v19 = vld [vmem:[#allocation64_spill] sm:$0xff] }
 0x4e8   :  { %11683 = vmatpush1.bf16.msra.mxu0 %v21844_v48  ;;  %v21855_v48 = vld [vmem:[#allocation179_spill] sm:$0xff] }
 0x4e9   :  { %11685 = vmatprep.subr.bf16.mxu0 %v21846_v15  ;;  %v21857_v15 = vld [vmem:[#allocation150_spill] sm:$0xff] }
 0x4ea   :  { %11875 = vmatpush1.bf16.msra.mxu1 %v21845_v35  ;;  %v21856_v35 = vld [vmem:[#allocation192_spill] sm:$0xff] }
 0x4eb   :  { %11877 = vmatprep.subr.bf16.mxu1 %v21847_v50  ;;  %v21858_v50 = vld [vmem:[#allocation156_spill] sm:$0xff] }
 0x4ec   :  { %11687 = vmatpush1.bf16.msra.mxu0 %v21848_v57  ;;  %v21859_v57 = vld [vmem:[#allocation235_spill] sm:$0xff] }
 0x4ed   :  { %11689 = vmatprep.subr.bf16.mxu0 %v21850_v60  ;;  %v21861_v60 = vld [vmem:[#allocation44_spill] sm:$0xff] }
 0x4ee   :  { %11879 = vmatpush1.bf16.msra.mxu1 %v21849_v2  ;;  %v21860_v2 = vld [vmem:[#allocation162_spill] sm:$0xff] }
 0x4ef   :  { %11881 = vmatprep.subr.bf16.mxu1 %v21851_v26  ;;  %v21862_v26 = vld [vmem:[#allocation122_spill] sm:$0xff] }
 0x4f0   :  { %11691 = vmatpush1.bf16.msra.mxu0 %v21852_v19 }
 0x4f1   :  { %11693 = vmatprep.subr.bf16.mxu0 %v21854_v40  ;;  %v21864_v40 = vand.u32 4294901760, %v21798_v41  ;;  %v21873_v41 = vand.u32 4294901760, %v21804_v22  ;;  %v21880_v22 = vand.u32 4294901760, %v21811_v8  ;;  %v21890_v8 = vld [vmem:[#allocation146_spill] sm:$0xff] }
 0x4f2   :  { %11883 = vmatpush1.bf16.msra.mxu1 %v21853_v21  ;;  %v21863_v21 = vand.u32 4294901760, %v21797_v46  ;;  %v21872_v46 = vand.u32 4294901760, %v21803_v14  ;;  %v21879_v14 = vand.u32 4294901760, %v21810_v44 }
 0x4f3   :  { %11885 = vmatprep.subr.bf16.mxu1 %v21855_v48  ;;  %v21865_v48 = vld [vmem:[#allocation228_spill] sm:$0xff] }
 0x4f4   :  { %11695 = vmatpush1.bf16.msra.mxu0 %v21856_v35  ;;  %v11704_v19 = vpack.c.bf16 %v21864_v40, %v21863_v21  ;;  %v21866_v35 = vand.u32 4294901760, %v21799_v56  ;;  %v11898_v40 = vpack.c.bf16 %v21873_v41, %v21872_v46  ;;  %v21874_v56 = vand.u32 4294901760, %v21805_v59  ;;  %v21888_v41 = vld [vmem:[#allocation231_spill] sm:$0xff] }
 0x4f5   :  { %11697 = vmatprep.subr.bf16.mxu0 %v21858_v50  ;;  %v21881_v59 = vand.u32 4294901760, %v21812_v3  ;;  %v21889_v44 = vand.u32 4294901760, %v21888_v41  ;;  %v21891_v3 = vand.u32 4294901760, %v21818_v27  ;;  %v21912_v41 = vand.u32 4294901760, %v21827_v6 }
 0x4f6   :  { %11887 = vmatpush1.bf16.msra.mxu1 %v21857_v15  ;;  %v21867_v15 = vand.u32 4294901760, %v21800_v11  ;;  %v21875_v11 = vand.u32 4294901760, %v21806_v62  ;;  %v21882_v62 = vand.u32 4294901760, %v21813_v36  ;;  %v21892_v36 = vand.u32 4294901760, %v21819_v42 }
 0x4f7   :  { %11889 = vmatprep.subr.bf16.mxu1 %v21859_v57  ;;  %v21920_v6 = vand.u32 4294901760, %v17383_v31  ;;  %v21929_v31 = vand.u32 4294901760, %v17407_v13  ;;  %v21937_v13 = vld [vmem:[#allocation149_spill] sm:$0xff] }
 0x4f8   :  { %11699 = vmatpush1.bf16.msra.mxu0 %v21860_v2  ;;  %v11896_v50 = vpack.c.bf16 %v21867_v15, %v21866_v35  ;;  %v21869_v2 = vand.u32 4294901760, %v21801_v28  ;;  %v11708_v21 = vpack.c.bf16 %v21875_v11, %v21874_v56  ;;  %v21876_v35 = vand.u32 4294901760, %v21807_v4  ;;  %v21884_v15 = vld [vmem:[#allocation166_spill] sm:$0xff] }
 0x4f9   :  { %11701 = vmatprep.subr.bf16.mxu0 %v21862_v26  ;;  %v21871_v26 = vld [vmem:[#allocation131_spill] sm:$0xff]  ;;  %v21877_v28 = vand.u32 4294901760, %v21808_v51  ;;  %v11902_v4 = vpack.c.bf16 %v21882_v62, %v21881_v59  ;;  %v21883_v51 = vand.u32 4294901760, %v21814_v49  ;;  %v11714_v49 = vpack.c.bf16 %v21892_v36, %v21891_v3 }
 0x4fa   :  { %11891 = vmatpush1.bf16.msra.mxu1 %v21861_v60  ;;  %v21870_v60 = vand.u32 4294901760, %v21802_v18  ;;  %v21894_v11 = vand.u32 4294901760, %v21821_v55  ;;  %v21903_v55 = vand.u32 4294901760, %v21729_v17  ;;  %v21905_v62 = vand.u32 4294901760, %v21734_v47 }
 0x4fb   :  { %11893 = vmatprep.subr.bf16.mxu1 %v21865_v48  ;;  %v11900_v18 = vpack.c.bf16 %v21877_v28, %v21876_v35  ;;  %v21895_v35 = vand.u32 4294901760, %v21822_v63  ;;  %v21896_v28 = vld [vmem:[#allocation86_spill] sm:$0xff]  ;;  %v21904_v63 = vand.u32 4294901760, %v21733_v16  ;;  %v21911_v17 = vand.u32 4294901760, %v21746_v10 }
 0x4fc   :  { %11703 = vmatpush1.bf16.msra.mxu0 %v21868_v20  ;;  %v11706_v57 = vpack.c.bf16 %v21870_v60, %v21869_v2  ;;  %v21878_v60 = vld [vmem:[#allocation221_spill] sm:$0xff]  ;;  %v21913_v47 = vand.u32 4294901760, %v21750_v1  ;;  %v21919_v10 = vand.u32 4294901760, %v21772_v58  ;;  %v21928_v58 = vand.u32 4294901760, %v21829_v30 }
 0x4fd   :  { %11705 = vmatprep.subr.bf16.mxu0 %v11704_v19  ;;  %v11710_v19 = vpack.c.bf16 %v21880_v22, %v21879_v14  ;;  %v21898_v14 = vld [vmem:[#allocation168_spill] sm:$0xff]  ;;  %v21900_v22 = vld [vmem:[#allocation113_spill] sm:$0xff]  ;;  %v11722_v16 = vpack.c.bf16 %v21912_v41, %v21911_v17  ;;  %v21961_v41 = vld [vmem:[#allocation150_spill] sm:$0xff] }
 0x4fe   :  { %11895 = vmatpush1.bf16.msra.mxu1 %v21871_v26  ;;  %v21899_v27 = vand.u32 4294901760, %v21898_v14  ;;  %v21901_v42 = vand.u32 4294901760, %v21900_v22  ;;  %v21932_v14 = vand.u32 4294901760, %v21780_v29  ;;  %v21934_v22 = vand.u32 4294901760, %v21830_v54  ;;  %v21940_v29 = vld [vmem:[#allocation73_spill] sm:$0xff]  ;;  %v21942_v54 = vld [vmem:[#allocation216_spill] sm:$0xff] }
 0x4ff   :  { %11897 = vmatprep.subr.bf16.mxu1 %v11896_v50  ;;  %8392 = vmatmul.mubr.f32.vlgmr.msra.gmra.mrb[8].mxu0 %v21878_v60  ;;  %v21885_v50 = vand.u32 4294901760, %v21884_v15  ;;  %v21907_v15 = vld [vmem:[#allocation62_spill] sm:$0xff]  ;;  %v21960_v17 = vld [vmem:[#allocation192_spill] sm:$0xff] }
 0x500   :  { %11707 = vmatpush1.bf16.msra.mxu0 %v11706_v57  ;;  %v21886_v57 = vld [vmem:[#allocation171_spill] sm:$0xff]  ;;  %8397 = vmatprep.mubr.f32.mxu0 %v21694_v53 }
 0x501   :  { %9296 = vmatmul.mubr.f32.vlgmr.msra.gmra.mrb[8].mxu1 %v21878_v60  ;;  %11709 = vmatprep.subr.bf16.mxu0 %v11708_v21  ;;  %v11712_v2 = vpack.c.bf16 %v21885_v50, %v21883_v51  ;;  %v21887_v46 = vand.u32 4294901760, %v21886_v57  ;;  %v21906_v51 = vand.u32 4294901760, %v21740_v37  ;;  %v21908_v50 = vand.u32 4294901760, %v21907_v15  ;;  %v21954_v15 = vld [vmem:[#allocation189_spill] sm:$0xff] }
 0x502   :  { %11899 = vmatpush1.bf16.msra.mxu1 %v11898_v40  ;;  %9301 = vmatprep.mubr.f32.mxu1 %v21694_v53  ;;  %v21893_v40 = vand.u32 4294901760, %v21820_v52  ;;  %v21902_v52 = vand.u32 4294901760, %v21728_v0  ;;  %v21909_v57 = vand.u32 4294901760, %v21825_v33  ;;  %v21910_v0 = vand.u32 4294901760, %v21826_v7 }
 0x503   :  { %11901 = vmatprep.subr.bf16.mxu1 %v11900_v18  ;;  %v11904_v56 = vpack.c.bf16 %v21889_v44, %v21887_v46  ;;  %8401 = vmatmul.mubr.f32.gmra.mrb[10].mxu0 %v21890_v8  ;;  %v21897_v18 = vand.u32 4294901760, %v21896_v28  ;;  %v21914_v37 = vand.u32 4294901760, %v21751_v39  ;;  %v21918_v7 = vand.u32 4294901760, %v21771_v61 }
 0x504   :  { %11711 = vmatpush1.bf16.msra.mxu0 %v11710_v19  ;;  %v11906_v21 = vpack.c.bf16 %v21894_v11, %v21893_v40  ;;  %v11908_v19 = vpack.c.bf16 %v21901_v42, %v21899_v27  ;;  %8567 = vmatprep.mubr.f32.mxu0 %v21694_v53  ;;  %v11718_v59 = vpack.c.bf16 %v21903_v55, %v21902_v52  ;;  %v21922_v39 = vand.u32 4294901760, %v21774_v43  ;;  %v21935_v42 = vld [vmem:[#allocation199_spill] sm:$0xff]  ;;  %v21943_v52 = vld [vmem:[#allocation137_spill] sm:$0xff] }
 0x505   :  { %9305 = vmatmul.mubr.f32.gmra.mrb[10].mxu1 %v21890_v8  ;;  %11713 = vmatprep.subr.bf16.mxu0 %v11712_v2  ;;  %v11716_v60 = vpack.c.bf16 %v21897_v18, %v21895_v35  ;;  %v11720_v2 = vpack.c.bf16 %v21908_v50, %v21906_v51  ;;  %v11912_v46 = vpack.c.bf16 %v21910_v0, %v21909_v57  ;;  %v21916_v8 = vld [vmem:[#allocation85_spill] sm:$0xff]  ;;  %v21926_v35 = vld [vmem:[#allocation79_spill] sm:$0xff]  ;;  %v21936_v30 = vand.u32 4294901760, %v21935_v42  ;;  %v21953_v51 = vld [vmem:[#allocation184_spill] sm:$0xff] }
 0x506   :  { %11903 = vmatpush1.bf16.msra.mxu1 %v11902_v4  ;;  %9471 = vmatprep.mubr.f32.mxu1 %v21694_v53  ;;  %v11910_v4 = vpack.c.bf16 %v21905_v62, %v21904_v63  ;;  %v11914_v44 = vpack.c.bf16 %v21914_v37, %v21913_v47  ;;  %v21917_v33 = vand.u32 4294901760, %v21916_v8  ;;  %v11916_v36 = vpack.c.bf16 %v21919_v10, %v21918_v7  ;;  %v21947_v55 = vld [vmem:[#allocation229_spill] sm:$0xff]  ;;  %v21951_v62 = vld [vmem:[#allocation88_spill] sm:$0xff]  ;;  %v21957_v57 = vld [vmem:[#allocation26_spill] sm:$0xff] }
 0x507   :  { %11905 = vmatprep.subr.bf16.mxu1 %v11904_v56  ;;  %v21915_v56 = vand.u32 4294901760, %v21828_v23  ;;  %v21923_v23 = vld [vmem:[#allocation154_spill] sm:$0xff]  ;;  %v21927_v61 = vand.u32 4294901760, %v21926_v35  ;;  %v11920_v18 = vpack.c.bf16 %v21929_v31, %v21928_v58  ;;  %v21950_v63 = vld [vmem:[#allocation77_spill] sm:$0xff]  ;;  %v21963_v47 = vld [vmem:[#allocation235_spill] sm:$0xff] }
 0x508   :  { %11715 = vmatpush1.bf16.msra.mxu0 %v11714_v49  ;;  %v21921_v49 = vand.u32 4294901760, %v21773_v32  ;;  %v21924_v40 = vand.u32 4294901760, %v21923_v23  ;;  %v21930_v32 = vand.u32 4294901760, %v21778_v34  ;;  %v21938_v34 = vld [vmem:[#allocation152_spill] sm:$0xff]  ;;  %v21955_v50 = vld [vmem:[#allocation201_spill] sm:$0xff]  ;;  %v21964_v37 = vld [vmem:[#allocation162_spill] sm:$0xff] }
 0x509   :  { %11717 = vmatprep.subr.bf16.mxu0 %v11716_v60  ;;  %v11724_v3 = vpack.c.bf16 %v21917_v33, %v21915_v56  ;;  %v21931_v60 = vand.u32 4294901760, %v21779_v12  ;;  %v21939_v12 = vld [vmem:[#allocation89_spill] sm:$0xff]  ;;  %v21966_v56 = vld [vmem:[#allocation122_spill] sm:$0xff]  ;;  %v21967_v8 = vld [vmem:[#allocation223_spill] sm:$0xff] }
 0x50a   :  { %11907 = vmatpush1.bf16.msra.mxu1 %v11906_v21  ;;  %v11726_v1 = vpack.c.bf16 %v21921_v49, %v21920_v6  ;;  %v11918_v11 = vpack.c.bf16 %v21924_v40, %v21922_v39  ;;  %v21925_v21 = vand.u32 4294901760, %v17398_v38  ;;  %v21933_v38 = vand.u32 4294901760, %v21781_v25  ;;  %v21941_v25 = vld [vmem:[#allocation200_spill] sm:$0xff]  ;;  %v21958_v0 = vld [vmem:[#allocation181_spill] sm:$0xff] }
 0x50b   :  { %11909 = vmatprep.subr.bf16.mxu1 %v11908_v19  ;;  %v11730_v43 = vpack.c.bf16 %v21931_v60, %v21930_v32  ;;  %v11732_v19 = vpack.c.bf16 %v21936_v30, %v21934_v22  ;;  %v21968_v33 = vld [vmem:[#allocation169_spill] sm:$0xff]  ;;  %v21970_v10 = vld [vmem:[#allocation224_spill] sm:$0xff] }
 0x50c   :  { %11719 = vmatpush1.bf16.msra.mxu0 %v11718_v59  ;;  %v11728_v28 = vpack.c.bf16 %v21927_v61, %v21925_v21  ;;  %v11922_v27 = vpack.c.bf16 %v21933_v38, %v21932_v14  ;;  %v21949_v59 = vld [vmem:[#allocation61_spill] sm:$0xff] }
 0x50d   :  { %11721 = vmatprep.subr.bf16.mxu0 %v11720_v2  ;;  %v21956_v2 = vld [vmem:[#allocation64_spill] sm:$0xff] }
 0x50e   :  { %11911 = vmatpush1.bf16.msra.mxu1 %v11910_v4  ;;  %v21952_v4 = vld [vmem:[#allocation116_spill] sm:$0xff] }
 0x50f   :  { %11913 = vmatprep.subr.bf16.mxu1 %v11912_v46  ;;  %v21959_v46 = vld [vmem:[#allocation179_spill] sm:$0xff] }
 0x510   :  { %11723 = vmatpush1.bf16.msra.mxu0 %v11722_v16  ;;  %v21962_v16 = vld [vmem:[#allocation156_spill] sm:$0xff] }
 0x511   :  { %11725 = vmatprep.subr.bf16.mxu0 %v11724_v3  ;;  %v21969_v3 = vld [vmem:[#allocation170_spill] sm:$0xff] }
 0x512   :  { %11915 = vmatpush1.bf16.msra.mxu1 %v11914_v44  ;;  %v21965_v44 = vld [vmem:[#allocation44_spill] sm:$0xff] }
 0x513   :  { %11917 = vmatprep.subr.bf16.mxu1 %v11916_v36 }
 0x514   :  { %11727 = vmatpush1.bf16.msra.mxu0 %v11726_v1 }
 0x515   :  { %11729 = vmatprep.subr.bf16.mxu0 %v11728_v28 }
 0x516   :  { %11919 = vmatpush1.bf16.msra.mxu1 %v11918_v11 }
 0x517   :  { %11921 = vmatprep.subr.bf16.mxu1 %v11920_v18 }
 0x518   :  { %11731 = vmatpush1.bf16.msra.mxu0 %v11730_v43 }
 0x519   :  { %11733 = vmatprep.subr.bf16.mxu0 %v11732_v19 }
 0x51a   :  { %11923 = vmatpush1.bf16.msra.mxu1 %v11922_v27 }
 0x51b   :  { %11925 = vmatprep.subr.bf16.mxu1 %v21937_v13 }
 0x51c   :  { %11735 = vmatpush1.bf16.msra.mxu0 %v21938_v34 }
 0x51d   :  { %11737 = vmatprep.subr.bf16.mxu0 %v21832_v9  ;;  %v21944_v9 = vld [vmem:[#allocation236_spill] sm:$0xff] }
 0x51e   :  { %11927 = vmatpush1.bf16.msra.mxu1 %v21939_v12 }
 0x51f   :  { %11929 = vmatprep.subr.bf16.mxu1 %v21833_v45  ;;  %8569 = vmatmul.mubr.f32.vlgmr.msra.gmra.mrb[8].mxu0 %v21940_v29  ;;  %v21945_v45 = vld [vmem:[#allocation120_spill] sm:$0xff] }
 0x520   :  { %11739 = vmatpush1.bf16.msra.mxu0 %v21835_v24  ;;  %8574 = vmatprep.mubr.f32.mxu0 %v21694_v53  ;;  %v21946_v24 = vld [vmem:[#allocation165_spill] sm:$0xff] }
 0x521   :  { %9473 = vmatmul.mubr.f32.vlgmr.msra.gmra.mrb[8].mxu1 %v21940_v29  ;;  %11741 = vmatprep.subr.bf16.mxu0 %v21941_v25 }
 0x522   :  { %11931 = vmatpush1.bf16.msra.mxu1 %v21836_v5  ;;  %9478 = vmatprep.mubr.f32.mxu1 %v21694_v53  ;;  %v21948_v5 = vld [vmem:[#allocation233_spill] sm:$0xff] }
 0x523   :  { %11933 = vmatprep.subr.bf16.mxu1 %v21942_v54  ;;  %8576 = vmatmul.mubr.f32.gmra.mrb[10].mxu0 %v21943_v52 }
 0x524   :  { %11743 = vmatpush1.bf16.msra.mxu0 %v21944_v9  ;;  %8678 = vmatprep.mubr.f32.mxu0 %v21694_v53 }
 0x525   :  { %9480 = vmatmul.mubr.f32.gmra.mrb[10].mxu1 %v21943_v52  ;;  %11745 = vmatprep.subr.bf16.mxu0 %v21946_v24 }
 0x526   :  { %11935 = vmatpush1.bf16.msra.mxu1 %v21945_v45  ;;  %9582 = vmatprep.mubr.f32.mxu1 %v21694_v53 }
 0x527   :  { %11937 = vmatprep.subr.bf16.mxu1 %v21947_v55 }
 0x528   :  { %11747 = vmatpush1.bf16.msra.mxu0 %v21948_v5 }
 0x529   :  { %11749 = vmatprep.subr.bf16.mxu0 %v21950_v63 }
 0x52a   :  { %11939 = vmatpush1.bf16.msra.mxu1 %v21949_v59 }
 0x52b   :  { %11941 = vmatprep.subr.bf16.mxu1 %v21951_v62 }
 0x52c   :  { %11751 = vmatpush1.bf16.msra.mxu0 %v21952_v4 }
 0x52d   :  { %11753 = vmatprep.subr.bf16.mxu0 %v21954_v15 }
 0x52e   :  { %11943 = vmatpush1.bf16.msra.mxu1 %v21953_v51 }
 0x52f   :  { %11945 = vmatprep.subr.bf16.mxu1 %v21955_v50 }
 0x530   :  { %11755 = vmatpush1.bf16.msra.mxu0 %v21956_v2 }
 0x531   :  { %11757 = vmatprep.subr.bf16.mxu0 %v21958_v0 }
 0x532   :  { %11947 = vmatpush1.bf16.msra.mxu1 %v21957_v57 }
 0x533   :  { %11949 = vmatprep.subr.bf16.mxu1 %v21959_v46 }
 0x534   :  { %11759 = vmatpush1.bf16.msra.mxu0 %v21960_v17 }
 0x535   :  { %11761 = vmatprep.subr.bf16.mxu0 %v21962_v16 }
 0x536   :  { %11951 = vmatpush1.bf16.msra.mxu1 %v21961_v41 }
 0x537   :  { %11953 = vmatprep.subr.bf16.mxu1 %v21963_v47 }
 0x538   :  { %11763 = vmatpush1.bf16.msra.mxu0 %v21964_v37 }
 0x539   :  { %11765 = vmatprep.subr.bf16.mxu0 %v21966_v56 }
 0x53a   :  { %11955 = vmatpush1.bf16.msra.mxu1 %v21965_v44 }
 0x53b   :  { %11957 = vmatprep.subr.bf16.mxu1 %v21865_v48  ;;  %v2287_v48 = vld [vmem:[%s18214_s7] sm:$0xf]  ;;  %s12387_s7 = smov [#allocation14]  }
 0x53c   :  { %11767 = vmatpush1.bf16.msra.mxu0 %v21868_v20  ;;  %v2292_v20 = vrot.slane %v2287_v48, %v21967_v8  ;;  %v2296_v7 = vrot.slane %v2287_v48, %v21969_v3  ;;  %v2304_v36 = vrot.slane %v2287_v48, %v21970_v10  ;;  %s9622_s19 = sshll.u32 %s12387_s7, 4  ;;  %s9623_s19 = int_to_ptr.vmem [resolvable:$true] %s9622_s19 }
 0x53d   :  { %s12298_s23 = scalar_lea.vmem %s9623_s19, 1024  ;;  %p12303_p7 = scmp.lt.s32.totalorder %s9623_s19, %s9623_s19 }
 0x53e   :  { %11959 = vmatpush1.bf16.msra.mxu1 %v21871_v26  ;;  %v2300_v26 = vrot.slane %v2287_v48, %v21968_v33  ;;  %p12299_p6 = scmp.ne.s32.totalorder %s9623_s19, %s12298_s23  ;;  %p12304_p8 = scmp.lt.s32.totalorder %s12298_s23, %s12298_s23 }
 0x53f   :  { %8680 = vmatmul.mubr.f32.vlgmr.msra.gmra.mrb[8].mxu0 %v21940_v29 }
 0x540   :  { %8685 = vmatprep.mubr.f32.mxu0 %v21694_v53  ;;  %p12305_p9 = por %p12304_p8, %p12303_p7 }
 0x541   :  { %9584 = vmatmul.mubr.f32.vlgmr.msra.gmra.mrb[8].mxu1 %v21940_v29 }
 0x542   :  { %9589 = vmatprep.mubr.f32.mxu1 %v21694_v53  ;;  %p12306_p10 = pnand %p12305_p9, %p12299_p6 }
 0x543   :  { %8687 = vmatmul.mubr.f32.gmra.mrb[10].mxu0 %v21943_v52 }
 0x545   :  { %9591 = vmatmul.mubr.f32.gmra.mrb[10].mxu1 %v21943_v52 }
 0x552   :  { %v4988_v6 = vpop.f32.mrb[4].mxu0 }
 0x553   :  { %v11968_v49 = vadd.f32 %v4988_v6, %v2292_v20  ;;  %v4990_v53 = vpop.f32.mrb[5].mxu0 }
 0x554   :  { %v7680_v1 = vpop.f32.mrb[4].mxu1  ;;  %v11969_v23 = vadd.f32 %v4990_v53, %v2296_v7 }
 0x555   :  { %v11972_v39 = vadd.f32 %v7680_v1, %v2300_v26  ;;  %v7682_v40 = vpop.f32.mrb[5].mxu1  ;;  %7693 = vst [vmem:[#allocation14] sm:$0xff] %v11968_v49 }
 0x556   :  { %v11973_v11 = vadd.f32 %v7682_v40, %v2304_v36  ;;  %7694 = vst [vmem:[#allocation14 + $0x8] sm:$0xff] %v11969_v23  ;;  %v4996_v21 = vpop.f32.mrb[6].mxu0 }
 0x557   :  { %7695 = vst [vmem:[#allocation14 + $0x10] sm:$0xff] %v11972_v39  ;;  %v11970_v35 = vadd.f32 %v4996_v21, %v2292_v20  ;;  %v4998_v28 = vpop.f32.mrb[7].mxu0 }
 0x558   :  { %7696 = vst [vmem:[#allocation14 + $0x18] sm:$0xff] %v11973_v11  ;;  %v7688_v61 = vpop.f32.mrb[6].mxu1  ;;  %v11971_v31 = vadd.f32 %v4998_v28, %v2296_v7 }
 0x559   :  { %v11974_v58 = vadd.f32 %v7688_v61, %v2300_v26  ;;  %v7690_v18 = vpop.f32.mrb[7].mxu1  ;;  %7697 = vst [vmem:[#allocation14 + $0x20] sm:$0xff] %v11970_v35 }
 0x55a   :  { %v11975_v32 = vadd.f32 %v7690_v18, %v2304_v36  ;;  %7698 = vst [vmem:[#allocation14 + $0x28] sm:$0xff] %v11971_v31 }
 0x55b   :  { %7699 = vst [vmem:[#allocation14 + $0x30] sm:$0xff] %v11974_v58 }
 0x55c   :  { %7700 = vst [vmem:[#allocation14 + $0x38] sm:$0xff] %v11975_v32 }
 0x55d   :  { %12309 = shalt.err (!%p12306_p10)
}
 0x55e   :  { %s12310_s2 = scalar_lea.hbm %s18217_s10, 1024 }
 0x55f   :  { %p12311_p11 = scmp.ne.s32.totalorder %s18217_s10, %s12310_s2  ;;  %p12314_p12 = scmp.lt.u32.totalorder %s12310_s2, %s18217_s10 }
 0x561   :  { %p12316_p13 = pnand %p12314_p12, %p12311_p11 }
 0x563   :  { %12319 = shalt.err (!%p12316_p13)
}
 0x564   :  { %9628 = dma.vmem_to_hbm [thread:$0]  %s9623_s19, 1024, %s18217_s10, [#allocation15], %s12377_s27, %s12377_s27, %s12378_s28  }
 0x565   :  { %s12320_s30 = scalar_lea.vmem %s9611_s21, 1024  ;;  %p12325_p1 = scmp.lt.s32.totalorder %s9611_s21, %s9611_s21 }
 0x566   :  { %p12321_p0 = scmp.ne.s32.totalorder %s9611_s21, %s12320_s30  ;;  %p12326_p2 = scmp.lt.s32.totalorder %s12320_s30, %s12320_s30 }
 0x568   :  { %p12327_p3 = por %p12326_p2, %p12325_p1 }
 0x56a   :  { %p12328_p4 = pnand %p12327_p3, %p12321_p0 }
 0x56c   :  { %12331 = shalt.err (!%p12328_p4)
}
 0x56d   :  { %s12332_s15 = scalar_lea.hbm %s18216_s9, 1024 }
 0x56e   :  { %p12333_p5 = scmp.ne.s32.totalorder %s18216_s9, %s12332_s15  ;;  %p12336_p6 = scmp.lt.u32.totalorder %s12332_s15, %s18216_s9 }
 0x570   :  { %p12338_p7 = pnand %p12336_p6, %p12333_p5 }
 0x572   :  { %12341 = shalt.err (!%p12338_p7)
}
 0x573   :  { %9616 = dma.vmem_to_hbm [thread:$0]  %s9611_s21, 1024, %s18216_s9, [#allocation4], %s12377_s27, %s12377_s27, %s12378_s28  }
 0x574   :  { %v7767_v60 = vld [vmem:[%s18215_s8] sm:$0xf]  ;;  %s12389_s8 = smov [#allocation16]  }
 0x575   :  { %v7772_v43 = vrot.slane %v7767_v60, %v21967_v8  ;;  %v7780_v14 = vrot.slane %v7767_v60, %v21968_v33  ;;  %v7776_v38 = vrot.slane %v7767_v60, %v21969_v3  ;;  %v7784_v27 = vrot.slane %v7767_v60, %v21970_v10  ;;  %s9634_s9 = sshll.u32 %s12389_s8, 4  ;;  %s9635_s9 = int_to_ptr.vmem [resolvable:$true] %s9634_s9 }
 0x576   :  { %s12342_s7 = scalar_lea.vmem %s9635_s9, 1024  ;;  %p12347_p9 = scmp.lt.s32.totalorder %s9635_s9, %s9635_s9 }
 0x577   :  { %p12343_p8 = scmp.ne.s32.totalorder %s9635_s9, %s12342_s7  ;;  %p12348_p10 = scmp.lt.s32.totalorder %s12342_s7, %s12342_s7 }
 0x579   :  { %p12349_p11 = por %p12348_p10, %p12347_p9 }
 0x57b   :  { %p12350_p12 = pnand %p12349_p11, %p12343_p8 }
 0x612   :  { %v8681_v22 = vpop.f32.mrb[8].mxu0 }
 0x613   :  { %v11976_v42 = vadd.f32 %v8681_v22, %v7772_v43  ;;  %v8683_v19 = vpop.f32.mrb[9].mxu0 }
 0x614   :  { %v9585_v30 = vpop.f32.mrb[8].mxu1  ;;  %v11977_v34 = vadd.f32 %v8683_v19, %v7776_v38 }
 0x615   :  { %v11980_v13 = vadd.f32 %v9585_v30, %v7780_v14  ;;  %v9587_v12 = vpop.f32.mrb[9].mxu1  ;;  %9597 = vst [vmem:[#allocation16] sm:$0xff] %v11976_v42 }
 0x616   :  { %v11981_v29 = vadd.f32 %v9587_v12, %v7784_v27  ;;  %9598 = vst [vmem:[#allocation16 + $0x8] sm:$0xff] %v11977_v34  ;;  %v8688_v25 = vpop.f32.mrb[10].mxu0 }
 0x617   :  { %9599 = vst [vmem:[#allocation16 + $0x10] sm:$0xff] %v11980_v13  ;;  %v11978_v54 = vadd.f32 %v8688_v25, %v7772_v43  ;;  %v8690_v9 = vpop.f32.mrb[11].mxu0 }
 0x618   :  { %9600 = vst [vmem:[#allocation16 + $0x18] sm:$0xff] %v11981_v29  ;;  %v9592_v52 = vpop.f32.mrb[10].mxu1  ;;  %v11979_v24 = vadd.f32 %v8690_v9, %v7776_v38 }
 0x619   :  { %v11982_v45 = vadd.f32 %v9592_v52, %v7780_v14  ;;  %v9594_v55 = vpop.f32.mrb[11].mxu1  ;;  %9601 = vst [vmem:[#allocation16 + $0x20] sm:$0xff] %v11978_v54 }
 0x61a   :  { %v11983_v5 = vadd.f32 %v9594_v55, %v7784_v27  ;;  %9602 = vst [vmem:[#allocation16 + $0x28] sm:$0xff] %v11979_v24 }
 0x61b   :  { %9603 = vst [vmem:[#allocation16 + $0x30] sm:$0xff] %v11982_v45 }
 0x61c   :  { %9604 = vst [vmem:[#allocation16 + $0x38] sm:$0xff] %v11983_v5 }
 0x61d   :  { %12353 = shalt.err (!%p12350_p12)
}
 0x61e   :  { %s12354_s21 = scalar_lea.hbm %s18218_s11, 1024 }
 0x61f   :  { %p12355_p13 = scmp.ne.s32.totalorder %s18218_s11, %s12354_s21  ;;  %p12358_p0 = scmp.lt.u32.totalorder %s12354_s21, %s18218_s11 }
 0x621   :  { %p12360_p1 = pnand %p12358_p0, %p12355_p13 }
 0x623   :  { %12363 = shalt.err (!%p12360_p1)
}
 0x624   :  { %9640 = dma.vmem_to_hbm [thread:$0]  %s9635_s9, 1024, %s18218_s11, [#allocation15], %s12377_s27, %s12377_s27, %s12378_s28  }
 0x625   :  { %12372 = dma.done.wait [#allocation4], 1024  }
 0x626   :  { %12373 = vsyncadd [#allocation4], 4294966272 }
 0x627   :  { %12374 = dma.done.wait [#allocation15], 2048  }
 0x628   :  { %12375 = vsyncadd [#allocation15], 4294965248 }
 0x629   :  { %9650 = vsyncpa [#allocation3], 1 }
 0x62a   :  { %9651 = vsyncpa [#allocation6], 1 }
 0x62b   :  { %9652 = vsyncpa [#allocation9], 1 }
 0x62c   :  { %9653 = vsyncpa [#allocation12], 1 }
 0x62d   :  { %9654 = vsyncpa [#allocation4], 1 }
 0x62e   :  { %9655 = vsyncpa [#allocation15], 1 }

</bundles_post_ra>
